<compile_context>
chip_gen: v5e
topology: v5e:2x2
jax: 0.10.0
libtpu: 0.0.40
codegen_flags: <defaults>
</compile_context>

<pallas_src>
import functools

import numpy as np
import jax
import jax.numpy as jnp
from jax.experimental import pallas as pl
from jax.experimental.pallas import tpu as pltpu

NUM_CLASSES = 1          # MOT-style single class (postprocess forces class id 1)


def _round_up(x, m):
    return (x + m - 1) // m * m


def _cdiv(a, b):
    return -(-a // b)


# ----------------------------------------------------------------------------
# Pallas kernels
# ----------------------------------------------------------------------------
def conv3x3s2_bn_silu_kernel(x_ref, h_ref, w_ref, b_ref, o_ref, acc_ref,
                             *, wp1, trf, act):
    """Fused 3x3 stride-2 conv (+folded BN) (+SiLU) on one row tile of the
    space-to-depth slab.

    x_ref : (1, 1, trf, 4*Cin)    bf16  main slab block (flat rows [t*trf, (t+1)*trf))
    h_ref : (1, 1, halo_p, 4*Cin) bf16  halo = first rows of the next slab block
    w_ref : (4, 4*Cin, Cout)      bf16  one matrix per 2x2 spatial offset
    b_ref : (1, Cout)             f32
    o_ref : (1, 1, trf, Cout)     bf16  output flat rows (junk column ow==Wo and
                                        padded tail rows are dropped by caller)
    acc_ref: (trf, Cout)          f32   VMEM scratch accumulator
    """
    x = x_ref[0, 0]                    # (trf, K) bf16
    h = h_ref[0, 0]                    # (halo_p, K) bf16

    # tap (0,0): initializes the accumulator
    acc_ref[...] = jnp.dot(x, w_ref[0], preferred_element_type=jnp.float32)

    # taps (0,1), (1,0), (1,1): shifted slices; rows that spill past the main
    # block come from the halo block.
    for i, d in enumerate((1, wp1, wp1 + 1), start=1):
        w_i = w_ref[i]
        if trf - d > 0:
            acc_ref[pl.ds(0, trf - d), :] += jnp.dot(
                x[d:, :], w_i, preferred_element_type=jnp.float32)
        acc_ref[pl.ds(trf - d, d), :] += jnp.dot(
            h[:d, :], w_i, preferred_element_type=jnp.float32)

    y = acc_ref[...] + b_ref[...]
    if act:
        y = y * jax.nn.sigmoid(y)                              # SiLU
    o_ref[0, 0] = y.astype(o_ref.dtype)


def head_decode_kernel(x_ref, w_ref, b_ref, o_ref, *, wl, stride):
    """Fused YOLOX head: 1x1 conv (matmul) + anchor-free decode (one image).

    x_ref : (1, A, C)     bf16   A = Hl*Wl anchors
    w_ref : (C, n_out)    bf16
    b_ref : (1, n_out)    f32
    o_ref : (1, A, n_out) f32    [cx, cy, w, h, obj, cls...]
    """
    y = jnp.dot(x_ref[0], w_ref[...],
                preferred_element_type=jnp.float32) + b_ref[...]
    row = jax.lax.broadcasted_iota(jnp.int32, y.shape, 0)
    col = jax.lax.broadcasted_iota(jnp.int32, y.shape, 1)
    # in-kernel anchor grid (row-major over (h, w)); float div avoids int div/rem
    rowf = row.astype(jnp.float32)
    gy = jnp.floor((rowf + 0.5) / wl)
    gx = rowf - gy * wl
    grid_add = jnp.where(col == 0, gx, jnp.where(col == 1, gy, 0.0))
    is_wh = (col >= 2) & (col < 4)
    xy = (y + grid_add) * stride
    wh = jnp.exp(jnp.where(is_wh, y, 0.0)) * stride            # exp only on w,h
    sg = jax.nn.sigmoid(y)
    o_ref[0] = jnp.where(col < 2, xy, jnp.where(is_wh, wh, sg))


# ----------------------------------------------------------------------------
# JAX-side glue (one fused pad+reshape+transpose per layer; slab kept bf16)
# ----------------------------------------------------------------------------
def _make_slab(x_nhwc, trf_target=512):
    """(B,H,W,C) -> bf16 slab (B, n_tiles+1, trf, 4C) of the 1-padded image.

    Flat slab row s = sy*(Wo+1) + sx holds the 2x2 block of the zero-padded
    image at (2sy .. 2sy+1, 2sx .. 2sx+1) with channel layout (py, px, c).
    The extra tile (+1) holds the tail rows / zero padding used as halo.
    """
    B, H, W, C = x_nhwc.shape
    assert H % 2 == 0 and W % 2 == 0, "spatial dims must be even for stride-2 conv"
    Ho, Wo = H // 2, W // 2
    wp1 = Wo + 1
    n_rows = Ho * wp1                                  # output flat rows (incl. junk col)
    halo_p = _round_up(wp1 + 1, 8)                     # halo rows, sublane aligned
    trf = max(halo_p, min(_round_up(trf_target, 8), _round_up(n_rows, 8)))
    n_tiles = _cdiv(n_rows, trf)
    total_rows = (n_tiles + 1) * trf                   # >= (Ho+1)*wp1 always

    xp = jnp.pad(x_nhwc, ((0, 0), (1, 1), (1, 1), (0, 0)))
    s = xp.reshape(B, Ho + 1, 2, wp1, 2, C).transpose(0, 1, 3, 2, 4, 5)
    s = s.reshape(B, (Ho + 1) * wp1, 4 * C)
    s = jnp.pad(s, ((0, 0), (0, total_rows - (Ho + 1) * wp1), (0, 0)))
    s = s.reshape(B, n_tiles + 1, trf, 4 * C).astype(jnp.bfloat16)
    meta = dict(Ho=Ho, Wo=Wo, wp1=wp1, n_rows=n_rows,
                trf=trf, n_tiles=n_tiles, halo_p=halo_p)
    return s, meta


def conv_bn_silu(x_nhwc, w_off, bias, *, act=True, trf_target=512):
    """3x3 stride-2 conv + folded BN + SiLU, row-tiled Pallas kernel."""
    B, H, W, C = x_nhwc.shape
    cout = w_off.shape[-1]
    K = 4 * C
    slab, m = _make_slab(x_nhwc, trf_target)
    trf, n_tiles, wp1, halo_p = m["trf"], m["n_tiles"], m["wp1"], m["halo_p"]

    out = pl.pallas_call(
        functools.partial(conv3x3s2_bn_silu_kernel, wp1=wp1, trf=trf, act=act),
        out_shape=jax.ShapeDtypeStruct((B, n_tiles, trf, cout), jnp.bfloat16),
        grid_spec=pltpu.PrefetchScalarGridSpec(
            num_scalar_prefetch=0,
            grid=(B, n_tiles),
            in_specs=[
                # main block: slab tile t
                pl.BlockSpec((1, 1, trf, K), lambda b, t: (b, t, 0, 0)),
                # halo block: first halo_p rows of slab tile t+1 (same array)
                pl.BlockSpec((1, 1, halo_p, K), lambda b, t: (b, t + 1, 0, 0)),
                pl.BlockSpec((4, K, cout), lambda b, t: (0, 0, 0)),
                pl.BlockSpec((1, cout), lambda b, t: (0, 0)),
            ],
            out_specs=pl.BlockSpec((1, 1, trf, cout), lambda b, t: (b, t, 0, 0)),
            scratch_shapes=[pltpu.VMEM((trf, cout), jnp.float32)],
        ),
        compiler_params=pltpu.CompilerParams(
            dimension_semantics=("parallel", "parallel"),
            vmem_limit_bytes=48 * 1024 * 1024,
        ),
    )(slab, slab, w_off, bias.reshape(1, cout))

    Ho, Wo = m["Ho"], m["Wo"]
    # Drop padded tail rows and the junk ow==Wo column; this slice/reshape chain
    # stays lazy and fuses into the next layer's slab construction / head reshape.
    y = out.reshape(B, n_tiles * trf, cout)[:, :m["n_rows"]]
    return y.reshape(B, Ho, wp1, cout)[:, :, :Wo, :]


def head_level(feat_nhwc, w, b, stride_level):
    B, Hl, Wl, C = feat_nhwc.shape
    A = Hl * Wl
    n_out = w.shape[1]
    x = feat_nhwc.reshape(B, A, C)
    return pl.pallas_call(
        functools.partial(head_decode_kernel, wl=float(Wl),
                          stride=float(stride_level)),
        out_shape=jax.ShapeDtypeStruct((B, A, n_out), jnp.float32),
        grid_spec=pltpu.PrefetchScalarGridSpec(
            num_scalar_prefetch=0,
            grid=(B,),
            in_specs=[pl.BlockSpec((1, A, C), lambda i: (i, 0, 0)),
                      pl.BlockSpec((C, n_out), lambda i: (0, 0)),
                      pl.BlockSpec((1, n_out), lambda i: (0, 0))],
            out_specs=pl.BlockSpec((1, A, n_out), lambda i: (i, 0, 0)),
        ),
        compiler_params=pltpu.CompilerParams(dimension_semantics=("parallel",)),
    )(x, w, b.reshape(1, n_out))


# ----------------------------------------------------------------------------
# Parameters (deterministic synthetic init; BN folded with eps=0.001 as in module)
# ----------------------------------------------------------------------------
def init_conv_bn(key, cin, cout, ksize=3, eps=1e-3):
    k1, k2, k3, k4, k5 = jax.random.split(key, 5)
    fan_in = ksize * ksize * cin
    w = jax.random.normal(k1, (fan_in, cout), jnp.float32) / np.sqrt(fan_in)
    gamma = 1.0 + 0.1 * jax.random.normal(k2, (cout,), jnp.float32)
    beta = 0.1 * jax.random.normal(k3, (cout,), jnp.float32)
    r_mean = 0.1 * jax.random.normal(k4, (cout,), jnp.float32)
    r_var = jnp.abs(jax.random.normal(k5, (cout,), jnp.float32)) + 0.5
    scale = gamma / jnp.sqrt(r_var + eps)
    return w * scale[None, :], beta - r_mean * scale


def repack_conv3x3_s2(w9, cin):
    """(9*Cin, Cout) tap-major conv weight -> (4, 4*Cin, Cout): one matrix per
    2x2 space-to-depth offset (qy, qx); taps falling outside 3x3 are zero."""
    cout = w9.shape[1]
    wt = w9.reshape(3, 3, cin, cout)                           # (dy, dx, c, cout)
    w_off = jnp.zeros((2, 2, 2, 2, cin, cout), w9.dtype)       # (qy, qx, py, px, c, cout)
    for qy in range(2):
        for qx in range(2):
            for py in range(2):
                for px in range(2):
                    dy, dx = 2 * qy + py, 2 * qx + px
                    if dy < 3 and dx < 3:
                        w_off = w_off.at[qy, qx, py, px].set(wt[dy, dx])
    return w_off.reshape(4, 4 * cin, cout)


def build_params(key):
    ks = jax.random.split(key, 8)
    pixel_mean = jnp.array([123.675, 116.28, 103.53], jnp.float32)
    pixel_std = jnp.array([58.395, 57.12, 57.375], jnp.float32)

    # Realistic-ish YOLOX channel widths for lane density on the MXU/stores.
    backbone_chans = [(3, 32), (32, 64), (64, 128), (128, 256)]
    backbone = []
    for i, (cin, cout) in enumerate(backbone_chans):
        w9, b = init_conv_bn(ks[i], cin, cout)
        backbone.append((repack_conv3x3_s2(w9, cin).astype(jnp.bfloat16),
                         b.astype(jnp.float32)))

    n_out = 4 + 1 + NUM_CLASSES
    head = []
    for j, c in enumerate([64, 128, 256]):                     # FPN level channels
        kw, kb = jax.random.split(ks[4 + j])
        w = jax.random.normal(kw, (c, n_out), jnp.float32) / np.sqrt(c)
        b = 0.01 * jax.random.normal(kb, (n_out,), jnp.float32)
        head.append((w.astype(jnp.bfloat16), b))

    return {"backbone": backbone, "head": head,
            "pixel_mean": pixel_mean, "pixel_std": pixel_std}


# ----------------------------------------------------------------------------
# Forward (eval path) + postprocess
# ----------------------------------------------------------------------------
def box_cxcywh_to_xyxy(b):
    cx, cy, w, h = b[..., 0], b[..., 1], b[..., 2], b[..., 3]
    return jnp.stack([cx - 0.5 * w, cy - 0.5 * h,
                      cx + 0.5 * w, cy + 0.5 * h], axis=-1)


def postprocess(outputs, topk=1000):
    # mirrors YOLOX.postprocess: per-image topk on obj score, cxcywh->xyxy,
    # pred_classes = ones; batched (no per-image Python loop).
    # top_k/gather kept in plain JAX (no Pallas equivalent).
    B, A, _ = outputs.shape
    k = min(topk, A)
    scores, idx = jax.lax.top_k(outputs[..., 4], k)                  # (B, k)
    sel = jnp.take_along_axis(outputs, idx[..., None], axis=1)       # (B, k, n_out)
    boxes = box_cxcywh_to_xyxy(sel[..., :4])                         # (B, k, 4)
    classes = jnp.ones((B, k), dtype=jnp.int32)
    return [{"pred_boxes": boxes[i], "scores": scores[i],
             "pred_classes": classes[i]} for i in range(B)]


@jax.jit
def yolox_forward(images_nchw, params):
    # preprocess: normalize; fuses into the first slab construction copy
    x = jnp.transpose(images_nchw, (0, 2, 3, 1)).astype(jnp.float32)  # NCHW->NHWC
    x = (x - params["pixel_mean"]) / params["pixel_std"]

    # backbone (reduced CSPDarknet/PAFPN stand-in): 4 strided conv-BN-SiLU blocks
    feats = []
    for (w_off, b) in params["backbone"]:
        x = conv_bn_silu(x, w_off, b)
        feats.append(x)
    fpn_outs = feats[1:]                     # 3 FPN levels at strides 4, 8, 16
    strides = [4, 8, 16]

    # head: fused 1x1-conv + anchor-free decode per level, concat over anchors
    level_outs = [head_level(f, w, b, s)
                  for f, (w, b), s in zip(fpn_outs, params["head"], strides)]
    outputs = jnp.concatenate(level_outs, axis=1)   # (B, A, 4+1+num_classes)

    return postprocess(outputs)


if __name__ == "__main__":
    key = jax.random.PRNGKey(0)
    pkey, xkey = jax.random.split(key)
    params = build_params(pkey)

    B, C, H, W = 2, 3, 32, 32
    images = jax.random.uniform(xkey, (B, C, H, W), jnp.float32,
                                minval=0.0, maxval=255.0)

    results = yolox_forward(images, params)
    jax.block_until_ready(results)
    assert results[0]["pred_boxes"].shape[-1] == 4
    assert results[0]["scores"].shape == results[0]["pred_classes"].shape
    assert bool(jnp.all(jnp.isfinite(results[0]["pred_boxes"])))
    print("KERNEL_OK")
</pallas_src>

<mosaic_0001>
module attributes {stable_mosaic.version = 11 : i64} {
  func.func @conv3x3s2_bn_silu_kernel(%arg0: i32, %arg1: i32, %arg2: memref<1x1x272x12xbf16, #tpu.memory_space<vmem>>, %arg3: memref<1x1x24x12xbf16, #tpu.memory_space<vmem>>, %arg4: memref<4x12x32xbf16, #tpu.memory_space<vmem>>, %arg5: memref<1x32xf32, #tpu.memory_space<vmem>>, %arg6: memref<1x1x272x32xbf16, #tpu.memory_space<vmem>>, %arg7: memref<272x32xf32, #tpu.memory_space<vmem>>) attributes {dimension_semantics = [#tpu.dimension_semantics<parallel>, #tpu.dimension_semantics<parallel>], iteration_bounds = array<i64: 2, 1>, scalar_prefetch = 0 : i64, scratch_operands = 1 : i64, tpu.core_type = #tpu.core_type<tc>, window_params = [{transform_indices = @transform_0, window_bounds = array<i64: 1, 1, 272, 12>}, {transform_indices = @transform_1, window_bounds = array<i64: 1, 1, 24, 12>}, {pipeline_mode = #tpu.pipeline_mode<synchronous>, transform_indices = @transform_2, window_bounds = array<i64: 4, 12, 32>}, {pipeline_mode = #tpu.pipeline_mode<synchronous>, transform_indices = @transform_3, window_bounds = array<i64: 1, 32>}, {transform_indices = @transform_4, window_bounds = array<i64: 1, 1, 272, 32>}]} {
    %c0 = arith.constant 0 : index
    %c0_0 = arith.constant 0 : index
    %c0_1 = arith.constant 0 : index
    %c0_2 = arith.constant 0 : index
    %0 = vector.load %arg2[%c0, %c0_0, %c0_1, %c0_2] : memref<1x1x272x12xbf16, #tpu.memory_space<vmem>>, vector<1x1x272x12xbf16>
    %1 = vector.shape_cast %0 : vector<1x1x272x12xbf16> to vector<272x12xbf16>
    %c0_3 = arith.constant 0 : index
    %c0_4 = arith.constant 0 : index
    %c0_5 = arith.constant 0 : index
    %c0_6 = arith.constant 0 : index
    %2 = vector.load %arg3[%c0_3, %c0_4, %c0_5, %c0_6] : memref<1x1x24x12xbf16, #tpu.memory_space<vmem>>, vector<1x1x24x12xbf16>
    %3 = vector.shape_cast %2 : vector<1x1x24x12xbf16> to vector<24x12xbf16>
    %c0_7 = arith.constant 0 : index
    %c0_8 = arith.constant 0 : index
    %c0_9 = arith.constant 0 : index
    %4 = vector.load %arg4[%c0_7, %c0_8, %c0_9] : memref<4x12x32xbf16, #tpu.memory_space<vmem>>, vector<1x12x32xbf16>
    %5 = vector.shape_cast %4 : vector<1x12x32xbf16> to vector<12x32xbf16>
    %cst = arith.constant dense<0.000000e+00> : vector<272x32xf32>
    %6 = tpu.matmul %1, %5, %cst {dimension_numbers = #tpu.dot_dimension_numbers<[1], [0], [0], [1], [0, 0, 1, 1], [], []>} : vector<272x12xbf16>, vector<12x32xbf16>, vector<272x32xf32> -> vector<272x32xf32>
    %c0_10 = arith.constant 0 : index
    %c0_11 = arith.constant 0 : index
    %7 = vector.load %arg7[%c0_10, %c0_11] : memref<272x32xf32, #tpu.memory_space<vmem>>, vector<272x32xf32>
    tpu.vector_store %arg7[%c0_10, %c0_11], %6 {strides = array<i32>} : memref<272x32xf32, #tpu.memory_space<vmem>>, vector<272x32xf32>,
    %c1 = arith.constant 1 : index
    %c0_12 = arith.constant 0 : index
    %c0_13 = arith.constant 0 : index
    %8 = vector.load %arg4[%c1, %c0_12, %c0_13] : memref<4x12x32xbf16, #tpu.memory_space<vmem>>, vector<1x12x32xbf16>
    %9 = vector.shape_cast %8 : vector<1x12x32xbf16> to vector<12x32xbf16>
    %c0_14 = arith.constant 0 : index
    %c0_15 = arith.constant 0 : index
    %10 = vector.load %arg7[%c0_14, %c0_15] : memref<272x32xf32, #tpu.memory_space<vmem>>, vector<271x32xf32>
    %11 = vector.extract_strided_slice %1 {offsets = [1, 0], sizes = [271, 12], strides = [1, 1]} : vector<272x12xbf16> to vector<271x12xbf16>
    %cst_16 = arith.constant dense<0.000000e+00> : vector<271x32xf32>
    %12 = tpu.matmul %11, %9, %cst_16 {dimension_numbers = #tpu.dot_dimension_numbers<[1], [0], [0], [1], [0, 0, 1, 1], [], []>} : vector<271x12xbf16>, vector<12x32xbf16>, vector<271x32xf32> -> vector<271x32xf32>
    %13 = arith.addf %10, %12 : vector<271x32xf32>
    %c0_17 = arith.constant 0 : index
    %c0_18 = arith.constant 0 : index
    %14 = vector.load %arg7[%c0_17, %c0_18] : memref<272x32xf32, #tpu.memory_space<vmem>>, vector<271x32xf32>
    tpu.vector_store %arg7[%c0_17, %c0_18], %13 {strides = array<i32>} : memref<272x32xf32, #tpu.memory_space<vmem>>, vector<271x32xf32>,
    %c271 = arith.constant 271 : index
    %c0_19 = arith.constant 0 : index
    %15 = vector.load %arg7[%c271, %c0_19] : memref<272x32xf32, #tpu.memory_space<vmem>>, vector<1x32xf32>
    %16 = vector.extract_strided_slice %3 {offsets = [0, 0], sizes = [1, 12], strides = [1, 1]} : vector<24x12xbf16> to vector<1x12xbf16>
    %cst_20 = arith.constant dense<0.000000e+00> : vector<1x32xf32>
    %17 = tpu.matmul %16, %9, %cst_20 {dimension_numbers = #tpu.dot_dimension_numbers<[1], [0], [0], [1], [0, 0, 1, 1], [], []>} : vector<1x12xbf16>, vector<12x32xbf16>, vector<1x32xf32> -> vector<1x32xf32>
    %18 = arith.addf %15, %17 : vector<1x32xf32>
    %c271_21 = arith.constant 271 : index
    %c0_22 = arith.constant 0 : index
    %19 = vector.load %arg7[%c271_21, %c0_22] : memref<272x32xf32, #tpu.memory_space<vmem>>, vector<1x32xf32>
    tpu.vector_store %arg7[%c271_21, %c0_22], %18 {strides = array<i32>} : memref<272x32xf32, #tpu.memory_space<vmem>>, vector<1x32xf32>,
    %c2 = arith.constant 2 : index
    %c0_23 = arith.constant 0 : index
    %c0_24 = arith.constant 0 : index
    %20 = vector.load %arg4[%c2, %c0_23, %c0_24] : memref<4x12x32xbf16, #tpu.memory_space<vmem>>, vector<1x12x32xbf16>
    %21 = vector.shape_cast %20 : vector<1x12x32xbf16> to vector<12x32xbf16>
    %c0_25 = arith.constant 0 : index
    %c0_26 = arith.constant 0 : index
    %22 = vector.load %arg7[%c0_25, %c0_26] : memref<272x32xf32, #tpu.memory_space<vmem>>, vector<255x32xf32>
    %23 = vector.extract_strided_slice %1 {offsets = [17, 0], sizes = [255, 12], strides = [1, 1]} : vector<272x12xbf16> to vector<255x12xbf16>
    %cst_27 = arith.constant dense<0.000000e+00> : vector<255x32xf32>
    %24 = tpu.matmul %23, %21, %cst_27 {dimension_numbers = #tpu.dot_dimension_numbers<[1], [0], [0], [1], [0, 0, 1, 1], [], []>} : vector<255x12xbf16>, vector<12x32xbf16>, vector<255x32xf32> -> vector<255x32xf32>
    %25 = arith.addf %22, %24 : vector<255x32xf32>
    %c0_28 = arith.constant 0 : index
    %c0_29 = arith.constant 0 : index
    %26 = vector.load %arg7[%c0_28, %c0_29] : memref<272x32xf32, #tpu.memory_space<vmem>>, vector<255x32xf32>
    tpu.vector_store %arg7[%c0_28, %c0_29], %25 {strides = array<i32>} : memref<272x32xf32, #tpu.memory_space<vmem>>, vector<255x32xf32>,
    %c255 = arith.constant 255 : index
    %c0_30 = arith.constant 0 : index
    %27 = vector.load %arg7[%c255, %c0_30] : memref<272x32xf32, #tpu.memory_space<vmem>>, vector<17x32xf32>
    %28 = vector.extract_strided_slice %3 {offsets = [0, 0], sizes = [17, 12], strides = [1, 1]} : vector<24x12xbf16> to vector<17x12xbf16>
    %cst_31 = arith.constant dense<0.000000e+00> : vector<17x32xf32>
    %29 = tpu.matmul %28, %21, %cst_31 {dimension_numbers = #tpu.dot_dimension_numbers<[1], [0], [0], [1], [0, 0, 1, 1], [], []>} : vector<17x12xbf16>, vector<12x32xbf16>, vector<17x32xf32> -> vector<17x32xf32>
    %30 = arith.addf %27, %29 : vector<17x32xf32>
    %c255_32 = arith.constant 255 : index
    %c0_33 = arith.constant 0 : index
    %31 = vector.load %arg7[%c255_32, %c0_33] : memref<272x32xf32, #tpu.memory_space<vmem>>, vector<17x32xf32>
    tpu.vector_store %arg7[%c255_32, %c0_33], %30 {strides = array<i32>} : memref<272x32xf32, #tpu.memory_space<vmem>>, vector<17x32xf32>,
    %c3 = arith.constant 3 : index
    %c0_34 = arith.constant 0 : index
    %c0_35 = arith.constant 0 : index
    %32 = vector.load %arg4[%c3, %c0_34, %c0_35] : memref<4x12x32xbf16, #tpu.memory_space<vmem>>, vector<1x12x32xbf16>
    %33 = vector.shape_cast %32 : vector<1x12x32xbf16> to vector<12x32xbf16>
    %c0_36 = arith.constant 0 : index
    %c0_37 = arith.constant 0 : index
    %34 = vector.load %arg7[%c0_36, %c0_37] : memref<272x32xf32, #tpu.memory_space<vmem>>, vector<254x32xf32>
    %35 = vector.extract_strided_slice %1 {offsets = [18, 0], sizes = [254, 12], strides = [1, 1]} : vector<272x12xbf16> to vector<254x12xbf16>
    %cst_38 = arith.constant dense<0.000000e+00> : vector<254x32xf32>
    %36 = tpu.matmul %35, %33, %cst_38 {dimension_numbers = #tpu.dot_dimension_numbers<[1], [0], [0], [1], [0, 0, 1, 1], [], []>} : vector<254x12xbf16>, vector<12x32xbf16>, vector<254x32xf32> -> vector<254x32xf32>
    %37 = arith.addf %34, %36 : vector<254x32xf32>
    %c0_39 = arith.constant 0 : index
    %c0_40 = arith.constant 0 : index
    %38 = vector.load %arg7[%c0_39, %c0_40] : memref<272x32xf32, #tpu.memory_space<vmem>>, vector<254x32xf32>
    tpu.vector_store %arg7[%c0_39, %c0_40], %37 {strides = array<i32>} : memref<272x32xf32, #tpu.memory_space<vmem>>, vector<254x32xf32>,
    %c254 = arith.constant 254 : index
    %c0_41 = arith.constant 0 : index
    %39 = vector.load %arg7[%c254, %c0_41] : memref<272x32xf32, #tpu.memory_space<vmem>>, vector<18x32xf32>
    %40 = vector.extract_strided_slice %3 {offsets = [0, 0], sizes = [18, 12], strides = [1, 1]} : vector<24x12xbf16> to vector<18x12xbf16>
    %cst_42 = arith.constant dense<0.000000e+00> : vector<18x32xf32>
    %41 = tpu.matmul %40, %33, %cst_42 {dimension_numbers = #tpu.dot_dimension_numbers<[1], [0], [0], [1], [0, 0, 1, 1], [], []>} : vector<18x12xbf16>, vector<12x32xbf16>, vector<18x32xf32> -> vector<18x32xf32>
    %42 = arith.addf %39, %41 : vector<18x32xf32>
    %c254_43 = arith.constant 254 : index
    %c0_44 = arith.constant 0 : index
    %43 = vector.load %arg7[%c254_43, %c0_44] : memref<272x32xf32, #tpu.memory_space<vmem>>, vector<18x32xf32>
    tpu.vector_store %arg7[%c254_43, %c0_44], %42 {strides = array<i32>} : memref<272x32xf32, #tpu.memory_space<vmem>>, vector<18x32xf32>,
    %c0_45 = arith.constant 0 : index
    %c0_46 = arith.constant 0 : index
    %44 = vector.load %arg7[%c0_45, %c0_46] : memref<272x32xf32, #tpu.memory_space<vmem>>, vector<272x32xf32>
    %c0_47 = arith.constant 0 : index
    %c0_48 = arith.constant 0 : index
    %45 = vector.load %arg5[%c0_47, %c0_48] : memref<1x32xf32, #tpu.memory_space<vmem>>, vector<1x32xf32>
    %46 = vector.broadcast %45 : vector<1x32xf32> to vector<272x32xf32>
    %47 = arith.addf %44, %46 : vector<272x32xf32>
    %48 = arith.negf %47 : vector<272x32xf32>
    %49 = math.exp %48 : vector<272x32xf32>
    %cst_49 = arith.constant 1.000000e+00 : f32
    %50 = vector.broadcast %cst_49 : f32 to vector<272x32xf32>
    %51 = arith.addf %50, %49 : vector<272x32xf32>
    %52 = arith.divf %50, %51 : vector<272x32xf32>
    %53 = arith.mulf %47, %52 : vector<272x32xf32>
    %54 = arith.truncf %53 : vector<272x32xf32> to vector<272x32xbf16>
    %c0_50 = arith.constant 0 : index
    %c0_51 = arith.constant 0 : index
    %c0_52 = arith.constant 0 : index
    %c0_53 = arith.constant 0 : index
    %55 = vector.load %arg6[%c0_50, %c0_51, %c0_52, %c0_53] : memref<1x1x272x32xbf16, #tpu.memory_space<vmem>>, vector<1x1x272x32xbf16>
    %56 = vector.shape_cast %55 : vector<1x1x272x32xbf16> to vector<272x32xbf16>
    %57 = vector.shape_cast %54 : vector<272x32xbf16> to vector<1x1x272x32xbf16>
    tpu.vector_store %arg6[%c0_50, %c0_51, %c0_52, %c0_53], %57 {strides = array<i32>} : memref<1x1x272x32xbf16, #tpu.memory_space<vmem>>, vector<1x1x272x32xbf16>,
    return
  }
  func.func @transform_0(%arg0: i32, %arg1: i32) -> (i32, i32, i32, i32) {
    %c0_i32 = arith.constant 0 : i32
    %c0_i32_0 = arith.constant 0 : i32
    %c0_i32_1 = arith.constant 0 : i32
    return %arg0, %arg1, %c0_i32, %c0_i32_0 : i32, i32, i32, i32
  }
  func.func @transform_1(%arg0: i32, %arg1: i32) -> (i32, i32, i32, i32) {
    %c1_i32 = arith.constant 1 : i32
    %0 = arith.addi %arg1, %c1_i32 : i32
    %c0_i32 = arith.constant 0 : i32
    %c0_i32_0 = arith.constant 0 : i32
    %c0_i32_1 = arith.constant 0 : i32
    return %arg0, %0, %c0_i32, %c0_i32_0 : i32, i32, i32, i32
  }
  func.func @transform_2(%arg0: i32, %arg1: i32) -> (i32, i32, i32) {
    %c0_i32 = arith.constant 0 : i32
    %c0_i32_0 = arith.constant 0 : i32
    %c0_i32_1 = arith.constant 0 : i32
    %c0_i32_2 = arith.constant 0 : i32
    return %c0_i32, %c0_i32_0, %c0_i32_1 : i32, i32, i32
  }
  func.func @transform_3(%arg0: i32, %arg1: i32) -> (i32, i32) {
    %c0_i32 = arith.constant 0 : i32
    %c0_i32_0 = arith.constant 0 : i32
    %c0_i32_1 = arith.constant 0 : i32
    return %c0_i32, %c0_i32_0 : i32, i32
  }
  func.func @transform_4(%arg0: i32, %arg1: i32) -> (i32, i32, i32, i32) {
    %c0_i32 = arith.constant 0 : i32
    %c0_i32_0 = arith.constant 0 : i32
    %c0_i32_1 = arith.constant 0 : i32
    return %arg0, %arg1, %c0_i32, %c0_i32_0 : i32, i32, i32, i32
  }
}

module attributes {stable_mosaic.version = 11 : i64} {
  func.func @conv3x3s2_bn_silu_kernel(%arg0: i32, %arg1: i32, %arg2: memref<1x1x72x128xbf16, #tpu.memory_space<vmem>>, %arg3: memref<1x1x16x128xbf16, #tpu.memory_space<vmem>>, %arg4: memref<4x128x64xbf16, #tpu.memory_space<vmem>>, %arg5: memref<1x64xf32, #tpu.memory_space<vmem>>, %arg6: memref<1x1x72x64xbf16, #tpu.memory_space<vmem>>, %arg7: memref<72x64xf32, #tpu.memory_space<vmem>>) attributes {dimension_semantics = [#tpu.dimension_semantics<parallel>, #tpu.dimension_semantics<parallel>], iteration_bounds = array<i64: 2, 1>, scalar_prefetch = 0 : i64, scratch_operands = 1 : i64, tpu.core_type = #tpu.core_type<tc>, window_params = [{transform_indices = @transform_0, window_bounds = array<i64: 1, 1, 72, 128>}, {transform_indices = @transform_1, window_bounds = array<i64: 1, 1, 16, 128>}, {pipeline_mode = #tpu.pipeline_mode<synchronous>, transform_indices = @transform_2, window_bounds = array<i64: 4, 128, 64>}, {pipeline_mode = #tpu.pipeline_mode<synchronous>, transform_indices = @transform_3, window_bounds = array<i64: 1, 64>}, {transform_indices = @transform_4, window_bounds = array<i64: 1, 1, 72, 64>}]} {
    %c0 = arith.constant 0 : index
    %c0_0 = arith.constant 0 : index
    %c0_1 = arith.constant 0 : index
    %c0_2 = arith.constant 0 : index
    %0 = vector.load %arg2[%c0, %c0_0, %c0_1, %c0_2] : memref<1x1x72x128xbf16, #tpu.memory_space<vmem>>, vector<1x1x72x128xbf16>
    %1 = vector.shape_cast %0 : vector<1x1x72x128xbf16> to vector<72x128xbf16>
    %c0_3 = arith.constant 0 : index
    %c0_4 = arith.constant 0 : index
    %c0_5 = arith.constant 0 : index
    %c0_6 = arith.constant 0 : index
    %2 = vector.load %arg3[%c0_3, %c0_4, %c0_5, %c0_6] : memref<1x1x16x128xbf16, #tpu.memory_space<vmem>>, vector<1x1x16x128xbf16>
    %3 = vector.shape_cast %2 : vector<1x1x16x128xbf16> to vector<16x128xbf16>
    %c0_7 = arith.constant 0 : index
    %c0_8 = arith.constant 0 : index
    %c0_9 = arith.constant 0 : index
    %4 = vector.load %arg4[%c0_7, %c0_8, %c0_9] : memref<4x128x64xbf16, #tpu.memory_space<vmem>>, vector<1x128x64xbf16>
    %5 = vector.shape_cast %4 : vector<1x128x64xbf16> to vector<128x64xbf16>
    %cst = arith.constant dense<0.000000e+00> : vector<72x64xf32>
    %6 = tpu.matmul %1, %5, %cst {dimension_numbers = #tpu.dot_dimension_numbers<[1], [0], [0], [1], [0, 0, 1, 1], [], []>} : vector<72x128xbf16>, vector<128x64xbf16>, vector<72x64xf32> -> vector<72x64xf32>
    %c0_10 = arith.constant 0 : index
    %c0_11 = arith.constant 0 : index
    %7 = vector.load %arg7[%c0_10, %c0_11] : memref<72x64xf32, #tpu.memory_space<vmem>>, vector<72x64xf32>
    tpu.vector_store %arg7[%c0_10, %c0_11], %6 {strides = array<i32>} : memref<72x64xf32, #tpu.memory_space<vmem>>, vector<72x64xf32>,
    %c1 = arith.constant 1 : index
    %c0_12 = arith.constant 0 : index
    %c0_13 = arith.constant 0 : index
    %8 = vector.load %arg4[%c1, %c0_12, %c0_13] : memref<4x128x64xbf16, #tpu.memory_space<vmem>>, vector<1x128x64xbf16>
    %9 = vector.shape_cast %8 : vector<1x128x64xbf16> to vector<128x64xbf16>
    %c0_14 = arith.constant 0 : index
    %c0_15 = arith.constant 0 : index
    %10 = vector.load %arg7[%c0_14, %c0_15] : memref<72x64xf32, #tpu.memory_space<vmem>>, vector<71x64xf32>
    %11 = vector.extract_strided_slice %1 {offsets = [1, 0], sizes = [71, 128], strides = [1, 1]} : vector<72x128xbf16> to vector<71x128xbf16>
    %cst_16 = arith.constant dense<0.000000e+00> : vector<71x64xf32>
    %12 = tpu.matmul %11, %9, %cst_16 {dimension_numbers = #tpu.dot_dimension_numbers<[1], [0], [0], [1], [0, 0, 1, 1], [], []>} : vector<71x128xbf16>, vector<128x64xbf16>, vector<71x64xf32> -> vector<71x64xf32>
    %13 = arith.addf %10, %12 : vector<71x64xf32>
    %c0_17 = arith.constant 0 : index
    %c0_18 = arith.constant 0 : index
    %14 = vector.load %arg7[%c0_17, %c0_18] : memref<72x64xf32, #tpu.memory_space<vmem>>, vector<71x64xf32>
    tpu.vector_store %arg7[%c0_17, %c0_18], %13 {strides = array<i32>} : memref<72x64xf32, #tpu.memory_space<vmem>>, vector<71x64xf32>,
    %c71 = arith.constant 71 : index
    %c0_19 = arith.constant 0 : index
    %15 = vector.load %arg7[%c71, %c0_19] : memref<72x64xf32, #tpu.memory_space<vmem>>, vector<1x64xf32>
    %16 = vector.extract_strided_slice %3 {offsets = [0, 0], sizes = [1, 128], strides = [1, 1]} : vector<16x128xbf16> to vector<1x128xbf16>
    %cst_20 = arith.constant dense<0.000000e+00> : vector<1x64xf32>
    %17 = tpu.matmul %16, %9, %cst_20 {dimension_numbers = #tpu.dot_dimension_numbers<[1], [0], [0], [1], [0, 0, 1, 1], [], []>} : vector<1x128xbf16>, vector<128x64xbf16>, vector<1x64xf32> -> vector<1x64xf32>
    %18 = arith.addf %15, %17 : vector<1x64xf32>
    %c71_21 = arith.constant 71 : index
    %c0_22 = arith.constant 0 : index
    %19 = vector.load %arg7[%c71_21, %c0_22] : memref<72x64xf32, #tpu.memory_space<vmem>>, vector<1x64xf32>
    tpu.vector_store %arg7[%c71_21, %c0_22], %18 {strides = array<i32>} : memref<72x64xf32, #tpu.memory_space<vmem>>, vector<1x64xf32>,
    %c2 = arith.constant 2 : index
    %c0_23 = arith.constant 0 : index
    %c0_24 = arith.constant 0 : index
    %20 = vector.load %arg4[%c2, %c0_23, %c0_24] : memref<4x128x64xbf16, #tpu.memory_space<vmem>>, vector<1x128x64xbf16>
    %21 = vector.shape_cast %20 : vector<1x128x64xbf16> to vector<128x64xbf16>
    %c0_25 = arith.constant 0 : index
    %c0_26 = arith.constant 0 : index
    %22 = vector.load %arg7[%c0_25, %c0_26] : memref<72x64xf32, #tpu.memory_space<vmem>>, vector<63x64xf32>
    %23 = vector.extract_strided_slice %1 {offsets = [9, 0], sizes = [63, 128], strides = [1, 1]} : vector<72x128xbf16> to vector<63x128xbf16>
    %cst_27 = arith.constant dense<0.000000e+00> : vector<63x64xf32>
    %24 = tpu.matmul %23, %21, %cst_27 {dimension_numbers = #tpu.dot_dimension_numbers<[1], [0], [0], [1], [0, 0, 1, 1], [], []>} : vector<63x128xbf16>, vector<128x64xbf16>, vector<63x64xf32> -> vector<63x64xf32>
    %25 = arith.addf %22, %24 : vector<63x64xf32>
    %c0_28 = arith.constant 0 : index
    %c0_29 = arith.constant 0 : index
    %26 = vector.load %arg7[%c0_28, %c0_29] : memref<72x64xf32, #tpu.memory_space<vmem>>, vector<63x64xf32>
    tpu.vector_store %arg7[%c0_28, %c0_29], %25 {strides = array<i32>} : memref<72x64xf32, #tpu.memory_space<vmem>>, vector<63x64xf32>,
    %c63 = arith.constant 63 : index
    %c0_30 = arith.constant 0 : index
    %27 = vector.load %arg7[%c63, %c0_30] : memref<72x64xf32, #tpu.memory_space<vmem>>, vector<9x64xf32>
    %28 = vector.extract_strided_slice %3 {offsets = [0, 0], sizes = [9, 128], strides = [1, 1]} : vector<16x128xbf16> to vector<9x128xbf16>
    %cst_31 = arith.constant dense<0.000000e+00> : vector<9x64xf32>
    %29 = tpu.matmul %28, %21, %cst_31 {dimension_numbers = #tpu.dot_dimension_numbers<[1], [0], [0], [1], [0, 0, 1, 1], [], []>} : vector<9x128xbf16>, vector<128x64xbf16>, vector<9x64xf32> -> vector<9x64xf32>
    %30 = arith.addf %27, %29 : vector<9x64xf32>
    %c63_32 = arith.constant 63 : index
    %c0_33 = arith.constant 0 : index
    %31 = vector.load %arg7[%c63_32, %c0_33] : memref<72x64xf32, #tpu.memory_space<vmem>>, vector<9x64xf32>
    tpu.vector_store %arg7[%c63_32, %c0_33], %30 {strides = array<i32>} : memref<72x64xf32, #tpu.memory_space<vmem>>, vector<9x64xf32>,
    %c3 = arith.constant 3 : index
    %c0_34 = arith.constant 0 : index
    %c0_35 = arith.constant 0 : index
    %32 = vector.load %arg4[%c3, %c0_34, %c0_35] : memref<4x128x64xbf16, #tpu.memory_space<vmem>>, vector<1x128x64xbf16>
    %33 = vector.shape_cast %32 : vector<1x128x64xbf16> to vector<128x64xbf16>
    %c0_36 = arith.constant 0 : index
    %c0_37 = arith.constant 0 : index
    %34 = vector.load %arg7[%c0_36, %c0_37] : memref<72x64xf32, #tpu.memory_space<vmem>>, vector<62x64xf32>
    %35 = vector.extract_strided_slice %1 {offsets = [10, 0], sizes = [62, 128], strides = [1, 1]} : vector<72x128xbf16> to vector<62x128xbf16>
    %cst_38 = arith.constant dense<0.000000e+00> : vector<62x64xf32>
    %36 = tpu.matmul %35, %33, %cst_38 {dimension_numbers = #tpu.dot_dimension_numbers<[1], [0], [0], [1], [0, 0, 1, 1], [], []>} : vector<62x128xbf16>, vector<128x64xbf16>, vector<62x64xf32> -> vector<62x64xf32>
    %37 = arith.addf %34, %36 : vector<62x64xf32>
    %c0_39 = arith.constant 0 : index
    %c0_40 = arith.constant 0 : index
    %38 = vector.load %arg7[%c0_39, %c0_40] : memref<72x64xf32, #tpu.memory_space<vmem>>, vector<62x64xf32>
    tpu.vector_store %arg7[%c0_39, %c0_40], %37 {strides = array<i32>} : memref<72x64xf32, #tpu.memory_space<vmem>>, vector<62x64xf32>,
    %c62 = arith.constant 62 : index
    %c0_41 = arith.constant 0 : index
    %39 = vector.load %arg7[%c62, %c0_41] : memref<72x64xf32, #tpu.memory_space<vmem>>, vector<10x64xf32>
    %40 = vector.extract_strided_slice %3 {offsets = [0, 0], sizes = [10, 128], strides = [1, 1]} : vector<16x128xbf16> to vector<10x128xbf16>
    %cst_42 = arith.constant dense<0.000000e+00> : vector<10x64xf32>
    %41 = tpu.matmul %40, %33, %cst_42 {dimension_numbers = #tpu.dot_dimension_numbers<[1], [0], [0], [1], [0, 0, 1, 1], [], []>} : vector<10x128xbf16>, vector<128x64xbf16>, vector<10x64xf32> -> vector<10x64xf32>
    %42 = arith.addf %39, %41 : vector<10x64xf32>
    %c62_43 = arith.constant 62 : index
    %c0_44 = arith.constant 0 : index
    %43 = vector.load %arg7[%c62_43, %c0_44] : memref<72x64xf32, #tpu.memory_space<vmem>>, vector<10x64xf32>
    tpu.vector_store %arg7[%c62_43, %c0_44], %42 {strides = array<i32>} : memref<72x64xf32, #tpu.memory_space<vmem>>, vector<10x64xf32>,
    %c0_45 = arith.constant 0 : index
    %c0_46 = arith.constant 0 : index
    %44 = vector.load %arg7[%c0_45, %c0_46] : memref<72x64xf32, #tpu.memory_space<vmem>>, vector<72x64xf32>
    %c0_47 = arith.constant 0 : index
    %c0_48 = arith.constant 0 : index
    %45 = vector.load %arg5[%c0_47, %c0_48] : memref<1x64xf32, #tpu.memory_space<vmem>>, vector<1x64xf32>
    %46 = vector.broadcast %45 : vector<1x64xf32> to vector<72x64xf32>
    %47 = arith.addf %44, %46 : vector<72x64xf32>
    %48 = arith.negf %47 : vector<72x64xf32>
    %49 = math.exp %48 : vector<72x64xf32>
    %cst_49 = arith.constant 1.000000e+00 : f32
    %50 = vector.broadcast %cst_49 : f32 to vector<72x64xf32>
    %51 = arith.addf %50, %49 : vector<72x64xf32>
    %52 = arith.divf %50, %51 : vector<72x64xf32>
    %53 = arith.mulf %47, %52 : vector<72x64xf32>
    %54 = arith.truncf %53 : vector<72x64xf32> to vector<72x64xbf16>
    %c0_50 = arith.constant 0 : index
    %c0_51 = arith.constant 0 : index
    %c0_52 = arith.constant 0 : index
    %c0_53 = arith.constant 0 : index
    %55 = vector.load %arg6[%c0_50, %c0_51, %c0_52, %c0_53] : memref<1x1x72x64xbf16, #tpu.memory_space<vmem>>, vector<1x1x72x64xbf16>
    %56 = vector.shape_cast %55 : vector<1x1x72x64xbf16> to vector<72x64xbf16>
    %57 = vector.shape_cast %54 : vector<72x64xbf16> to vector<1x1x72x64xbf16>
    tpu.vector_store %arg6[%c0_50, %c0_51, %c0_52, %c0_53], %57 {strides = array<i32>} : memref<1x1x72x64xbf16, #tpu.memory_space<vmem>>, vector<1x1x72x64xbf16>,
    return
  }
  func.func @transform_0(%arg0: i32, %arg1: i32) -> (i32, i32, i32, i32) {
    %c0_i32 = arith.constant 0 : i32
    %c0_i32_0 = arith.constant 0 : i32
    %c0_i32_1 = arith.constant 0 : i32
    return %arg0, %arg1, %c0_i32, %c0_i32_0 : i32, i32, i32, i32
  }
  func.func @transform_1(%arg0: i32, %arg1: i32) -> (i32, i32, i32, i32) {
    %c1_i32 = arith.constant 1 : i32
    %0 = arith.addi %arg1, %c1_i32 : i32
    %c0_i32 = arith.constant 0 : i32
    %c0_i32_0 = arith.constant 0 : i32
    %c0_i32_1 = arith.constant 0 : i32
    return %arg0, %0, %c0_i32, %c0_i32_0 : i32, i32, i32, i32
  }
  func.func @transform_2(%arg0: i32, %arg1: i32) -> (i32, i32, i32) {
    %c0_i32 = arith.constant 0 : i32
    %c0_i32_0 = arith.constant 0 : i32
    %c0_i32_1 = arith.constant 0 : i32
    %c0_i32_2 = arith.constant 0 : i32
    return %c0_i32, %c0_i32_0, %c0_i32_1 : i32, i32, i32
  }
  func.func @transform_3(%arg0: i32, %arg1: i32) -> (i32, i32) {
    %c0_i32 = arith.constant 0 : i32
    %c0_i32_0 = arith.constant 0 : i32
    %c0_i32_1 = arith.constant 0 : i32
    return %c0_i32, %c0_i32_0 : i32, i32
  }
  func.func @transform_4(%arg0: i32, %arg1: i32) -> (i32, i32, i32, i32) {
    %c0_i32 = arith.constant 0 : i32
    %c0_i32_0 = arith.constant 0 : i32
    %c0_i32_1 = arith.constant 0 : i32
    return %arg0, %arg1, %c0_i32, %c0_i32_0 : i32, i32, i32, i32
  }
}

module attributes {stable_mosaic.version = 11 : i64} {
  func.func @conv3x3s2_bn_silu_kernel(%arg0: i32, %arg1: i32, %arg2: memref<1x1x24x256xbf16, #tpu.memory_space<vmem>>, %arg3: memref<1x1x8x256xbf16, #tpu.memory_space<vmem>>, %arg4: memref<4x256x128xbf16, #tpu.memory_space<vmem>>, %arg5: memref<1x128xf32, #tpu.memory_space<vmem>>, %arg6: memref<1x1x24x128xbf16, #tpu.memory_space<vmem>>, %arg7: memref<24x128xf32, #tpu.memory_space<vmem>>) attributes {dimension_semantics = [#tpu.dimension_semantics<parallel>, #tpu.dimension_semantics<parallel>], iteration_bounds = array<i64: 2, 1>, scalar_prefetch = 0 : i64, scratch_operands = 1 : i64, tpu.core_type = #tpu.core_type<tc>, window_params = [{transform_indices = @transform_0, window_bounds = array<i64: 1, 1, 24, 256>}, {transform_indices = @transform_1, window_bounds = array<i64: 1, 1, 8, 256>}, {pipeline_mode = #tpu.pipeline_mode<synchronous>, transform_indices = @transform_2, window_bounds = array<i64: 4, 256, 128>}, {pipeline_mode = #tpu.pipeline_mode<synchronous>, transform_indices = @transform_3, window_bounds = array<i64: 1, 128>}, {transform_indices = @transform_4, window_bounds = array<i64: 1, 1, 24, 128>}]} {
    %c0 = arith.constant 0 : index
    %c0_0 = arith.constant 0 : index
    %c0_1 = arith.constant 0 : index
    %c0_2 = arith.constant 0 : index
    %0 = vector.load %arg2[%c0, %c0_0, %c0_1, %c0_2] : memref<1x1x24x256xbf16, #tpu.memory_space<vmem>>, vector<1x1x24x256xbf16>
    %1 = vector.shape_cast %0 : vector<1x1x24x256xbf16> to vector<24x256xbf16>
    %c0_3 = arith.constant 0 : index
    %c0_4 = arith.constant 0 : index
    %c0_5 = arith.constant 0 : index
    %c0_6 = arith.constant 0 : index
    %2 = vector.load %arg3[%c0_3, %c0_4, %c0_5, %c0_6] : memref<1x1x8x256xbf16, #tpu.memory_space<vmem>>, vector<1x1x8x256xbf16>
    %3 = vector.shape_cast %2 : vector<1x1x8x256xbf16> to vector<8x256xbf16>
    %c0_7 = arith.constant 0 : index
    %c0_8 = arith.constant 0 : index
    %c0_9 = arith.constant 0 : index
    %4 = vector.load %arg4[%c0_7, %c0_8, %c0_9] : memref<4x256x128xbf16, #tpu.memory_space<vmem>>, vector<1x256x128xbf16>
    %5 = vector.shape_cast %4 : vector<1x256x128xbf16> to vector<256x128xbf16>
    %cst = arith.constant dense<0.000000e+00> : vector<24x128xf32>
    %6 = tpu.matmul %1, %5, %cst {dimension_numbers = #tpu.dot_dimension_numbers<[1], [0], [0], [1], [0, 0, 1, 1], [], []>} : vector<24x256xbf16>, vector<256x128xbf16>, vector<24x128xf32> -> vector<24x128xf32>
    %c0_10 = arith.constant 0 : index
    %c0_11 = arith.constant 0 : index
    %7 = vector.load %arg7[%c0_10, %c0_11] : memref<24x128xf32, #tpu.memory_space<vmem>>, vector<24x128xf32>
    tpu.vector_store %arg7[%c0_10, %c0_11], %6 {strides = array<i32>} : memref<24x128xf32, #tpu.memory_space<vmem>>, vector<24x128xf32>,
    %c1 = arith.constant 1 : index
    %c0_12 = arith.constant 0 : index
    %c0_13 = arith.constant 0 : index
    %8 = vector.load %arg4[%c1, %c0_12, %c0_13] : memref<4x256x128xbf16, #tpu.memory_space<vmem>>, vector<1x256x128xbf16>
    %9 = vector.shape_cast %8 : vector<1x256x128xbf16> to vector<256x128xbf16>
    %c0_14 = arith.constant 0 : index
    %c0_15 = arith.constant 0 : index
    %10 = vector.load %arg7[%c0_14, %c0_15] : memref<24x128xf32, #tpu.memory_space<vmem>>, vector<23x128xf32>
    %11 = vector.extract_strided_slice %1 {offsets = [1, 0], sizes = [23, 256], strides = [1, 1]} : vector<24x256xbf16> to vector<23x256xbf16>
    %cst_16 = arith.constant dense<0.000000e+00> : vector<23x128xf32>
    %12 = tpu.matmul %11, %9, %cst_16 {dimension_numbers = #tpu.dot_dimension_numbers<[1], [0], [0], [1], [0, 0, 1, 1], [], []>} : vector<23x256xbf16>, vector<256x128xbf16>, vector<23x128xf32> -> vector<23x128xf32>
    %13 = arith.addf %10, %12 : vector<23x128xf32>
    %c0_17 = arith.constant 0 : index
    %c0_18 = arith.constant 0 : index
    %14 = vector.load %arg7[%c0_17, %c0_18] : memref<24x128xf32, #tpu.memory_space<vmem>>, vector<23x128xf32>
    tpu.vector_store %arg7[%c0_17, %c0_18], %13 {strides = array<i32>} : memref<24x128xf32, #tpu.memory_space<vmem>>, vector<23x128xf32>,
    %c23 = arith.constant 23 : index
    %c0_19 = arith.constant 0 : index
    %15 = vector.load %arg7[%c23, %c0_19] : memref<24x128xf32, #tpu.memory_space<vmem>>, vector<1x128xf32>
    %16 = vector.extract_strided_slice %3 {offsets = [0, 0], sizes = [1, 256], strides = [1, 1]} : vector<8x256xbf16> to vector<1x256xbf16>
    %cst_20 = arith.constant dense<0.000000e+00> : vector<1x128xf32>
    %17 = tpu.matmul %16, %9, %cst_20 {dimension_numbers = #tpu.dot_dimension_numbers<[1], [0], [0], [1], [0, 0, 1, 1], [], []>} : vector<1x256xbf16>, vector<256x128xbf16>, vector<1x128xf32> -> vector<1x128xf32>
    %18 = arith.addf %15, %17 : vector<1x128xf32>
    %c23_21 = arith.constant 23 : index
    %c0_22 = arith.constant 0 : index
    %19 = vector.load %arg7[%c23_21, %c0_22] : memref<24x128xf32, #tpu.memory_space<vmem>>, vector<1x128xf32>
    tpu.vector_store %arg7[%c23_21, %c0_22], %18 {strides = array<i32>} : memref<24x128xf32, #tpu.memory_space<vmem>>, vector<1x128xf32>,
    %c2 = arith.constant 2 : index
    %c0_23 = arith.constant 0 : index
    %c0_24 = arith.constant 0 : index
    %20 = vector.load %arg4[%c2, %c0_23, %c0_24] : memref<4x256x128xbf16, #tpu.memory_space<vmem>>, vector<1x256x128xbf16>
    %21 = vector.shape_cast %20 : vector<1x256x128xbf16> to vector<256x128xbf16>
    %c0_25 = arith.constant 0 : index
    %c0_26 = arith.constant 0 : index
    %22 = vector.load %arg7[%c0_25, %c0_26] : memref<24x128xf32, #tpu.memory_space<vmem>>, vector<19x128xf32>
    %23 = vector.extract_strided_slice %1 {offsets = [5, 0], sizes = [19, 256], strides = [1, 1]} : vector<24x256xbf16> to vector<19x256xbf16>
    %cst_27 = arith.constant dense<0.000000e+00> : vector<19x128xf32>
    %24 = tpu.matmul %23, %21, %cst_27 {dimension_numbers = #tpu.dot_dimension_numbers<[1], [0], [0], [1], [0, 0, 1, 1], [], []>} : vector<19x256xbf16>, vector<256x128xbf16>, vector<19x128xf32> -> vector<19x128xf32>
    %25 = arith.addf %22, %24 : vector<19x128xf32>
    %c0_28 = arith.constant 0 : index
    %c0_29 = arith.constant 0 : index
    %26 = vector.load %arg7[%c0_28, %c0_29] : memref<24x128xf32, #tpu.memory_space<vmem>>, vector<19x128xf32>
    tpu.vector_store %arg7[%c0_28, %c0_29], %25 {strides = array<i32>} : memref<24x128xf32, #tpu.memory_space<vmem>>, vector<19x128xf32>,
    %c19 = arith.constant 19 : index
    %c0_30 = arith.constant 0 : index
    %27 = vector.load %arg7[%c19, %c0_30] : memref<24x128xf32, #tpu.memory_space<vmem>>, vector<5x128xf32>
    %28 = vector.extract_strided_slice %3 {offsets = [0, 0], sizes = [5, 256], strides = [1, 1]} : vector<8x256xbf16> to vector<5x256xbf16>
    %cst_31 = arith.constant dense<0.000000e+00> : vector<5x128xf32>
    %29 = tpu.matmul %28, %21, %cst_31 {dimension_numbers = #tpu.dot_dimension_numbers<[1], [0], [0], [1], [0, 0, 1, 1], [], []>} : vector<5x256xbf16>, vector<256x128xbf16>, vector<5x128xf32> -> vector<5x128xf32>
    %30 = arith.addf %27, %29 : vector<5x128xf32>
    %c19_32 = arith.constant 19 : index
    %c0_33 = arith.constant 0 : index
    %31 = vector.load %arg7[%c19_32, %c0_33] : memref<24x128xf32, #tpu.memory_space<vmem>>, vector<5x128xf32>
    tpu.vector_store %arg7[%c19_32, %c0_33], %30 {strides = array<i32>} : memref<24x128xf32, #tpu.memory_space<vmem>>, vector<5x128xf32>,
    %c3 = arith.constant 3 : index
    %c0_34 = arith.constant 0 : index
    %c0_35 = arith.constant 0 : index
    %32 = vector.load %arg4[%c3, %c0_34, %c0_35] : memref<4x256x128xbf16, #tpu.memory_space<vmem>>, vector<1x256x128xbf16>
    %33 = vector.shape_cast %32 : vector<1x256x128xbf16> to vector<256x128xbf16>
    %c0_36 = arith.constant 0 : index
    %c0_37 = arith.constant 0 : index
    %34 = vector.load %arg7[%c0_36, %c0_37] : memref<24x128xf32, #tpu.memory_space<vmem>>, vector<18x128xf32>
    %35 = vector.extract_strided_slice %1 {offsets = [6, 0], sizes = [18, 256], strides = [1, 1]} : vector<24x256xbf16> to vector<18x256xbf16>
    %cst_38 = arith.constant dense<0.000000e+00> : vector<18x128xf32>
    %36 = tpu.matmul %35, %33, %cst_38 {dimension_numbers = #tpu.dot_dimension_numbers<[1], [0], [0], [1], [0, 0, 1, 1], [], []>} : vector<18x256xbf16>, vector<256x128xbf16>, vector<18x128xf32> -> vector<18x128xf32>
    %37 = arith.addf %34, %36 : vector<18x128xf32>
    %c0_39 = arith.constant 0 : index
    %c0_40 = arith.constant 0 : index
    %38 = vector.load %arg7[%c0_39, %c0_40] : memref<24x128xf32, #tpu.memory_space<vmem>>, vector<18x128xf32>
    tpu.vector_store %arg7[%c0_39, %c0_40], %37 {strides = array<i32>} : memref<24x128xf32, #tpu.memory_space<vmem>>, vector<18x128xf32>,
    %c18 = arith.constant 18 : index
    %c0_41 = arith.constant 0 : index
    %39 = vector.load %arg7[%c18, %c0_41] : memref<24x128xf32, #tpu.memory_space<vmem>>, vector<6x128xf32>
    %40 = vector.extract_strided_slice %3 {offsets = [0, 0], sizes = [6, 256], strides = [1, 1]} : vector<8x256xbf16> to vector<6x256xbf16>
    %cst_42 = arith.constant dense<0.000000e+00> : vector<6x128xf32>
    %41 = tpu.matmul %40, %33, %cst_42 {dimension_numbers = #tpu.dot_dimension_numbers<[1], [0], [0], [1], [0, 0, 1, 1], [], []>} : vector<6x256xbf16>, vector<256x128xbf16>, vector<6x128xf32> -> vector<6x128xf32>
    %42 = arith.addf %39, %41 : vector<6x128xf32>
    %c18_43 = arith.constant 18 : index
    %c0_44 = arith.constant 0 : index
    %43 = vector.load %arg7[%c18_43, %c0_44] : memref<24x128xf32, #tpu.memory_space<vmem>>, vector<6x128xf32>
    tpu.vector_store %arg7[%c18_43, %c0_44], %42 {strides = array<i32>} : memref<24x128xf32, #tpu.memory_space<vmem>>, vector<6x128xf32>,
    %c0_45 = arith.constant 0 : index
    %c0_46 = arith.constant 0 : index
    %44 = vector.load %arg7[%c0_45, %c0_46] : memref<24x128xf32, #tpu.memory_space<vmem>>, vector<24x128xf32>
    %c0_47 = arith.constant 0 : index
    %c0_48 = arith.constant 0 : index
    %45 = vector.load %arg5[%c0_47, %c0_48] : memref<1x128xf32, #tpu.memory_space<vmem>>, vector<1x128xf32>
    %46 = vector.broadcast %45 : vector<1x128xf32> to vector<24x128xf32>
    %47 = arith.addf %44, %46 : vector<24x128xf32>
    %48 = arith.negf %47 : vector<24x128xf32>
    %49 = math.exp %48 : vector<24x128xf32>
    %cst_49 = arith.constant 1.000000e+00 : f32
    %50 = vector.broadcast %cst_49 : f32 to vector<24x128xf32>
    %51 = arith.addf %50, %49 : vector<24x128xf32>
    %52 = arith.divf %50, %51 : vector<24x128xf32>
    %53 = arith.mulf %47, %52 : vector<24x128xf32>
    %54 = arith.truncf %53 : vector<24x128xf32> to vector<24x128xbf16>
    %c0_50 = arith.constant 0 : index
    %c0_51 = arith.constant 0 : index
    %c0_52 = arith.constant 0 : index
    %c0_53 = arith.constant 0 : index
    %55 = vector.load %arg6[%c0_50, %c0_51, %c0_52, %c0_53] : memref<1x1x24x128xbf16, #tpu.memory_space<vmem>>, vector<1x1x24x128xbf16>
    %56 = vector.shape_cast %55 : vector<1x1x24x128xbf16> to vector<24x128xbf16>
    %57 = vector.shape_cast %54 : vector<24x128xbf16> to vector<1x1x24x128xbf16>
    tpu.vector_store %arg6[%c0_50, %c0_51, %c0_52, %c0_53], %57 {strides = array<i32>} : memref<1x1x24x128xbf16, #tpu.memory_space<vmem>>, vector<1x1x24x128xbf16>,
    return
  }
  func.func @transform_0(%arg0: i32, %arg1: i32) -> (i32, i32, i32, i32) {
    %c0_i32 = arith.constant 0 : i32
    %c0_i32_0 = arith.constant 0 : i32
    %c0_i32_1 = arith.constant 0 : i32
    return %arg0, %arg1, %c0_i32, %c0_i32_0 : i32, i32, i32, i32
  }
  func.func @transform_1(%arg0: i32, %arg1: i32) -> (i32, i32, i32, i32) {
    %c1_i32 = arith.constant 1 : i32
    %0 = arith.addi %arg1, %c1_i32 : i32
    %c0_i32 = arith.constant 0 : i32
    %c0_i32_0 = arith.constant 0 : i32
    %c0_i32_1 = arith.constant 0 : i32
    return %arg0, %0, %c0_i32, %c0_i32_0 : i32, i32, i32, i32
  }
  func.func @transform_2(%arg0: i32, %arg1: i32) -> (i32, i32, i32) {
    %c0_i32 = arith.constant 0 : i32
    %c0_i32_0 = arith.constant 0 : i32
    %c0_i32_1 = arith.constant 0 : i32
    %c0_i32_2 = arith.constant 0 : i32
    return %c0_i32, %c0_i32_0, %c0_i32_1 : i32, i32, i32
  }
  func.func @transform_3(%arg0: i32, %arg1: i32) -> (i32, i32) {
    %c0_i32 = arith.constant 0 : i32
    %c0_i32_0 = arith.constant 0 : i32
    %c0_i32_1 = arith.constant 0 : i32
    return %c0_i32, %c0_i32_0 : i32, i32
  }
  func.func @transform_4(%arg0: i32, %arg1: i32) -> (i32, i32, i32, i32) {
    %c0_i32 = arith.constant 0 : i32
    %c0_i32_0 = arith.constant 0 : i32
    %c0_i32_1 = arith.constant 0 : i32
    return %arg0, %arg1, %c0_i32, %c0_i32_0 : i32, i32, i32, i32
  }
}

module attributes {stable_mosaic.version = 11 : i64} {
  func.func @conv3x3s2_bn_silu_kernel(%arg0: i32, %arg1: i32, %arg2: memref<1x1x8x512xbf16, #tpu.memory_space<vmem>>, %arg3: memref<1x1x8x512xbf16, #tpu.memory_space<vmem>>, %arg4: memref<4x512x256xbf16, #tpu.memory_space<vmem>>, %arg5: memref<1x256xf32, #tpu.memory_space<vmem>>, %arg6: memref<1x1x8x256xbf16, #tpu.memory_space<vmem>>, %arg7: memref<8x256xf32, #tpu.memory_space<vmem>>) attributes {dimension_semantics = [#tpu.dimension_semantics<parallel>, #tpu.dimension_semantics<parallel>], iteration_bounds = array<i64: 2, 1>, scalar_prefetch = 0 : i64, scratch_operands = 1 : i64, tpu.core_type = #tpu.core_type<tc>, window_params = [{transform_indices = @transform_0, window_bounds = array<i64: 1, 1, 8, 512>}, {transform_indices = @transform_1, window_bounds = array<i64: 1, 1, 8, 512>}, {pipeline_mode = #tpu.pipeline_mode<synchronous>, transform_indices = @transform_2, window_bounds = array<i64: 4, 512, 256>}, {pipeline_mode = #tpu.pipeline_mode<synchronous>, transform_indices = @transform_3, window_bounds = array<i64: 1, 256>}, {transform_indices = @transform_4, window_bounds = array<i64: 1, 1, 8, 256>}]} {
    %c0 = arith.constant 0 : index
    %c0_0 = arith.constant 0 : index
    %c0_1 = arith.constant 0 : index
    %c0_2 = arith.constant 0 : index
    %0 = vector.load %arg2[%c0, %c0_0, %c0_1, %c0_2] : memref<1x1x8x512xbf16, #tpu.memory_space<vmem>>, vector<1x1x8x512xbf16>
    %1 = vector.shape_cast %0 : vector<1x1x8x512xbf16> to vector<8x512xbf16>
    %c0_3 = arith.constant 0 : index
    %c0_4 = arith.constant 0 : index
    %c0_5 = arith.constant 0 : index
    %c0_6 = arith.constant 0 : index
    %2 = vector.load %arg3[%c0_3, %c0_4, %c0_5, %c0_6] : memref<1x1x8x512xbf16, #tpu.memory_space<vmem>>, vector<1x1x8x512xbf16>
    %3 = vector.shape_cast %2 : vector<1x1x8x512xbf16> to vector<8x512xbf16>
    %c0_7 = arith.constant 0 : index
    %c0_8 = arith.constant 0 : index
    %c0_9 = arith.constant 0 : index
    %4 = vector.load %arg4[%c0_7, %c0_8, %c0_9] : memref<4x512x256xbf16, #tpu.memory_space<vmem>>, vector<1x512x256xbf16>
    %5 = vector.shape_cast %4 : vector<1x512x256xbf16> to vector<512x256xbf16>
    %cst = arith.constant dense<0.000000e+00> : vector<8x256xf32>
    %6 = tpu.matmul %1, %5, %cst {dimension_numbers = #tpu.dot_dimension_numbers<[1], [0], [0], [1], [0, 0, 1, 1], [], []>} : vector<8x512xbf16>, vector<512x256xbf16>, vector<8x256xf32> -> vector<8x256xf32>
    %c0_10 = arith.constant 0 : index
    %c0_11 = arith.constant 0 : index
    %7 = vector.load %arg7[%c0_10, %c0_11] : memref<8x256xf32, #tpu.memory_space<vmem>>, vector<8x256xf32>
    tpu.vector_store %arg7[%c0_10, %c0_11], %6 {strides = array<i32>} : memref<8x256xf32, #tpu.memory_space<vmem>>, vector<8x256xf32>,
    %c1 = arith.constant 1 : index
    %c0_12 = arith.constant 0 : index
    %c0_13 = arith.constant 0 : index
    %8 = vector.load %arg4[%c1, %c0_12, %c0_13] : memref<4x512x256xbf16, #tpu.memory_space<vmem>>, vector<1x512x256xbf16>
    %9 = vector.shape_cast %8 : vector<1x512x256xbf16> to vector<512x256xbf16>
    %c0_14 = arith.constant 0 : index
    %c0_15 = arith.constant 0 : index
    %10 = vector.load %arg7[%c0_14, %c0_15] : memref<8x256xf32, #tpu.memory_space<vmem>>, vector<7x256xf32>
    %11 = vector.extract_strided_slice %1 {offsets = [1, 0], sizes = [7, 512], strides = [1, 1]} : vector<8x512xbf16> to vector<7x512xbf16>
    %cst_16 = arith.constant dense<0.000000e+00> : vector<7x256xf32>
    %12 = tpu.matmul %11, %9, %cst_16 {dimension_numbers = #tpu.dot_dimension_numbers<[1], [0], [0], [1], [0, 0, 1, 1], [], []>} : vector<7x512xbf16>, vector<512x256xbf16>, vector<7x256xf32> -> vector<7x256xf32>
    %13 = arith.addf %10, %12 : vector<7x256xf32>
    %c0_17 = arith.constant 0 : index
    %c0_18 = arith.constant 0 : index
    %14 = vector.load %arg7[%c0_17, %c0_18] : memref<8x256xf32, #tpu.memory_space<vmem>>, vector<7x256xf32>
    tpu.vector_store %arg7[%c0_17, %c0_18], %13 {strides = array<i32>} : memref<8x256xf32, #tpu.memory_space<vmem>>, vector<7x256xf32>,
    %c7 = arith.constant 7 : index
    %c0_19 = arith.constant 0 : index
    %15 = vector.load %arg7[%c7, %c0_19] : memref<8x256xf32, #tpu.memory_space<vmem>>, vector<1x256xf32>
    %16 = vector.extract_strided_slice %3 {offsets = [0, 0], sizes = [1, 512], strides = [1, 1]} : vector<8x512xbf16> to vector<1x512xbf16>
    %cst_20 = arith.constant dense<0.000000e+00> : vector<1x256xf32>
    %17 = tpu.matmul %16, %9, %cst_20 {dimension_numbers = #tpu.dot_dimension_numbers<[1], [0], [0], [1], [0, 0, 1, 1], [], []>} : vector<1x512xbf16>, vector<512x256xbf16>, vector<1x256xf32> -> vector<1x256xf32>
    %18 = arith.addf %15, %17 : vector<1x256xf32>
    %c7_21 = arith.constant 7 : index
    %c0_22 = arith.constant 0 : index
    %19 = vector.load %arg7[%c7_21, %c0_22] : memref<8x256xf32, #tpu.memory_space<vmem>>, vector<1x256xf32>
    tpu.vector_store %arg7[%c7_21, %c0_22], %18 {strides = array<i32>} : memref<8x256xf32, #tpu.memory_space<vmem>>, vector<1x256xf32>,
    %c2 = arith.constant 2 : index
    %c0_23 = arith.constant 0 : index
    %c0_24 = arith.constant 0 : index
    %20 = vector.load %arg4[%c2, %c0_23, %c0_24] : memref<4x512x256xbf16, #tpu.memory_space<vmem>>, vector<1x512x256xbf16>
    %21 = vector.shape_cast %20 : vector<1x512x256xbf16> to vector<512x256xbf16>
    %c0_25 = arith.constant 0 : index
    %c0_26 = arith.constant 0 : index
    %22 = vector.load %arg7[%c0_25, %c0_26] : memref<8x256xf32, #tpu.memory_space<vmem>>, vector<5x256xf32>
    %23 = vector.extract_strided_slice %1 {offsets = [3, 0], sizes = [5, 512], strides = [1, 1]} : vector<8x512xbf16> to vector<5x512xbf16>
    %cst_27 = arith.constant dense<0.000000e+00> : vector<5x256xf32>
    %24 = tpu.matmul %23, %21, %cst_27 {dimension_numbers = #tpu.dot_dimension_numbers<[1], [0], [0], [1], [0, 0, 1, 1], [], []>} : vector<5x512xbf16>, vector<512x256xbf16>, vector<5x256xf32> -> vector<5x256xf32>
    %25 = arith.addf %22, %24 : vector<5x256xf32>
    %c0_28 = arith.constant 0 : index
    %c0_29 = arith.constant 0 : index
    %26 = vector.load %arg7[%c0_28, %c0_29] : memref<8x256xf32, #tpu.memory_space<vmem>>, vector<5x256xf32>
    tpu.vector_store %arg7[%c0_28, %c0_29], %25 {strides = array<i32>} : memref<8x256xf32, #tpu.memory_space<vmem>>, vector<5x256xf32>,
    %c5 = arith.constant 5 : index
    %c0_30 = arith.constant 0 : index
    %27 = vector.load %arg7[%c5, %c0_30] : memref<8x256xf32, #tpu.memory_space<vmem>>, vector<3x256xf32>
    %28 = vector.extract_strided_slice %3 {offsets = [0, 0], sizes = [3, 512], strides = [1, 1]} : vector<8x512xbf16> to vector<3x512xbf16>
    %cst_31 = arith.constant dense<0.000000e+00> : vector<3x256xf32>
    %29 = tpu.matmul %28, %21, %cst_31 {dimension_numbers = #tpu.dot_dimension_numbers<[1], [0], [0], [1], [0, 0, 1, 1], [], []>} : vector<3x512xbf16>, vector<512x256xbf16>, vector<3x256xf32> -> vector<3x256xf32>
    %30 = arith.addf %27, %29 : vector<3x256xf32>
    %c5_32 = arith.constant 5 : index
    %c0_33 = arith.constant 0 : index
    %31 = vector.load %arg7[%c5_32, %c0_33] : memref<8x256xf32, #tpu.memory_space<vmem>>, vector<3x256xf32>
    tpu.vector_store %arg7[%c5_32, %c0_33], %30 {strides = array<i32>} : memref<8x256xf32, #tpu.memory_space<vmem>>, vector<3x256xf32>,
    %c3 = arith.constant 3 : index
    %c0_34 = arith.constant 0 : index
    %c0_35 = arith.constant 0 : index
    %32 = vector.load %arg4[%c3, %c0_34, %c0_35] : memref<4x512x256xbf16, #tpu.memory_space<vmem>>, vector<1x512x256xbf16>
    %33 = vector.shape_cast %32 : vector<1x512x256xbf16> to vector<512x256xbf16>
    %c0_36 = arith.constant 0 : index
    %c0_37 = arith.constant 0 : index
    %34 = vector.load %arg7[%c0_36, %c0_37] : memref<8x256xf32, #tpu.memory_space<vmem>>, vector<4x256xf32>
    %35 = vector.extract_strided_slice %1 {offsets = [4, 0], sizes = [4, 512], strides = [1, 1]} : vector<8x512xbf16> to vector<4x512xbf16>
    %cst_38 = arith.constant dense<0.000000e+00> : vector<4x256xf32>
    %36 = tpu.matmul %35, %33, %cst_38 {dimension_numbers = #tpu.dot_dimension_numbers<[1], [0], [0], [1], [0, 0, 1, 1], [], []>} : vector<4x512xbf16>, vector<512x256xbf16>, vector<4x256xf32> -> vector<4x256xf32>
    %37 = arith.addf %34, %36 : vector<4x256xf32>
    %c0_39 = arith.constant 0 : index
    %c0_40 = arith.constant 0 : index
    %38 = vector.load %arg7[%c0_39, %c0_40] : memref<8x256xf32, #tpu.memory_space<vmem>>, vector<4x256xf32>
    tpu.vector_store %arg7[%c0_39, %c0_40], %37 {strides = array<i32>} : memref<8x256xf32, #tpu.memory_space<vmem>>, vector<4x256xf32>,
    %c4 = arith.constant 4 : index
    %c0_41 = arith.constant 0 : index
    %39 = vector.load %arg7[%c4, %c0_41] : memref<8x256xf32, #tpu.memory_space<vmem>>, vector<4x256xf32>
    %40 = vector.extract_strided_slice %3 {offsets = [0, 0], sizes = [4, 512], strides = [1, 1]} : vector<8x512xbf16> to vector<4x512xbf16>
    %cst_42 = arith.constant dense<0.000000e+00> : vector<4x256xf32>
    %41 = tpu.matmul %40, %33, %cst_42 {dimension_numbers = #tpu.dot_dimension_numbers<[1], [0], [0], [1], [0, 0, 1, 1], [], []>} : vector<4x512xbf16>, vector<512x256xbf16>, vector<4x256xf32> -> vector<4x256xf32>
    %42 = arith.addf %39, %41 : vector<4x256xf32>
    %c4_43 = arith.constant 4 : index
    %c0_44 = arith.constant 0 : index
    %43 = vector.load %arg7[%c4_43, %c0_44] : memref<8x256xf32, #tpu.memory_space<vmem>>, vector<4x256xf32>
    tpu.vector_store %arg7[%c4_43, %c0_44], %42 {strides = array<i32>} : memref<8x256xf32, #tpu.memory_space<vmem>>, vector<4x256xf32>,
    %c0_45 = arith.constant 0 : index
    %c0_46 = arith.constant 0 : index
    %44 = vector.load %arg7[%c0_45, %c0_46] : memref<8x256xf32, #tpu.memory_space<vmem>>, vector<8x256xf32>
    %c0_47 = arith.constant 0 : index
    %c0_48 = arith.constant 0 : index
    %45 = vector.load %arg5[%c0_47, %c0_48] : memref<1x256xf32, #tpu.memory_space<vmem>>, vector<1x256xf32>
    %46 = vector.broadcast %45 : vector<1x256xf32> to vector<8x256xf32>
    %47 = arith.addf %44, %46 : vector<8x256xf32>
    %48 = arith.negf %47 : vector<8x256xf32>
    %49 = math.exp %48 : vector<8x256xf32>
    %cst_49 = arith.constant 1.000000e+00 : f32
    %50 = vector.broadcast %cst_49 : f32 to vector<8x256xf32>
    %51 = arith.addf %50, %49 : vector<8x256xf32>
    %52 = arith.divf %50, %51 : vector<8x256xf32>
    %53 = arith.mulf %47, %52 : vector<8x256xf32>
    %54 = arith.truncf %53 : vector<8x256xf32> to vector<8x256xbf16>
    %c0_50 = arith.constant 0 : index
    %c0_51 = arith.constant 0 : index
    %c0_52 = arith.constant 0 : index
    %c0_53 = arith.constant 0 : index
    %55 = vector.load %arg6[%c0_50, %c0_51, %c0_52, %c0_53] : memref<1x1x8x256xbf16, #tpu.memory_space<vmem>>, vector<1x1x8x256xbf16>
    %56 = vector.shape_cast %55 : vector<1x1x8x256xbf16> to vector<8x256xbf16>
    %57 = vector.shape_cast %54 : vector<8x256xbf16> to vector<1x1x8x256xbf16>
    tpu.vector_store %arg6[%c0_50, %c0_51, %c0_52, %c0_53], %57 {strides = array<i32>} : memref<1x1x8x256xbf16, #tpu.memory_space<vmem>>, vector<1x1x8x256xbf16>,
    return
  }
  func.func @transform_0(%arg0: i32, %arg1: i32) -> (i32, i32, i32, i32) {
    %c0_i32 = arith.constant 0 : i32
    %c0_i32_0 = arith.constant 0 : i32
    %c0_i32_1 = arith.constant 0 : i32
    return %arg0, %arg1, %c0_i32, %c0_i32_0 : i32, i32, i32, i32
  }
  func.func @transform_1(%arg0: i32, %arg1: i32) -> (i32, i32, i32, i32) {
    %c1_i32 = arith.constant 1 : i32
    %0 = arith.addi %arg1, %c1_i32 : i32
    %c0_i32 = arith.constant 0 : i32
    %c0_i32_0 = arith.constant 0 : i32
    %c0_i32_1 = arith.constant 0 : i32
    return %arg0, %0, %c0_i32, %c0_i32_0 : i32, i32, i32, i32
  }
  func.func @transform_2(%arg0: i32, %arg1: i32) -> (i32, i32, i32) {
    %c0_i32 = arith.constant 0 : i32
    %c0_i32_0 = arith.constant 0 : i32
    %c0_i32_1 = arith.constant 0 : i32
    %c0_i32_2 = arith.constant 0 : i32
    return %c0_i32, %c0_i32_0, %c0_i32_1 : i32, i32, i32
  }
  func.func @transform_3(%arg0: i32, %arg1: i32) -> (i32, i32) {
    %c0_i32 = arith.constant 0 : i32
    %c0_i32_0 = arith.constant 0 : i32
    %c0_i32_1 = arith.constant 0 : i32
    return %c0_i32, %c0_i32_0 : i32, i32
  }
  func.func @transform_4(%arg0: i32, %arg1: i32) -> (i32, i32, i32, i32) {
    %c0_i32 = arith.constant 0 : i32
    %c0_i32_0 = arith.constant 0 : i32
    %c0_i32_1 = arith.constant 0 : i32
    return %arg0, %arg1, %c0_i32, %c0_i32_0 : i32, i32, i32, i32
  }
}

module attributes {stable_mosaic.version = 11 : i64} {
  func.func @head_decode_kernel(%arg0: i32, %arg1: memref<1x4x256xbf16, #tpu.memory_space<vmem>>, %arg2: memref<256x6xbf16, #tpu.memory_space<vmem>>, %arg3: memref<1x6xf32, #tpu.memory_space<vmem>>, %arg4: memref<1x4x6xf32, #tpu.memory_space<vmem>>) attributes {dimension_semantics = [#tpu.dimension_semantics<parallel>], iteration_bounds = array<i64: 2>, scalar_prefetch = 0 : i64, scratch_operands = 0 : i64, tpu.core_type = #tpu.core_type<tc>, window_params = [{transform_indices = @transform_0, window_bounds = array<i64: 1, 4, 256>}, {pipeline_mode = #tpu.pipeline_mode<synchronous>, transform_indices = @transform_1, window_bounds = array<i64: 256, 6>}, {pipeline_mode = #tpu.pipeline_mode<synchronous>, transform_indices = @transform_2, window_bounds = array<i64: 1, 6>}, {transform_indices = @transform_3, window_bounds = array<i64: 1, 4, 6>}]} {
    %c0 = arith.constant 0 : index
    %c0_0 = arith.constant 0 : index
    %c0_1 = arith.constant 0 : index
    %0 = vector.load %arg1[%c0, %c0_0, %c0_1] : memref<1x4x256xbf16, #tpu.memory_space<vmem>>, vector<1x4x256xbf16>
    %1 = vector.shape_cast %0 : vector<1x4x256xbf16> to vector<4x256xbf16>
    %c0_2 = arith.constant 0 : index
    %c0_3 = arith.constant 0 : index
    %2 = vector.load %arg2[%c0_2, %c0_3] : memref<256x6xbf16, #tpu.memory_space<vmem>>, vector<256x6xbf16>
    %cst = arith.constant dense<0.000000e+00> : vector<4x6xf32>
    %3 = tpu.matmul %1, %2, %cst {dimension_numbers = #tpu.dot_dimension_numbers<[1], [0], [0], [1], [0, 0, 1, 1], [], []>} : vector<4x256xbf16>, vector<256x6xbf16>, vector<4x6xf32> -> vector<4x6xf32>
    %c0_4 = arith.constant 0 : index
    %c0_5 = arith.constant 0 : index
    %4 = vector.load %arg3[%c0_4, %c0_5] : memref<1x6xf32, #tpu.memory_space<vmem>>, vector<1x6xf32>
    %5 = vector.broadcast %4 : vector<1x6xf32> to vector<4x6xf32>
    %6 = arith.addf %3, %5 : vector<4x6xf32>
    %7 = tpu.iota {dimensions = array<i32: 0>} : vector<4x6xi32>
    %8 = tpu.iota {dimensions = array<i32: 1>} : vector<4x6xi32>
    %9 = arith.sitofp %7 : vector<4x6xi32> to vector<4x6xf32>
    %cst_6 = arith.constant 5.000000e-01 : f32
    %10 = vector.broadcast %cst_6 : f32 to vector<4x6xf32>
    %11 = arith.addf %9, %10 : vector<4x6xf32>
    %cst_7 = arith.constant 2.000000e+00 : f32
    %12 = vector.broadcast %cst_7 : f32 to vector<4x6xf32>
    %13 = arith.divf %11, %12 : vector<4x6xf32>
    %14 = math.floor %13 : vector<4x6xf32>
    %cst_8 = arith.constant 2.000000e+00 : f32
    %15 = vector.broadcast %cst_8 : f32 to vector<4x6xf32>
    %16 = arith.mulf %14, %15 : vector<4x6xf32>
    %17 = arith.subf %9, %16 : vector<4x6xf32>
    %c0_i32 = arith.constant 0 : i32
    %18 = vector.broadcast %c0_i32 : i32 to vector<4x6xi32>
    %19 = arith.cmpi eq, %8, %18 : vector<4x6xi32>
    %c1_i32 = arith.constant 1 : i32
    %20 = vector.broadcast %c1_i32 : i32 to vector<4x6xi32>
    %21 = arith.cmpi eq, %8, %20 : vector<4x6xi32>
    %cst_9 = arith.constant 0.000000e+00 : f32
    %22 = vector.broadcast %cst_9 : f32 to vector<4x6xf32>
    %23 = arith.select %21, %14, %22 : vector<4x6xi1>, vector<4x6xf32>
    %24 = arith.select %19, %17, %23 : vector<4x6xi1>, vector<4x6xf32>
    %c2_i32 = arith.constant 2 : i32
    %25 = vector.broadcast %c2_i32 : i32 to vector<4x6xi32>
    %26 = arith.cmpi sge, %8, %25 : vector<4x6xi32>
    %c4_i32 = arith.constant 4 : i32
    %27 = vector.broadcast %c4_i32 : i32 to vector<4x6xi32>
    %28 = arith.cmpi slt, %8, %27 : vector<4x6xi32>
    %29 = arith.andi %26, %28 : vector<4x6xi1>
    %30 = arith.addf %6, %24 : vector<4x6xf32>
    %cst_10 = arith.constant 1.600000e+01 : f32
    %31 = vector.broadcast %cst_10 : f32 to vector<4x6xf32>
    %32 = arith.mulf %30, %31 : vector<4x6xf32>
    %cst_11 = arith.constant 0.000000e+00 : f32
    %33 = vector.broadcast %cst_11 : f32 to vector<4x6xf32>
    %34 = arith.select %29, %6, %33 : vector<4x6xi1>, vector<4x6xf32>
    %35 = math.exp %34 : vector<4x6xf32>
    %cst_12 = arith.constant 1.600000e+01 : f32
    %36 = vector.broadcast %cst_12 : f32 to vector<4x6xf32>
    %37 = arith.mulf %35, %36 : vector<4x6xf32>
    %38 = arith.negf %6 : vector<4x6xf32>
    %39 = math.exp %38 : vector<4x6xf32>
    %cst_13 = arith.constant 1.000000e+00 : f32
    %40 = vector.broadcast %cst_13 : f32 to vector<4x6xf32>
    %41 = arith.addf %40, %39 : vector<4x6xf32>
    %42 = arith.divf %40, %41 : vector<4x6xf32>
    %c2_i32_14 = arith.constant 2 : i32
    %43 = vector.broadcast %c2_i32_14 : i32 to vector<4x6xi32>
    %44 = arith.cmpi slt, %8, %43 : vector<4x6xi32>
    %45 = arith.select %29, %37, %42 : vector<4x6xi1>, vector<4x6xf32>
    %46 = arith.select %44, %32, %45 : vector<4x6xi1>, vector<4x6xf32>
    %c0_15 = arith.constant 0 : index
    %c0_16 = arith.constant 0 : index
    %c0_17 = arith.constant 0 : index
    %47 = vector.load %arg4[%c0_15, %c0_16, %c0_17] : memref<1x4x6xf32, #tpu.memory_space<vmem>>, vector<1x4x6xf32>
    %48 = vector.shape_cast %47 : vector<1x4x6xf32> to vector<4x6xf32>
    %49 = vector.shape_cast %46 : vector<4x6xf32> to vector<1x4x6xf32>
    tpu.vector_store %arg4[%c0_15, %c0_16, %c0_17], %49 {strides = array<i32>} : memref<1x4x6xf32, #tpu.memory_space<vmem>>, vector<1x4x6xf32>,
    return
  }
  func.func @transform_0(%arg0: i32) -> (i32, i32, i32) {
    %c0_i32 = arith.constant 0 : i32
    %c0_i32_0 = arith.constant 0 : i32
    %c0_i32_1 = arith.constant 0 : i32
    return %arg0, %c0_i32, %c0_i32_0 : i32, i32, i32
  }
  func.func @transform_1(%arg0: i32) -> (i32, i32) {
    %c0_i32 = arith.constant 0 : i32
    %c0_i32_0 = arith.constant 0 : i32
    %c0_i32_1 = arith.constant 0 : i32
    return %c0_i32, %c0_i32_0 : i32, i32
  }
  func.func @transform_2(%arg0: i32) -> (i32, i32) {
    %c0_i32 = arith.constant 0 : i32
    %c0_i32_0 = arith.constant 0 : i32
    %c0_i32_1 = arith.constant 0 : i32
    return %c0_i32, %c0_i32_0 : i32, i32
  }
  func.func @transform_3(%arg0: i32) -> (i32, i32, i32) {
    %c0_i32 = arith.constant 0 : i32
    %c0_i32_0 = arith.constant 0 : i32
    %c0_i32_1 = arith.constant 0 : i32
    return %arg0, %c0_i32, %c0_i32_0 : i32, i32, i32
  }
}

module attributes {stable_mosaic.version = 11 : i64} {
  func.func @head_decode_kernel(%arg0: i32, %arg1: memref<1x16x128xbf16, #tpu.memory_space<vmem>>, %arg2: memref<128x6xbf16, #tpu.memory_space<vmem>>, %arg3: memref<1x6xf32, #tpu.memory_space<vmem>>, %arg4: memref<1x16x6xf32, #tpu.memory_space<vmem>>) attributes {dimension_semantics = [#tpu.dimension_semantics<parallel>], iteration_bounds = array<i64: 2>, scalar_prefetch = 0 : i64, scratch_operands = 0 : i64, tpu.core_type = #tpu.core_type<tc>, window_params = [{transform_indices = @transform_0, window_bounds = array<i64: 1, 16, 128>}, {pipeline_mode = #tpu.pipeline_mode<synchronous>, transform_indices = @transform_1, window_bounds = array<i64: 128, 6>}, {pipeline_mode = #tpu.pipeline_mode<synchronous>, transform_indices = @transform_2, window_bounds = array<i64: 1, 6>}, {transform_indices = @transform_3, window_bounds = array<i64: 1, 16, 6>}]} {
    %c0 = arith.constant 0 : index
    %c0_0 = arith.constant 0 : index
    %c0_1 = arith.constant 0 : index
    %0 = vector.load %arg1[%c0, %c0_0, %c0_1] : memref<1x16x128xbf16, #tpu.memory_space<vmem>>, vector<1x16x128xbf16>
    %1 = vector.shape_cast %0 : vector<1x16x128xbf16> to vector<16x128xbf16>
    %c0_2 = arith.constant 0 : index
    %c0_3 = arith.constant 0 : index
    %2 = vector.load %arg2[%c0_2, %c0_3] : memref<128x6xbf16, #tpu.memory_space<vmem>>, vector<128x6xbf16>
    %cst = arith.constant dense<0.000000e+00> : vector<16x6xf32>
    %3 = tpu.matmul %1, %2, %cst {dimension_numbers = #tpu.dot_dimension_numbers<[1], [0], [0], [1], [0, 0, 1, 1], [], []>} : vector<16x128xbf16>, vector<128x6xbf16>, vector<16x6xf32> -> vector<16x6xf32>
    %c0_4 = arith.constant 0 : index
    %c0_5 = arith.constant 0 : index
    %4 = vector.load %arg3[%c0_4, %c0_5] : memref<1x6xf32, #tpu.memory_space<vmem>>, vector<1x6xf32>
    %5 = vector.broadcast %4 : vector<1x6xf32> to vector<16x6xf32>
    %6 = arith.addf %3, %5 : vector<16x6xf32>
    %7 = tpu.iota {dimensions = array<i32: 0>} : vector<16x6xi32>
    %8 = tpu.iota {dimensions = array<i32: 1>} : vector<16x6xi32>
    %9 = arith.sitofp %7 : vector<16x6xi32> to vector<16x6xf32>
    %cst_6 = arith.constant 5.000000e-01 : f32
    %10 = vector.broadcast %cst_6 : f32 to vector<16x6xf32>
    %11 = arith.addf %9, %10 : vector<16x6xf32>
    %cst_7 = arith.constant 4.000000e+00 : f32
    %12 = vector.broadcast %cst_7 : f32 to vector<16x6xf32>
    %13 = arith.divf %11, %12 : vector<16x6xf32>
    %14 = math.floor %13 : vector<16x6xf32>
    %cst_8 = arith.constant 4.000000e+00 : f32
    %15 = vector.broadcast %cst_8 : f32 to vector<16x6xf32>
    %16 = arith.mulf %14, %15 : vector<16x6xf32>
    %17 = arith.subf %9, %16 : vector<16x6xf32>
    %c0_i32 = arith.constant 0 : i32
    %18 = vector.broadcast %c0_i32 : i32 to vector<16x6xi32>
    %19 = arith.cmpi eq, %8, %18 : vector<16x6xi32>
    %c1_i32 = arith.constant 1 : i32
    %20 = vector.broadcast %c1_i32 : i32 to vector<16x6xi32>
    %21 = arith.cmpi eq, %8, %20 : vector<16x6xi32>
    %cst_9 = arith.constant 0.000000e+00 : f32
    %22 = vector.broadcast %cst_9 : f32 to vector<16x6xf32>
    %23 = arith.select %21, %14, %22 : vector<16x6xi1>, vector<16x6xf32>
    %24 = arith.select %19, %17, %23 : vector<16x6xi1>, vector<16x6xf32>
    %c2_i32 = arith.constant 2 : i32
    %25 = vector.broadcast %c2_i32 : i32 to vector<16x6xi32>
    %26 = arith.cmpi sge, %8, %25 : vector<16x6xi32>
    %c4_i32 = arith.constant 4 : i32
    %27 = vector.broadcast %c4_i32 : i32 to vector<16x6xi32>
    %28 = arith.cmpi slt, %8, %27 : vector<16x6xi32>
    %29 = arith.andi %26, %28 : vector<16x6xi1>
    %30 = arith.addf %6, %24 : vector<16x6xf32>
    %cst_10 = arith.constant 8.000000e+00 : f32
    %31 = vector.broadcast %cst_10 : f32 to vector<16x6xf32>
    %32 = arith.mulf %30, %31 : vector<16x6xf32>
    %cst_11 = arith.constant 0.000000e+00 : f32
    %33 = vector.broadcast %cst_11 : f32 to vector<16x6xf32>
    %34 = arith.select %29, %6, %33 : vector<16x6xi1>, vector<16x6xf32>
    %35 = math.exp %34 : vector<16x6xf32>
    %cst_12 = arith.constant 8.000000e+00 : f32
    %36 = vector.broadcast %cst_12 : f32 to vector<16x6xf32>
    %37 = arith.mulf %35, %36 : vector<16x6xf32>
    %38 = arith.negf %6 : vector<16x6xf32>
    %39 = math.exp %38 : vector<16x6xf32>
    %cst_13 = arith.constant 1.000000e+00 : f32
    %40 = vector.broadcast %cst_13 : f32 to vector<16x6xf32>
    %41 = arith.addf %40, %39 : vector<16x6xf32>
    %42 = arith.divf %40, %41 : vector<16x6xf32>
    %c2_i32_14 = arith.constant 2 : i32
    %43 = vector.broadcast %c2_i32_14 : i32 to vector<16x6xi32>
    %44 = arith.cmpi slt, %8, %43 : vector<16x6xi32>
    %45 = arith.select %29, %37, %42 : vector<16x6xi1>, vector<16x6xf32>
    %46 = arith.select %44, %32, %45 : vector<16x6xi1>, vector<16x6xf32>
    %c0_15 = arith.constant 0 : index
    %c0_16 = arith.constant 0 : index
    %c0_17 = arith.constant 0 : index
    %47 = vector.load %arg4[%c0_15, %c0_16, %c0_17] : memref<1x16x6xf32, #tpu.memory_space<vmem>>, vector<1x16x6xf32>
    %48 = vector.shape_cast %47 : vector<1x16x6xf32> to vector<16x6xf32>
    %49 = vector.shape_cast %46 : vector<16x6xf32> to vector<1x16x6xf32>
    tpu.vector_store %arg4[%c0_15, %c0_16, %c0_17], %49 {strides = array<i32>} : memref<1x16x6xf32, #tpu.memory_space<vmem>>, vector<1x16x6xf32>,
    return
  }
  func.func @transform_0(%arg0: i32) -> (i32, i32, i32) {
    %c0_i32 = arith.constant 0 : i32
    %c0_i32_0 = arith.constant 0 : i32
    %c0_i32_1 = arith.constant 0 : i32
    return %arg0, %c0_i32, %c0_i32_0 : i32, i32, i32
  }
  func.func @transform_1(%arg0: i32) -> (i32, i32) {
    %c0_i32 = arith.constant 0 : i32
    %c0_i32_0 = arith.constant 0 : i32
    %c0_i32_1 = arith.constant 0 : i32
    return %c0_i32, %c0_i32_0 : i32, i32
  }
  func.func @transform_2(%arg0: i32) -> (i32, i32) {
    %c0_i32 = arith.constant 0 : i32
    %c0_i32_0 = arith.constant 0 : i32
    %c0_i32_1 = arith.constant 0 : i32
    return %c0_i32, %c0_i32_0 : i32, i32
  }
  func.func @transform_3(%arg0: i32) -> (i32, i32, i32) {
    %c0_i32 = arith.constant 0 : i32
    %c0_i32_0 = arith.constant 0 : i32
    %c0_i32_1 = arith.constant 0 : i32
    return %arg0, %c0_i32, %c0_i32_0 : i32, i32, i32
  }
}

module attributes {stable_mosaic.version = 11 : i64} {
  func.func @head_decode_kernel(%arg0: i32, %arg1: memref<1x64x64xbf16, #tpu.memory_space<vmem>>, %arg2: memref<64x6xbf16, #tpu.memory_space<vmem>>, %arg3: memref<1x6xf32, #tpu.memory_space<vmem>>, %arg4: memref<1x64x6xf32, #tpu.memory_space<vmem>>) attributes {dimension_semantics = [#tpu.dimension_semantics<parallel>], iteration_bounds = array<i64: 2>, scalar_prefetch = 0 : i64, scratch_operands = 0 : i64, tpu.core_type = #tpu.core_type<tc>, window_params = [{transform_indices = @transform_0, window_bounds = array<i64: 1, 64, 64>}, {pipeline_mode = #tpu.pipeline_mode<synchronous>, transform_indices = @transform_1, window_bounds = array<i64: 64, 6>}, {pipeline_mode = #tpu.pipeline_mode<synchronous>, transform_indices = @transform_2, window_bounds = array<i64: 1, 6>}, {transform_indices = @transform_3, window_bounds = array<i64: 1, 64, 6>}]} {
    %c0 = arith.constant 0 : index
    %c0_0 = arith.constant 0 : index
    %c0_1 = arith.constant 0 : index
    %0 = vector.load %arg1[%c0, %c0_0, %c0_1] : memref<1x64x64xbf16, #tpu.memory_space<vmem>>, vector<1x64x64xbf16>
    %1 = vector.shape_cast %0 : vector<1x64x64xbf16> to vector<64x64xbf16>
    %c0_2 = arith.constant 0 : index
    %c0_3 = arith.constant 0 : index
    %2 = vector.load %arg2[%c0_2, %c0_3] : memref<64x6xbf16, #tpu.memory_space<vmem>>, vector<64x6xbf16>
    %cst = arith.constant dense<0.000000e+00> : vector<64x6xf32>
    %3 = tpu.matmul %1, %2, %cst {dimension_numbers = #tpu.dot_dimension_numbers<[1], [0], [0], [1], [0, 0, 1, 1], [], []>} : vector<64x64xbf16>, vector<64x6xbf16>, vector<64x6xf32> -> vector<64x6xf32>
    %c0_4 = arith.constant 0 : index
    %c0_5 = arith.constant 0 : index
    %4 = vector.load %arg3[%c0_4, %c0_5] : memref<1x6xf32, #tpu.memory_space<vmem>>, vector<1x6xf32>
    %5 = vector.broadcast %4 : vector<1x6xf32> to vector<64x6xf32>
    %6 = arith.addf %3, %5 : vector<64x6xf32>
    %7 = tpu.iota {dimensions = array<i32: 0>} : vector<64x6xi32>
    %8 = tpu.iota {dimensions = array<i32: 1>} : vector<64x6xi32>
    %9 = arith.sitofp %7 : vector<64x6xi32> to vector<64x6xf32>
    %cst_6 = arith.constant 5.000000e-01 : f32
    %10 = vector.broadcast %cst_6 : f32 to vector<64x6xf32>
    %11 = arith.addf %9, %10 : vector<64x6xf32>
    %cst_7 = arith.constant 8.000000e+00 : f32
    %12 = vector.broadcast %cst_7 : f32 to vector<64x6xf32>
    %13 = arith.divf %11, %12 : vector<64x6xf32>
    %14 = math.floor %13 : vector<64x6xf32>
    %cst_8 = arith.constant 8.000000e+00 : f32
    %15 = vector.broadcast %cst_8 : f32 to vector<64x6xf32>
    %16 = arith.mulf %14, %15 : vector<64x6xf32>
    %17 = arith.subf %9, %16 : vector<64x6xf32>
    %c0_i32 = arith.constant 0 : i32
    %18 = vector.broadcast %c0_i32 : i32 to vector<64x6xi32>
    %19 = arith.cmpi eq, %8, %18 : vector<64x6xi32>
    %c1_i32 = arith.constant 1 : i32
    %20 = vector.broadcast %c1_i32 : i32 to vector<64x6xi32>
    %21 = arith.cmpi eq, %8, %20 : vector<64x6xi32>
    %cst_9 = arith.constant 0.000000e+00 : f32
    %22 = vector.broadcast %cst_9 : f32 to vector<64x6xf32>
    %23 = arith.select %21, %14, %22 : vector<64x6xi1>, vector<64x6xf32>
    %24 = arith.select %19, %17, %23 : vector<64x6xi1>, vector<64x6xf32>
    %c2_i32 = arith.constant 2 : i32
    %25 = vector.broadcast %c2_i32 : i32 to vector<64x6xi32>
    %26 = arith.cmpi sge, %8, %25 : vector<64x6xi32>
    %c4_i32 = arith.constant 4 : i32
    %27 = vector.broadcast %c4_i32 : i32 to vector<64x6xi32>
    %28 = arith.cmpi slt, %8, %27 : vector<64x6xi32>
    %29 = arith.andi %26, %28 : vector<64x6xi1>
    %30 = arith.addf %6, %24 : vector<64x6xf32>
    %cst_10 = arith.constant 4.000000e+00 : f32
    %31 = vector.broadcast %cst_10 : f32 to vector<64x6xf32>
    %32 = arith.mulf %30, %31 : vector<64x6xf32>
    %cst_11 = arith.constant 0.000000e+00 : f32
    %33 = vector.broadcast %cst_11 : f32 to vector<64x6xf32>
    %34 = arith.select %29, %6, %33 : vector<64x6xi1>, vector<64x6xf32>
    %35 = math.exp %34 : vector<64x6xf32>
    %cst_12 = arith.constant 4.000000e+00 : f32
    %36 = vector.broadcast %cst_12 : f32 to vector<64x6xf32>
    %37 = arith.mulf %35, %36 : vector<64x6xf32>
    %38 = arith.negf %6 : vector<64x6xf32>
    %39 = math.exp %38 : vector<64x6xf32>
    %cst_13 = arith.constant 1.000000e+00 : f32
    %40 = vector.broadcast %cst_13 : f32 to vector<64x6xf32>
    %41 = arith.addf %40, %39 : vector<64x6xf32>
    %42 = arith.divf %40, %41 : vector<64x6xf32>
    %c2_i32_14 = arith.constant 2 : i32
    %43 = vector.broadcast %c2_i32_14 : i32 to vector<64x6xi32>
    %44 = arith.cmpi slt, %8, %43 : vector<64x6xi32>
    %45 = arith.select %29, %37, %42 : vector<64x6xi1>, vector<64x6xf32>
    %46 = arith.select %44, %32, %45 : vector<64x6xi1>, vector<64x6xf32>
    %c0_15 = arith.constant 0 : index
    %c0_16 = arith.constant 0 : index
    %c0_17 = arith.constant 0 : index
    %47 = vector.load %arg4[%c0_15, %c0_16, %c0_17] : memref<1x64x6xf32, #tpu.memory_space<vmem>>, vector<1x64x6xf32>
    %48 = vector.shape_cast %47 : vector<1x64x6xf32> to vector<64x6xf32>
    %49 = vector.shape_cast %46 : vector<64x6xf32> to vector<1x64x6xf32>
    tpu.vector_store %arg4[%c0_15, %c0_16, %c0_17], %49 {strides = array<i32>} : memref<1x64x6xf32, #tpu.memory_space<vmem>>, vector<1x64x6xf32>,
    return
  }
  func.func @transform_0(%arg0: i32) -> (i32, i32, i32) {
    %c0_i32 = arith.constant 0 : i32
    %c0_i32_0 = arith.constant 0 : i32
    %c0_i32_1 = arith.constant 0 : i32
    return %arg0, %c0_i32, %c0_i32_0 : i32, i32, i32
  }
  func.func @transform_1(%arg0: i32) -> (i32, i32) {
    %c0_i32 = arith.constant 0 : i32
    %c0_i32_0 = arith.constant 0 : i32
    %c0_i32_1 = arith.constant 0 : i32
    return %c0_i32, %c0_i32_0 : i32, i32
  }
  func.func @transform_2(%arg0: i32) -> (i32, i32) {
    %c0_i32 = arith.constant 0 : i32
    %c0_i32_0 = arith.constant 0 : i32
    %c0_i32_1 = arith.constant 0 : i32
    return %c0_i32, %c0_i32_0 : i32, i32
  }
  func.func @transform_3(%arg0: i32) -> (i32, i32, i32) {
    %c0_i32 = arith.constant 0 : i32
    %c0_i32_0 = arith.constant 0 : i32
    %c0_i32_1 = arith.constant 0 : i32
    return %arg0, %c0_i32, %c0_i32_0 : i32, i32, i32
  }
}

</mosaic_0001>

<bundles_post_ra>
// kernel: yolox_forward.7
= control target key start
LH: loop header
LB: loop body
LE: loop exit
PB: predicated region body
PF: predicated region fallthrough
CT: control target
= control target key end

     0   :  { %s2914_s15 = smov 0   ;;  %s2916_s16 = smov 0   ;;  %s3849_s0 = inlined_call_operand.vmem [shape: bf16[2,2,272,12], index: 0, kind: input, shape index: {}, may-alias: {0,1}]   ;;  %s3850_s1 = inlined_call_operand.vmem [shape: bf16[2,2,272,12], index: 1, kind: input, shape index: {}, may-alias: {0,1}]   ;;  %s3851_s2 = inlined_call_operand.vmem [shape: bf16[4,12,32], index: 2, kind: input, shape index: {}]   ;;  %s3852_s3 = inlined_call_operand.vmem [shape: f32[1,32], index: 3, kind: input, shape index: {}]   ;;  %s3853_s4 = inlined_call_operand.vmem [shape: bf16[2,1,272,32], index: 4, kind: output, shape index: {}]  }
   0x1   :  { %s2918_s17 = smov 0  }
   0x2 LB: > { %s26_s18 = sadd.s32 1, %s2883_s16  ;;  %p2468_p0 = scmp.ge.s32.totalorder %s2887_s17, 1  ;;  %s2887_s17 = sphi %s2918_s17, %s14_s17   ;;  %s2883_s16 = sphi %s2916_s16, %s3859_s16   ;;  %s2879_s15 = sphi %s2914_s15, %s3858_s15  }
   0x3   : > { %p28_p1 = scmp.ge.s32.totalorder %s26_s18, 2  ;;  %p202_p2 = scmp.lt.s32.totalorder %s2887_s17, 3 }
   0x5   : > { %s3861_s18 = smov (%p28_p1, %s26_s18), 0  ;;  %p203_p3 = pnand %p2468_p0, %p202_p2 }
   0x6   : > { %p246_p4 = scmp.lt.s32.totalorder (!%p203_p3), %s2879_s15, 1 }
   0x7   : > { %206 = sbr.rel (%p203_p3) target bundleno = 486 (0x1e6), region = 36 }
   0xc   : > { %v2542_v0 = vld [vmem:[%s3851_s2] sm:$0xf]  ;;  %v2693_v1 = vld [vmem:[%s3851_s2] sm:$0x30]  ;;  %vm457_vm0 = vcmask 1045504   ;;  %s3863_s15 = smov (!%p246_p4, %s2879_s15), 1 }
   0xd   : > { %v2543_v2 = vor.u32 %v2693_v1, %v2542_v0  ;;  %v2589_v3 = vld [vmem:[%s3851_s2 + $0x10] sm:$0xf]  ;;  %v2695_v4 = vld [vmem:[%s3851_s2 + $0x10] sm:$0x30]  ;;  %v2565_v6 = vld [vmem:[%s3851_s2 + $0x8] sm:$0xf] }
   0xe   : > { %v2590_v5 = vor.u32 %v2695_v4, %v2589_v3  ;;  %v2694_v7 = vld [vmem:[%s3851_s2 + $0x8] sm:$0x30]  ;;  %v2617_v10 = vld [vmem:[%s3851_s2 + $0x18] sm:$0xf]  ;;  %v2696_v11 = vld [vmem:[%s3851_s2 + $0x18] sm:$0x30] }
   0xf   : > { %v459_v8 = vsel %vm457_vm0, %v2543_v2, 0  ;;  %v2566_v9 = vor.u32 %v2694_v7, %v2565_v6  ;;  %s2697_s9 = smul.u32 272, %s3863_s15  ;;  %v2618_v13 = vor.u32 %v2696_v11, %v2617_v10  ;;  %vm405_vm1 = vcmask 97280  }
  0x10   : > { %468 = vmatpush.bf16.msra.mxu0 %v459_v8  ;;  %v1029_v12 = vsel %vm457_vm0, %v2590_v5, 0  ;;  %vm627_vm2 = vsmask.f32 7424  ;;  %vm1260_vm3 = vcmask 1046528   ;;  %vm555_vm4 = vcmask 261120   ;;  %s2699_s23 = smul.u32 136, %s3863_s15 }
  0x11   : > { %1208 = vmatpush.bf16.msra.mxu2 %v1029_v12  ;;  %v803_v14 = vsel %vm457_vm0, %v2566_v9, 0  ;;  %1038 = vmatpush.bf16.msra.mxu3 %v1029_v12  ;;  %s2965_s12 = scalar_lea.vmem %s3849_s0, %s2697_s9  ;;  %v1346_v15 = vsel %vm457_vm0, %v2618_v13, 0  ;;  %s2674_s13 = sadd.s32 136, %s2697_s9  ;;  %vm2316_vm8 = vcmask 257024  }
  0x12   : > { %812 = vmatpush.bf16.msra.mxu1 %v803_v14  ;;  %v2675_v16 = vld [vmem:[%s2965_s12] sm:$0xff]  ;;  %v2676_v17 = vld [vmem:[%s2965_s12 + $0x8] sm:$0xff]  ;;  %v2677_v18 = vld [vmem:[%s2965_s12 + $0x10] sm:$0xff]  ;;  %s2974_s20 = scalar_lea.vmem %s3850_s1, %s2674_s13  ;;  %s3211_s25 = scalar_lea.vmem %s3853_s4, %s2699_s23 }
  0x13   : > { %2544 = vmatmul.msk.bf16.vlgmr.msra.gmra.mxu0 %vm405_vm1, %v2675_v16  ;;  %v630_v19 = vshll.u32 %v2675_v16, 16  ;;  %v2692_v20 = vld [vmem:[%s2974_s20] sm:$0xff]  ;;  %v628_v21 = vshrl.u32 %v2675_v16, 16  ;;  %v634_v22 = vshll.u32 %v2676_v17, 16  ;;  %v638_v23 = vshrl.u32 %v2676_v17, 16  ;;  %v2678_v33 = vld [vmem:[%s2965_s12 + $0x18] sm:$0xff] }
  0x14   : > { %979 = vmatpush.bf16.msrb.mxu0 %v803_v14  ;;  %v641_v24 = vshll.u32 %v2677_v18, 16  ;;  %2611 = vmatmul.msk.bf16.vlgmr.msra.gmra.mxu2 %vm405_vm1, %v2692_v20  ;;  %v312_v32 = vld [vmem:[%s2974_s20 + $0x8] sm:$0xf]  ;;  %v645_v35 = vshrl.u32 %v2677_v18, 16  ;;  %v648_v36 = vshll.u32 %v2678_v33, 16  ;;  %v2679_v41 = vld [vmem:[%s2965_s12 + $0x20] sm:$0xff] }
  0x15   : > { %1355 = vmatpush.bf16.msrb.mxu2 %v1346_v15  ;;  %1512 = vmatpush.bf16.msrb.mxu3 %v1346_v15  ;;  %v632_v25 = vrot.slane %v630_v19, 1  ;;  %v636_v26 = vrot.slane %v634_v22, 1  ;;  %v1192_v34 = vunpack.c.l.b16 %v312_v32  ;;  %v1261_v42 = vrot.slane %v2676_v17, 1  ;;  %v2680_v50 = vld [vmem:[%s2965_s12 + $0x28] sm:$0xff]  ;;  %v2681_v58 = vld [vmem:[%s2965_s12 + $0x30] sm:$0xff]  ;;  %v2682_v2 = vld [vmem:[%s2965_s12 + $0x38] sm:$0xff] }
  0x16   : > { %v643_v27 = vrot.slane %v641_v24, 1  ;;  %v650_v39 = vrot.slane %v648_v36, 1  ;;  %v1262_v43 = vrot.slane %v2677_v18, 1  ;;  %v652_v44 = vshrl.u32 %v2678_v33, 16  ;;  %v2683_v10 = vld [vmem:[%s2965_s12 + $0x40] sm:$0xff] }
  0x17   : > { %v633_v28 = vor.u32 %v632_v25, %v628_v21  ;;  %v640_v29 = vor.u32 %v638_v23, %v636_v26  ;;  %v2985_v37 = vpack.c.b16 %v1192_v34, %v1192_v34  ;;  %v655_v45 = vshll.u32 %v2679_v41, 16 }
  0x18   : > { %v647_v38 = vor.u32 %v645_v35, %v643_v27  ;;  %v1263_v46 = vsel %vm1260_vm3, %v1261_v42, %v1262_v43  ;;  %v654_v47 = vor.u32 %v652_v44, %v650_v39  ;;  %v1264_v51 = vrot.slane %v2678_v33, 1 }
  0x19   : > { %v637_v30 = vsel %vm627_vm2, %v633_v28, %v636_v26  ;;  %v644_v31 = vsel %vm627_vm2, %v640_v29, %v643_v27  ;;  %v657_v48 = vrot.slane %v655_v45, 1  ;;  %v659_v52 = vshrl.u32 %v2679_v41, 16  ;;  %v3039_v26 = vld [vmem:[%s2965_s12 + $0x50] sm:$0xff] }
  0x1a   : > { %2567 = vmatmul.msk.bf16.vlgmr.msra.gmra.mxu1 %vm405_vm1, %v637_v30  ;;  %2591 = vmatmul.msk.bf16.vlgmr.msra.gmra.mxu3 %vm405_vm1, %v644_v31  ;;  %v651_v40 = vsel %vm627_vm2, %v647_v38, %v650_v39  ;;  %v662_v53 = vshll.u32 %v2680_v50, 16  ;;  %v1265_v54 = vsel %vm1260_vm3, %v1262_v43, %v1264_v51  ;;  %v1266_v59 = vrot.slane %v2679_v41, 1 }
  0x1b   : > { %v658_v49 = vsel %vm627_vm2, %v654_v47, %v657_v48  ;;  %v661_v55 = vor.u32 %v659_v52, %v657_v48  ;;  %v666_v60 = vshrl.u32 %v2680_v50, 16  ;;  %v669_v61 = vshll.u32 %v2681_v58, 16 }
  0x1c   : > { %v664_v56 = vrot.slane %v662_v53, 1  ;;  %v1267_v62 = vsel %vm1260_vm3, %v1264_v51, %v1266_v59  ;;  %v1268_v3 = vrot.slane %v2680_v50, 1  ;;  %v673_v4 = vshrl.u32 %v2681_v58, 16 }
  0x1d   : > { %v671_v0 = vrot.slane %v669_v61, 1  ;;  %v676_v5 = vshll.u32 %v2682_v2, 16  ;;  %v1270_v11 = vrot.slane %v2681_v58, 1  ;;  %v680_v12 = vshrl.u32 %v2682_v2, 16 }
  0x1e   : > { %v665_v57 = vsel %vm627_vm2, %v661_v55, %v664_v56  ;;  %v668_v63 = vor.u32 %v666_v60, %v664_v56  ;;  %v1269_v6 = vsel %vm1260_vm3, %v1266_v59, %v1268_v3  ;;  %v683_v13 = vshll.u32 %v2683_v10, 16 }
  0x1f   : > { %v675_v7 = vor.u32 %v673_v4, %v671_v0  ;;  %v678_v8 = vrot.slane %v676_v5, 1  ;;  %v1271_v14 = vsel %vm1260_vm3, %v1268_v3, %v1270_v11  ;;  %v1272_v19 = vrot.slane %v2682_v2, 1 }
  0x20   : > { %v672_v1 = vsel %vm627_vm2, %v668_v63, %v671_v0  ;;  %v685_v16 = vrot.slane %v683_v13, 1  ;;  %v687_v20 = vshrl.u32 %v2683_v10, 16  ;;  %v1274_v27 = vrot.slane %v2683_v10, 1 }
  0x21   : > { %v679_v9 = vsel %vm627_vm2, %v675_v7, %v678_v8  ;;  %v682_v15 = vor.u32 %v680_v12, %v678_v8  ;;  %v1273_v22 = vsel %vm1260_vm3, %v1270_v11, %v1272_v19  ;;  %v697_v29 = vshll.u32 %v3039_v26, 16 }
  0x22   : > { %v689_v23 = vor.u32 %v687_v20, %v685_v16  ;;  %v701_v45 = vshrl.u32 %v3039_v26, 16  ;;  %v1278_v3 = vrot.slane %v3039_v26, 1 }
  0x23   : > { %2545 = vmatmul.msk.bf16.gmra.mxu0 %vm405_vm1, %v2676_v17  ;;  %v686_v17 = vsel %vm627_vm2, %v682_v15, %v685_v16 }
  0x24   : > { %2612 = vmatmul.msk.bf16.gmra.mxu2 %vm405_vm1, %v2985_v37 }
  0x2a   : > { %2568 = vmatmul.msk.bf16.gmra.mxu1 %vm405_vm1, %v644_v31  ;;  %2592 = vmatmul.msk.bf16.gmra.mxu3 %vm405_vm1, %v651_v40  ;;  %v1275_v31 = vsel %vm1260_vm3, %v1272_v19, %v1274_v27 }
  0x33   : > { %2546 = vmatmul.msk.bf16.gmra.mxu0 %vm405_vm1, %v2677_v18  ;;  %v3029_v18 = vld [vmem:[%s2965_s12 + $0x48] sm:$0xff] }
  0x34   : > { %2619 = vmatmul.msk.bf16.vlgmr.msrb.gmra.mxu2 %vm405_vm1, %v1263_v46  ;;  %v690_v21 = vshll.u32 %v3029_v18, 16  ;;  %v694_v28 = vshrl.u32 %v3029_v18, 16  ;;  %v1276_v43 = vrot.slane %v3029_v18, 1 }
  0x36   : > { %v692_v24 = vrot.slane %v690_v21, 1  ;;  %v1277_v52 = vsel %vm1260_vm3, %v1274_v27, %v1276_v43  ;;  %v1279_v12 = vsel %vm1260_vm3, %v1276_v43, %v1278_v3  ;;  %v3096_v27 = vld [vmem:[%s2965_s12 + $0x68] sm:$0xff] }
  0x38   : > { %v693_v25 = vsel %vm627_vm2, %v689_v23, %v692_v24  ;;  %v696_v32 = vor.u32 %v694_v28, %v692_v24 }
  0x3a   : > { %2569 = vmatmul.msk.bf16.gmra.mxu1 %vm405_vm1, %v651_v40  ;;  %2593 = vmatmul.msk.bf16.gmra.mxu3 %vm405_vm1, %v658_v49 }
  0x43   : > { %2547 = vmatmul.msk.bf16.gmra.mxu0 %vm405_vm1, %v2678_v33  ;;  %v699_v33 = vrot.slane %v697_v29, 1 }
  0x44   : > { %2620 = vmatmul.msk.bf16.gmra.mxu2 %vm405_vm1, %v1265_v54 }
  0x45   : > { %v700_v35 = vsel %vm627_vm2, %v696_v32, %v699_v33  ;;  %v703_v54 = vor.u32 %v701_v45, %v699_v33  ;;  %v718_v32 = vshll.u32 %v3096_v27, 16  ;;  %v3106_v33 = vld [vmem:[%s3852_s3] ss:$0 sm:$0xff] }
  0x4a   : > { %2570 = vmatmul.msk.bf16.gmra.mxu1 %vm405_vm1, %v658_v49  ;;  %2594 = vmatmul.msk.bf16.gmra.mxu3 %vm405_vm1, %v665_v57 }
  0x53   : > { %2548 = vmatmul.msk.bf16.gmra.mxu0 %vm405_vm1, %v2679_v41  ;;  %v3055_v41 = vld [vmem:[%s2965_s12 + $0x58] sm:$0xff] }
  0x54   : > { %2621 = vmatmul.msk.bf16.gmra.mxu2 %vm405_vm1, %v1267_v62  ;;  %v704_v46 = vshll.u32 %v3055_v41, 16  ;;  %v708_v5 = vshrl.u32 %v3055_v41, 16  ;;  %v1280_v29 = vrot.slane %v3055_v41, 1 }
  0x56   : > { %v706_v55 = vrot.slane %v704_v46, 1 }
  0x5a   : > { %2571 = vmatmul.msk.bf16.gmra.mxu1 %vm405_vm1, %v665_v57  ;;  %2595 = vmatmul.msk.bf16.gmra.mxu3 %vm405_vm1, %v672_v1 }
  0x63   : > { %2549 = vmatmul.msk.bf16.gmra.mxu0 %vm405_vm1, %v2680_v50 }
  0x64   : > { %2622 = vmatmul.msk.bf16.gmra.mxu2 %vm405_vm1, %v1269_v6 }
  0x6a   : > { %2572 = vmatmul.msk.bf16.gmra.mxu1 %vm405_vm1, %v672_v1  ;;  %2596 = vmatmul.msk.bf16.gmra.mxu3 %vm405_vm1, %v679_v9  ;;  %v3077_v1 = vld [vmem:[%s2965_s12 + $0x60] sm:$0xff] }
  0x6b   : > { %v711_v6 = vshll.u32 %v3077_v1, 16 }
  0x6d   : > { %v713_v15 = vrot.slane %v711_v6, 1 }
  0x73   : > { %2550 = vmatmul.msk.bf16.gmra.mxu0 %vm405_vm1, %v2681_v58  ;;  %v707_v58 = vsel %vm627_vm2, %v703_v54, %v706_v55 }
  0x74   : > { %2623 = vmatmul.msk.bf16.gmra.mxu2 %vm405_vm1, %v1271_v14  ;;  %v710_v14 = vor.u32 %v708_v5, %v706_v55 }
  0x7a   : > { %2573 = vmatmul.msk.bf16.gmra.mxu1 %vm405_vm1, %v679_v9  ;;  %2597 = vmatmul.msk.bf16.gmra.mxu3 %vm405_vm1, %v686_v17 }
  0x83   : > { %2551 = vmatmul.msk.bf16.gmra.mxu0 %vm405_vm1, %v2682_v2 }
  0x84   : > { %2624 = vmatmul.msk.bf16.gmra.mxu2 %vm405_vm1, %v1273_v22 }
  0x8a   : > { %2574 = vmatmul.msk.bf16.gmra.mxu1 %vm405_vm1, %v686_v17  ;;  %2598 = vmatmul.msk.bf16.gmra.mxu3 %vm405_vm1, %v693_v25 }
  0x90   : > { %v470_v30 = vpop.f32.mrf.mxu0 }
  0x91   : > { %556 = vst.msk [vmem:[#allocation2] sm:$0xff] %vm555_vm4, %v470_v30 }
  0x93   : > { %2552 = vmatmul.msk.bf16.gmra.mxu0 %vm405_vm1, %v2683_v10 }
  0x94   : > { %2625 = vmatmul.msk.bf16.gmra.mxu2 %vm405_vm1, %v1275_v31  ;;  %v715_v31 = vshrl.u32 %v3077_v1, 16 }
  0x97   : > { %v814_v34 = vpop.f32.mrf.mxu1  ;;  %v3048_v38 = vpop.f32.mrf.mxu2 }
  0x98   : > { %v593_v36 = vld [vmem:[#allocation2] sm:$0xff]  ;;  %v472_v39 = vpop.f32.mrf.mxu0 }
  0x99   : > { %v899_v40 = vadd.f32 %v814_v34, %v593_v36  ;;  %557 = vst.msk [vmem:[#allocation2 + $0x8] sm:$0xff] %vm555_vm4, %v472_v39 }
  0x9a   : > { %2575 = vmatmul.msk.bf16.gmra.mxu1 %vm405_vm1, %v693_v25  ;;  %2599 = vmatmul.msk.bf16.gmra.mxu3 %vm405_vm1, %v700_v35 }
  0x9b   : > { %933 = vst.msk [vmem:[#allocation2] sm:$0xff] %vm555_vm4, %v899_v40 }
  0x9d   : > { %v1040_v42 = vpop.f32.mrf.mxu3 }
  0x9f   : > { %v816_v44 = vpop.f32.mrf.mxu1  ;;  %v3060_v48 = vpop.f32.mrf.mxu2 }
  0xa0   : > { %v594_v47 = vld [vmem:[#allocation2 + $0x8] sm:$0xff]  ;;  %v475_v49 = vpop.f32.mrf.mxu0 }
  0xa1   : > { %v900_v50 = vadd.f32 %v816_v44, %v594_v47  ;;  %558 = vst.msk [vmem:[#allocation2 + $0x10] sm:$0xff] %vm555_vm4, %v475_v49  ;;  %v1281_v44 = vsel %vm1260_vm3, %v1278_v3, %v1280_v29  ;;  %v717_v47 = vor.u32 %v715_v31, %v713_v15  ;;  %v720_v49 = vrot.slane %v718_v32, 1 }
  0xa2   : > { %v991_v51 = vld [vmem:[#allocation2] sm:$0xff] }
  0xa3   : > { %v1120_v53 = vadd.f32 %v1040_v42, %v991_v51  ;;  %934 = vst.msk [vmem:[#allocation2 + $0x8] sm:$0xff] %vm555_vm4, %v900_v50  ;;  %2553 = vmatmul.msk.bf16.gmra.mxu0 %vm405_vm1, %v3029_v18  ;;  %v714_v18 = vsel %vm627_vm2, %v710_v14, %v713_v15  ;;  %v3123_v54 = vsel %vm627_vm2, %v717_v47, %v720_v49 }
  0xa4   : > { %2626 = vmatmul.msk.bf16.gmra.mxu2 %vm405_vm1, %v1277_v52 }
  0xa5   : > { %1152 = vst.msk [vmem:[#allocation2] sm:$0xff] %vm555_vm4, %v1120_v53  ;;  %v1042_v56 = vpop.f32.mrf.mxu3 }
  0xa7   : > { %v819_v57 = vpop.f32.mrf.mxu1  ;;  %v3070_v60 = vpop.f32.mrf.mxu2 }
  0xa8   : > { %v595_v59 = vld [vmem:[#allocation2 + $0x10] sm:$0xff]  ;;  %v477_v61 = vpop.f32.mrf.mxu0 }
  0xa9   : > { %v901_v62 = vadd.f32 %v819_v57, %v595_v59  ;;  %559 = vst.msk [vmem:[#allocation2 + $0x18] sm:$0xff] %vm555_vm4, %v477_v61 }
  0xaa   : > { %v992_v63 = vld [vmem:[#allocation2 + $0x8] sm:$0xff]  ;;  %2576 = vmatmul.msk.bf16.gmra.mxu1 %vm405_vm1, %v700_v35  ;;  %2600 = vmatmul.msk.bf16.gmra.mxu3 %vm405_vm1, %v707_v58 }
  0xab   : > { %v1121_v0 = vadd.f32 %v1042_v56, %v992_v63  ;;  %935 = vst.msk [vmem:[#allocation2 + $0x10] sm:$0xff] %vm555_vm4, %v901_v62 }
  0xac   : > { %v1228_v20 = vld [vmem:[#allocation2] sm:$0xff] }
  0xad   : > { %1153 = vst.msk [vmem:[#allocation2 + $0x8] sm:$0xff] %vm555_vm4, %v1121_v0  ;;  %v1045_v2 = vpop.f32.mrf.mxu3 }
  0xaf   : > { %v821_v4 = vpop.f32.mrf.mxu1  ;;  %v1217_v8 = vpop.f32.mrf.mxu2 }
  0xb0   : > { %v596_v7 = vld [vmem:[#allocation2 + $0x18] sm:$0xff]  ;;  %v480_v9 = vpop.f32.mrf.mxu0 }
  0xb1   : > { %v902_v10 = vadd.f32 %v821_v4, %v596_v7  ;;  %560 = vst.msk [vmem:[#allocation2 + $0x20] sm:$0xff] %vm555_vm4, %v480_v9  ;;  %v1282_v7 = vrot.slane %v3077_v1, 1 }
  0xb2   : > { %v993_v11 = vld [vmem:[#allocation2 + $0x10] sm:$0xff] }
  0xb3   : > { %v1122_v13 = vadd.f32 %v1045_v2, %v993_v11  ;;  %936 = vst.msk [vmem:[#allocation2 + $0x18] sm:$0xff] %vm555_vm4, %v902_v10  ;;  %2554 = vmatmul.msk.bf16.gmra.mxu0 %vm405_vm1, %v3039_v26  ;;  %v3131_v2 = vld [vmem:[%s2965_s12 + $0x70] sm:$0xff]  ;;  %v722_v10 = vshrl.u32 %v3096_v27, 16 }
  0xb4   : > { %2627 = vmatmul.msk.bf16.gmra.mxu2 %vm405_vm1, %v1279_v12  ;;  %v1229_v35 = vld [vmem:[#allocation2 + $0x8] sm:$0xff]  ;;  %v725_v11 = vshll.u32 %v3131_v2, 16 }
  0xb5   : > { %1154 = vst.msk [vmem:[#allocation2 + $0x10] sm:$0xff] %vm555_vm4, %v1122_v13  ;;  %v1047_v16 = vpop.f32.mrf.mxu3 }
  0xb7   : > { %v824_v17 = vpop.f32.mrf.mxu1  ;;  %v1357_v21 = vpop.f32.mrf.mxu2 }
  0xb8   : > { %v597_v19 = vld [vmem:[#allocation2 + $0x20] sm:$0xff]  ;;  %v482_v22 = vpop.f32.mrf.mxu0  ;;  %v1437_v24 = vadd.f32 %v1357_v21, %v1228_v20 }
  0xb9   : > { %v903_v23 = vadd.f32 %v824_v17, %v597_v19  ;;  %561 = vst.msk [vmem:[#allocation2 + $0x28] sm:$0xff] %vm555_vm4, %v482_v22  ;;  %v1283_v19 = vsel %vm1260_vm3, %v1280_v29, %v1282_v7  ;;  %v724_v22 = vor.u32 %v722_v10, %v720_v49 }
  0xba   : > { %v994_v25 = vld [vmem:[#allocation2 + $0x18] sm:$0xff]  ;;  %2577 = vmatmul.msk.bf16.gmra.mxu1 %vm405_vm1, %v707_v58  ;;  %2601 = vmatmul.msk.bf16.gmra.mxu3 %vm405_vm1, %v714_v18  ;;  %1469 = vst.msk [vmem:[#allocation2] sm:$0xff] %vm555_vm4, %v1437_v24 }
  0xbb   : > { %v1123_v26 = vadd.f32 %v1047_v16, %v994_v25  ;;  %937 = vst.msk [vmem:[#allocation2 + $0x20] sm:$0xff] %vm555_vm4, %v903_v23  ;;  %v3153_v23 = vrot.slane %v725_v11, 1 }
  0xbc   : > { %v1230_v56 = vld [vmem:[#allocation2 + $0x10] sm:$0xff] }
  0xbd   : > { %1155 = vst.msk [vmem:[#allocation2 + $0x18] sm:$0xff] %vm555_vm4, %v1123_v26  ;;  %v1050_v28 = vpop.f32.mrf.mxu3  ;;  %v3167_v31 = vsel %vm627_vm2, %v724_v22, %v3153_v23 }
  0xbf   : > { %v826_v30 = vpop.f32.mrf.mxu1  ;;  %v1359_v36 = vpop.f32.mrf.mxu2 }
  0xc0   : > { %v598_v34 = vld [vmem:[#allocation2 + $0x28] sm:$0xff]  ;;  %v485_v39 = vpop.f32.mrf.mxu0  ;;  %v1438_v42 = vadd.f32 %v1359_v36, %v1229_v35 }
  0xc1   : > { %v904_v40 = vadd.f32 %v826_v30, %v598_v34  ;;  %562 = vst.msk [vmem:[#allocation2 + $0x30] sm:$0xff] %vm555_vm4, %v485_v39  ;;  %v1530_v45 = vld [vmem:[#allocation2] sm:$0xff] }
  0xc2   : > { %v995_v43 = vld [vmem:[#allocation2 + $0x20] sm:$0xff]  ;;  %v3116_v50 = vadd.f32 %v3106_v33, %v1530_v45  ;;  %1470 = vst.msk [vmem:[#allocation2 + $0x8] sm:$0xff] %vm555_vm4, %v1438_v42 }
  0xc3   : > { %v1124_v46 = vadd.f32 %v1050_v28, %v995_v43  ;;  %938 = vst.msk [vmem:[#allocation2 + $0x28] sm:$0xff] %vm555_vm4, %v904_v40  ;;  %2555 = vmatmul.msk.bf16.gmra.mxu0 %vm405_vm1, %v3055_v41 }
  0xc4   : > { %2628 = vmatmul.msk.bf16.gmra.mxu2 %vm405_vm1, %v1281_v44  ;;  %v2637_v52 = vmul.f32 -1.442695, %v3116_v50  ;;  %v1231_v15 = vld [vmem:[#allocation2 + $0x18] sm:$0xff] }
  0xc5   : > { %1156 = vst.msk [vmem:[#allocation2 + $0x20] sm:$0xff] %vm555_vm4, %v1124_v46  ;;  %v1052_v51 = vpop.f32.mrf.mxu3  ;;  %v3177_v44 = vld [vmem:[%s2965_s12 + $0x78] sm:$0xff] }
  0xc6   : > { %2726 = vpow2.f32 %v2637_v52 }
  0xc7   : > { %v829_v53 = vpop.f32.mrf.mxu1  ;;  %v1362_v57 = vpop.f32.mrf.mxu2 }
  0xc8   : > { %v599_v55 = vld [vmem:[#allocation2 + $0x30] sm:$0xff]  ;;  %v487_v58 = vpop.f32.mrf.mxu0  ;;  %v1439_v61 = vadd.f32 %v1362_v57, %v1230_v56 }
  0xc9   : > { %v905_v59 = vadd.f32 %v829_v53, %v599_v55  ;;  %563 = vst.msk [vmem:[#allocation2 + $0x38] sm:$0xff] %vm555_vm4, %v487_v58  ;;  %v1531_v63 = vld [vmem:[#allocation2 + $0x8] sm:$0xff]  ;;  %v729_v55 = vshrl.u32 %v3131_v2, 16 }
  0xca   : > { %v996_v62 = vld [vmem:[#allocation2 + $0x28] sm:$0xff]  ;;  %2578 = vmatmul.msk.bf16.gmra.mxu1 %vm405_vm1, %v714_v18  ;;  %2602 = vmatmul.msk.bf16.gmra.mxu3 %vm405_vm1, %v3123_v54  ;;  %v3134_v3 = vadd.f32 %v3106_v33, %v1531_v63  ;;  %1471 = vst.msk [vmem:[#allocation2 + $0x10] sm:$0xff] %vm555_vm4, %v1439_v61 }
  0xcb   : > { %v1125_v0 = vadd.f32 %v1052_v51, %v996_v62  ;;  %939 = vst.msk [vmem:[#allocation2 + $0x30] sm:$0xff] %vm555_vm4, %v905_v59  ;;  %v732_v59 = vshll.u32 %v3177_v44, 16 }
  0xcc   : > { %v2727_v5 = vpop.eup %2726  ;;  %v2638_v6 = vmul.f32 -1.442695, %v3134_v3  ;;  %v1232_v39 = vld [vmem:[#allocation2 + $0x20] sm:$0xff] }
  0xcd   : > { %1157 = vst.msk [vmem:[#allocation2 + $0x28] sm:$0xff] %vm555_vm4, %v1125_v0  ;;  %v1055_v4 = vpop.f32.mrf.mxu3  ;;  %v3140_v8 = vadd.f32 1.0, %v2727_v5 }
  0xce   : > { %2728 = vpow2.f32 %v2638_v6 }
  0xcf   : > { %v831_v9 = vpop.f32.mrf.mxu1  ;;  %v1364_v13 = vpop.f32.mrf.mxu2  ;;  %2730 = vrcp.f32 %v3140_v8  ;;  %v1749_v45 = vand.u32 2147483648, %v3140_v8  ;;  %v1747_v49 = vand.u32 2147483647, %v3140_v8  ;;  %vm1743_vm6 = vweird.f32 %v3140_v8 }
  0xd0   : > { %v600_v12 = vld [vmem:[#allocation2 + $0x38] sm:$0xff]  ;;  %v490_v14 = vpop.f32.mrf.mxu0  ;;  %v1440_v18 = vadd.f32 %v1364_v13, %v1231_v15  ;;  %v731_v13 = vor.u32 %v729_v55, %v3153_v23 }
  0xd1   : > { %564 = vst.msk [vmem:[#allocation2 + $0x40] sm:$0xff] %vm555_vm4, %v490_v14  ;;  %v906_v17 = vadd.f32 %v831_v9, %v600_v12  ;;  %v1532_v20 = vld [vmem:[#allocation2 + $0x10] sm:$0xff]  ;;  %v1750_v62 = vor.u32 1.1754944e-38, %v1749_v45  ;;  %vm1748_vm9 = vcmp.eq.f32.partialorder %v1747_v49, 8.507059e+37 }
  0xd2   : > { %v997_v16 = vld [vmem:[#allocation2 + $0x30] sm:$0xff]  ;;  %v3156_v24 = vadd.f32 %v3106_v33, %v1532_v20  ;;  %1472 = vst.msk [vmem:[#allocation2 + $0x18] sm:$0xff] %vm555_vm4, %v1440_v18 }
  0xd3   : > { %v1126_v21 = vadd.f32 %v1055_v4, %v997_v16  ;;  %2556 = vmatmul.msk.bf16.gmra.mxu0 %vm405_vm1, %v3077_v1  ;;  %940 = vst.msk [vmem:[#allocation2 + $0x38] sm:$0xff] %vm555_vm4, %v906_v17  ;;  %v3206_v16 = vrot.slane %v732_v59, 1 }
  0xd4   : > { %2629 = vmatmul.msk.bf16.gmra.mxu2 %vm405_vm1, %v1283_v19  ;;  %v2729_v25 = vpop.eup %2728  ;;  %v2639_v26 = vmul.f32 -1.442695, %v3156_v24  ;;  %v1233_v19 = vld [vmem:[#allocation2 + $0x28] sm:$0xff] }
  0xd5   : > { %1158 = vst.msk [vmem:[#allocation2 + $0x30] sm:$0xff] %vm555_vm4, %v1126_v21  ;;  %v1057_v41 = vpop.f32.mrf.mxu3  ;;  %v2731_v28 = vpop.eup %2730  ;;  %v3163_v29 = vadd.f32 1.0, %v2729_v25 }
  0xd6   : > { %v1739_v32 = vmul.f32 %v2731_v28, %v3140_v8  ;;  %2732 = vpow2.f32 %v2639_v26  ;;  %vm1744_vm5 = vweird.f32 %v2731_v28 }
  0xd7   : > { %v834_v30 = vpop.f32.mrf.mxu1  ;;  %v1367_v35 = vpop.f32.mrf.mxu2  ;;  %2734 = vrcp.f32 %v3163_v29  ;;  %vm1745_vm7 = vmor %vm1743_vm6, %vm1744_vm5  ;;  %v1762_v17 = vand.u32 2147483647, %v3163_v29  ;;  %v1764_v1 = vand.u32 2147483648, %v3163_v29  ;;  %vm1758_vm11 = vweird.f32 %v3163_v29 }
  0xd8   : > { %v601_v34 = vld [vmem:[#allocation2 + $0x40] sm:$0xff]  ;;  %v492_v36 = vpop.f32.mrf.mxu0  ;;  %v1740_v40 = vsub.f32 1.0, %v1739_v32  ;;  %v1441_v43 = vadd.f32 %v1367_v35, %v1232_v39  ;;  %v3230_v35 = vsel %vm627_vm2, %v731_v13, %v3206_v16 }
  0xd9   : > { %565 = vst.msk [vmem:[#allocation2 + $0x48] sm:$0xff] %vm555_vm4, %v492_v36  ;;  %v907_v42 = vadd.f32 %v834_v30, %v601_v34  ;;  %v1533_v52 = vld [vmem:[#allocation2 + $0x18] sm:$0xff]  ;;  %v1765_v30 = vor.u32 1.1754944e-38, %v1764_v1  ;;  %vm1763_vm13 = vcmp.eq.f32.partialorder %v1762_v17, 8.507059e+37 }
  0xda   : > { %2579 = vmatmul.msk.bf16.gmra.mxu1 %vm405_vm1, %v3123_v54  ;;  %2603 = vmatmul.msk.bf16.gmra.mxu3 %vm405_vm1, %v3167_v31  ;;  %v998_v46 = vld [vmem:[#allocation2 + $0x38] sm:$0xff]  ;;  %v1741_v47 = vmul.f32 %v2731_v28, %v1740_v40  ;;  %1473 = vst.msk [vmem:[#allocation2 + $0x20] sm:$0xff] %vm555_vm4, %v1441_v43  ;;  %v1284_v54 = vrot.slane %v3096_v27, 1  ;;  %v3187_v58 = vadd.f32 %v3106_v33, %v1533_v52 }
  0xdb   : > { %v1127_v51 = vadd.f32 %v1057_v41, %v998_v46  ;;  %941 = vst.msk [vmem:[#allocation2 + $0x40] sm:$0xff] %vm555_vm4, %v907_v42 }
  0xdc   : > { %v2733_v56 = vpop.eup %2732  ;;  %v1742_v57 = vadd.f32 %v2731_v28, %v1741_v47  ;;  %v2640_v6 = vmul.f32 -1.442695, %v3187_v58  ;;  %v1285_v12 = vsel %vm1260_vm3, %v1282_v7, %v1284_v54  ;;  %v1234_v49 = vld [vmem:[#allocation2 + $0x30] sm:$0xff] }
  0xdd   : > { %v1060_v53 = vpop.f32.mrf.mxu3  ;;  %1159 = vst.msk [vmem:[#allocation2 + $0x38] sm:$0xff] %vm555_vm4, %v1127_v51  ;;  %v2735_v61 = vpop.eup %2734  ;;  %v3193_v63 = vadd.f32 1.0, %v2733_v56  ;;  %v3246_v56 = vld [vmem:[%s2965_s12 + $0x80] sm:$0xff] }
  0xde   : > { %v1746_v4 = vsel %vm1745_vm7, %v2731_v28, %v1742_v57  ;;  %v1754_v5 = vmul.f32 %v2735_v61, %v3163_v29  ;;  %vm1759_vm10 = vweird.f32 %v2735_v61 }
  0xdf   : > { %v836_v0 = vpop.f32.mrf.mxu1  ;;  %v1369_v9 = vpop.f32.mrf.mxu2  ;;  %v1751_v11 = vsel %vm1748_vm9, %v1750_v62, %v1746_v4  ;;  %2736 = vrcp.f32 %v3193_v63  ;;  %vm1760_vm12 = vmor %vm1758_vm11, %vm1759_vm10  ;;  %v1779_v55 = vand.u32 2147483648, %v3193_v63  ;;  %vm1773_vm15 = vweird.f32 %v3193_v63 }
  0xe0   : > { %v602_v8 = vld [vmem:[#allocation2 + $0x48] sm:$0xff]  ;;  %v495_v10 = vpop.f32.mrf.mxu0  ;;  %v2248_v14 = vmul.f32 %v1751_v11, %v3116_v50  ;;  %v1755_v15 = vsub.f32 1.0, %v1754_v5  ;;  %2738 = vpow2.f32 %v2640_v6  ;;  %v1442_v23 = vadd.f32 %v1369_v9, %v1233_v19 }
  0xe1   : > { %566 = vst.msk [vmem:[#allocation2 + $0x50] sm:$0xff] %vm555_vm4, %v495_v10  ;;  %v908_v18 = vadd.f32 %v836_v0, %v602_v8  ;;  %v1534_v21 = vld [vmem:[#allocation2 + $0x20] sm:$0xff]  ;;  %v1286_v4 = vrot.slane %v3131_v2, 1  ;;  %v1780_v8 = vor.u32 1.1754944e-38, %v1779_v55  ;;  %v736_v11 = vshrl.u32 %v3177_v44, 16 }
  0xe2   : > { %v999_v7 = vld [vmem:[#allocation2 + $0x40] sm:$0xff]  ;;  %v2282_v50 = vpack.c.bf16 %v2248_v14, %v2248_v14  ;;  %v1756_v20 = vmul.f32 %v2735_v61, %v1755_v15  ;;  %v3218_v41 = vadd.f32 %v3106_v33, %v1534_v21  ;;  %1474 = vst.msk [vmem:[#allocation2 + $0x28] sm:$0xff] %vm555_vm4, %v1442_v23 }
  0xe3   : > { %2557 = vmatmul.msk.bf16.gmra.mxu0 %vm405_vm1, %v3096_v27  ;;  %v1128_v22 = vadd.f32 %v1060_v53, %v999_v7  ;;  %942 = vst.msk [vmem:[#allocation2 + $0x48] sm:$0xff] %vm555_vm4, %v908_v18 }
  0xe4   : > { %2630 = vmatmul.msk.bf16.gmra.mxu2 %vm405_vm1, %v1285_v12  ;;  %2317 = vst.msk [vmem:[%s3211_s25] sm:$0xf] %vm2316_vm8, %v2282_v50  ;;  %v1757_v26 = vadd.f32 %v2735_v61, %v1756_v20  ;;  %v2641_v32 = vmul.f32 -1.442695, %v3218_v41  ;;  %v739_v12 = vshll.u32 %v3246_v56, 16  ;;  %v1235_v17 = vld [vmem:[#allocation2 + $0x38] sm:$0xff] }
  0xe5   : > { %v1062_v25 = vpop.f32.mrf.mxu3  ;;  %v2737_v28 = vpop.eup %2736  ;;  %1160 = vst.msk [vmem:[#allocation2 + $0x40] sm:$0xff] %vm555_vm4, %v1128_v22 }
  0xe6   : > { %v2739_v36 = vpop.eup %2738  ;;  %v1761_v39 = vsel %vm1760_vm12, %v2735_v61, %v1757_v26  ;;  %v1769_v40 = vmul.f32 %v2737_v28, %v3193_v63  ;;  %2740 = vpow2.f32 %v2641_v32  ;;  %vm1774_vm14 = vweird.f32 %v2737_v28 }
  0xe7   : > { %v839_v34 = vpop.f32.mrf.mxu1  ;;  %v1372_v42 = vpop.f32.mrf.mxu2  ;;  %v1766_v45 = vsel %vm1763_vm13, %v1765_v30, %v1761_v39  ;;  %v3234_v46 = vadd.f32 1.0, %v2739_v36  ;;  %vm3254_vm0 = vmor %vm1773_vm15, %vm1774_vm14  ;;  %v3281_v30 = vrot.slane %v739_v12, 1 }
  0xe8   : > { %v603_v29 = vld [vmem:[#allocation2 + $0x50] sm:$0xff]  ;;  %v497_v43 = vpop.f32.mrf.mxu0  ;;  %v2249_v51 = vmul.f32 %v1766_v45, %v3134_v3  ;;  %v1770_v52 = vsub.f32 1.0, %v1769_v40  ;;  %v1443_v53 = vadd.f32 %v1372_v42, %v1234_v49  ;;  %v1777_v3 = vand.u32 2147483647, %v3193_v63 }
  0xe9   : > { %v909_v47 = vadd.f32 %v839_v34, %v603_v29  ;;  %567 = vst.msk [vmem:[#allocation2 + $0x58] sm:$0xff] %vm555_vm4, %v497_v43  ;;  %2742 = vrcp.f32 %v3234_v46  ;;  %v1535_v9 = vld [vmem:[#allocation2 + $0x28] sm:$0xff]  ;;  %v1794_v27 = vand.u32 2147483648, %v3234_v46  ;;  %v1792_v40 = vand.u32 2147483647, %v3234_v46 }
  0xea   : > { %2580 = vmatmul.msk.bf16.gmra.mxu1 %vm405_vm1, %v3167_v31  ;;  %2604 = vmatmul.msk.bf16.gmra.mxu3 %vm405_vm1, %v3230_v35  ;;  %v2283_v57 = vpack.c.bf16 %v2249_v51, %v2249_v51  ;;  %v1771_v59 = vmul.f32 %v2737_v28, %v1770_v52  ;;  %v1000_v61 = vld [vmem:[#allocation2 + $0x48] sm:$0xff]  ;;  %1475 = vst.msk [vmem:[#allocation2 + $0x30] sm:$0xff] %vm555_vm4, %v1443_v53  ;;  %vm1778_vm5 = vcmp.eq.f32.partialorder %v1777_v3, 8.507059e+37  ;;  %vm1788_vm7 = vweird.f32 %v3234_v46 }
  0xeb   : > { %943 = vst.msk [vmem:[#allocation2 + $0x50] sm:$0xff] %vm555_vm4, %v909_v47  ;;  %v1129_v31 = vadd.f32 %v1062_v25, %v1000_v61  ;;  %v3266_v14 = vadd.f32 %v3106_v33, %v1535_v9  ;;  %v1287_v25 = vsel %vm1260_vm3, %v1284_v54, %v1286_v4  ;;  %v1795_v55 = vor.u32 1.1754944e-38, %v1794_v27 }
  0xec   : > { %2318 = vst.msk [vmem:[%s3211_s25 + $0x4] sm:$0xf] %vm2316_vm8, %v2283_v57  ;;  %v1772_v0 = vadd.f32 %v2737_v28, %v1771_v59  ;;  %v2741_v5 = vpop.eup %2740  ;;  %v1236_v51 = vld [vmem:[#allocation2 + $0x40] sm:$0xff] }
  0xed   : > { %v1065_v62 = vpop.f32.mrf.mxu3  ;;  %1161 = vst.msk [vmem:[#allocation2 + $0x48] sm:$0xff] %vm555_vm4, %v1129_v31  ;;  %v3263_v63 = vadd.f32 1.0, %v2741_v5  ;;  %v2642_v26 = vmul.f32 -1.442695, %v3266_v14 }
  0xee   : > { %v1776_v13 = vsel %vm3254_vm0, %v2737_v28, %v1772_v0 }
  0xef   : > { %v841_v10 = vpop.f32.mrf.mxu1  ;;  %v1374_v1 = vpop.f32.mrf.mxu2  ;;  %v1781_v19 = vsel %vm1778_vm5, %v1780_v8, %v1776_v13  ;;  %2744 = vrcp.f32 %v3263_v63  ;;  %v1809_v6 = vand.u32 2147483648, %v3263_v63  ;;  %vm1803_vm11 = vweird.f32 %v3263_v63 }
  0xf0   : > { %v604_v15 = vld [vmem:[#allocation2 + $0x58] sm:$0xff]  ;;  %v500_v7 = vpop.f32.mrf.mxu0  ;;  %v2743_v18 = vpop.eup %2742  ;;  %v1444_v20 = vadd.f32 %v1374_v1, %v1235_v17  ;;  %v2250_v21 = vmul.f32 %v1781_v19, %v3156_v24  ;;  %v738_v24 = vor.u32 %v736_v11, %v3206_v16  ;;  %2746 = vpow2.f32 %v2642_v26 }
  0xf1   : > { %v910_v50 = vadd.f32 %v841_v10, %v604_v15  ;;  %568 = vst.msk [vmem:[#allocation2 + $0x60] sm:$0xff] %vm555_vm4, %v500_v7  ;;  %v1784_v22 = vmul.f32 %v2743_v18, %v3234_v46  ;;  %v1536_v28 = vld [vmem:[#allocation2 + $0x30] sm:$0xff]  ;;  %vm1789_vm6 = vweird.f32 %v2743_v18  ;;  %v1807_v11 = vand.u32 2147483647, %v3263_v63 }
  0xf2   : > { %v1001_v23 = vld [vmem:[#allocation2 + $0x50] sm:$0xff]  ;;  %v2284_v32 = vpack.c.bf16 %v2250_v21, %v2250_v21  ;;  %v3284_v36 = vadd.f32 %v3106_v33, %v1536_v28  ;;  %1476 = vst.msk [vmem:[#allocation2 + $0x38] sm:$0xff] %vm555_vm4, %v1444_v20  ;;  %v3297_v43 = vsel %vm627_vm2, %v738_v24, %v3281_v30  ;;  %vm1790_vm9 = vmor %vm1788_vm7, %vm1789_vm6  ;;  %vm1793_vm2 = vcmp.eq.f32.partialorder %v1792_v40, 8.507059e+37 }
  0xf3   : > { %2558 = vmatmul.msk.bf16.gmra.mxu0 %vm405_vm1, %v3131_v2  ;;  %v1785_v34 = vsub.f32 1.0, %v1784_v22  ;;  %v1130_v39 = vadd.f32 %v1065_v62, %v1001_v23  ;;  %944 = vst.msk [vmem:[#allocation2 + $0x58] sm:$0xff] %vm555_vm4, %v910_v50  ;;  %v1810_v50 = vor.u32 1.1754944e-38, %v1809_v6  ;;  %vm1808_vm13 = vcmp.eq.f32.partialorder %v1807_v11, 8.507059e+37 }
  0xf4   : > { %2631 = vmatmul.msk.bf16.gmra.mxu2 %vm405_vm1, %v1287_v25  ;;  %2319 = vst.msk [vmem:[%s3211_s25 + $0x8] sm:$0xf] %vm2316_vm8, %v2284_v32  ;;  %v2643_v29 = vmul.f32 -1.442695, %v3284_v36  ;;  %v743_v28 = vshrl.u32 %v3246_v56, 16  ;;  %v1237_v27 = vld [vmem:[#allocation2 + $0x48] sm:$0xff] }
  0xf5   : > { %v1067_v54 = vpop.f32.mrf.mxu3  ;;  %v1786_v16 = vmul.f32 %v2743_v18, %v1785_v34  ;;  %1162 = vst.msk [vmem:[#allocation2 + $0x50] sm:$0xff] %vm555_vm4, %v1130_v39  ;;  %v2745_v45 = vpop.eup %2744 }
  0xf6   : > { %2748 = vpow2.f32 %v2643_v29  ;;  %v1799_v57 = vmul.f32 %v2745_v45, %v3263_v63  ;;  %v2747_v46 = vpop.eup %2746  ;;  %vm1804_vm10 = vweird.f32 %v2745_v45 }
  0xf7   : > { %v844_v42 = vpop.f32.mrf.mxu1  ;;  %v1787_v47 = vadd.f32 %v2743_v18, %v1786_v16  ;;  %v1377_v52 = vpop.f32.mrf.mxu2  ;;  %v3309_v8 = vadd.f32 1.0, %v2747_v46  ;;  %vm1805_vm12 = vmor %vm1803_vm11, %vm1804_vm10 }
  0xf8   : > { %v605_v49 = vld [vmem:[#allocation2 + $0x60] sm:$0xff]  ;;  %v502_v53 = vpop.f32.mrf.mxu0  ;;  %v1445_v3 = vadd.f32 %v1377_v52, %v1236_v51  ;;  %v1800_v62 = vsub.f32 1.0, %v1799_v57 }
  0xf9   : > { %v911_v59 = vadd.f32 %v844_v42, %v605_v49  ;;  %569 = vst.msk [vmem:[#allocation2 + $0x68] sm:$0xff] %vm555_vm4, %v502_v53  ;;  %v1791_v61 = vsel %vm1790_vm9, %v2743_v18, %v1787_v47  ;;  %v1537_v9 = vld [vmem:[#allocation2 + $0x38] sm:$0xff]  ;;  %2750 = vrcp.f32 %v3309_v8  ;;  %v3346_v42 = vor.u32 %v743_v28, %v3281_v30 }
  0xfa   : > { %2581 = vmatmul.msk.bf16.gmra.mxu1 %vm405_vm1, %v3230_v35  ;;  %2605 = vmatmul.msk.bf16.gmra.mxu3 %vm405_vm1, %v3297_v43  ;;  %v1796_v31 = vsel %vm1793_vm2, %v1795_v55, %v1791_v61  ;;  %v1002_v0 = vld [vmem:[#allocation2 + $0x58] sm:$0xff]  ;;  %1477 = vst.msk [vmem:[#allocation2 + $0x40] sm:$0xff] %vm555_vm4, %v1445_v3  ;;  %v1801_v35 = vmul.f32 %v2745_v45, %v1800_v62  ;;  %v1822_v49 = vand.u32 2147483647, %v3309_v8  ;;  %v1824_v53 = vand.u32 2147483648, %v3309_v8 }
  0xfb   : > { %945 = vst.msk [vmem:[#allocation2 + $0x60] sm:$0xff] %vm555_vm4, %v911_v59  ;;  %v2251_v5 = vmul.f32 %v1796_v31, %v3187_v58  ;;  %v1131_v10 = vadd.f32 %v1067_v54, %v1002_v0  ;;  %v3314_v12 = vadd.f32 %v3106_v33, %v1537_v9  ;;  %v1288_v58 = vrot.slane %v3177_v44, 1 }
  0xfc   : > { %v2749_v15 = vpop.eup %2748  ;;  %v1802_v1 = vadd.f32 %v2745_v45, %v1801_v35  ;;  %v1238_v59 = vld [vmem:[#allocation2 + $0x50] sm:$0xff]  ;;  %vm1818_vm15 = vweird.f32 %v3309_v8  ;;  %v1825_v9 = vor.u32 1.1754944e-38, %v1824_v53  ;;  %vm1823_vm6 = vcmp.eq.f32.partialorder %v1822_v49, 8.507059e+37 }
  0xfd   : > { %v1070_v13 = vpop.f32.mrf.mxu3  ;;  %v2285_v17 = vpack.c.bf16 %v2251_v5, %v2251_v5  ;;  %1163 = vst.msk [vmem:[#allocation2 + $0x58] sm:$0xff] %vm555_vm4, %v1131_v10  ;;  %v3320_v7 = vadd.f32 1.0, %v2749_v15  ;;  %v2644_v18 = vmul.f32 -1.442695, %v3314_v12  ;;  %v1289_v26 = vsel %vm1260_vm3, %v1286_v4, %v1288_v58 }
  0xfe   : > { %v1806_v23 = vsel %vm1805_vm12, %v2745_v45, %v1802_v1 }
  0xff   : > { %v846_v19 = vpop.f32.mrf.mxu1  ;;  %2320 = vst.msk [vmem:[%s3211_s25 + $0xc] sm:$0xf] %vm2316_vm8, %v2285_v17  ;;  %v1379_v21 = vpop.f32.mrf.mxu2  ;;  %2752 = vrcp.f32 %v3320_v7  ;;  %v1811_v63 = vsel %vm1808_vm13, %v1810_v50, %v1806_v23  ;;  %v1839_v6 = vand.u32 2147483648, %v3320_v7  ;;  %v1837_v35 = vand.u32 2147483647, %v3320_v7 }
 0x100   : > { %v606_v20 = vld [vmem:[#allocation2 + $0x68] sm:$0xff]  ;;  %v505_v22 = vpop.f32.mrf.mxu0  ;;  %2754 = vpow2.f32 %v2644_v18  ;;  %v2252_v24 = vmul.f32 %v1811_v63, %v3218_v41  ;;  %v2751_v54 = vpop.eup %2750  ;;  %v1446_v40 = vadd.f32 %v1379_v21, %v1237_v27  ;;  %vm1833_vm7 = vweird.f32 %v3320_v7 }
 0x101   : > { %570 = vst.msk [vmem:[#allocation2 + $0x70] sm:$0xff] %vm555_vm4, %v505_v22  ;;  %v1538_v32 = vld [vmem:[#allocation2 + $0x40] sm:$0xff]  ;;  %v912_v39 = vadd.f32 %v846_v19, %v606_v20  ;;  %v1814_v4 = vmul.f32 %v2751_v54, %v3309_v8  ;;  %vm1819_vm14 = vweird.f32 %v2751_v54  ;;  %v1290_v8 = vrot.slane %v3246_v56, 1 }
 0x102   : > { %v1003_v25 = vld [vmem:[#allocation2 + $0x60] sm:$0xff]  ;;  %v3338_v16 = vadd.f32 %v3106_v33, %v1538_v32  ;;  %v2286_v2 = vpack.c.bf16 %v2252_v24, %v2252_v24  ;;  %1478 = vst.msk [vmem:[#allocation2 + $0x48] sm:$0xff] %vm555_vm4, %v1446_v40  ;;  %vm1820_vm0 = vmor %vm1818_vm15, %vm1819_vm14  ;;  %v1840_v50 = vor.u32 1.1754944e-38, %v1839_v6  ;;  %vm1838_vm2 = vcmp.eq.f32.partialorder %v1837_v35, 8.507059e+37 }
 0x103   : > { %v1132_v34 = vadd.f32 %v1070_v13, %v1003_v25  ;;  %2559 = vmatmul.msk.bf16.gmra.mxu0 %vm405_vm1, %v3177_v44  ;;  %946 = vst.msk [vmem:[#allocation2 + $0x68] sm:$0xff] %vm555_vm4, %v912_v39  ;;  %v1815_v47 = vsub.f32 1.0, %v1814_v4  ;;  %v1291_v27 = vsel %vm1260_vm3, %v1288_v58, %v1290_v8 }
 0x104   : > { %2632 = vmatmul.msk.bf16.gmra.mxu2 %vm405_vm1, %v1289_v26  ;;  %v2645_v29 = vmul.f32 -1.442695, %v3338_v16  ;;  %2321 = vst.msk [vmem:[%s3211_s25 + $0x10] sm:$0xf] %vm2316_vm8, %v2286_v2 }
 0x105   : > { %1164 = vst.msk [vmem:[#allocation2 + $0x60] sm:$0xff] %vm555_vm4, %v1132_v34  ;;  %v1072_v41 = vpop.f32.mrf.mxu3  ;;  %v2753_v45 = vpop.eup %2752  ;;  %v1816_v61 = vmul.f32 %v2751_v54, %v1815_v47 }
 0x106   : > { %v2755_v52 = vpop.eup %2754  ;;  %v1829_v55 = vmul.f32 %v2753_v45, %v3320_v7  ;;  %2756 = vpow2.f32 %v2645_v29  ;;  %vm1834_vm5 = vweird.f32 %v2753_v45 }
 0x107   : > { %v849_v51 = vpop.f32.mrf.mxu1  ;;  %v1382_v30 = vpop.f32.mrf.mxu2  ;;  %v3354_v46 = vadd.f32 1.0, %v2755_v52  ;;  %v1817_v5 = vadd.f32 %v2751_v54, %v1816_v61  ;;  %vm1835_vm9 = vmor %vm1833_vm7, %vm1834_vm5 }
 0x108   : > { %v607_v57 = vld [vmem:[#allocation2 + $0x70] sm:$0xff]  ;;  %v507_v3 = vpop.f32.mrf.mxu0  ;;  %v1447_v62 = vadd.f32 %v1382_v30, %v1238_v59  ;;  %v1830_v0 = vsub.f32 1.0, %v1829_v55 }
 0x109   : > { %v913_v31 = vadd.f32 %v849_v51, %v607_v57  ;;  %571 = vst.msk [vmem:[#allocation2 + $0x78] sm:$0xff] %vm555_vm4, %v507_v3  ;;  %2758 = vrcp.f32 %v3354_v46  ;;  %v1539_v21 = vld [vmem:[#allocation2 + $0x48] sm:$0xff]  ;;  %v1854_v44 = vand.u32 2147483648, %v3354_v46  ;;  %v1852_v51 = vand.u32 2147483647, %v3354_v46 }
 0x10a   : > { %2582 = vmatmul.msk.bf16.gmra.mxu1 %vm405_vm1, %v3297_v43  ;;  %2606 = vmatmul.msk.bf16.gmra.mxu3 %vm405_vm1, %v3346_v42  ;;  %v1831_v10 = vmul.f32 %v2753_v45, %v1830_v0  ;;  %1479 = vst.msk [vmem:[#allocation2 + $0x50] sm:$0xff] %vm555_vm4, %v1447_v62  ;;  %v1821_v43 = vsel %vm1820_vm0, %v2751_v54, %v1817_v5  ;;  %v1004_v11 = vld [vmem:[#allocation2 + $0x68] sm:$0xff]  ;;  %vm1848_vm10 = vweird.f32 %v3354_v46 }
 0x10b   : > { %947 = vst.msk [vmem:[#allocation2 + $0x70] sm:$0xff] %vm555_vm4, %v913_v31  ;;  %v1826_v17 = vsel %vm1823_vm6, %v1825_v9, %v1821_v43  ;;  %v1133_v18 = vadd.f32 %v1072_v41, %v1004_v11  ;;  %v3374_v63 = vadd.f32 %v3106_v33, %v1539_v21  ;;  %v1855_v62 = vor.u32 1.1754944e-38, %v1854_v44  ;;  %v2862_v9 = vld [vmem:[%s2974_s20] sm:$0xff] }
 0x10c   : > { %v2757_v15 = vpop.eup %2756  ;;  %v1832_v1 = vadd.f32 %v2753_v45, %v1831_v10  ;;  %v2253_v19 = vmul.f32 %v1826_v17, %v3266_v14  ;;  %v1240_v3 = vld [vmem:[#allocation2 + $0x60] sm:$0xff]  ;;  %vm1853_vm12 = vcmp.eq.f32.partialorder %v1852_v51, 8.507059e+37 }
 0x10d   : > { %v1075_v13 = vpop.f32.mrf.mxu3  ;;  %v3371_v20 = vadd.f32 1.0, %v2757_v15  ;;  %1165 = vst.msk [vmem:[#allocation2 + $0x68] sm:$0xff] %vm555_vm4, %v1133_v18  ;;  %v2646_v54 = vmul.f32 -1.442695, %v3374_v63 }
 0x10e   : > { %v1836_v23 = vsel %vm1835_vm9, %v2753_v45, %v1832_v1  ;;  %v2287_v24 = vpack.c.bf16 %v2253_v19, %v2253_v19  ;;  %v1239_v45 = vld [vmem:[#allocation2 + $0x58] sm:$0xff] }
 0x10f   : > { %v851_v22 = vpop.f32.mrf.mxu1  ;;  %v1384_v26 = vpop.f32.mrf.mxu2  ;;  %v1841_v14 = vsel %vm1838_vm2, %v1840_v50, %v1836_v23  ;;  %2760 = vrcp.f32 %v3371_v20  ;;  %v1867_v43 = vand.u32 2147483647, %v3371_v20  ;;  %v1869_v11 = vand.u32 2147483648, %v3371_v20 }
 0x110   : > { %v608_v25 = vld [vmem:[#allocation2 + $0x78] sm:$0xff]  ;;  %v510_v7 = vpop.f32.mrf.mxu0  ;;  %v2759_v28 = vpop.eup %2758  ;;  %v2254_v32 = vmul.f32 %v1841_v14, %v3284_v36  ;;  %2322 = vst.msk [vmem:[%s3211_s25 + $0x14] sm:$0xf] %vm2316_vm8, %v2287_v24  ;;  %2762 = vpow2.f32 %v2646_v54  ;;  %v1448_v58 = vadd.f32 %v1384_v26, %v1239_v45  ;;  %vm1863_vm14 = vweird.f32 %v3371_v20  ;;  %v310_v14 = vld [vmem:[%s2974_s20] sm:$0xf] }
 0x111   : > { %572 = vst.msk [vmem:[#allocation2 + $0x80] sm:$0xff] %vm555_vm4, %v510_v7  ;;  %v1844_v34 = vmul.f32 %v2759_v28, %v3354_v46  ;;  %v1540_v40 = vld [vmem:[#allocation2 + $0x50] sm:$0xff]  ;;  %v914_v4 = vadd.f32 %v851_v22, %v608_v25  ;;  %vm1849_vm3 = vweird.f32 %v2759_v28  ;;  %v1870_v21 = vor.u32 1.1754944e-38, %v1869_v11 }
 0x112   : > { %v1005_v39 = vld [vmem:[#allocation2 + $0x70] sm:$0xff]  ;;  %v2288_v36 = vpack.c.bf16 %v2254_v32, %v2254_v32  ;;  %v3392_v29 = vadd.f32 %v3106_v33, %v1540_v40  ;;  %1480 = vst.msk [vmem:[#allocation2 + $0x58] sm:$0xff] %vm555_vm4, %v1448_v58  ;;  %vm1850_vm11 = vmor %vm1848_vm10, %vm1849_vm3  ;;  %vm1868_vm0 = vcmp.eq.f32.partialorder %v1867_v43, 8.507059e+37 }
 0x113   : > { %v1134_v2 = vadd.f32 %v1075_v13, %v1005_v39  ;;  %2560 = vmatmul.msk.bf16.gmra.mxu0 %vm405_vm1, %v3246_v56  ;;  %v1845_v41 = vsub.f32 1.0, %v1844_v34  ;;  %948 = vst.msk [vmem:[#allocation2 + $0x78] sm:$0xff] %vm555_vm4, %v914_v4 }
 0x114   : > { %2633 = vmatmul.msk.bf16.gmra.mxu2 %vm405_vm1, %v1291_v27  ;;  %2323 = vst.msk [vmem:[%s3211_s25 + $0x18] sm:$0xf] %vm2316_vm8, %v2288_v36  ;;  %v2647_v52 = vmul.f32 -1.442695, %v3392_v29  ;;  %v1241_v4 = vld [vmem:[#allocation2 + $0x68] sm:$0xff] }
 0x115   : > { %1166 = vst.msk [vmem:[#allocation2 + $0x70] sm:$0xff] %vm555_vm4, %v1134_v2  ;;  %v1077_v47 = vpop.f32.mrf.mxu3  ;;  %v1846_v49 = vmul.f32 %v2759_v28, %v1845_v41  ;;  %v2761_v53 = vpop.eup %2760 }
 0x116   : > { %v1859_v59 = vmul.f32 %v2761_v53, %v3371_v20  ;;  %2764 = vpow2.f32 %v2647_v52  ;;  %v2763_v10 = vpop.eup %2762  ;;  %vm1864_vm13 = vweird.f32 %v2761_v53 }
 0x117   : > { %v854_v55 = vpop.f32.mrf.mxu1  ;;  %v1847_v57 = vadd.f32 %v2759_v28, %v1846_v49  ;;  %v1387_v61 = vpop.f32.mrf.mxu2  ;;  %v3415_v17 = vadd.f32 1.0, %v2763_v10  ;;  %vm1865_vm15 = vmor %vm1863_vm14, %vm1864_vm13 }
 0x118   : > { %v609_v30 = vld [vmem:[#allocation2 + $0x80] sm:$0xff]  ;;  %v512_v31 = vpop.f32.mrf.mxu0  ;;  %v1449_v5 = vadd.f32 %v1387_v61, %v1240_v3  ;;  %v1860_v46 = vsub.f32 1.0, %v1859_v59 }
 0x119   : > { %v915_v0 = vadd.f32 %v854_v55, %v609_v30  ;;  %573 = vst.msk [vmem:[#allocation2 + $0x88] sm:$0xff] %vm555_vm4, %v512_v31  ;;  %v1851_v6 = vsel %vm1850_vm11, %v2759_v28, %v1847_v57  ;;  %2766 = vrcp.f32 %v3415_v17  ;;  %v1541_v22 = vld [vmem:[#allocation2 + $0x58] sm:$0xff]  ;;  %v1882_v59 = vand.u32 2147483647, %v3415_v17 }
 0x11a   : > { %2583 = vmatmul.msk.bf16.gmra.mxu1 %vm405_vm1, %v3346_v42  ;;  %2635 = vmatmul.msk.bf16.vlgmr.msrb.gmra.mxu3 %vm405_vm1, %v2862_v9  ;;  %v1856_v35 = vsel %vm1853_vm12, %v1855_v62, %v1851_v6  ;;  %v1861_v15 = vmul.f32 %v2761_v53, %v1860_v46  ;;  %1481 = vst.msk [vmem:[#allocation2 + $0x60] sm:$0xff] %vm555_vm4, %v1449_v5  ;;  %v1006_v50 = vld [vmem:[#allocation2 + $0x78] sm:$0xff]  ;;  %vm1878_vm6 = vweird.f32 %v3415_v17 }
 0x11b   : > { %949 = vst.msk [vmem:[#allocation2 + $0x80] sm:$0xff] %vm555_vm4, %v915_v0  ;;  %v2255_v13 = vmul.f32 %v1856_v35, %v3314_v12  ;;  %v1135_v23 = vadd.f32 %v1077_v47, %v1006_v50  ;;  %v3425_v7 = vadd.f32 %v3106_v33, %v1541_v22 }
 0x11c   : > { %v2765_v1 = vpop.eup %2764  ;;  %v1862_v19 = vadd.f32 %v2761_v53, %v1861_v15  ;;  %v1242_v56 = vld [vmem:[#allocation2 + $0x70] sm:$0xff] }
 0x11d   : > { %v1080_v42 = vpop.f32.mrf.mxu3  ;;  %v2289_v18 = vpack.c.bf16 %v2255_v13, %v2255_v13  ;;  %v3420_v12 = vadd.f32 1.0, %v2765_v1  ;;  %1167 = vst.msk [vmem:[#allocation2 + $0x78] sm:$0xff] %vm555_vm4, %v1135_v23  ;;  %v2648_v27 = vmul.f32 -1.442695, %v3425_v7 }
 0x11e   : > { %v1866_v26 = vsel %vm1865_vm15, %v2761_v53, %v1862_v19 }
 0x11f   : > { %v856_v25 = vpop.f32.mrf.mxu1  ;;  %2324 = vst.msk [vmem:[%s3211_s25 + $0x1c] sm:$0xf] %vm2316_vm8, %v2289_v18  ;;  %v1389_v20 = vpop.f32.mrf.mxu2  ;;  %v1871_v32 = vsel %vm1868_vm0, %v1870_v21, %v1866_v26  ;;  %2768 = vrcp.f32 %v3420_v12  ;;  %v1899_v6 = vand.u32 2147483648, %v3420_v12  ;;  %v1897_v9 = vand.u32 2147483647, %v3420_v12 }
 0x120   : > { %v610_v28 = vld [vmem:[#allocation2 + $0x88] sm:$0xff]  ;;  %v515_v24 = vpop.f32.mrf.mxu0  ;;  %v2256_v34 = vmul.f32 %v1871_v32, %v3338_v16  ;;  %v2767_v36 = vpop.eup %2766  ;;  %v1450_v44 = vadd.f32 %v1389_v20, %v1241_v4  ;;  %2770 = vpow2.f32 %v2648_v27  ;;  %vm1893_vm2 = vweird.f32 %v3420_v12  ;;  %v3468_v21 = vld [vmem:[%s3852_s3] ss:$0 sm:$0xff] }
 0x121   : > { %574 = vst.msk [vmem:[#allocation2 + $0x90] sm:$0xff] %vm555_vm4, %v515_v24  ;;  %v1542_v54 = vld [vmem:[#allocation2 + $0x60] sm:$0xff]  ;;  %v916_v2 = vadd.f32 %v856_v25, %v610_v28  ;;  %v1874_v16 = vmul.f32 %v2767_v36, %v3415_v17  ;;  %vm1879_vm5 = vweird.f32 %v2767_v36  ;;  %vm1898_vm10 = vcmp.eq.f32.partialorder %v1897_v9, 8.507059e+37 }
 0x122   : > { %v1007_v39 = vld [vmem:[#allocation2 + $0x80] sm:$0xff]  ;;  %v2290_v41 = vpack.c.bf16 %v2256_v34, %v2256_v34  ;;  %v3435_v45 = vadd.f32 %v3106_v33, %v1542_v54  ;;  %v1884_v33 = vand.u32 2147483648, %v3415_v17  ;;  %1482 = vst.msk [vmem:[#allocation2 + $0x68] sm:$0xff] %vm555_vm4, %v1450_v44  ;;  %vm1880_vm7 = vmor %vm1878_vm6, %vm1879_vm5 }
 0x123   : > { %v1136_v40 = vadd.f32 %v1080_v42, %v1007_v39  ;;  %2584 = vmatmul.msk.bf16.vlgmr.msrb.gmra.mxu0 %vm405_vm1, %v310_v14  ;;  %v1875_v51 = vsub.f32 1.0, %v1874_v16  ;;  %950 = vst.msk [vmem:[#allocation2 + $0x88] sm:$0xff] %vm555_vm4, %v916_v2  ;;  %v1900_v42 = vor.u32 1.1754944e-38, %v1899_v6 }
 0x124   : > { %2634 = vmatmul.msk.bf16.gmra.mxu2 %vm405_vm1, %v1290_v8  ;;  %2325 = vst.msk [vmem:[%s3211_s25 + $0x20] sm:$0xf] %vm2316_vm8, %v2290_v41  ;;  %v2649_v47 = vmul.f32 -1.442695, %v3435_v45  ;;  %v1885_v5 = vor.u32 1.1754944e-38, %v1884_v33  ;;  %v1243_v27 = vld [vmem:[#allocation2 + $0x78] sm:$0xff] }
 0x125   : > { %1168 = vst.msk [vmem:[#allocation2 + $0x80] sm:$0xff] %vm555_vm4, %v1136_v40  ;;  %v1082_v58 = vpop.f32.mrf.mxu3  ;;  %v2769_v49 = vpop.eup %2768  ;;  %v1876_v57 = vmul.f32 %v2767_v36, %v1875_v51 }
 0x126   : > { %v1889_v53 = vmul.f32 %v2769_v49, %v3420_v12  ;;  %2772 = vpow2.f32 %v2649_v47  ;;  %v2771_v62 = vpop.eup %2770  ;;  %vm1894_vm9 = vweird.f32 %v2769_v49 }
 0x127   : > { %v859_v52 = vpop.f32.mrf.mxu1  ;;  %v1392_v55 = vpop.f32.mrf.mxu2  ;;  %v1877_v0 = vadd.f32 %v2767_v36, %v1876_v57  ;;  %v3457_v10 = vadd.f32 1.0, %v2771_v62  ;;  %vm1895_vm3 = vmor %vm1893_vm2, %vm1894_vm9 }
 0x128   : > { %v517_v8 = vpop.f32.mrf.mxu0  ;;  %v611_v30 = vld [vmem:[#allocation2 + $0x90] sm:$0xff]  ;;  %v1451_v3 = vadd.f32 %v1392_v55, %v1242_v56  ;;  %v1890_v61 = vsub.f32 1.0, %v1889_v53 }
 0x129   : > { %575 = vst.msk [vmem:[#allocation2 + $0x98] sm:$0xff] %vm555_vm4, %v517_v8  ;;  %v917_v31 = vadd.f32 %v859_v52, %v611_v30  ;;  %v1881_v35 = vsel %vm1880_vm7, %v2767_v36, %v1877_v0  ;;  %2774 = vrcp.f32 %v3457_v10  ;;  %v1543_v18 = vld [vmem:[#allocation2 + $0x68] sm:$0xff]  ;;  %v1912_v16 = vand.u32 2147483647, %v3457_v10 }
 0x12a   : > { %2636 = vmatmul.msk.bf16.gmra.mxu3 %vm405_vm1, %v2985_v37  ;;  %1483 = vst.msk [vmem:[#allocation2 + $0x70] sm:$0xff] %vm555_vm4, %v1451_v3  ;;  %v1891_v46 = vmul.f32 %v2769_v49, %v1890_v61  ;;  %vm1883_vm1 = vcmp.eq.f32.partialorder %v1882_v59, 8.507059e+37  ;;  %v1008_v15 = vld [vmem:[#allocation2 + $0x88] sm:$0xff]  ;;  %v3471_v12 = vadd.f32 %v3468_v21, %v1543_v18  ;;  %vm1908_vm12 = vweird.f32 %v3457_v10 }
 0x12b   : > { %951 = vst.msk [vmem:[#allocation2 + $0x90] sm:$0xff] %vm555_vm4, %v917_v31  ;;  %v1886_v11 = vsel %vm1883_vm1, %v1885_v5, %v1881_v35  ;;  %v1137_v22 = vadd.f32 %v1082_v58, %v1008_v15  ;;  %v1914_v58 = vand.u32 2147483648, %v3457_v10  ;;  %vm3495_vm13 = vcmp.eq.f32.partialorder %v1912_v16, 8.507059e+37 }
 0x12c   : > { %v2773_v43 = vpop.eup %2772  ;;  %v1892_v13 = vadd.f32 %v2769_v49, %v1891_v46  ;;  %v2257_v17 = vmul.f32 %v1886_v11, %v3374_v63  ;;  %v2650_v14 = vmul.f32 -1.442695, %v3471_v12  ;;  %v1244_v8 = vld [vmem:[#allocation2 + $0x80] sm:$0xff] }
 0x12d   : > { %v1085_v37 = vpop.f32.mrf.mxu3  ;;  %v3463_v1 = vadd.f32 1.0, %v2773_v43  ;;  %1169 = vst.msk [vmem:[#allocation2 + $0x88] sm:$0xff] %vm555_vm4, %v1137_v22  ;;  %v1915_v61 = vor.u32 1.1754944e-38, %v1914_v58 }
 0x12e   : > { %v1896_v50 = vsel %vm1895_vm3, %v2769_v49, %v1892_v13  ;;  %v2291_v26 = vpack.c.bf16 %v2257_v17, %v2257_v17 }
 0x12f   : > { %v861_v19 = vpop.f32.mrf.mxu1  ;;  %v1394_v63 = vpop.f32.mrf.mxu2  ;;  %v1901_v28 = vsel %vm1898_vm10, %v1900_v42, %v1896_v50  ;;  %2776 = vrcp.f32 %v3463_v1  ;;  %v1927_v62 = vand.u32 2147483647, %v3463_v1  ;;  %v1929_v0 = vand.u32 2147483648, %v3463_v1 }
 0x130   : > { %v612_v23 = vld [vmem:[#allocation2 + $0x98] sm:$0xff]  ;;  %v520_v25 = vpop.f32.mrf.mxu0  ;;  %v2258_v20 = vmul.f32 %v1901_v28, %v3392_v29  ;;  %2326 = vst.msk [vmem:[%s3211_s25 + $0x24] sm:$0xf] %vm2316_vm8, %v2291_v26  ;;  %v2775_v54 = vpop.eup %2774  ;;  %v1452_v29 = vadd.f32 %v1394_v63, %v1243_v27  ;;  %2778 = vpow2.f32 %v2650_v14  ;;  %vm1923_vm0 = vweird.f32 %v3463_v1 }
 0x131   : > { %576 = vst.msk [vmem:[#allocation2 + $0xa0] sm:$0xff] %vm555_vm4, %v520_v25  ;;  %v1544_v24 = vld [vmem:[#allocation2 + $0x70] sm:$0xff]  ;;  %v918_v39 = vadd.f32 %v861_v19, %v612_v23  ;;  %v1904_v4 = vmul.f32 %v2775_v54, %v3457_v10  ;;  %vm1909_vm11 = vweird.f32 %v2775_v54  ;;  %v1930_v18 = vor.u32 1.1754944e-38, %v1929_v0 }
 0x132   : > { %v3481_v32 = vadd.f32 %v3468_v21, %v1544_v24  ;;  %v1009_v34 = vld [vmem:[#allocation2 + $0x90] sm:$0xff]  ;;  %v2292_v40 = vpack.c.bf16 %v2258_v20, %v2258_v20  ;;  %1484 = vst.msk [vmem:[#allocation2 + $0x78] sm:$0xff] %vm555_vm4, %v1452_v29  ;;  %vm1910_vm14 = vmor %vm1908_vm12, %vm1909_vm11  ;;  %vm1928_vm6 = vcmp.eq.f32.partialorder %v1927_v62, 8.507059e+37 }
 0x133   : > { %v1138_v2 = vadd.f32 %v1085_v37, %v1009_v34  ;;  %952 = vst.msk [vmem:[#allocation2 + $0x98] sm:$0xff] %vm555_vm4, %v918_v39  ;;  %v1905_v44 = vsub.f32 1.0, %v1904_v4 }
 0x134   : > { %2327 = vst.msk [vmem:[%s3211_s25 + $0x28] sm:$0xf] %vm2316_vm8, %v2292_v40  ;;  %v2651_v41 = vmul.f32 -1.442695, %v3481_v32  ;;  %v1245_v34 = vld [vmem:[#allocation2 + $0x88] sm:$0xff] }
 0x135   : > { %v1087_v36 = vpop.f32.mrf.mxu3  ;;  %1170 = vst.msk [vmem:[#allocation2 + $0x90] sm:$0xff] %vm555_vm4, %v1138_v2  ;;  %v2777_v49 = vpop.eup %2776  ;;  %v1906_v53 = vmul.f32 %v2775_v54, %v1905_v44 }
 0x136   : > { %2780 = vpow2.f32 %v2651_v41  ;;  %v1919_v56 = vmul.f32 %v2777_v49, %v3463_v1  ;;  %v2779_v59 = vpop.eup %2778  ;;  %vm1924_vm15 = vweird.f32 %v2777_v49 }
 0x137   : > { %v864_v47 = vpop.f32.mrf.mxu1  ;;  %v1397_v33 = vpop.f32.mrf.mxu2  ;;  %v1907_v30 = vadd.f32 %v2775_v54, %v1906_v53  ;;  %v3502_v5 = vadd.f32 1.0, %v2779_v59  ;;  %vm1925_vm5 = vmor %vm1923_vm0, %vm1924_vm15 }
 0x138   : > { %v613_v51 = vld [vmem:[#allocation2 + $0xa0] sm:$0xff]  ;;  %v522_v52 = vpop.f32.mrf.mxu0  ;;  %v1453_v57 = vadd.f32 %v1397_v33, %v1244_v8  ;;  %v1920_v31 = vsub.f32 1.0, %v1919_v56 }
 0x139   : > { %v919_v55 = vadd.f32 %v864_v47, %v613_v51  ;;  %577 = vst.msk [vmem:[#allocation2 + $0xa8] sm:$0xff] %vm555_vm4, %v522_v52  ;;  %v1911_v46 = vsel %vm1910_vm14, %v2775_v54, %v1907_v30  ;;  %2782 = vrcp.f32 %v3502_v5  ;;  %v1545_v17 = vld [vmem:[#allocation2 + $0x78] sm:$0xff]  ;;  %v1944_v41 = vand.u32 2147483648, %v3502_v5 }
 0x13a   : > { %v1010_v6 = vld [vmem:[#allocation2 + $0x98] sm:$0xff]  ;;  %1485 = vst.msk [vmem:[#allocation2 + $0x80] sm:$0xff] %vm555_vm4, %v1453_v57  ;;  %v1921_v9 = vmul.f32 %v2777_v49, %v1920_v31  ;;  %v1916_v43 = vsel %vm3495_vm13, %v1915_v61, %v1911_v46  ;;  %v3514_v19 = vadd.f32 %v3468_v21, %v1545_v17  ;;  %v1942_v16 = vand.u32 2147483647, %v3502_v5 }
 0x13b   : > { %953 = vst.msk [vmem:[#allocation2 + $0xa0] sm:$0xff] %vm555_vm4, %v919_v55  ;;  %v1139_v10 = vadd.f32 %v1087_v36, %v1010_v6  ;;  %v2259_v11 = vmul.f32 %v1916_v43, %v3425_v7  ;;  %vm1938_vm9 = vweird.f32 %v3502_v5  ;;  %v1945_v59 = vor.u32 1.1754944e-38, %v1944_v41 }
 0x13c   : > { %v2781_v37 = vpop.eup %2780  ;;  %v1922_v13 = vadd.f32 %v2777_v49, %v1921_v9  ;;  %v2652_v28 = vmul.f32 -1.442695, %v3514_v19  ;;  %vm1943_vm3 = vcmp.eq.f32.partialorder %v1942_v16, 8.507059e+37 }
 0x13d   : > { %v1090_v35 = vpop.f32.mrf.mxu3  ;;  %v3510_v15 = vadd.f32 1.0, %v2781_v37  ;;  %1171 = vst.msk [vmem:[#allocation2 + $0x98] sm:$0xff] %vm555_vm4, %v1139_v10  ;;  %v2293_v63 = vpack.c.bf16 %v2259_v11, %v2259_v11 }
 0x13e   : > { %v1926_v7 = vsel %vm1925_vm5, %v2777_v49, %v1922_v13  ;;  %v1246_v49 = vld [vmem:[#allocation2 + $0x90] sm:$0xff] }
 0x13f   : > { %v866_v42 = vpop.f32.mrf.mxu1  ;;  %v1399_v22 = vpop.f32.mrf.mxu2  ;;  %2784 = vrcp.f32 %v3510_v15  ;;  %v1931_v1 = vsel %vm1928_vm6, %v1930_v18, %v1926_v7  ;;  %2328 = vst.msk [vmem:[%s3211_s25 + $0x2c] sm:$0xf] %vm2316_vm8, %v2293_v63  ;;  %v1959_v30 = vand.u32 2147483648, %v3510_v15  ;;  %v1957_v61 = vand.u32 2147483647, %v3510_v15 }
 0x140   : > { %v614_v50 = vld [vmem:[#allocation2 + $0xa8] sm:$0xff]  ;;  %v525_v23 = vpop.f32.mrf.mxu0  ;;  %v2260_v26 = vmul.f32 %v1931_v1, %v3435_v45  ;;  %v2783_v39 = vpop.eup %2782  ;;  %v1454_v54 = vadd.f32 %v1399_v22, %v1245_v34  ;;  %2786 = vpow2.f32 %v2652_v28  ;;  %vm1953_vm10 = vweird.f32 %v3510_v15 }
 0x141   : > { %578 = vst.msk [vmem:[#allocation2 + $0xb0] sm:$0xff] %vm555_vm4, %v525_v23  ;;  %v1546_v20 = vld [vmem:[#allocation2 + $0x80] sm:$0xff]  ;;  %v920_v14 = vadd.f32 %v866_v42, %v614_v50  ;;  %v1934_v2 = vmul.f32 %v2783_v39, %v3502_v5  ;;  %vm1939_vm7 = vweird.f32 %v2783_v39  ;;  %vm1958_vm12 = vcmp.eq.f32.partialorder %v1957_v61, 8.507059e+37 }
 0x142   : > { %v1011_v25 = vld [vmem:[#allocation2 + $0xa0] sm:$0xff]  ;;  %v3523_v27 = vadd.f32 %v3468_v21, %v1546_v20  ;;  %v2294_v40 = vpack.c.bf16 %v2260_v26, %v2260_v26  ;;  %1486 = vst.msk [vmem:[#allocation2 + $0x88] sm:$0xff] %vm555_vm4, %v1454_v54  ;;  %vm1940_vm1 = vmor %vm1938_vm9, %vm1939_vm7 }
 0x143   : > { %v1140_v24 = vadd.f32 %v1090_v35, %v1011_v25  ;;  %954 = vst.msk [vmem:[#allocation2 + $0xa8] sm:$0xff] %vm555_vm4, %v920_v14  ;;  %v1935_v36 = vsub.f32 1.0, %v1934_v2  ;;  %v1960_v35 = vor.u32 1.1754944e-38, %v1959_v30 }
 0x144   : > { %v2653_v45 = vmul.f32 -1.442695, %v3523_v27  ;;  %2329 = vst.msk [vmem:[%s3211_s25 + $0x30] sm:$0xf] %vm2316_vm8, %v2294_v40  ;;  %v1247_v28 = vld [vmem:[#allocation2 + $0x98] sm:$0xff] }
 0x145   : > { %1172 = vst.msk [vmem:[#allocation2 + $0xa0] sm:$0xff] %vm555_vm4, %v1140_v24  ;;  %v1092_v29 = vpop.f32.mrf.mxu3  ;;  %v2785_v4 = vpop.eup %2784  ;;  %v1936_v52 = vmul.f32 %v2783_v39, %v1935_v36 }
 0x146   : > { %v1949_v58 = vmul.f32 %v2785_v4, %v3510_v15  ;;  %2788 = vpow2.f32 %v2653_v45  ;;  %v2787_v8 = vpop.eup %2786  ;;  %vm1954_vm2 = vweird.f32 %v2785_v4 }
 0x147   : > { %v869_v44 = vpop.f32.mrf.mxu1  ;;  %v1402_v51 = vpop.f32.mrf.mxu2  ;;  %v1937_v57 = vadd.f32 %v2783_v39, %v1936_v52  ;;  %v3540_v31 = vadd.f32 1.0, %v2787_v8  ;;  %vm1955_vm11 = vmor %vm1953_vm10, %vm1954_vm2 }
 0x148   : > { %v615_v47 = vld [vmem:[#allocation2 + $0xb0] sm:$0xff]  ;;  %v527_v33 = vpop.f32.mrf.mxu0  ;;  %v1455_v56 = vadd.f32 %v1402_v51, %v1246_v49  ;;  %v1950_v55 = vsub.f32 1.0, %v1949_v58 }
 0x149   : > { %v921_v53 = vadd.f32 %v869_v44, %v615_v47  ;;  %579 = vst.msk [vmem:[#allocation2 + $0xb8] sm:$0xff] %vm555_vm4, %v527_v33  ;;  %v1941_v62 = vsel %vm1940_vm1, %v2783_v39, %v1937_v57  ;;  %2790 = vrcp.f32 %v3540_v31  ;;  %v1547_v43 = vld [vmem:[#allocation2 + $0x88] sm:$0xff]  ;;  %v1972_v45 = vand.u32 2147483647, %v3540_v31 }
 0x14a   : > { %v1951_v3 = vmul.f32 %v2785_v4, %v1950_v55  ;;  %1487 = vst.msk [vmem:[#allocation2 + $0x90] sm:$0xff] %vm555_vm4, %v1455_v56  ;;  %v1012_v0 = vld [vmem:[#allocation2 + $0xa8] sm:$0xff]  ;;  %v1946_v5 = vsel %vm1943_vm3, %v1945_v59, %v1941_v62  ;;  %v3549_v17 = vadd.f32 %v3468_v21, %v1547_v43  ;;  %vm1968_vm14 = vweird.f32 %v3540_v31 }
 0x14b   : > { %955 = vst.msk [vmem:[#allocation2 + $0xb0] sm:$0xff] %vm555_vm4, %v921_v53  ;;  %v2261_v10 = vmul.f32 %v1946_v5, %v3471_v12  ;;  %v1141_v42 = vadd.f32 %v1092_v29, %v1012_v0  ;;  %vm1973_vm0 = vcmp.eq.f32.partialorder %v1972_v45, 8.507059e+37 }
 0x14c   : > { %v2789_v46 = vpop.eup %2788  ;;  %v1952_v9 = vadd.f32 %v2785_v4, %v1951_v3  ;;  %v2654_v7 = vmul.f32 -1.442695, %v3549_v17  ;;  %v1248_v49 = vld [vmem:[#allocation2 + $0xa0] sm:$0xff] }
 0x14d   : > { %v1095_v6 = vpop.f32.mrf.mxu3  ;;  %v3546_v37 = vadd.f32 1.0, %v2789_v46  ;;  %v2295_v22 = vpack.c.bf16 %v2261_v10, %v2261_v10  ;;  %1173 = vst.msk [vmem:[#allocation2 + $0xa8] sm:$0xff] %vm555_vm4, %v1141_v42 }
 0x14e   : > { %v1956_v13 = vsel %vm1955_vm11, %v2785_v4, %v1952_v9  ;;  %v1974_v4 = vand.u32 2147483648, %v3540_v31 }
 0x14f   : > { %v871_v11 = vpop.f32.mrf.mxu1  ;;  %v1404_v50 = vpop.f32.mrf.mxu2  ;;  %v1961_v23 = vsel %vm1958_vm12, %v1960_v35, %v1956_v13  ;;  %2792 = vrcp.f32 %v3546_v37  ;;  %2330 = vst.msk [vmem:[%s3211_s25 + $0x34] sm:$0xf] %vm2316_vm8, %v2295_v22  ;;  %v1989_v55 = vand.u32 2147483648, %v3546_v37  ;;  %v1987_v30 = vand.u32 2147483647, %v3546_v37 }
 0x150   : > { %v616_v18 = vld [vmem:[#allocation2 + $0xb8] sm:$0xff]  ;;  %v530_v15 = vpop.f32.mrf.mxu0  ;;  %v2262_v12 = vmul.f32 %v1961_v23, %v3481_v32  ;;  %v2791_v20 = vpop.eup %2790  ;;  %v1456_v32 = vadd.f32 %v1404_v50, %v1247_v28  ;;  %2794 = vpow2.f32 %v2654_v7  ;;  %v1975_v56 = vor.u32 1.1754944e-38, %v1974_v4 }
 0x151   : > { %580 = vst.msk [vmem:[#allocation2 + $0xc0] sm:$0xff] %vm555_vm4, %v530_v15  ;;  %v1548_v1 = vld [vmem:[#allocation2 + $0x90] sm:$0xff]  ;;  %v922_v26 = vadd.f32 %v871_v11, %v616_v18  ;;  %v1964_v34 = vmul.f32 %v2791_v20, %v3540_v31  ;;  %vm1969_vm13 = vweird.f32 %v2791_v20  ;;  %vm1983_vm6 = vweird.f32 %v3546_v37 }
 0x152   : > { %v1013_v63 = vld [vmem:[#allocation2 + $0xb0] sm:$0xff]  ;;  %v2296_v24 = vpack.c.bf16 %v2262_v12, %v2262_v12  ;;  %v3559_v14 = vadd.f32 %v3468_v21, %v1548_v1  ;;  %1488 = vst.msk [vmem:[#allocation2 + $0x98] sm:$0xff] %vm555_vm4, %v1456_v32  ;;  %vm1970_vm15 = vmor %vm1968_vm14, %vm1969_vm13  ;;  %v1990_v10 = vor.u32 1.1754944e-38, %v1989_v55  ;;  %vm1988_vm9 = vcmp.eq.f32.partialorder %v1987_v30, 8.507059e+37 }
 0x153   : > { %v1142_v25 = vadd.f32 %v1095_v6, %v1013_v63  ;;  %v1965_v40 = vsub.f32 1.0, %v1964_v34  ;;  %956 = vst.msk [vmem:[#allocation2 + $0xb8] sm:$0xff] %vm555_vm4, %v922_v26 }
 0x154   : > { %2331 = vst.msk [vmem:[%s3211_s25 + $0x38] sm:$0xf] %vm2316_vm8, %v2296_v24  ;;  %v2655_v54 = vmul.f32 -1.442695, %v3559_v14  ;;  %v1249_v7 = vld [vmem:[#allocation2 + $0xa8] sm:$0xff] }
 0x155   : > { %1174 = vst.msk [vmem:[#allocation2 + $0xb0] sm:$0xff] %vm555_vm4, %v1142_v25  ;;  %v1097_v39 = vpop.f32.mrf.mxu3  ;;  %v2793_v29 = vpop.eup %2792  ;;  %v1966_v16 = vmul.f32 %v2791_v20, %v1965_v40 }
 0x156   : > { %2796 = vpow2.f32 %v2655_v54  ;;  %v1979_v58 = vmul.f32 %v2793_v29, %v3546_v37  ;;  %v2795_v33 = vpop.eup %2794  ;;  %vm1984_vm5 = vweird.f32 %v2793_v29 }
 0x157   : > { %v874_v2 = vpop.f32.mrf.mxu1  ;;  %v1407_v41 = vpop.f32.mrf.mxu2  ;;  %v1967_v52 = vadd.f32 %v2791_v20, %v1966_v16  ;;  %v3575_v8 = vadd.f32 1.0, %v2795_v33  ;;  %vm1985_vm7 = vmor %vm1983_vm6, %vm1984_vm5 }
 0x158   : > { %v617_v36 = vld [vmem:[#allocation2 + $0xc0] sm:$0xff]  ;;  %v532_v44 = vpop.f32.mrf.mxu0  ;;  %v1457_v51 = vadd.f32 %v1407_v41, %v1248_v49  ;;  %v1980_v53 = vsub.f32 1.0, %v1979_v58 }
 0x159   : > { %v923_v47 = vadd.f32 %v874_v2, %v617_v36  ;;  %581 = vst.msk [vmem:[#allocation2 + $0xc8] sm:$0xff] %vm555_vm4, %v532_v44  ;;  %v1971_v57 = vsel %vm1970_vm15, %v2791_v20, %v1967_v52  ;;  %2798 = vrcp.f32 %v3575_v8  ;;  %v1549_v5 = vld [vmem:[#allocation2 + $0x98] sm:$0xff]  ;;  %v2002_v40 = vand.u32 2147483647, %v3575_v8 }
 0x15a   : > { %1489 = vst.msk [vmem:[#allocation2 + $0xa0] sm:$0xff] %vm555_vm4, %v1457_v51  ;;  %v1981_v59 = vmul.f32 %v2793_v29, %v1980_v53  ;;  %v1976_v31 = vsel %vm1973_vm0, %v1975_v56, %v1971_v57  ;;  %v1014_v62 = vld [vmem:[#allocation2 + $0xb8] sm:$0xff]  ;;  %v3585_v35 = vadd.f32 %v3468_v21, %v1549_v5  ;;  %vm1998_vm2 = vweird.f32 %v3575_v8 }
 0x15b   : > { %957 = vst.msk [vmem:[#allocation2 + $0xc0] sm:$0xff] %vm555_vm4, %v923_v47  ;;  %v2263_v0 = vmul.f32 %v1976_v31, %v3514_v19  ;;  %v1143_v43 = vadd.f32 %v1097_v39, %v1014_v62  ;;  %v2004_v39 = vand.u32 2147483648, %v3575_v8  ;;  %vm2003_vm11 = vcmp.eq.f32.partialorder %v2002_v40, 8.507059e+37 }
 0x15c   : > { %v2797_v61 = vpop.eup %2796  ;;  %v1982_v6 = vadd.f32 %v2793_v29, %v1981_v59  ;;  %v2656_v22 = vmul.f32 -1.442695, %v3585_v35  ;;  %v1250_v45 = vld [vmem:[#allocation2 + $0xb0] sm:$0xff] }
 0x15d   : > { %v1100_v3 = vpop.f32.mrf.mxu3  ;;  %v3582_v46 = vadd.f32 1.0, %v2797_v61  ;;  %v2297_v18 = vpack.c.bf16 %v2263_v0, %v2263_v0  ;;  %1175 = vst.msk [vmem:[#allocation2 + $0xb8] sm:$0xff] %vm555_vm4, %v1143_v43  ;;  %v2005_v51 = vor.u32 1.1754944e-38, %v2004_v39 }
 0x15e   : > { %v1986_v50 = vsel %vm1985_vm7, %v2793_v29, %v1982_v6 }
 0x15f   : > { %v876_v9 = vpop.f32.mrf.mxu1  ;;  %v1409_v13 = vpop.f32.mrf.mxu2  ;;  %2800 = vrcp.f32 %v3582_v46  ;;  %v1991_v19 = vsel %vm1988_vm9, %v1990_v10, %v1986_v50  ;;  %2332 = vst.msk [vmem:[%s3211_s25 + $0x3c] sm:$0xf] %vm2316_vm8, %v2297_v18  ;;  %v2019_v33 = vand.u32 2147483648, %v3582_v46  ;;  %v2017_v53 = vand.u32 2147483647, %v3582_v46 }
 0x160   : > { %v618_v11 = vld [vmem:[#allocation2 + $0xc8] sm:$0xff]  ;;  %v535_v42 = vpop.f32.mrf.mxu0  ;;  %v2264_v15 = vmul.f32 %v1991_v19, %v3523_v27  ;;  %v2799_v1 = vpop.eup %2798  ;;  %v1458_v26 = vadd.f32 %v1409_v13, %v1249_v7  ;;  %2802 = vpow2.f32 %v2656_v22  ;;  %vm2013_vm12 = vweird.f32 %v3582_v46 }
 0x161   : > { %582 = vst.msk [vmem:[#allocation2 + $0xd0] sm:$0xff] %vm555_vm4, %v535_v42  ;;  %v1550_v23 = vld [vmem:[#allocation2 + $0xa0] sm:$0xff]  ;;  %v924_v63 = vadd.f32 %v876_v9, %v618_v11  ;;  %v1994_v20 = vmul.f32 %v2799_v1, %v3575_v8  ;;  %vm1999_vm1 = vweird.f32 %v2799_v1  ;;  %v2020_v31 = vor.u32 1.1754944e-38, %v2019_v33 }
 0x162   : > { %v1015_v37 = vld [vmem:[#allocation2 + $0xc0] sm:$0xff]  ;;  %v3595_v25 = vadd.f32 %v3468_v21, %v1550_v23  ;;  %v2298_v28 = vpack.c.bf16 %v2264_v15, %v2264_v15  ;;  %1490 = vst.msk [vmem:[#allocation2 + $0xa8] sm:$0xff] %vm555_vm4, %v1458_v26  ;;  %vm2000_vm3 = vmor %vm1998_vm2, %vm1999_vm1  ;;  %vm2018_vm14 = vcmp.eq.f32.partialorder %v2017_v53, 8.507059e+37 }
 0x163   : > { %v1144_v12 = vadd.f32 %v1100_v3, %v1015_v37  ;;  %958 = vst.msk [vmem:[#allocation2 + $0xc8] sm:$0xff] %vm555_vm4, %v924_v63  ;;  %v1995_v34 = vsub.f32 1.0, %v1994_v20 }
 0x164   : > { %v2657_v27 = vmul.f32 -1.442695, %v3595_v25  ;;  %2333 = vst.msk [vmem:[%s3211_s25 + $0x40] sm:$0xf] %vm2316_vm8, %v2298_v28  ;;  %v1251_v22 = vld [vmem:[#allocation2 + $0xb8] sm:$0xff] }
 0x165   : > { %1176 = vst.msk [vmem:[#allocation2 + $0xc0] sm:$0xff] %vm555_vm4, %v1144_v12  ;;  %v1102_v24 = vpop.f32.mrf.mxu3  ;;  %v2801_v32 = vpop.eup %2800  ;;  %v1996_v41 = vmul.f32 %v2799_v1, %v1995_v34 }
 0x166   : > { %v2009_v2 = vmul.f32 %v2801_v32, %v3582_v46  ;;  %2804 = vpow2.f32 %v2657_v27  ;;  %v2803_v47 = vpop.eup %2802  ;;  %vm2014_vm10 = vweird.f32 %v2801_v32 }
 0x167   : > { %v879_v54 = vpop.f32.mrf.mxu1  ;;  %v1412_v4 = vpop.f32.mrf.mxu2  ;;  %v1997_v49 = vadd.f32 %v2799_v1, %v1996_v41  ;;  %v3612_v56 = vadd.f32 1.0, %v2803_v47  ;;  %vm2015_vm13 = vmor %vm2013_vm12, %vm2014_vm10 }
 0x168   : > { %v619_v29 = vld [vmem:[#allocation2 + $0xd0] sm:$0xff]  ;;  %v537_v36 = vpop.f32.mrf.mxu0  ;;  %v1459_v16 = vadd.f32 %v1412_v4, %v1250_v45  ;;  %v2010_v58 = vsub.f32 1.0, %v2009_v2 }
 0x169   : > { %v925_v44 = vadd.f32 %v879_v54, %v619_v29  ;;  %583 = vst.msk [vmem:[#allocation2 + $0xd8] sm:$0xff] %vm555_vm4, %v537_v36  ;;  %v2001_v55 = vsel %vm2000_vm3, %v2799_v1, %v1997_v49  ;;  %2806 = vrcp.f32 %v3612_v56  ;;  %v1551_v0 = vld [vmem:[#allocation2 + $0xa8] sm:$0xff]  ;;  %v2032_v27 = vand.u32 2147483647, %v3612_v56 }
 0x16a   : > { %v2011_v52 = vmul.f32 %v2801_v32, %v2010_v58  ;;  %1491 = vst.msk [vmem:[#allocation2 + $0xb0] sm:$0xff] %vm555_vm4, %v1459_v16  ;;  %v1016_v57 = vld [vmem:[#allocation2 + $0xc8] sm:$0xff]  ;;  %v2006_v8 = vsel %vm2003_vm11, %v2005_v51, %v2001_v55  ;;  %v3621_v9 = vadd.f32 %v3468_v21, %v1551_v0  ;;  %vm2028_vm0 = vweird.f32 %v3612_v56 }
 0x16b   : > { %959 = vst.msk [vmem:[#allocation2 + $0xd0] sm:$0xff] %vm555_vm4, %v925_v44  ;;  %v2265_v61 = vmul.f32 %v2006_v8, %v3549_v17  ;;  %v1145_v10 = vadd.f32 %v1102_v24, %v1016_v57  ;;  %vm2033_vm6 = vcmp.eq.f32.partialorder %v2032_v27, 8.507059e+37 }
 0x16c   : > { %v2805_v30 = vpop.eup %2804  ;;  %v2012_v3 = vadd.f32 %v2801_v32, %v2011_v52  ;;  %v2658_v50 = vmul.f32 -1.442695, %v3621_v9  ;;  %v1252_v45 = vld [vmem:[#allocation2 + $0xc0] sm:$0xff] }
 0x16d   : > { %v1105_v59 = vpop.f32.mrf.mxu3  ;;  %v3618_v62 = vadd.f32 1.0, %v2805_v30  ;;  %v2299_v13 = vpack.c.bf16 %v2265_v61, %v2265_v61  ;;  %1177 = vst.msk [vmem:[#allocation2 + $0xc8] sm:$0xff] %vm555_vm4, %v1145_v10 }
 0x16e   : > { %v2016_v5 = vsel %vm2015_vm13, %v2801_v32, %v2012_v3  ;;  %v2034_v32 = vand.u32 2147483648, %v3612_v56 }
 0x16f   : > { %v881_v6 = vpop.f32.mrf.mxu1  ;;  %v1414_v11 = vpop.f32.mrf.mxu2  ;;  %v2021_v42 = vsel %vm2018_vm14, %v2020_v31, %v2016_v5  ;;  %2808 = vrcp.f32 %v3618_v62  ;;  %2334 = vst.msk [vmem:[%s3211_s25 + $0x44] sm:$0xf] %vm2316_vm8, %v2299_v13  ;;  %v2049_v58 = vand.u32 2147483648, %v3618_v62  ;;  %v2047_v33 = vand.u32 2147483647, %v3618_v62 }
 0x170   : > { %v620_v43 = vld [vmem:[#allocation2 + $0xd8] sm:$0xff]  ;;  %v540_v46 = vpop.f32.mrf.mxu0  ;;  %v2266_v17 = vmul.f32 %v2021_v42, %v3559_v14  ;;  %v2807_v23 = vpop.eup %2806  ;;  %v1460_v14 = vadd.f32 %v1414_v11, %v1251_v22  ;;  %2810 = vpow2.f32 %v2658_v50  ;;  %v2035_v16 = vor.u32 1.1754944e-38, %v2034_v32 }
 0x171   : > { %584 = vst.msk [vmem:[#allocation2 + $0xe0] sm:$0xff] %vm555_vm4, %v540_v46  ;;  %v1552_v19 = vld [vmem:[#allocation2 + $0xb0] sm:$0xff]  ;;  %v926_v15 = vadd.f32 %v881_v6, %v620_v43  ;;  %v2024_v7 = vmul.f32 %v2807_v23, %v3612_v56  ;;  %vm2029_vm15 = vweird.f32 %v2807_v23  ;;  %vm2043_vm9 = vweird.f32 %v3618_v62 }
 0x172   : > { %v1017_v18 = vld [vmem:[#allocation2 + $0xd0] sm:$0xff]  ;;  %v2300_v12 = vpack.c.bf16 %v2266_v17, %v2266_v17  ;;  %v3631_v63 = vadd.f32 %v3468_v21, %v1552_v19  ;;  %1492 = vst.msk [vmem:[#allocation2 + $0xb8] sm:$0xff] %vm555_vm4, %v1460_v14  ;;  %vm2030_vm5 = vmor %vm2028_vm0, %vm2029_vm15  ;;  %v2050_v61 = vor.u32 1.1754944e-38, %v2049_v58  ;;  %vm2048_vm2 = vcmp.eq.f32.partialorder %v2047_v33, 8.507059e+37 }
 0x173   : > { %v1146_v37 = vadd.f32 %v1105_v59, %v1017_v18  ;;  %v2025_v28 = vsub.f32 1.0, %v2024_v7  ;;  %960 = vst.msk [vmem:[#allocation2 + $0xd8] sm:$0xff] %vm555_vm4, %v926_v15 }
 0x174   : > { %2335 = vst.msk [vmem:[%s3211_s25 + $0x48] sm:$0xf] %vm2316_vm8, %v2300_v12  ;;  %v2659_v26 = vmul.f32 -1.442695, %v3631_v63  ;;  %v1253_v50 = vld [vmem:[#allocation2 + $0xc8] sm:$0xff] }
 0x175   : > { %1178 = vst.msk [vmem:[#allocation2 + $0xd0] sm:$0xff] %vm555_vm4, %v1146_v37  ;;  %v1107_v1 = vpop.f32.mrf.mxu3  ;;  %v2809_v24 = vpop.eup %2808  ;;  %v2026_v40 = vmul.f32 %v2807_v23, %v2025_v28 }
 0x176   : > { %2812 = vpow2.f32 %v2659_v26  ;;  %v2039_v2 = vmul.f32 %v2809_v24, %v3618_v62  ;;  %v2811_v36 = vpop.eup %2810  ;;  %vm2044_vm7 = vweird.f32 %v2809_v24 }
 0x177   : > { %v884_v20 = vpop.f32.mrf.mxu1  ;;  %v1417_v39 = vpop.f32.mrf.mxu2  ;;  %v2027_v41 = vadd.f32 %v2807_v23, %v2026_v40  ;;  %v3647_v47 = vadd.f32 1.0, %v2811_v36  ;;  %vm2045_vm1 = vmor %vm2043_vm9, %vm2044_vm7 }
 0x178   : > { %v621_v34 = vld [vmem:[#allocation2 + $0xe0] sm:$0xff]  ;;  %v542_v54 = vpop.f32.mrf.mxu0  ;;  %v1461_v4 = vadd.f32 %v1417_v39, %v1252_v45  ;;  %v2040_v44 = vsub.f32 1.0, %v2039_v2 }
 0x179   : > { %v927_v29 = vadd.f32 %v884_v20, %v621_v34  ;;  %585 = vst.msk [vmem:[#allocation2 + $0xe8] sm:$0xff] %vm555_vm4, %v542_v54  ;;  %v2031_v49 = vsel %vm2030_vm5, %v2807_v23, %v2027_v41  ;;  %2814 = vrcp.f32 %v3647_v47  ;;  %v1553_v8 = vld [vmem:[#allocation2 + $0xb8] sm:$0xff]  ;;  %v2062_v28 = vand.u32 2147483647, %v3647_v47 }
 0x17a   : > { %1493 = vst.msk [vmem:[#allocation2 + $0xc0] sm:$0xff] %vm555_vm4, %v1461_v4  ;;  %v2041_v51 = vmul.f32 %v2809_v24, %v2040_v44  ;;  %v2036_v56 = vsel %vm2033_vm6, %v2035_v16, %v2031_v49  ;;  %v1018_v55 = vld [vmem:[#allocation2 + $0xd8] sm:$0xff]  ;;  %v3657_v31 = vadd.f32 %v3468_v21, %v1553_v8  ;;  %vm2058_vm10 = vweird.f32 %v3647_v47 }
 0x17b   : > { %961 = vst.msk [vmem:[#allocation2 + $0xe0] sm:$0xff] %vm555_vm4, %v927_v29  ;;  %v2267_v57 = vmul.f32 %v2036_v56, %v3585_v35  ;;  %v1147_v0 = vadd.f32 %v1107_v1, %v1018_v55  ;;  %v2064_v1 = vand.u32 2147483648, %v3647_v47  ;;  %vm2063_vm13 = vcmp.eq.f32.partialorder %v2062_v28, 8.507059e+37 }
 0x17c   : > { %v2813_v53 = vpop.eup %2812  ;;  %v2042_v59 = vadd.f32 %v2809_v24, %v2041_v51  ;;  %v2660_v13 = vmul.f32 -1.442695, %v3657_v31  ;;  %v1254_v27 = vld [vmem:[#allocation2 + $0xd0] sm:$0xff] }
 0x17d   : > { %v1110_v52 = vpop.f32.mrf.mxu3  ;;  %v3654_v30 = vadd.f32 1.0, %v2813_v53  ;;  %v2301_v43 = vpack.c.bf16 %v2267_v57, %v2267_v57  ;;  %1179 = vst.msk [vmem:[#allocation2 + $0xd8] sm:$0xff] %vm555_vm4, %v1147_v0  ;;  %v2065_v4 = vor.u32 1.1754944e-38, %v2064_v1 }
 0x17e   : > { %v2046_v11 = vsel %vm2045_vm1, %v2809_v24, %v2042_v59 }
 0x17f   : > { %v886_v3 = vpop.f32.mrf.mxu1  ;;  %v1419_v5 = vpop.f32.mrf.mxu2  ;;  %2816 = vrcp.f32 %v3654_v30  ;;  %v2051_v35 = vsel %vm2048_vm2, %v2050_v61, %v2046_v11  ;;  %2336 = vst.msk [vmem:[%s3211_s25 + $0x4c] sm:$0xf] %vm2316_vm8, %v2301_v43  ;;  %v2079_v36 = vand.u32 2147483648, %v3654_v30  ;;  %v2077_v44 = vand.u32 2147483647, %v3654_v30 }
 0x180   : > { %v622_v6 = vld [vmem:[#allocation2 + $0xe8] sm:$0xff]  ;;  %v545_v10 = vpop.f32.mrf.mxu0  ;;  %v2268_v46 = vmul.f32 %v2051_v35, %v3595_v25  ;;  %v2815_v19 = vpop.eup %2814  ;;  %v1462_v15 = vadd.f32 %v1419_v5, %v1253_v50  ;;  %2818 = vpow2.f32 %v2660_v13  ;;  %vm2073_vm14 = vweird.f32 %v3654_v30 }
 0x181   : > { %586 = vst.msk [vmem:[#allocation2 + $0xf0] sm:$0xff] %vm555_vm4, %v545_v10  ;;  %v1554_v42 = vld [vmem:[#allocation2 + $0xc0] sm:$0xff]  ;;  %v928_v18 = vadd.f32 %v886_v3, %v622_v6  ;;  %v2054_v23 = vmul.f32 %v2815_v19, %v3647_v47  ;;  %vm2059_vm3 = vweird.f32 %v2815_v19  ;;  %v2080_v56 = vor.u32 1.1754944e-38, %v2079_v36 }
 0x182   : > { %v1019_v62 = vld [vmem:[#allocation2 + $0xe0] sm:$0xff]  ;;  %v3667_v37 = vadd.f32 %v3468_v21, %v1554_v42  ;;  %v2302_v22 = vpack.c.bf16 %v2268_v46, %v2268_v46  ;;  %1494 = vst.msk [vmem:[#allocation2 + $0xc8] sm:$0xff] %vm555_vm4, %v1462_v15  ;;  %vm2060_vm11 = vmor %vm2058_vm10, %vm2059_vm3  ;;  %vm2078_vm0 = vcmp.eq.f32.partialorder %v2077_v44, 8.507059e+37  ;;  %vm966_vm2 = vcmask 260096  }
 0x183   : > { %v1148_v17 = vadd.f32 %v1110_v52, %v1019_v62  ;;  %962 = vst.msk [vmem:[#allocation2 + $0xe8] sm:$0xff] %vm555_vm4, %v928_v18  ;;  %v2055_v7 = vsub.f32 1.0, %v2054_v23 }
 0x184   : > { %v2661_v25 = vmul.f32 -1.442695, %v3667_v37  ;;  %2337 = vst.msk [vmem:[%s3211_s25 + $0x50] sm:$0xf] %vm2316_vm8, %v2302_v22  ;;  %v1255_v13 = vld [vmem:[#allocation2 + $0xd8] sm:$0xff] }
 0x185   : > { %1180 = vst.msk [vmem:[#allocation2 + $0xe0] sm:$0xff] %vm555_vm4, %v1148_v17  ;;  %v1112_v12 = vpop.f32.mrf.mxu3  ;;  %v2817_v14 = vpop.eup %2816  ;;  %v2056_v39 = vmul.f32 %v2815_v19, %v2055_v7 }
 0x186   : > { %v2069_v20 = vmul.f32 %v2817_v14, %v3654_v30  ;;  %2820 = vpow2.f32 %v2661_v25  ;;  %v2819_v29 = vpop.eup %2818  ;;  %vm2074_vm12 = vweird.f32 %v2817_v14 }
 0x187   : > { %v889_v26 = vpop.f32.mrf.mxu1  ;;  %v1422_v32 = vpop.f32.mrf.mxu2  ;;  %v2057_v45 = vadd.f32 %v2815_v19, %v2056_v39  ;;  %v3684_v16 = vadd.f32 1.0, %v2819_v29  ;;  %vm2075_vm15 = vmor %vm2073_vm14, %vm2074_vm12  ;;  %vm986_vm12 = vcmask 253952  }
 0x188   : > { %v623_v24 = vld [vmem:[#allocation2 + $0xf0] sm:$0xff]  ;;  %v547_v34 = vpop.f32.mrf.mxu0  ;;  %v1463_v40 = vadd.f32 %v1422_v32, %v1254_v27  ;;  %v2070_v2 = vsub.f32 1.0, %v2069_v20 }
 0x189   : > { %v929_v54 = vadd.f32 %v889_v26, %v623_v24  ;;  %587 = vst.msk [vmem:[#allocation2 + $0xf8] sm:$0xff] %vm555_vm4, %v547_v34  ;;  %v2061_v58 = vsel %vm2060_vm11, %v2815_v19, %v2057_v45  ;;  %2822 = vrcp.f32 %v3684_v16  ;;  %v1555_v57 = vld [vmem:[#allocation2 + $0xc8] sm:$0xff]  ;;  %v2092_v25 = vand.u32 2147483647, %v3684_v16 }
 0x18a   : > { %v2071_v41 = vmul.f32 %v2817_v14, %v2070_v2  ;;  %1495 = vst.msk [vmem:[#allocation2 + $0xd0] sm:$0xff] %vm555_vm4, %v1463_v40  ;;  %v1020_v49 = vld [vmem:[#allocation2 + $0xe8] sm:$0xff]  ;;  %v2066_v47 = vsel %vm2063_vm13, %v2065_v4, %v2061_v58  ;;  %v3693_v3 = vadd.f32 %v3468_v21, %v1555_v57  ;;  %vm2088_vm6 = vweird.f32 %v3684_v16 }
 0x18b   : > { %963 = vst.msk [vmem:[#allocation2 + $0xf0] sm:$0xff] %vm555_vm4, %v929_v54  ;;  %v2269_v53 = vmul.f32 %v2066_v47, %v3621_v9  ;;  %v1149_v61 = vadd.f32 %v1112_v12, %v1020_v49  ;;  %vm2093_vm9 = vcmp.eq.f32.partialorder %v2092_v25, 8.507059e+37 }
 0x18c   : > { %v2821_v33 = vpop.eup %2820  ;;  %v2072_v52 = vadd.f32 %v2817_v14, %v2071_v41  ;;  %v2662_v11 = vmul.f32 -1.442695, %v3693_v3  ;;  %v1256_v24 = vld [vmem:[#allocation2 + $0xe0] sm:$0xff] }
 0x18d   : > { %v1115_v51 = vpop.f32.mrf.mxu3  ;;  %v3690_v55 = vadd.f32 1.0, %v2821_v33  ;;  %v2303_v5 = vpack.c.bf16 %v2269_v53, %v2269_v53  ;;  %1181 = vst.msk [vmem:[#allocation2 + $0xe8] sm:$0xff] %vm555_vm4, %v1149_v61  ;;  %v3733_v53 = vld [vmem:[%s3852_s3] ss:$0 sm:$0xff] }
 0x18e   : > { %v2076_v8 = vsel %vm2075_vm15, %v2817_v14, %v2072_v52 }
 0x18f   : > { %v891_v59 = vpop.f32.mrf.mxu1  ;;  %v1424_v6 = vpop.f32.mrf.mxu2  ;;  %v2081_v10 = vsel %vm2078_vm0, %v2080_v56, %v2076_v8  ;;  %2824 = vrcp.f32 %v3690_v55  ;;  %2338 = vst.msk [vmem:[%s3211_s25 + $0x54] sm:$0xf] %vm2316_vm8, %v2303_v5  ;;  %v2109_v40 = vand.u32 2147483648, %v3690_v55  ;;  %v2107_v4 = vand.u32 2147483647, %v3690_v55 }
 0x190   : > { %v624_v0 = vld [vmem:[#allocation2 + $0xf8] sm:$0xff]  ;;  %v550_v30 = vpop.f32.mrf.mxu0  ;;  %v2270_v9 = vmul.f32 %v2081_v10, %v3631_v63  ;;  %v2823_v42 = vpop.eup %2822  ;;  %v1464_v63 = vadd.f32 %v1424_v6, %v1255_v13  ;;  %2826 = vpow2.f32 %v2662_v11  ;;  %vm2103_vm3 = vweird.f32 %v3690_v55 }
 0x191   : > { %588 = vst.msk [vmem:[#allocation2 + $0x100] sm:$0xff] %vm555_vm4, %v550_v30  ;;  %v1556_v35 = vld [vmem:[#allocation2 + $0xd0] sm:$0xff]  ;;  %v930_v46 = vadd.f32 %v891_v59, %v624_v0  ;;  %v2084_v50 = vmul.f32 %v2823_v42, %v3684_v16  ;;  %vm2089_vm5 = vweird.f32 %v2823_v42  ;;  %v2110_v52 = vor.u32 1.1754944e-38, %v2109_v40 }
 0x192   : > { %v1021_v43 = vld [vmem:[#allocation2 + $0xf0] sm:$0xff]  ;;  %v2304_v17 = vpack.c.bf16 %v2270_v9, %v2270_v9  ;;  %v3703_v18 = vadd.f32 %v3468_v21, %v1556_v35  ;;  %v2094_v21 = vand.u32 2147483648, %v3684_v16  ;;  %1496 = vst.msk [vmem:[#allocation2 + $0xd8] sm:$0xff] %vm555_vm4, %v1464_v63  ;;  %vm2090_vm7 = vmor %vm2088_vm6, %vm2089_vm5  ;;  %vm2108_vm11 = vcmp.eq.f32.partialorder %v2107_v4, 8.507059e+37 }
 0x193   : > { %v1150_v62 = vadd.f32 %v1115_v51, %v1021_v43  ;;  %v2085_v22 = vsub.f32 1.0, %v2084_v50  ;;  %964 = vst.msk [vmem:[#allocation2 + $0xf8] sm:$0xff] %vm555_vm4, %v930_v46 }
 0x194   : > { %2339 = vst.msk [vmem:[%s3211_s25 + $0x58] sm:$0xf] %vm2316_vm8, %v2304_v17  ;;  %v2663_v15 = vmul.f32 -1.442695, %v3703_v18  ;;  %v2095_v54 = vor.u32 1.1754944e-38, %v2094_v21  ;;  %v1257_v35 = vld [vmem:[#allocation2 + $0xe8] sm:$0xff] }
 0x195   : > { %1182 = vst.msk [vmem:[#allocation2 + $0xf0] sm:$0xff] %vm555_vm4, %v1150_v62  ;;  %v1117_v19 = vpop.f32.mrf.mxu3  ;;  %v2825_v12 = vpop.eup %2824  ;;  %v2086_v26 = vmul.f32 %v2823_v42, %v2085_v22 }
 0x196   : > { %2828 = vpow2.f32 %v2663_v15  ;;  %v2099_v28 = vmul.f32 %v2825_v12, %v3690_v55  ;;  %v2827_v32 = vpop.eup %2826  ;;  %vm2104_vm1 = vweird.f32 %v2825_v12 }
 0x197   : > { %v894_v23 = vpop.f32.mrf.mxu1  ;;  %v1427_v7 = vpop.f32.mrf.mxu2  ;;  %v2087_v34 = vadd.f32 %v2823_v42, %v2086_v26  ;;  %v3719_v2 = vadd.f32 1.0, %v2827_v32  ;;  %vm2105_vm10 = vmor %vm2103_vm3, %vm2104_vm1  ;;  %vm1500_vm1 = vcmask 259072  }
 0x198   : > { %v625_v14 = vld [vmem:[#allocation2 + $0x100] sm:$0xff]  ;;  %v552_v1 = vpop.f32.mrf.mxu0  ;;  %v1465_v27 = vadd.f32 %v1427_v7, %v1256_v24  ;;  %v2100_v39 = vsub.f32 1.0, %v2099_v28 }
 0x199   : > { %v931_v20 = vadd.f32 %v894_v23, %v625_v14  ;;  %589 = vst.msk [vmem:[#allocation2 + $0x108] sm:$0xff] %vm555_vm4, %v552_v1  ;;  %v2091_v29 = vsel %vm2090_vm7, %v2823_v42, %v2087_v34  ;;  %2830 = vrcp.f32 %v3719_v2  ;;  %v1557_v33 = vld [vmem:[#allocation2 + $0xd8] sm:$0xff]  ;;  %v2124_v15 = vand.u32 2147483648, %v3719_v2 }
 0x19a   : > { %1497 = vst.msk [vmem:[#allocation2 + $0xe0] sm:$0xff] %vm555_vm4, %v1465_v27  ;;  %v2101_v45 = vmul.f32 %v2825_v12, %v2100_v39  ;;  %v2096_v44 = vsel %vm2093_vm9, %v2095_v54, %v2091_v29  ;;  %v1022_v16 = vld [vmem:[#allocation2 + $0xf8] sm:$0x7f]  ;;  %v3736_v56 = vadd.f32 %v3733_v53, %v1557_v33  ;;  %v2122_v14 = vand.u32 2147483647, %v3719_v2 }
 0x19b   : > { %965 = vst.msk [vmem:[#allocation2 + $0x100] sm:$0xff] %vm555_vm4, %v931_v20  ;;  %v2271_v58 = vmul.f32 %v2096_v44, %v3657_v31  ;;  %v1151_v57 = vadd.f32 %v1117_v19, %v1022_v16  ;;  %vm2118_vm14 = vweird.f32 %v3719_v2  ;;  %v2125_v20 = vor.u32 1.1754944e-38, %v2124_v15 }
 0x19c   : > { %v2829_v41 = vpop.eup %2828  ;;  %v2102_v49 = vadd.f32 %v2825_v12, %v2101_v45  ;;  %v2664_v10 = vmul.f32 -1.442695, %v3736_v56  ;;  %v1258_v23 = vld [vmem:[#allocation2 + $0xf0] sm:$0xff]  ;;  %vm2123_vm5 = vcmp.eq.f32.partialorder %v2122_v14, 8.507059e+37 }
 0x19d   : > { %v3723_v36 = vpop.f32.mrf.mxu3  ;;  %v3728_v51 = vadd.f32 1.0, %v2829_v41  ;;  %v2305_v55 = vpack.c.bf16 %v2271_v58, %v2271_v58  ;;  %1183 = vst.msk [vmem:[#allocation2 + $0xf8] sm:$0x7f] %vm966_vm2, %v1151_v57 }
 0x19e   : > { %v2106_v61 = vsel %vm2105_vm10, %v2825_v12, %v2102_v49  ;;  %vm1528_vm10 = vcmask 254976  }
 0x19f   : > { %v896_v47 = vpop.f32.mrf.mxu1  ;;  %v1429_v59 = vpop.f32.mrf.mxu2  ;;  %2832 = vrcp.f32 %v3728_v51  ;;  %v2111_v0 = vsel %vm2108_vm11, %v2110_v52, %v2106_v61  ;;  %2340 = vst.msk [vmem:[%s3211_s25 + $0x5c] sm:$0xf] %vm2316_vm8, %v2305_v55  ;;  %v2139_v24 = vand.u32 2147483648, %v3728_v51  ;;  %v2137_v32 = vand.u32 2147483647, %v3728_v51 }
 0x1a0   : > { %v626_v31 = vld [vmem:[#allocation2 + $0x108] sm:$0x7f]  ;;  %v981_v8 = vpop.f32.mrf.mxu0  ;;  %v968_v30 = vld [vmem:[#allocation2 + $0x10f] sm:$0x1]  ;;  %v2272_v5 = vmul.f32 %v2111_v0, %v3667_v37  ;;  %v2831_v62 = vpop.eup %2830  ;;  %v1466_v13 = vadd.f32 %v1429_v59, %v1257_v35  ;;  %2834 = vpow2.f32 %v2664_v10  ;;  %vm2133_vm6 = vweird.f32 %v3728_v51 }
 0x1a1   : > { %v1558_v43 = vld [vmem:[#allocation2 + $0xe0] sm:$0xff]  ;;  %v932_v11 = vadd.f32 %v896_v47, %v626_v31  ;;  %v2114_v17 = vmul.f32 %v2831_v62, %v3719_v2  ;;  %vm2119_vm13 = vweird.f32 %v2831_v62  ;;  %v2140_v16 = vor.u32 1.1754944e-38, %v2139_v24 }
 0x1a2   : > { %v1184_v6 = vld [vmem:[#allocation2 + $0xff] sm:$0xff]  ;;  %v3746_v46 = vadd.f32 %v3733_v53, %v1558_v43  ;;  %v2306_v42 = vpack.c.bf16 %v2272_v5, %v2272_v5  ;;  %1498 = vst.msk [vmem:[#allocation2 + $0xe8] sm:$0xff] %vm555_vm4, %v1466_v13  ;;  %vm2120_vm15 = vmor %vm2118_vm14, %vm2119_vm13  ;;  %vm2138_vm9 = vcmp.eq.f32.partialorder %v2137_v32, 8.507059e+37 }
 0x1a3   : > { %v1219_v9 = vadd.f32 %v3048_v38, %v1184_v6  ;;  %967 = vst.msk [vmem:[#allocation2 + $0x108] sm:$0x7f] %vm966_vm2, %v932_v11  ;;  %v985_v38 = vadd.f32 %v981_v8, %v968_v30  ;;  %v2115_v19 = vsub.f32 1.0, %v2114_v17 }
 0x1a4   : > { %v2665_v63 = vmul.f32 -1.442695, %v3746_v46  ;;  %2341 = vst.msk [vmem:[%s3211_s25 + $0x60] sm:$0xf] %vm2316_vm8, %v2306_v42  ;;  %v1259_v61 = vld [vmem:[#allocation2 + $0xf8] sm:$0x3f] }
 0x1a5   : > { %1222 = vst.msk [vmem:[#allocation2 + $0xff] sm:$0xff] %vm555_vm4, %v1219_v9  ;;  %v3750_v37 = vpop.f32.mrf.mxu3  ;;  %v2833_v50 = vpop.eup %2832  ;;  %v2116_v21 = vmul.f32 %v2831_v62, %v2115_v19 }
 0x1a6   : > { %v2129_v22 = vmul.f32 %v2833_v50, %v3728_v51  ;;  %2836 = vpow2.f32 %v2665_v63  ;;  %987 = vst.msk [vmem:[#allocation2 + $0x10f] sm:$0x1] %vm986_vm12, %v985_v38  ;;  %v2835_v26 = vpop.eup %2834  ;;  %vm2134_vm0 = vweird.f32 %v2833_v50 }
 0x1a7   : > { %v1432_v12 = vpop.f32.mrf.mxu2  ;;  %v2117_v28 = vadd.f32 %v2831_v62, %v2116_v21  ;;  %v3765_v34 = vadd.f32 1.0, %v2835_v26  ;;  %vm2135_vm7 = vmor %vm2133_vm6, %vm2134_vm0 }
 0x1a8   : > { %v983_v25 = vpop.f32.mrf.mxu0  ;;  %v1467_v7 = vadd.f32 %v1432_v12, %v1258_v23  ;;  %v2130_v1 = vsub.f32 1.0, %v2129_v22 }
 0x1a9   : > { %v2121_v54 = vsel %vm2120_vm15, %v2831_v62, %v2117_v28  ;;  %2838 = vrcp.f32 %v3765_v34  ;;  %v2154_v11 = vand.u32 2147483648, %v3765_v34  ;;  %vm2148_vm3 = vweird.f32 %v3765_v34 }
 0x1aa   : > { %1499 = vst.msk [vmem:[#allocation2 + $0xf0] sm:$0xff] %vm555_vm4, %v1467_v7  ;;  %v2131_v27 = vmul.f32 %v2833_v50, %v2130_v1  ;;  %v1185_v29 = vld [vmem:[#allocation2 + $0x107] sm:$0xff]  ;;  %v2126_v4 = vsel %vm2123_vm5, %v2125_v20, %v2121_v54 }
 0x1ab   : > { %v2273_v44 = vmul.f32 %v2126_v4, %v3693_v3  ;;  %v1220_v33 = vadd.f32 %v3060_v48, %v1185_v29  ;;  %v2155_v19 = vor.u32 1.1754944e-38, %v2154_v11 }
 0x1ac   : > { %v1502_v39 = vld [vmem:[#allocation2 + $0xfe] sm:$0xff]  ;;  %v2837_v2 = vpop.eup %2836  ;;  %v2132_v41 = vadd.f32 %v2833_v50, %v2131_v27 }
 0x1ad   : > { %v1523_v40 = vadd.f32 %v3723_v36, %v1502_v39  ;;  %v3768_v45 = vpop.f32.mrf.mxu3  ;;  %v3774_v58 = vadd.f32 1.0, %v2837_v2  ;;  %v1559_v36 = vld [vmem:[#allocation2 + $0xe8] sm:$0xff]  ;;  %v2307_v52 = vpack.c.bf16 %v2273_v44, %v2273_v44  ;;  %1223 = vst.msk [vmem:[#allocation2 + $0x107] sm:$0xff] %vm555_vm4, %v1220_v33 }
 0x1ae   : > { %v2136_v49 = vsel %vm2135_vm7, %v2833_v50, %v2132_v41  ;;  %v3779_v47 = vadd.f32 %v3733_v53, %v1559_v36  ;;  %v1186_v51 = vld [vmem:[#allocation2 + $0x10f] sm:$0x1] }
 0x1af   : > { %1526 = vst.msk [vmem:[#allocation2 + $0xfe] sm:$0xff] %vm555_vm4, %v1523_v40  ;;  %v2141_v57 = vsel %vm2138_vm9, %v2140_v16, %v2136_v49  ;;  %v1434_v3 = vpop.f32.mrf.mxu2  ;;  %2840 = vrcp.f32 %v3774_v58  ;;  %v1221_v48 = vadd.f32 %v3070_v60, %v1186_v51  ;;  %v2839_v0 = vpop.eup %2838  ;;  %v2152_v60 = vand.u32 2147483647, %v3765_v34 }
 0x1b0   : > { %v2274_v31 = vmul.f32 %v2141_v57, %v3703_v18  ;;  %2342 = vst.msk [vmem:[%s3211_s25 + $0x64] sm:$0xf] %vm2316_vm8, %v2307_v52  ;;  %v2666_v8 = vmul.f32 -1.442695, %v3779_v47  ;;  %v1468_v30 = vadd.f32 %v1434_v3, %v1259_v61  ;;  %v2144_v18 = vmul.f32 %v2839_v0, %v3765_v34 }
 0x1b1   : > { %v1560_v59 = vld [vmem:[#allocation2 + $0xf0] sm:$0xff]  ;;  %1224 = vst.msk [vmem:[#allocation2 + $0x10f] sm:$0x1] %vm986_vm12, %v1221_v48  ;;  %vm2149_vm2 = vweird.f32 %v2839_v0  ;;  %vm2153_vm11 = vcmp.eq.f32.partialorder %v2152_v60, 8.507059e+37  ;;  %v2167_v50 = vand.u32 2147483647, %v3774_v58  ;;  %vm2163_vm14 = vweird.f32 %v3774_v58 }
 0x1b2   : > { %v3789_v55 = vadd.f32 %v3733_v53, %v1560_v59  ;;  %v2308_v6 = vpack.c.bf16 %v2274_v31, %v2274_v31  ;;  %2842 = vpow2.f32 %v2666_v8  ;;  %v2145_v9 = vsub.f32 1.0, %v2144_v18  ;;  %1501 = vst.msk [vmem:[#allocation2 + $0xf8] sm:$0x3f] %vm1500_vm1, %v1468_v30  ;;  %vm2150_vm12 = vmor %vm2148_vm3, %vm2149_vm2 }
 0x1b3   : > { %v2169_v15 = vand.u32 2147483648, %v3774_v58  ;;  %vm2168_vm15 = vcmp.eq.f32.partialorder %v2167_v50, 8.507059e+37 }
 0x1b4   : > { %2343 = vst.msk [vmem:[%s3211_s25 + $0x68] sm:$0xf] %vm2316_vm8, %v2308_v6  ;;  %v2667_v10 = vmul.f32 -1.442695, %v3789_v55  ;;  %v2146_v35 = vmul.f32 %v2839_v0, %v2145_v9  ;;  %v1503_v13 = vld [vmem:[#allocation2 + $0x106] sm:$0xff] }
 0x1b5   : > { %v1521_v5 = vpop.f32.mrf.mxu3  ;;  %v2841_v43 = vpop.eup %2840  ;;  %v1524_v42 = vadd.f32 %v3750_v37, %v1503_v13  ;;  %v2170_v20 = vor.u32 1.1754944e-38, %v2169_v15 }
 0x1b6   : > { %2844 = vpow2.f32 %v2667_v10  ;;  %v2159_v62 = vmul.f32 %v2841_v43, %v3774_v58  ;;  %v2147_v63 = vadd.f32 %v2839_v0, %v2146_v35  ;;  %vm2164_vm13 = vweird.f32 %v2841_v43 }
 0x1b7   : > { %1527 = vst.msk [vmem:[#allocation2 + $0x106] sm:$0xff] %vm555_vm4, %v1524_v42  ;;  %vm2165_vm4 = vmor %vm2163_vm14, %vm2164_vm13 }
 0x1b8   : > { %v2843_v17 = vpop.eup %2842  ;;  %v2160_v38 = vsub.f32 1.0, %v2159_v62  ;;  %v1504_v23 = vld [vmem:[#allocation2 + $0x10e] sm:$0x3]  ;;  %v2151_v12 = vsel %vm2150_vm12, %v2839_v0, %v2147_v63 }
 0x1b9   : > { %v1733_v22 = vadd.f32 1.0, %v2843_v17  ;;  %v1525_v37 = vadd.f32 %v3768_v45, %v1504_v23  ;;  %v2156_v14 = vsel %vm2153_vm11, %v2155_v19, %v2151_v12  ;;  %v1561_v7 = vld [vmem:[#allocation2 + $0xf8] sm:$0xff] }
 0x1ba   : > { %v2161_v25 = vmul.f32 %v2841_v43, %v2160_v38  ;;  %v2275_v1 = vmul.f32 %v2156_v14, %v3736_v56  ;;  %v3809_v24 = vadd.f32 %v3733_v53, %v1561_v7 }
 0x1bb   : > { %2846 = vrcp.f32 %v1733_v22  ;;  %1529 = vst.msk [vmem:[#allocation2 + $0x10e] sm:$0x3] %vm1528_vm10, %v1525_v37  ;;  %v2184_v58 = vand.u32 2147483648, %v1733_v22  ;;  %v2182_v33 = vand.u32 2147483647, %v1733_v22  ;;  %vm2178_vm5 = vweird.f32 %v1733_v22 }
 0x1bc   : > { %v2845_v21 = vpop.eup %2844  ;;  %v2162_v26 = vadd.f32 %v2841_v43, %v2161_v25  ;;  %v2309_v27 = vpack.c.bf16 %v2275_v1, %v2275_v1  ;;  %v2668_v54 = vmul.f32 -1.442695, %v3809_v24 }
 0x1bd   : > { %v1734_v28 = vadd.f32 1.0, %v2845_v21  ;;  %v2185_v31 = vor.u32 1.1754944e-38, %v2184_v58  ;;  %vm2183_vm9 = vcmp.eq.f32.partialorder %v2182_v33, 8.507059e+37 }
 0x1be   : > { %v2166_v32 = vsel %vm2165_vm4, %v2841_v43, %v2162_v26  ;;  %2344 = vst.msk [vmem:[%s3211_s25 + $0x6c] sm:$0xf] %vm2316_vm8, %v2309_v27  ;;  %v1562_v39 = vld [vmem:[#allocation2 + $0x100] sm:$0xff] }
 0x1bf   : > { %2848 = vrcp.f32 %v1734_v28  ;;  %v2171_v34 = vsel %vm2168_vm15, %v2170_v20, %v2166_v32  ;;  %v3816_v29 = vadd.f32 %v3733_v53, %v1562_v39  ;;  %v2199_v8 = vand.u32 2147483648, %v1734_v28 }
 0x1c0   : > { %v2276_v56 = vmul.f32 %v2171_v34, %v3746_v46  ;;  %2850 = vpow2.f32 %v2668_v54  ;;  %v2197_v61 = vand.u32 2147483647, %v1734_v28  ;;  %vm2193_vm1 = vweird.f32 %v1734_v28 }
 0x1c1   : > { %v2847_v40 = vpop.eup %2846  ;;  %v2669_v4 = vmul.f32 -1.442695, %v3816_v29  ;;  %v2200_v9 = vor.u32 1.1754944e-38, %v2199_v8 }
 0x1c2   : > { %v2310_v45 = vpack.c.bf16 %v2276_v56, %v2276_v56  ;;  %v2174_v2 = vmul.f32 %v2847_v40, %v1733_v22  ;;  %v1563_v41 = vld [vmem:[#allocation2 + $0x108] sm:$0xff]  ;;  %vm2179_vm0 = vweird.f32 %v2847_v40  ;;  %vm2198_vm3 = vcmp.eq.f32.partialorder %v2197_v61, 8.507059e+37 }
 0x1c3   : > { %v3822_v46 = vadd.f32 %v3733_v53, %v1563_v41  ;;  %2852 = vpow2.f32 %v2669_v4  ;;  %vm2180_vm6 = vmor %vm2178_vm5, %vm2179_vm0 }
 0x1c4   : > { %2345 = vst.msk [vmem:[%s3211_s25 + $0x70] sm:$0xf] %vm2316_vm8, %v2310_v45  ;;  %v2175_v16 = vsub.f32 1.0, %v2174_v2 }
 0x1c5   : > { %v2849_v44 = vpop.eup %2848  ;;  %v2670_v51 = vmul.f32 -1.442695, %v3822_v46 }
 0x1c6   : > { %v2189_v36 = vmul.f32 %v2849_v44, %v1734_v28  ;;  %v2176_v49 = vmul.f32 %v2847_v40, %v2175_v16  ;;  %v2851_v57 = vpop.eup %2850  ;;  %vm2194_vm7 = vweird.f32 %v2849_v44 }
 0x1c7   : > { %2854 = vpow2.f32 %v2670_v51  ;;  %v1735_v48 = vadd.f32 1.0, %v2851_v57  ;;  %vm2195_vm2 = vmor %vm2193_vm1, %vm2194_vm7 }
 0x1c8   : > { %v2190_v52 = vsub.f32 1.0, %v2189_v36  ;;  %v2177_v3 = vadd.f32 %v2847_v40, %v2176_v49 }
 0x1c9   : > { %v2853_v0 = vpop.eup %2852  ;;  %2856 = vrcp.f32 %v1735_v48  ;;  %v2214_v50 = vand.u32 2147483648, %v1735_v48  ;;  %v2212_v15 = vand.u32 2147483647, %v1735_v48  ;;  %vm2208_vm11 = vweird.f32 %v1735_v48 }
 0x1ca   : > { %v2191_v59 = vmul.f32 %v2849_v44, %v2190_v52  ;;  %v2181_v53 = vsel %vm2180_vm6, %v2847_v40, %v2177_v3  ;;  %v1736_v5 = vadd.f32 1.0, %v2853_v0 }
 0x1cb   : > { %v2186_v6 = vsel %vm2183_vm9, %v2185_v31, %v2181_v53  ;;  %v2215_v14 = vor.u32 1.1754944e-38, %v2214_v50  ;;  %vm2213_vm4 = vcmp.eq.f32.partialorder %v2212_v15, 8.507059e+37 }
 0x1cc   : > { %v2192_v30 = vadd.f32 %v2849_v44, %v2191_v59  ;;  %v2277_v18 = vmul.f32 %v2186_v6, %v3779_v47  ;;  %2858 = vrcp.f32 %v1736_v5  ;;  %v2229_v12 = vand.u32 2147483648, %v1736_v5 }
 0x1cd   : > { %v2855_v60 = vpop.eup %2854  ;;  %v2227_v21 = vand.u32 2147483647, %v1736_v5  ;;  %vm2223_vm14 = vweird.f32 %v1736_v5 }
 0x1ce   : > { %v2196_v10 = vsel %vm2195_vm2, %v2849_v44, %v2192_v30  ;;  %v2311_v43 = vpack.c.bf16 %v2277_v18, %v2277_v18  ;;  %v1737_v35 = vadd.f32 1.0, %v2855_v60  ;;  %v2230_v28 = vor.u32 1.1754944e-38, %v2229_v12 }
 0x1cf   : > { %v2201_v11 = vsel %vm2198_vm3, %v2200_v9, %v2196_v10  ;;  %v2857_v13 = vpop.eup %2856  ;;  %vm2228_vm5 = vcmp.eq.f32.partialorder %v2227_v21, 8.507059e+37 }
 0x1d0   : > { %2346 = vst.msk [vmem:[%s3211_s25 + $0x74] sm:$0xf] %vm2316_vm8, %v2311_v43  ;;  %v2278_v62 = vmul.f32 %v2201_v11, %v3789_v55  ;;  %2860 = vrcp.f32 %v1737_v35  ;;  %v2204_v17 = vmul.f32 %v2857_v13, %v1735_v48  ;;  %vm2209_vm10 = vweird.f32 %v2857_v13 }
 0x1d1   : > { %vm2210_vm13 = vmor %vm2208_vm11, %vm2209_vm10  ;;  %v2244_v20 = vand.u32 2147483648, %v1737_v35  ;;  %v2242_v34 = vand.u32 2147483647, %v1737_v35  ;;  %vm2238_vm6 = vweird.f32 %v1737_v35 }
 0x1d2   : > { %v2312_v42 = vpack.c.bf16 %v2278_v62, %v2278_v62  ;;  %v2859_v47 = vpop.eup %2858  ;;  %v2205_v63 = vsub.f32 1.0, %v2204_v17 }
 0x1d3   : > { %v2219_v38 = vmul.f32 %v2859_v47, %v1736_v5  ;;  %vm2224_vm12 = vweird.f32 %v2859_v47  ;;  %v2245_v4 = vor.u32 1.1754944e-38, %v2244_v20  ;;  %vm2243_vm9 = vcmp.eq.f32.partialorder %v2242_v34, 8.507059e+37 }
 0x1d4   : > { %2347 = vst.msk [vmem:[%s3211_s25 + $0x78] sm:$0xf] %vm2316_vm8, %v2312_v42  ;;  %v2206_v19 = vmul.f32 %v2857_v13, %v2205_v63  ;;  %vm2225_vm15 = vmor %vm2223_vm14, %vm2224_vm12 }
 0x1d5   : > { %v2220_v23 = vsub.f32 1.0, %v2219_v38 }
 0x1d6   : > { %v2861_v22 = vpop.eup %2860  ;;  %v2207_v37 = vadd.f32 %v2857_v13, %v2206_v19 }
 0x1d7   : > { %v2234_v25 = vmul.f32 %v2861_v22, %v1737_v35  ;;  %v2221_v55 = vmul.f32 %v2859_v47, %v2220_v23  ;;  %vm2239_vm0 = vweird.f32 %v2861_v22 }
 0x1d8   : > { %v2211_v1 = vsel %vm2210_vm13, %v2857_v13, %v2207_v37  ;;  %vm2240_vm7 = vmor %vm2238_vm6, %vm2239_vm0 }
 0x1d9   : > { %v2235_v7 = vsub.f32 1.0, %v2234_v25  ;;  %v2222_v26 = vadd.f32 %v2859_v47, %v2221_v55  ;;  %v2216_v27 = vsel %vm2213_vm4, %v2215_v14, %v2211_v1 }
 0x1da   : > { %v2279_v56 = vmul.f32 %v2216_v27, %v3809_v24 }
 0x1db   : > { %v2236_v32 = vmul.f32 %v2861_v22, %v2235_v7  ;;  %v2226_v39 = vsel %vm2225_vm15, %v2859_v47, %v2222_v26 }
 0x1dc   : > { %v2231_v54 = vsel %vm2228_vm5, %v2230_v28, %v2226_v39  ;;  %v2313_v45 = vpack.c.bf16 %v2279_v56, %v2279_v56 }
 0x1dd   : > { %v2237_v40 = vadd.f32 %v2861_v22, %v2236_v32  ;;  %v2280_v2 = vmul.f32 %v2231_v54, %v3816_v29 }
 0x1de   : > { %2348 = vst.msk [vmem:[%s3211_s25 + $0x7c] sm:$0xf] %vm2316_vm8, %v2313_v45 }
 0x1df   : > { %v2241_v41 = vsel %vm2240_vm7, %v2861_v22, %v2237_v40  ;;  %v2314_v44 = vpack.c.bf16 %v2280_v2, %v2280_v2 }
 0x1e0   : > { %v2246_v16 = vsel %vm2243_vm9, %v2245_v4, %v2241_v41 }
 0x1e1   : > { %v2281_v24 = vmul.f32 %v2246_v16, %v3822_v46  ;;  %2349 = vst.msk [vmem:[%s3211_s25 + $0x80] sm:$0xf] %vm2316_vm8, %v2314_v44 }
 0x1e3   : > { %v2315_v58 = vpack.c.bf16 %v2281_v24, %v2281_v24 }
 0x1e5   : > { %2350 = vst.msk [vmem:[%s3211_s25 + $0x84] sm:$0xf] %vm2316_vm8, %v2315_v58 }
 0x1e6 PF: > { %s14_s17 = sadd.s32 1, %s2887_s17   ;;  %s3858_s15 = smov %s2883_s16 }
 0x1e7   : > { %p11_p5 = scmp.ge.s32.totalorder %s14_s17, 4   ;;  %s3859_s16 = smov %s3861_s18 }
 0x1e9   :  { %13 = sbr.rel (!%p11_p5) target bundleno = 2 (0x2), region = 72 }

// kernel: yolox_forward.8
= control target key start
LH: loop header
LB: loop body
LE: loop exit
PB: predicated region body
PF: predicated region fallthrough
CT: control target
= control target key end

     0   :  { %s1666_s15 = smov 0   ;;  %s1668_s16 = smov 0   ;;  %s2027_s0 = inlined_call_operand.vmem [shape: bf16[2,2,72,128], index: 0, kind: input, shape index: {}, may-alias: {0,1}]   ;;  %s2028_s1 = inlined_call_operand.vmem [shape: bf16[2,2,72,128], index: 1, kind: input, shape index: {}, may-alias: {0,1}]   ;;  %s2029_s2 = inlined_call_operand.vmem [shape: bf16[4,128,64], index: 2, kind: input, shape index: {}]   ;;  %s2030_s3 = inlined_call_operand.vmem [shape: f32[1,64], index: 3, kind: input, shape index: {}]   ;;  %s2031_s4 = inlined_call_operand.vmem [shape: bf16[2,1,72,64], index: 4, kind: output, shape index: {}]  }
   0x1   :  { %s1670_s17 = smov 0  }
   0x2 LB: > { %s26_s18 = sadd.s32 1, %s1635_s16  ;;  %p1282_p0 = scmp.ge.s32.totalorder %s1639_s17, 1  ;;  %s1639_s17 = sphi %s1670_s17, %s14_s17   ;;  %s1635_s16 = sphi %s1668_s16, %s2033_s16   ;;  %s1631_s15 = sphi %s1666_s15, %s2032_s15  }
   0x3   : > { %p28_p1 = scmp.ge.s32.totalorder %s26_s18, 2  ;;  %p202_p2 = scmp.lt.s32.totalorder %s1639_s17, 3 }
   0x5   : > { %s2035_s18 = smov (%p28_p1, %s26_s18), 0  ;;  %p203_p3 = pnand %p1282_p0, %p202_p2 }
   0x6   : > { %p246_p4 = scmp.lt.s32.totalorder (!%p203_p3), %s1631_s15, 1 }
   0x7   : > { %206 = sbr.rel (%p203_p3) target bundleno = 315 (0x13b), region = 36 }
   0xc   : > { %v1487_v0 = vld [vmem:[%s2029_s2 + $0x38] sm:$0xff]  ;;  %v1486_v3 = vld [vmem:[%s2029_s2 + $0x30] sm:$0xff]  ;;  %s2037_s15 = smov (!%p246_p4, %s1631_s15), 1  ;;  %v1485_v6 = vld [vmem:[%s2029_s2 + $0x28] sm:$0xff]  ;;  %vm447_vm0 = vsmask.f32 7424 }
   0xd   : > { %v1503_v1 = vld [vmem:[%s2029_s2 + $0xb8] sm:$0xff]  ;;  %378 = vmatpush.bf16.msra.mxu0 %v1487_v0  ;;  %v1502_v4 = vld [vmem:[%s2029_s2 + $0xb0] sm:$0xff]  ;;  %v1501_v7 = vld [vmem:[%s2029_s2 + $0xa8] sm:$0xff]  ;;  %s1552_s19 = smul.u32 72, %s2037_s15  ;;  %vm817_vm1 = vcmask 1046528   ;;  %vm411_vm2 = vcmask 523264  }
   0xe   : > { %v1693_v2 = vld [vmem:[%s2029_s2 + $0x78] sm:$0xff]  ;;  %774 = vmatpush.bf16.msra.mxu2 %v1503_v1  ;;  %v1705_v5 = vld [vmem:[%s2029_s2 + $0x70] sm:$0xff]  ;;  %721 = vmatpush.bf16.msra.mxu3 %v1503_v1  ;;  %v1719_v8 = vld [vmem:[%s2029_s2 + $0x68] sm:$0xff]  ;;  %vm590_vm5 = vcmask 522240   ;;  %s1554_s27 = smul.u32 36, %s2037_s15  ;;  %vm1155_vm8 = vcmask 519168  }
   0xf   : > { %540 = vmatpush.bf16.msra.mxu1 %v1693_v2  ;;  %v1484_v9 = vld [vmem:[%s2029_s2 + $0x20] sm:$0xff]  ;;  %v1483_v12 = vld [vmem:[%s2029_s2 + $0x18] sm:$0xff]  ;;  %s1745_s28 = scalar_lea.vmem %s2027_s0, %s1552_s19  ;;  %v1482_v17 = vld [vmem:[%s2029_s2 + $0x10] sm:$0xff]  ;;  %s1478_s22 = sadd.s32 36, %s1552_s19  ;;  %vm607_vm11 = vcmask 516096  }
  0x10   : > { %v1500_v10 = vld [vmem:[%s2029_s2 + $0xa0] sm:$0xff]  ;;  %v1499_v13 = vld [vmem:[%s2029_s2 + $0x98] sm:$0xff]  ;;  %v1498_v18 = vld [vmem:[%s2029_s2 + $0x90] sm:$0xff]  ;;  %s1802_s29 = scalar_lea.vmem %s2028_s1, %s1478_s22  ;;  %s1940_s30 = scalar_lea.vmem %s2031_s4, %s1554_s27 }
  0x11   : > { %379 = vmatpush.bf16.msra.mxu0 %v1486_v3  ;;  %v1732_v11 = vld [vmem:[%s2029_s2 + $0x60] sm:$0xff]  ;;  %v1751_v14 = vld [vmem:[%s2029_s2 + $0x58] sm:$0xff]  ;;  %v1767_v19 = vld [vmem:[%s2029_s2 + $0x50] sm:$0xff] }
  0x12   : > { %775 = vmatpush.bf16.msra.mxu2 %v1502_v4  ;;  %722 = vmatpush.bf16.msra.mxu3 %v1502_v4  ;;  %v1513_v15 = vld [vmem:[%s1745_s28] sm:$0xff]   ;;  %v1770_v21 = vld [vmem:[%s1745_s28 + $0x8] sm:$0xff]   ;;  %v1511_v35 = vld [vmem:[%s2029_s2 + $0xf8] sm:$0xff] }
  0x13   : > { %541 = vmatpush.bf16.msra.mxu1 %v1705_v5  ;;  %v1755_v16 = vld [vmem:[%s1745_s28 + $0x4] sm:$0xff]   ;;  %v451_v20 = vshll.u32 %v1513_v15, 16  ;;  %v1773_v22 = vld [vmem:[%s1745_s28 + $0xc] sm:$0xff]   ;;  %v449_v27 = vshrl.u32 %v1513_v15, 16  ;;  %v456_v29 = vshll.u32 %v1770_v21, 16  ;;  %v1830_v47 = vld [vmem:[%s1745_s28 + $0x14] sm:$0xff]  }
  0x14   : > { %v641_v23 = vshll.u32 %v1755_v16, 16  ;;  %v1481_v24 = vld [vmem:[%s2029_s2 + $0x8] sm:$0xff]  ;;  %v639_v30 = vshrl.u32 %v1755_v16, 16  ;;  %v646_v32 = vshll.u32 %v1773_v22, 16  ;;  %v1480_v33 = vld [vmem:[%s2029_s2] sm:$0xff]  ;;  %v1510_v42 = vld [vmem:[%s2029_s2 + $0xf0] sm:$0xff] }
  0x15   : > { %380 = vmatpush.bf16.msra.mxu0 %v1485_v6  ;;  %v1497_v25 = vld [vmem:[%s2029_s2 + $0x88] sm:$0xff]  ;;  %v453_v28 = vrot.slane %v451_v20, 1  ;;  %v1496_v34 = vld [vmem:[%s2029_s2 + $0x80] sm:$0xff]  ;;  %v458_v38 = vrot.slane %v456_v29, 1  ;;  %v1529_v46 = vld [vmem:[%s1745_s28 + $0x10] sm:$0xff]   ;;  %v460_v49 = vshrl.u32 %v1770_v21, 16 }
  0x16   : > { %776 = vmatpush.bf16.msra.mxu2 %v1501_v7  ;;  %723 = vmatpush.bf16.msra.mxu3 %v1501_v7  ;;  %v1786_v26 = vld [vmem:[%s2029_s2 + $0x48] sm:$0xff]  ;;  %v643_v31 = vrot.slane %v641_v23, 1  ;;  %v1811_v36 = vld [vmem:[%s2029_s2 + $0x40] sm:$0xff]  ;;  %v648_v40 = vrot.slane %v646_v32, 1  ;;  %v464_v50 = vshll.u32 %v1529_v46, 16  ;;  %v650_v51 = vshrl.u32 %v1773_v22, 16 }
  0x17   : > { %542 = vmatpush.bf16.msra.mxu1 %v1719_v8  ;;  %v454_v37 = vor.u32 %v453_v28, %v449_v27  ;;  %v1814_v41 = vld [vmem:[%s1802_s29] sm:$0xff]  ;;  %v1509_v45 = vld [vmem:[%s2029_s2 + $0xe8] sm:$0xff]  ;;  %v654_v52 = vshll.u32 %v1830_v47, 16  ;;  %v1507_v53 = vld [vmem:[%s2029_s2 + $0xd8] sm:$0xff]  ;;  %v462_v54 = vor.u32 %v460_v49, %v458_v38  ;;  %v818_v4 = vrot.slane %v1755_v16, 1 }
  0x18   : > { %v644_v39 = vor.u32 %v643_v31, %v639_v30  ;;  %v1508_v48 = vld [vmem:[%s2029_s2 + $0xe0] sm:$0xff]  ;;  %v466_v55 = vrot.slane %v464_v50, 1  ;;  %v652_v56 = vor.u32 %v650_v51, %v648_v40  ;;  %v1530_v58 = vld [vmem:[%s1745_s28 + $0x18] sm:$0xff]   ;;  %v1506_v60 = vld [vmem:[%s2029_s2 + $0xd0] sm:$0xff]  ;;  %v468_v6 = vshrl.u32 %v1529_v46, 16 }
  0x19   : > { %381 = vmatpush.bf16.msra.mxu0 %v1484_v9  ;;  %v459_v43 = vsel %vm447_vm0, %v454_v37, %v458_v38  ;;  %v656_v57 = vrot.slane %v654_v52, 1  ;;  %v283_v59 = vld [vmem:[%s1745_s28 + $0x20] sm:$0xf]  ;;  %v1527_v63 = vunpack.c.h.b16 %v1530_v58  ;;  %v1505_v1 = vld [vmem:[%s2029_s2 + $0xc8] sm:$0xff]  ;;  %v472_v7 = vshll.u32 %v1530_v58, 16 }
  0x1a   : > { %777 = vmatpush.bf16.msra.mxu2 %v1500_v10  ;;  %724 = vmatpush.bf16.msra.mxu3 %v1500_v10  ;;  %v649_v44 = vsel %vm447_vm0, %v644_v39, %v648_v40  ;;  %v467_v61 = vsel %vm447_vm0, %v462_v54, %v466_v55  ;;  %v319_v0 = vunpack.c.l.b16 %v283_v59  ;;  %v1504_v3 = vld [vmem:[%s2029_s2 + $0xc0] sm:$0xff] }
  0x1b   : > { %543 = vmatpush.bf16.msra.mxu1 %v1732_v11  ;;  %v657_v62 = vsel %vm447_vm0, %v652_v56, %v656_v57  ;;  %v284_v31 = vld [vmem:[%s1802_s29] sm:$0xf] }
  0x1d   : > { %382 = vmatpush.bf16.msra.mxu0 %v1483_v12  ;;  %v474_v12 = vrot.slane %v472_v7, 1 }
  0x1e   : > { %778 = vmatpush.bf16.msra.mxu2 %v1499_v13  ;;  %725 = vmatpush.bf16.msra.mxu3 %v1499_v13 }
  0x1f   : > { %544 = vmatpush.bf16.msra.mxu1 %v1751_v14 }
  0x21   : > { %383 = vmatpush.bf16.msra.mxu0 %v1482_v17  ;;  %v324_v17 = vpack.c.b16 %v319_v0, %v319_v0 }
  0x22   : > { %779 = vmatpush.bf16.msra.mxu2 %v1498_v18  ;;  %726 = vmatpush.bf16.msra.mxu3 %v1498_v18  ;;  %v821_v18 = vrot.slane %v1830_v47, 1 }
  0x23   : > { %545 = vmatpush.bf16.msra.mxu1 %v1767_v19  ;;  %v480_v20 = vshll.u32 %v324_v17, 16  ;;  %v484_v29 = vshrl.u32 %v324_v17, 16 }
  0x25   : > { %384 = vmatpush.bf16.msra.mxu0 %v1481_v24  ;;  %v482_v23 = vrot.slane %v480_v20, 1 }
  0x26   : > { %780 = vmatpush.bf16.msra.mxu2 %v1497_v25  ;;  %727 = vmatpush.bf16.msra.mxu3 %v1497_v25 }
  0x27   : > { %546 = vmatpush.bf16.msra.mxu1 %v1786_v26  ;;  %v486_v30 = vor.u32 %v484_v29, %v482_v23 }
  0x29   : > { %385 = vmatpush.bf16.msra.mxu0 %v1480_v33 }
  0x2a   : > { %781 = vmatpush.bf16.msra.mxu2 %v1496_v34  ;;  %728 = vmatpush.bf16.msra.mxu3 %v1496_v34 }
  0x2b   : > { %547 = vmatpush.bf16.msra.mxu1 %v1811_v36 }
  0x2c   : > { %386 = vmatmul.bf16.vlgmr.msra.gmra.mxu0 %v1513_v15 }
  0x2d   : > { %593 = vmatpush.bf16.msrb.mxu0 %v1693_v2  ;;  %782 = vmatmul.bf16.vlgmr.msra.gmra.mxu2 %v1814_v41  ;;  %v637_v2 = vpack.c.b16 %v319_v0, %v1527_v63 }
  0x2e   : > { %877 = vmatpush.bf16.msrb.mxu2 %v1511_v35  ;;  %925 = vmatpush.bf16.msrb.mxu3 %v1511_v35 }
  0x2f   : > { %548 = vmatmul.bf16.vlgmr.msra.gmra.mxu1 %v459_v43  ;;  %729 = vmatmul.bf16.vlgmr.msra.gmra.mxu3 %v649_v44  ;;  %v662_v9 = vshll.u32 %v637_v2, 16  ;;  %v666_v24 = vshrl.u32 %v637_v2, 16  ;;  %v823_v27 = vrot.slane %v637_v2, 1 }
  0x31   : > { %594 = vmatpush.bf16.msrb.mxu0 %v1705_v5  ;;  %v819_v5 = vrot.slane %v1773_v22, 1  ;;  %v824_v28 = vsel %vm817_vm1, %v821_v18, %v823_v27 }
  0x32   : > { %878 = vmatpush.bf16.msrb.mxu2 %v1510_v42  ;;  %926 = vmatpush.bf16.msrb.mxu3 %v1510_v42 }
  0x33   : > { %v820_v10 = vsel %vm817_vm1, %v818_v4, %v819_v5  ;;  %v1894_v4 = vld [vmem:[%s2030_s3] ss:$0 sm:$0xff] }
  0x35   : > { %595 = vmatpush.bf16.msrb.mxu0 %v1719_v8  ;;  %v658_v8 = vshrl.u32 %v1830_v47, 16 }
  0x36   : > { %879 = vmatpush.bf16.msrb.mxu2 %v1509_v45  ;;  %927 = vmatpush.bf16.msrb.mxu3 %v1509_v45 }
  0x37   : > { %v660_v13 = vor.u32 %v658_v8, %v656_v57 }
  0x39   : > { %596 = vmatpush.bf16.msrb.mxu0 %v1732_v11  ;;  %v470_v11 = vor.u32 %v468_v6, %v466_v55 }
  0x3a   : > { %880 = vmatpush.bf16.msrb.mxu2 %v1508_v48  ;;  %928 = vmatpush.bf16.msrb.mxu3 %v1508_v48 }
  0x3b   : > { %v475_v15 = vsel %vm447_vm0, %v470_v11, %v474_v12 }
  0x3c   : > { %391 = vmatmul.bf16.gmra.mxu0 %v1770_v21  ;;  %v822_v21 = vsel %vm817_vm1, %v819_v5, %v821_v18 }
  0x3d   : > { %597 = vmatpush.bf16.msrb.mxu0 %v1751_v14  ;;  %v664_v14 = vrot.slane %v662_v9, 1 }
  0x3e   : > { %881 = vmatpush.bf16.msrb.mxu2 %v1507_v53  ;;  %929 = vmatpush.bf16.msrb.mxu3 %v1507_v53 }
  0x3f   : > { %553 = vmatmul.bf16.gmra.mxu1 %v467_v61  ;;  %734 = vmatmul.bf16.gmra.mxu3 %v657_v62  ;;  %v665_v16 = vsel %vm447_vm0, %v660_v13, %v664_v14 }
  0x41   : > { %598 = vmatpush.bf16.msrb.mxu0 %v1767_v19  ;;  %v476_v19 = vshrl.u32 %v1530_v58, 16 }
  0x42   : > { %882 = vmatpush.bf16.msrb.mxu2 %v1506_v60  ;;  %930 = vmatpush.bf16.msrb.mxu3 %v1506_v60 }
  0x43   : > { %v478_v22 = vor.u32 %v476_v19, %v474_v12 }
  0x45   : > { %599 = vmatpush.bf16.msrb.mxu0 %v1786_v26  ;;  %v483_v25 = vsel %vm447_vm0, %v478_v22, %v482_v23  ;;  %v668_v26 = vor.u32 %v666_v24, %v664_v14 }
  0x46   : > { %883 = vmatpush.bf16.msrb.mxu2 %v1505_v1  ;;  %931 = vmatpush.bf16.msrb.mxu3 %v1505_v1 }
  0x49   : > { %600 = vmatpush.bf16.msrb.mxu0 %v1811_v36 }
  0x4a   : > { %884 = vmatpush.bf16.msrb.mxu2 %v1504_v3  ;;  %932 = vmatpush.bf16.msrb.mxu3 %v1504_v3 }
  0x4c   : > { %396 = vmatmul.bf16.gmra.mxu0 %v1529_v46 }
  0x4d   : > { %885 = vmatmul.bf16.vlgmr.msrb.gmra.mxu2 %v820_v10 }
  0x4f   : > { %558 = vmatmul.bf16.gmra.mxu1 %v475_v15  ;;  %739 = vmatmul.bf16.gmra.mxu3 %v665_v16 }
  0x5c   : > { %401 = vmatmul.bf16.gmra.mxu0 %v1530_v58 }
  0x5d   : > { %890 = vmatmul.bf16.gmra.mxu2 %v822_v21 }
  0x5f   : > { %563 = vmatmul.bf16.gmra.mxu1 %v483_v25  ;;  %744 = vmatmul.bf16.gmra.mxu3 %v668_v26 }
  0x6c   : > { %406 = vmatmul.bf16.gmra.mxu0 %v324_v17 }
  0x6d   : > { %895 = vmatmul.bf16.gmra.mxu2 %v824_v28 }
  0x6f   : > { %568 = vmatmul.bf16.gmra.mxu1 %v486_v30  ;;  %933 = vmatmul.bf16.vlgmr.msrb.gmra.mxu3 %v1814_v41 }
  0x7c   : > { %601 = vmatmul.bf16.vlgmr.msrb.gmra.mxu0 %v284_v31 }
  0x7d   : > { %900 = vmatmul.bf16.gmra.mxu2 %v823_v27 }
  0xa9   : > { %v387_v32 = vpop.f32.mrf.mxu0 }
  0xaa   : > { %412 = vst.msk [vmem:[#allocation2] sm:$0xff] %vm411_vm2, %v387_v32 }
  0xac   : > { %v549_v33 = vpop.f32.mrf.mxu1 }
  0xb0   : > { %v1876_v39 = vpop.f32.mrf.mxu2 }
  0xb1   : > { %v389_v34 = vpop.f32.mrf.mxu0  ;;  %v438_v35 = vld [vmem:[#allocation2] sm:$0xff] }
  0xb2   : > { %413 = vst.msk [vmem:[#allocation2 + $0x8] sm:$0xff] %vm411_vm2, %v389_v34  ;;  %v573_v36 = vadd.f32 %v549_v33, %v438_v35  ;;  %v730_v37 = vpop.f32.mrf.mxu3 }
  0xb4   : > { %v551_v38 = vpop.f32.mrf.mxu1  ;;  %582 = vst.msk [vmem:[#allocation2] sm:$0xff] %vm411_vm2, %v573_v36 }
  0xb8   : > { %v1882_v50 = vpop.f32.mrf.mxu2 }
  0xb9   : > { %v392_v40 = vpop.f32.mrf.mxu0  ;;  %v439_v41 = vld [vmem:[#allocation2 + $0x8] sm:$0xff] }
  0xba   : > { %414 = vst.msk [vmem:[#allocation2 + $0x10] sm:$0xff] %vm411_vm2, %v392_v40  ;;  %v574_v42 = vadd.f32 %v551_v38, %v439_v41  ;;  %v732_v43 = vpop.f32.mrf.mxu3 }
  0xbb   : > { %v626_v44 = vld [vmem:[#allocation2] sm:$0xff] }
  0xbc   : > { %v554_v45 = vpop.f32.mrf.mxu1  ;;  %583 = vst.msk [vmem:[#allocation2 + $0x8] sm:$0xff] %vm411_vm2, %v574_v42  ;;  %v750_v46 = vadd.f32 %v730_v37, %v626_v44 }
  0xbe   : > { %758 = vst.msk [vmem:[#allocation2] sm:$0xff] %vm411_vm2, %v750_v46 }
  0xc1   : > { %v394_v47 = vpop.f32.mrf.mxu0  ;;  %v440_v48 = vld [vmem:[#allocation2 + $0x10] sm:$0xff] }
  0xc2   : > { %415 = vst.msk [vmem:[#allocation2 + $0x18] sm:$0xff] %vm411_vm2, %v394_v47  ;;  %v575_v49 = vadd.f32 %v554_v45, %v440_v48  ;;  %v735_v51 = vpop.f32.mrf.mxu3 }
  0xc3   : > { %v627_v52 = vld [vmem:[#allocation2 + $0x8] sm:$0xff] }
  0xc4   : > { %v556_v53 = vpop.f32.mrf.mxu1  ;;  %584 = vst.msk [vmem:[#allocation2 + $0x10] sm:$0xff] %vm411_vm2, %v575_v49  ;;  %v751_v54 = vadd.f32 %v732_v43, %v627_v52 }
  0xc5   : > { %v809_v62 = vld [vmem:[#allocation2] sm:$0xff] }
  0xc6   : > { %759 = vst.msk [vmem:[#allocation2 + $0x8] sm:$0xff] %vm411_vm2, %v751_v54 }
  0xc9   : > { %v397_v55 = vpop.f32.mrf.mxu0  ;;  %v441_v56 = vld [vmem:[#allocation2 + $0x18] sm:$0xff] }
  0xca   : > { %416 = vst.msk [vmem:[#allocation2 + $0x20] sm:$0xff] %vm411_vm2, %v397_v55  ;;  %v576_v57 = vadd.f32 %v556_v53, %v441_v56  ;;  %v737_v60 = vpop.f32.mrf.mxu3 }
  0xcb   : > { %v628_v58 = vld [vmem:[#allocation2 + $0x10] sm:$0xff] }
  0xcc   : > { %v559_v59 = vpop.f32.mrf.mxu1  ;;  %585 = vst.msk [vmem:[#allocation2 + $0x18] sm:$0xff] %vm411_vm2, %v576_v57  ;;  %v752_v61 = vadd.f32 %v735_v51, %v628_v58 }
  0xcd   : > { %v810_v8 = vld [vmem:[#allocation2 + $0x8] sm:$0xff] }
  0xce   : > { %760 = vst.msk [vmem:[#allocation2 + $0x10] sm:$0xff] %vm411_vm2, %v752_v61 }
  0xd0   : > { %v886_v63 = vpop.f32.mrf.mxu2 }
  0xd1   : > { %v906_v0 = vadd.f32 %v886_v63, %v809_v62  ;;  %v399_v1 = vpop.f32.mrf.mxu0  ;;  %v442_v2 = vld [vmem:[#allocation2 + $0x20] sm:$0xff] }
  0xd2   : > { %417 = vst.msk [vmem:[#allocation2 + $0x28] sm:$0xff] %vm411_vm2, %v399_v1  ;;  %v577_v3 = vadd.f32 %v559_v59, %v442_v2  ;;  %v740_v11 = vpop.f32.mrf.mxu3 }
  0xd3   : > { %914 = vst.msk [vmem:[#allocation2] sm:$0xff] %vm411_vm2, %v906_v0  ;;  %v629_v5 = vld [vmem:[#allocation2 + $0x18] sm:$0xff] }
  0xd4   : > { %v561_v6 = vpop.f32.mrf.mxu1  ;;  %586 = vst.msk [vmem:[#allocation2 + $0x20] sm:$0xff] %vm411_vm2, %v577_v3  ;;  %v753_v7 = vadd.f32 %v737_v60, %v629_v5 }
  0xd5   : > { %v811_v21 = vld [vmem:[#allocation2 + $0x10] sm:$0xff] }
  0xd6   : > { %761 = vst.msk [vmem:[#allocation2 + $0x18] sm:$0xff] %vm411_vm2, %v753_v7 }
  0xd8   : > { %v888_v9 = vpop.f32.mrf.mxu2 }
  0xd9   : > { %v907_v10 = vadd.f32 %v888_v9, %v810_v8  ;;  %v402_v15 = vpop.f32.mrf.mxu0  ;;  %v443_v16 = vld [vmem:[#allocation2 + $0x28] sm:$0xff] }
  0xda   : > { %v944_v12 = vld [vmem:[#allocation2] sm:$0xff]  ;;  %418 = vst.msk [vmem:[#allocation2 + $0x30] sm:$0xff] %vm411_vm2, %v402_v15  ;;  %v578_v17 = vadd.f32 %v561_v6, %v443_v16  ;;  %v742_v26 = vpop.f32.mrf.mxu3 }
  0xdb   : > { %v1899_v13 = vadd.f32 %v1894_v4, %v944_v12  ;;  %915 = vst.msk [vmem:[#allocation2 + $0x8] sm:$0xff] %vm411_vm2, %v907_v10  ;;  %v630_v18 = vld [vmem:[#allocation2 + $0x20] sm:$0xff] }
  0xdc   : > { %v564_v19 = vpop.f32.mrf.mxu1  ;;  %587 = vst.msk [vmem:[#allocation2 + $0x28] sm:$0xff] %vm411_vm2, %v578_v17  ;;  %v754_v20 = vadd.f32 %v740_v11, %v630_v18 }
  0xdd   : > { %v1466_v14 = vmul.f32 -1.442695, %v1899_v13  ;;  %v812_v35 = vld [vmem:[#allocation2 + $0x18] sm:$0xff] }
  0xde   : > { %762 = vst.msk [vmem:[#allocation2 + $0x20] sm:$0xff] %vm411_vm2, %v754_v20 }
  0xdf   : > { %1581 = vpow2.f32 %v1466_v14 }
  0xe0   : > { %v891_v22 = vpop.f32.mrf.mxu2 }
  0xe1   : > { %v908_v23 = vadd.f32 %v891_v22, %v811_v21  ;;  %v404_v29 = vpop.f32.mrf.mxu0  ;;  %v444_v30 = vld [vmem:[#allocation2 + $0x30] sm:$0xff] }
  0xe2   : > { %v945_v24 = vld [vmem:[#allocation2 + $0x8] sm:$0xff]  ;;  %419 = vst.msk [vmem:[#allocation2 + $0x38] sm:$0xff] %vm411_vm2, %v404_v29  ;;  %v579_v32 = vadd.f32 %v564_v19, %v444_v30  ;;  %v745_v46 = vpop.f32.mrf.mxu3 }
  0xe3   : > { %v1907_v25 = vadd.f32 %v1894_v4, %v945_v24  ;;  %916 = vst.msk [vmem:[#allocation2 + $0x10] sm:$0xff] %vm411_vm2, %v908_v23  ;;  %v631_v33 = vld [vmem:[#allocation2 + $0x28] sm:$0xff] }
  0xe4   : > { %v566_v34 = vpop.f32.mrf.mxu1  ;;  %588 = vst.msk [vmem:[#allocation2 + $0x30] sm:$0xff] %vm411_vm2, %v579_v32  ;;  %v755_v37 = vadd.f32 %v742_v26, %v631_v33 }
  0xe5   : > { %v1582_v27 = vpop.eup %1581  ;;  %v1467_v28 = vmul.f32 -1.442695, %v1907_v25  ;;  %v813_v54 = vld [vmem:[#allocation2 + $0x20] sm:$0xff] }
  0xe6   : > { %v993_v31 = vadd.f32 1.0, %v1582_v27  ;;  %763 = vst.msk [vmem:[#allocation2 + $0x28] sm:$0xff] %vm411_vm2, %v755_v37 }
  0xe7   : > { %1583 = vpow2.f32 %v1467_v28 }
  0xe8   : > { %1585 = vrcp.f32 %v993_v31  ;;  %v893_v36 = vpop.f32.mrf.mxu2  ;;  %v1013_v59 = vand.u32 2147483648, %v993_v31  ;;  %v1011_v61 = vand.u32 2147483647, %v993_v31  ;;  %vm1007_vm4 = vweird.f32 %v993_v31 }
  0xe9   : > { %v909_v38 = vadd.f32 %v893_v36, %v812_v35  ;;  %v407_v44 = vpop.f32.mrf.mxu0  ;;  %v445_v45 = vld [vmem:[#allocation2 + $0x38] sm:$0xff] }
  0xea   : > { %v946_v40 = vld [vmem:[#allocation2 + $0x10] sm:$0xff]  ;;  %420 = vst.msk [vmem:[#allocation2 + $0x40] sm:$0xff] %vm411_vm2, %v407_v44  ;;  %v580_v49 = vadd.f32 %v566_v34, %v445_v45  ;;  %v1014_v6 = vor.u32 1.1754944e-38, %v1013_v59  ;;  %vm1012_vm7 = vcmp.eq.f32.partialorder %v1011_v61, 8.507059e+37  ;;  %v747_v14 = vpop.f32.mrf.mxu3 }
  0xeb   : > { %v1914_v41 = vadd.f32 %v1894_v4, %v946_v40  ;;  %917 = vst.msk [vmem:[#allocation2 + $0x18] sm:$0xff] %vm411_vm2, %v909_v38  ;;  %v632_v52 = vld [vmem:[#allocation2 + $0x30] sm:$0xff] }
  0xec   : > { %v569_v53 = vpop.f32.mrf.mxu1  ;;  %589 = vst.msk [vmem:[#allocation2 + $0x38] sm:$0xff] %vm411_vm2, %v580_v49  ;;  %v756_v57 = vadd.f32 %v745_v46, %v632_v52 }
  0xed   : > { %v1584_v42 = vpop.eup %1583  ;;  %v1468_v43 = vmul.f32 -1.442695, %v1914_v41  ;;  %v814_v20 = vld [vmem:[#allocation2 + $0x28] sm:$0xff] }
  0xee   : > { %v1586_v47 = vpop.eup %1585  ;;  %v1919_v48 = vadd.f32 1.0, %v1584_v42  ;;  %764 = vst.msk [vmem:[#allocation2 + $0x30] sm:$0xff] %vm411_vm2, %v756_v57 }
  0xef   : > { %v1003_v51 = vmul.f32 %v1586_v47, %v993_v31  ;;  %1587 = vpow2.f32 %v1468_v43  ;;  %vm1008_vm3 = vweird.f32 %v1586_v47 }
  0xf0   : > { %1589 = vrcp.f32 %v1919_v48  ;;  %v896_v55 = vpop.f32.mrf.mxu2  ;;  %vm1009_vm6 = vmor %vm1007_vm4, %vm1008_vm3  ;;  %v1028_v21 = vand.u32 2147483648, %v1919_v48  ;;  %v1026_v27 = vand.u32 2147483647, %v1919_v48  ;;  %vm1022_vm10 = vweird.f32 %v1919_v48 }
  0xf1   : > { %v1004_v56 = vsub.f32 1.0, %v1003_v51  ;;  %v910_v58 = vadd.f32 %v896_v55, %v813_v54  ;;  %v409_v2 = vpop.f32.mrf.mxu0  ;;  %v446_v3 = vld [vmem:[#allocation2 + $0x40] sm:$0x7f]  ;;  %v592_v30 = vld [vmem:[#allocation2 + $0x47] sm:$0x1]  ;;  %vm921_vm3 = vcmask 521216  }
  0xf2   : > { %v947_v62 = vld [vmem:[#allocation2 + $0x18] sm:$0xff]  ;;  %v581_v9 = vadd.f32 %v569_v53, %v446_v3  ;;  %v1029_v33 = vor.u32 1.1754944e-38, %v1028_v21  ;;  %vm1027_vm13 = vcmp.eq.f32.partialorder %v1026_v27, 8.507059e+37 }
  0xf3   : > { %v1005_v60 = vmul.f32 %v1586_v47, %v1004_v56  ;;  %v1926_v63 = vadd.f32 %v1894_v4, %v947_v62  ;;  %918 = vst.msk [vmem:[#allocation2 + $0x20] sm:$0xff] %vm411_vm2, %v910_v58  ;;  %v633_v12 = vld [vmem:[#allocation2 + $0x38] sm:$0x7f]  ;;  %v934_v62 = vpop.f32.mrf.mxu3 }
  0xf4   : > { %v571_v15 = vpop.f32.mrf.mxu1  ;;  %591 = vst.msk [vmem:[#allocation2 + $0x40] sm:$0x7f] %vm590_vm5, %v581_v9  ;;  %v757_v22 = vadd.f32 %v747_v14, %v633_v12 }
  0xf5   : > { %v1588_v0 = vpop.eup %1587  ;;  %v1006_v1 = vadd.f32 %v1586_v47, %v1005_v60  ;;  %v1469_v8 = vmul.f32 -1.442695, %v1926_v63  ;;  %v815_v45 = vld [vmem:[#allocation2 + $0x30] sm:$0xff] }
  0xf6   : > { %v1590_v5 = vpop.eup %1589  ;;  %v1930_v7 = vadd.f32 1.0, %v1588_v0  ;;  %765 = vst.msk [vmem:[#allocation2 + $0x38] sm:$0x7f] %vm590_vm5, %v757_v22 }
  0xf7   : > { %v1010_v10 = vsel %vm1009_vm6, %v1586_v47, %v1006_v1  ;;  %v1018_v11 = vmul.f32 %v1590_v5, %v1919_v48  ;;  %vm1023_vm9 = vweird.f32 %v1590_v5 }
  0xf8   : > { %v1015_v16 = vsel %vm1012_vm7, %v1014_v6, %v1010_v10  ;;  %1591 = vrcp.f32 %v1930_v7  ;;  %v898_v17 = vpop.f32.mrf.mxu2  ;;  %vm1024_vm12 = vmor %vm1022_vm10, %vm1023_vm9  ;;  %v1043_v51 = vand.u32 2147483648, %v1930_v7  ;;  %v1041_v54 = vand.u32 2147483647, %v1930_v7 }
  0xf9   : > { %v1137_v18 = vmul.f32 %v1015_v16, %v1899_v13  ;;  %v1019_v19 = vsub.f32 1.0, %v1018_v11  ;;  %1593 = vpow2.f32 %v1469_v8  ;;  %v911_v23 = vadd.f32 %v898_v17, %v814_v20  ;;  %v602_v31 = vpop.f32.mrf.mxu0 }
  0xfa   : > { %v948_v13 = vld [vmem:[#allocation2 + $0x20] sm:$0xff]  ;;  %v606_v35 = vadd.f32 %v602_v31, %v592_v30  ;;  %vm1037_vm15 = vweird.f32 %v1930_v7  ;;  %v1044_v57 = vor.u32 1.1754944e-38, %v1043_v51  ;;  %vm1042_vm1 = vcmp.eq.f32.partialorder %v1041_v54, 8.507059e+37 }
  0xfb   : > { %v1146_v24 = vpack.c.bf16 %v1137_v18, %v1137_v18  ;;  %v1020_v26 = vmul.f32 %v1590_v5, %v1019_v19  ;;  %v1945_v28 = vadd.f32 %v1894_v4, %v948_v13  ;;  %919 = vst.msk [vmem:[#allocation2 + $0x28] sm:$0xff] %vm411_vm2, %v911_v23  ;;  %v766_v40 = vld [vmem:[#allocation2 + $0x3f] sm:$0xff]  ;;  %v936_v13 = vpop.f32.mrf.mxu3  ;;  %vm942_vm9 = vcmask 517120  }
  0xfc   : > { %v788_v44 = vadd.f32 %v1876_v39, %v766_v40  ;;  %608 = vst.msk [vmem:[#allocation2 + $0x47] sm:$0x1] %vm607_vm11, %v606_v35 }
  0xfd   : > { %1156 = vst.msk [vmem:[%s1940_s30] sm:$0xf] %vm1155_vm8, %v1146_v24  ;;  %v1021_v29 = vadd.f32 %v1590_v5, %v1020_v26  ;;  %v1470_v34 = vmul.f32 -1.442695, %v1945_v28 }
  0xfe   : > { %v1592_v32 = vpop.eup %1591  ;;  %790 = vst.msk [vmem:[#allocation2 + $0x3f] sm:$0xff] %vm411_vm2, %v788_v44 }
  0xff   : > { %v1594_v36 = vpop.eup %1593  ;;  %v1025_v37 = vsel %vm1024_vm12, %v1590_v5, %v1021_v29  ;;  %v1033_v38 = vmul.f32 %v1592_v32, %v1930_v7  ;;  %1595 = vpow2.f32 %v1470_v34  ;;  %vm1038_vm14 = vweird.f32 %v1592_v32 }
 0x100   : > { %v1030_v42 = vsel %vm1027_vm13, %v1029_v33, %v1025_v37  ;;  %v1954_v43 = vadd.f32 1.0, %v1594_v36  ;;  %v901_v46 = vpop.f32.mrf.mxu2  ;;  %vm1039_vm0 = vmor %vm1037_vm15, %vm1038_vm14 }
 0x101   : > { %v1138_v47 = vmul.f32 %v1030_v42, %v1907_v25  ;;  %v1034_v48 = vsub.f32 1.0, %v1033_v38  ;;  %v912_v49 = vadd.f32 %v901_v46, %v815_v45  ;;  %v604_v55 = vpop.f32.mrf.mxu0 }
 0x102   : > { %1597 = vrcp.f32 %v1954_v43  ;;  %v949_v25 = vld [vmem:[#allocation2 + $0x28] sm:$0xff]  ;;  %v1056_v17 = vand.u32 2147483647, %v1954_v43  ;;  %vm1052_vm5 = vweird.f32 %v1954_v43 }
 0x103   : > { %v1147_v52 = vpack.c.bf16 %v1138_v47, %v1138_v47  ;;  %v1035_v53 = vmul.f32 %v1592_v32, %v1034_v48  ;;  %920 = vst.msk [vmem:[#allocation2 + $0x30] sm:$0xff] %vm411_vm2, %v912_v49  ;;  %v1968_v58 = vadd.f32 %v1894_v4, %v949_v25  ;;  %v767_v61 = vld [vmem:[#allocation2 + $0x47] sm:$0x1] }
 0x104   : > { %v789_v3 = vadd.f32 %v1882_v50, %v767_v61  ;;  %v816_v50 = vld [vmem:[#allocation2 + $0x38] sm:$0x3f]  ;;  %vm1057_vm7 = vcmp.eq.f32.partialorder %v1056_v17, 8.507059e+37 }
 0x105   : > { %1157 = vst.msk [vmem:[%s1940_s30 + $0x4] sm:$0xf] %vm1155_vm8, %v1147_v52  ;;  %v1036_v39 = vadd.f32 %v1592_v32, %v1035_v53  ;;  %v1596_v56 = vpop.eup %1595  ;;  %v1471_v2 = vmul.f32 -1.442695, %v1968_v58  ;;  %v923_v7 = vld [vmem:[#allocation2 + $0x3e] sm:$0xff] }
 0x106   : > { %v1970_v60 = vadd.f32 1.0, %v1596_v56  ;;  %791 = vst.msk [vmem:[#allocation2 + $0x47] sm:$0x1] %vm607_vm11, %v789_v3  ;;  %v939_v14 = vadd.f32 %v934_v62, %v923_v7 }
 0x107   : > { %v1040_v59 = vsel %vm1039_vm0, %v1592_v32, %v1036_v39 }
 0x108   : > { %v1598_v0 = vpop.eup %1597  ;;  %v1045_v1 = vsel %vm1042_vm1, %v1044_v57, %v1040_v59  ;;  %1599 = vrcp.f32 %v1970_v60  ;;  %v903_v8 = vpop.f32.mrf.mxu2  ;;  %941 = vst.msk [vmem:[#allocation2 + $0x3e] sm:$0xff] %vm411_vm2, %v939_v14  ;;  %v1073_v33 = vand.u32 2147483648, %v1970_v60  ;;  %v1071_v35 = vand.u32 2147483647, %v1970_v60 }
 0x109   : > { %v1139_v5 = vmul.f32 %v1045_v1, %v1914_v41  ;;  %v1048_v6 = vmul.f32 %v1598_v0, %v1954_v43  ;;  %1601 = vpow2.f32 %v1471_v2  ;;  %v1058_v41 = vand.u32 2147483648, %v1954_v43 }
 0x10a   : > { %v950_v9 = vld [vmem:[#allocation2 + $0x30] sm:$0xff]  ;;  %v913_v15 = vadd.f32 %v903_v8, %v816_v50  ;;  %vm1053_vm4 = vweird.f32 %v1598_v0  ;;  %vm1067_vm10 = vweird.f32 %v1970_v60  ;;  %v1074_v43 = vor.u32 1.1754944e-38, %v1073_v33 }
 0x10b   : > { %v1148_v10 = vpack.c.bf16 %v1139_v5, %v1139_v5  ;;  %v1049_v11 = vsub.f32 1.0, %v1048_v6  ;;  %v1979_v12 = vadd.f32 %v1894_v4, %v950_v9  ;;  %vm1054_vm6 = vmor %vm1052_vm5, %vm1053_vm4  ;;  %v1059_v22 = vor.u32 1.1754944e-38, %v1058_v41 }
 0x10c   : > { %922 = vst.msk [vmem:[#allocation2 + $0x38] sm:$0x3f] %vm921_vm3, %v913_v15  ;;  %vm1072_vm12 = vcmp.eq.f32.partialorder %v1071_v35, 8.507059e+37 }
 0x10d   : > { %1158 = vst.msk [vmem:[%s1940_s30 + $0x8] sm:$0xf] %vm1155_vm8, %v1148_v10  ;;  %v1050_v16 = vmul.f32 %v1598_v0, %v1049_v11  ;;  %v1472_v18 = vmul.f32 -1.442695, %v1979_v12  ;;  %v924_v27 = vld [vmem:[#allocation2 + $0x46] sm:$0x3] }
 0x10e   : > { %v1600_v19 = vpop.eup %1599  ;;  %v940_v31 = vadd.f32 %v936_v13, %v924_v27 }
 0x10f   : > { %v1051_v20 = vadd.f32 %v1598_v0, %v1050_v16  ;;  %1603 = vpow2.f32 %v1472_v18  ;;  %v1602_v21 = vpop.eup %1601  ;;  %v1063_v23 = vmul.f32 %v1600_v19, %v1970_v60  ;;  %vm1068_vm2 = vweird.f32 %v1600_v19 }
 0x110   : > { %v998_v26 = vadd.f32 1.0, %v1602_v21  ;;  %943 = vst.msk [vmem:[#allocation2 + $0x46] sm:$0x3] %vm942_vm9, %v940_v31  ;;  %vm1069_vm11 = vmor %vm1067_vm10, %vm1068_vm2 }
 0x111   : > { %v1055_v24 = vsel %vm1054_vm6, %v1598_v0, %v1051_v20  ;;  %v1064_v30 = vsub.f32 1.0, %v1063_v23 }
 0x112   : > { %v1060_v29 = vsel %vm1057_vm7, %v1059_v22, %v1055_v24  ;;  %1605 = vrcp.f32 %v998_v26  ;;  %v1088_v39 = vand.u32 2147483648, %v998_v26  ;;  %v1086_v56 = vand.u32 2147483647, %v998_v26 }
 0x113   : > { %v1140_v32 = vmul.f32 %v1060_v29, %v1926_v63  ;;  %v1065_v34 = vmul.f32 %v1600_v19, %v1064_v30  ;;  %v951_v42 = vld [vmem:[#allocation2 + $0x38] sm:$0xff]  ;;  %vm1082_vm14 = vweird.f32 %v998_v26 }
 0x114   : > { %v1996_v63 = vadd.f32 %v1894_v4, %v951_v42  ;;  %v1089_v61 = vor.u32 1.1754944e-38, %v1088_v39  ;;  %vm1087_vm0 = vcmp.eq.f32.partialorder %v1086_v56, 8.507059e+37 }
 0x115   : > { %v1604_v36 = vpop.eup %1603  ;;  %v1149_v37 = vpack.c.bf16 %v1140_v32, %v1140_v32  ;;  %v1066_v38 = vadd.f32 %v1600_v19, %v1065_v34 }
 0x116   : > { %v999_v40 = vadd.f32 1.0, %v1604_v36  ;;  %v1473_v47 = vmul.f32 -1.442695, %v1996_v63 }
 0x117   : > { %1159 = vst.msk [vmem:[%s1940_s30 + $0xc] sm:$0xf] %vm1155_vm8, %v1149_v37  ;;  %v1070_v44 = vsel %vm1069_vm11, %v1600_v19, %v1066_v38  ;;  %v952_v51 = vld [vmem:[#allocation2 + $0x40] sm:$0xff] }
 0x118   : > { %1607 = vrcp.f32 %v999_v40  ;;  %v1606_v45 = vpop.eup %1605  ;;  %v1075_v46 = vsel %vm1072_vm12, %v1074_v43, %v1070_v44  ;;  %v2001_v54 = vadd.f32 %v1894_v4, %v952_v51  ;;  %v1103_v4 = vand.u32 2147483648, %v999_v40 }
 0x119   : > { %v1141_v48 = vmul.f32 %v1075_v46, %v1945_v28  ;;  %v1078_v49 = vmul.f32 %v1606_v45, %v998_v26  ;;  %1609 = vpow2.f32 %v1473_v47  ;;  %vm1083_vm13 = vweird.f32 %v1606_v45 }
 0x11a   : > { %v1474_v57 = vmul.f32 -1.442695, %v2001_v54  ;;  %vm1084_vm15 = vmor %vm1082_vm14, %vm1083_vm13  ;;  %v1101_v5 = vand.u32 2147483647, %v999_v40  ;;  %vm1097_vm3 = vweird.f32 %v999_v40  ;;  %v1104_v10 = vor.u32 1.1754944e-38, %v1103_v4 }
 0x11b   : > { %v1150_v52 = vpack.c.bf16 %v1141_v48, %v1141_v48  ;;  %v1079_v53 = vsub.f32 1.0, %v1078_v49 }
 0x11c   : > { %1611 = vpow2.f32 %v1474_v57  ;;  %vm1102_vm5 = vcmp.eq.f32.partialorder %v1101_v5, 8.507059e+37 }
 0x11d   : > { %1160 = vst.msk [vmem:[%s1940_s30 + $0x10] sm:$0xf] %vm1155_vm8, %v1150_v52  ;;  %v1080_v55 = vmul.f32 %v1606_v45, %v1079_v53 }
 0x11e   : > { %v1608_v25 = vpop.eup %1607 }
 0x11f   : > { %v1093_v59 = vmul.f32 %v1608_v25, %v999_v40  ;;  %v1081_v60 = vadd.f32 %v1606_v45, %v1080_v55  ;;  %v1610_v28 = vpop.eup %1609  ;;  %vm1098_vm1 = vweird.f32 %v1608_v25 }
 0x120   : > { %v1000_v1 = vadd.f32 1.0, %v1610_v28  ;;  %vm1099_vm4 = vmor %vm1097_vm3, %vm1098_vm1 }
 0x121   : > { %v1094_v62 = vsub.f32 1.0, %v1093_v59  ;;  %v1085_v0 = vsel %vm1084_vm15, %v1606_v45, %v1081_v60 }
 0x122   : > { %v1090_v2 = vsel %vm1087_vm0, %v1089_v61, %v1085_v0  ;;  %1613 = vrcp.f32 %v1000_v1  ;;  %v1612_v8 = vpop.eup %1611  ;;  %v1118_v18 = vand.u32 2147483648, %v1000_v1  ;;  %v1116_v21 = vand.u32 2147483647, %v1000_v1 }
 0x123   : > { %v1095_v3 = vmul.f32 %v1608_v25, %v1094_v62  ;;  %v1142_v6 = vmul.f32 %v1090_v2, %v1968_v58  ;;  %v1001_v14 = vadd.f32 1.0, %v1612_v8  ;;  %vm1112_vm7 = vweird.f32 %v1000_v1 }
 0x124   : > { %v1119_v24 = vor.u32 1.1754944e-38, %v1118_v18  ;;  %vm1117_vm2 = vcmp.eq.f32.partialorder %v1116_v21, 8.507059e+37 }
 0x125   : > { %v1096_v7 = vadd.f32 %v1608_v25, %v1095_v3  ;;  %v1151_v9 = vpack.c.bf16 %v1142_v6, %v1142_v6  ;;  %1615 = vrcp.f32 %v1001_v14  ;;  %v1133_v27 = vand.u32 2147483648, %v1001_v14 }
 0x126   : > { %v1131_v30 = vand.u32 2147483647, %v1001_v14  ;;  %vm1127_vm11 = vweird.f32 %v1001_v14 }
 0x127   : > { %v1100_v11 = vsel %vm1099_vm4, %v1608_v25, %v1096_v7  ;;  %1161 = vst.msk [vmem:[%s1940_s30 + $0x14] sm:$0xf] %vm1155_vm8, %v1151_v9  ;;  %v1134_v34 = vor.u32 1.1754944e-38, %v1133_v27 }
 0x128   : > { %v1105_v50 = vsel %vm1102_vm5, %v1104_v10, %v1100_v11  ;;  %v1614_v15 = vpop.eup %1613  ;;  %vm1132_vm13 = vcmp.eq.f32.partialorder %v1131_v30, 8.507059e+37 }
 0x129   : > { %v1143_v41 = vmul.f32 %v1105_v50, %v1979_v12  ;;  %v1108_v58 = vmul.f32 %v1614_v15, %v1000_v1  ;;  %vm1113_vm6 = vweird.f32 %v1614_v15 }
 0x12a   : > { %vm1114_vm9 = vmor %vm1112_vm7, %vm1113_vm6 }
 0x12b   : > { %v1152_v16 = vpack.c.bf16 %v1143_v41, %v1143_v41  ;;  %v1109_v17 = vsub.f32 1.0, %v1108_v58  ;;  %v1616_v19 = vpop.eup %1615 }
 0x12c   : > { %v1123_v22 = vmul.f32 %v1616_v19, %v1001_v14  ;;  %vm1128_vm10 = vweird.f32 %v1616_v19 }
 0x12d   : > { %1162 = vst.msk [vmem:[%s1940_s30 + $0x18] sm:$0xf] %vm1155_vm8, %v1152_v16  ;;  %v1110_v20 = vmul.f32 %v1614_v15, %v1109_v17  ;;  %vm1129_vm12 = vmor %vm1127_vm11, %vm1128_vm10 }
 0x12e   : > { %v1124_v26 = vsub.f32 1.0, %v1123_v22 }
 0x12f   : > { %v1111_v23 = vadd.f32 %v1614_v15, %v1110_v20 }
 0x130   : > { %v1125_v29 = vmul.f32 %v1616_v19, %v1124_v26 }
 0x131   : > { %v1115_v12 = vsel %vm1114_vm9, %v1614_v15, %v1111_v23 }
 0x132   : > { %v1120_v13 = vsel %vm1117_vm2, %v1119_v24, %v1115_v12  ;;  %v1126_v32 = vadd.f32 %v1616_v19, %v1125_v29 }
 0x133   : > { %v1144_v31 = vmul.f32 %v1120_v13, %v1996_v63 }
 0x134   : > { %v1130_v35 = vsel %vm1129_vm12, %v1616_v19, %v1126_v32 }
 0x135   : > { %v1153_v33 = vpack.c.bf16 %v1144_v31, %v1144_v31  ;;  %v1135_v36 = vsel %vm1132_vm13, %v1134_v34, %v1130_v35 }
 0x136   : > { %v1145_v37 = vmul.f32 %v1135_v36, %v2001_v54 }
 0x137   : > { %1163 = vst.msk [vmem:[%s1940_s30 + $0x1c] sm:$0xf] %vm1155_vm8, %v1153_v33 }
 0x138   : > { %v1154_v38 = vpack.c.bf16 %v1145_v37, %v1145_v37 }
 0x13a   : > { %1164 = vst.msk [vmem:[%s1940_s30 + $0x20] sm:$0xf] %vm1155_vm8, %v1154_v38 }
 0x13b PF: > { %s14_s17 = sadd.s32 1, %s1639_s17   ;;  %s2032_s15 = smov %s1635_s16 }
 0x13c   : > { %p11_p5 = scmp.ge.s32.totalorder %s14_s17, 4   ;;  %s2033_s16 = smov %s2035_s18 }
 0x13e   :  { %13 = sbr.rel (!%p11_p5) target bundleno = 2 (0x2), region = 72 }

// kernel: yolox_forward.9
= control target key start
LH: loop header
LB: loop body
LE: loop exit
PB: predicated region body
PF: predicated region fallthrough
CT: control target
= control target key end

     0   :  { %s1868_s15 = smov 0   ;;  %s1870_s16 = smov 0   ;;  %s2315_s0 = inlined_call_operand.vmem [shape: bf16[2,2,24,256], index: 0, kind: input, shape index: {}, may-alias: {0,1}]   ;;  %s2316_s1 = inlined_call_operand.vmem [shape: bf16[2,2,24,256], index: 1, kind: input, shape index: {}, may-alias: {0,1}]   ;;  %s2317_s2 = inlined_call_operand.vmem [shape: bf16[4,256,128], index: 2, kind: input, shape index: {}]   ;;  %s2318_s3 = inlined_call_operand.vmem [shape: f32[1,128], index: 3, kind: input, shape index: {}]   ;;  %s2319_s4 = inlined_call_operand.vmem [shape: bf16[2,1,24,128], index: 4, kind: output, shape index: {}]  }
   0x1   :  { %s1872_s17 = smov 0  }
   0x2 LB: > { %s26_s18 = sadd.s32 1, %s1837_s16  ;;  %p1337_p0 = scmp.ge.s32.totalorder %s1841_s17, 1  ;;  %s1841_s17 = sphi %s1872_s17, %s14_s17   ;;  %s1837_s16 = sphi %s1870_s16, %s2321_s16   ;;  %s1833_s15 = sphi %s1868_s15, %s2320_s15  }
   0x3   : > { %p28_p1 = scmp.ge.s32.totalorder %s26_s18, 2  ;;  %p202_p2 = scmp.lt.s32.totalorder %s1841_s17, 3 }
   0x5   : > { %s2323_s18 = smov (%p28_p1, %s26_s18), 0  ;;  %p203_p3 = pnand %p1337_p0, %p202_p2 }
   0x6   : > { %p246_p4 = scmp.lt.s32.totalorder (!%p203_p3), %s1833_s15, 1 }
   0x7   : > { %206 = sbr.rel (%p203_p3) target bundleno = 314 (0x13a), region = 36 }
   0xc   : > { %v1717_v0 = vld [vmem:[%s2317_s2 + $0x38] sm:$0xff]  ;;  %v1716_v4 = vld [vmem:[%s2317_s2 + $0x30] sm:$0xff]  ;;  %s2325_s15 = smov (!%p246_p4, %s1833_s15), 1  ;;  %v1715_v8 = vld [vmem:[%s2317_s2 + $0x28] sm:$0xff]  ;;  %vm499_vm0 = vsmask.f32 7424 }
   0xd   : > { %v1725_v1 = vld [vmem:[%s2317_s2 + $0x78] sm:$0xff]  ;;  %424 = vmatpush.bf16.msra.mxu0 %v1717_v0  ;;  %v1724_v5 = vld [vmem:[%s2317_s2 + $0x70] sm:$0xff]  ;;  %s1779_s9 = smul.u32 48, %s2325_s15  ;;  %v1723_v9 = vld [vmem:[%s2317_s2 + $0x68] sm:$0xff]  ;;  %vm744_vm1 = vsmask.f32 5376 }
   0xe   : > { %v1895_v2 = vld [vmem:[%s2317_s2 + $0xb8] sm:$0xff]  ;;  %442 = vmatpush.bf16.msra.mxu1 %v1725_v1  ;;  %v1915_v6 = vld [vmem:[%s2317_s2 + $0xb0] sm:$0xff]  ;;  %v1934_v10 = vld [vmem:[%s2317_s2 + $0xa8] sm:$0xff]  ;;  %vm966_vm2 = vcmask 1044480   ;;  %s1780_s27 = smul.u32 12, %s2325_s15 }
   0xf   : > { %v1900_v3 = vld [vmem:[%s2317_s2 + $0xf8] sm:$0xff]  ;;  %630 = vmatpush.bf16.msra.mxu2 %v1895_v2  ;;  %v1920_v7 = vld [vmem:[%s2317_s2 + $0xf0] sm:$0xff]  ;;  %v1939_v11 = vld [vmem:[%s2317_s2 + $0xe8] sm:$0xff]  ;;  %s254_s24 = scalar_lea.vmem %s2315_s0, %s1779_s9  ;;  %s1707_s22 = sadd.s32 24, %s1779_s9 }
  0x10   : > { %648 = vmatpush.bf16.msra.mxu3 %v1900_v3  ;;  %v1714_v12 = vld [vmem:[%s2317_s2 + $0x20] sm:$0xff]  ;;  %v1709_v17 = vld [vmem:[%s254_s24 + $0x4] sm:$0xf0]  ;;  %v1345_v19 = vld [vmem:[%s254_s24 + $0x8] sm:$0xf0]  ;;  %s264_s28 = scalar_lea.vmem %s2316_s1, %s1707_s22  ;;  %s274_s30 = scalar_lea.vmem %s2319_s4, %s1780_s27 }
  0x11   : > { %425 = vmatpush.bf16.msra.mxu0 %v1716_v4  ;;  %v1722_v13 = vld [vmem:[%s2317_s2 + $0x60] sm:$0xff]  ;;  %v277_v20 = vld [vmem:[%s254_s24 + $0x10] sm:$0xff]  ;;  %v1713_v21 = vld [vmem:[%s2317_s2 + $0x18] sm:$0xff] }
  0x12   : > { %443 = vmatpush.bf16.msra.mxu1 %v1724_v5  ;;  %v1955_v14 = vld [vmem:[%s2317_s2 + $0xa0] sm:$0xff]  ;;  %v1721_v22 = vld [vmem:[%s2317_s2 + $0x58] sm:$0xff]  ;;  %v318_v27 = vunpack.c.l.b16 %v277_v20  ;;  %v319_v28 = vunpack.c.h.b16 %v277_v20  ;;  %v1712_v29 = vld [vmem:[%s2317_s2 + $0x10] sm:$0xff] }
  0x13   : > { %631 = vmatpush.bf16.msra.mxu2 %v1915_v6  ;;  %v1962_v15 = vld [vmem:[%s2317_s2 + $0xe0] sm:$0xff]  ;;  %v1975_v23 = vld [vmem:[%s2317_s2 + $0x98] sm:$0xff]  ;;  %v1720_v30 = vld [vmem:[%s2317_s2 + $0x50] sm:$0xff] }
  0x14   : > { %649 = vmatpush.bf16.msra.mxu3 %v1920_v7  ;;  %v1343_v16 = vld [vmem:[%s254_s24] sm:$0xf]  ;;  %v1708_v18 = vld [vmem:[%s254_s24 + $0x4] sm:$0xf]  ;;  %v1980_v24 = vld [vmem:[%s2317_s2 + $0xd8] sm:$0xff]  ;;  %v2004_v33 = vpack.c.b16 %v318_v27, %v318_v27  ;;  %v2007_v35 = vpack.c.b16 %v319_v28, %v319_v28 }
  0x15   : > { %426 = vmatpush.bf16.msra.mxu0 %v1715_v8  ;;  %v1982_v25 = vor.u32 %v1709_v17, %v1343_v16  ;;  %v1984_v26 = vor.u32 %v1708_v18, %v1345_v19  ;;  %v1997_v31 = vld [vmem:[%s2317_s2 + $0x90] sm:$0xff]  ;;  %v1711_v37 = vld [vmem:[%s2317_s2 + $0x8] sm:$0xff]  ;;  %v1710_v47 = vld [vmem:[%s2317_s2] sm:$0xff] }
  0x16   : > { %444 = vmatpush.bf16.msra.mxu1 %v1723_v9  ;;  %v2002_v32 = vld [vmem:[%s2317_s2 + $0xd0] sm:$0xff]  ;;  %v1719_v38 = vld [vmem:[%s2317_s2 + $0x48] sm:$0xff]  ;;  %v508_v44 = vshll.u32 %v2004_v33, 16  ;;  %v520_v46 = vshll.u32 %v2007_v35, 16  ;;  %v1718_v48 = vld [vmem:[%s2317_s2 + $0x40] sm:$0xff]  ;;  %v524_v63 = vshrl.u32 %v2004_v33, 16 }
  0x17   : > { %632 = vmatpush.bf16.msra.mxu2 %v1934_v10  ;;  %v503_v34 = vshll.u32 %v1982_v25, 16  ;;  %v515_v36 = vshll.u32 %v1984_v26, 16  ;;  %v501_v39 = vshrl.u32 %v1982_v25, 16  ;;  %v513_v40 = vshrl.u32 %v1984_v26, 16  ;;  %v2023_v41 = vld [vmem:[%s2317_s2 + $0x88] sm:$0xff]  ;;  %v2047_v49 = vld [vmem:[%s2317_s2 + $0x80] sm:$0xff] }
  0x18   : > { %650 = vmatpush.bf16.msra.mxu3 %v1939_v11  ;;  %v2028_v42 = vld [vmem:[%s2317_s2 + $0xc8] sm:$0xff]  ;;  %v2052_v50 = vld [vmem:[%s2317_s2 + $0xc0] sm:$0xff]  ;;  %v510_v52 = vrot.slane %v508_v44, 1  ;;  %v522_v54 = vrot.slane %v520_v46, 1  ;;  %v2067_v57 = vld [vmem:[%s2317_s2 + $0x138] sm:$0xff]  ;;  %v527_v0 = vshrl.u32 %v2007_v35, 16 }
  0x19   : > { %427 = vmatpush.bf16.msra.mxu0 %v1714_v12  ;;  %v505_v43 = vrot.slane %v503_v34, 1  ;;  %v517_v45 = vrot.slane %v515_v36, 1  ;;  %v2072_v58 = vld [vmem:[%s2317_s2 + $0x178] sm:$0xff]  ;;  %v2083_v59 = vld [vmem:[%s2317_s2 + $0x130] sm:$0xff]  ;;  %v2097_v61 = vld [vmem:[%s2317_s2 + $0x128] sm:$0xff]  ;;  %v752_v17 = vrot.slane %v513_v40, 2 }
  0x1a   : > { %445 = vmatpush.bf16.msra.mxu1 %v1722_v13  ;;  %v2088_v60 = vld [vmem:[%s2317_s2 + $0x170] sm:$0xff]  ;;  %v2102_v62 = vld [vmem:[%s2317_s2 + $0x168] sm:$0xff]  ;;  %v2113_v1 = vld [vmem:[%s2317_s2 + $0x120] sm:$0xff]  ;;  %v529_v4 = vor.u32 %v527_v0, %v522_v54  ;;  %v745_v13 = vrot.slane %v501_v39, 2  ;;  %v755_v16 = vrot.slane %v527_v0, 2  ;;  %v753_v18 = vrot.slane %v515_v36, 3 }
  0x1b   : > { %633 = vmatpush.bf16.msra.mxu2 %v1955_v14  ;;  %v506_v51 = vor.u32 %v505_v43, %v501_v39  ;;  %v518_v53 = vor.u32 %v517_v45, %v513_v40  ;;  %v2127_v5 = vld [vmem:[%s2317_s2 + $0x118] sm:$0xff]  ;;  %v2150_v8 = vld [vmem:[%s2317_s2 + $0x150] sm:$0xff]  ;;  %v278_v9 = vld [vmem:[%s264_s28] sm:$0xff]  ;;  %v756_v19 = vrot.slane %v520_v46, 3  ;;  %v967_v36 = vrot.slane %v1982_v25, 3 }
  0x1c   : > { %651 = vmatpush.bf16.msra.mxu3 %v1962_v15  ;;  %v2167_v12 = vld [vmem:[%s2317_s2 + $0x148] sm:$0xff]  ;;  %v674_v20 = vunpack.c.l.b16 %v278_v9  ;;  %v754_v28 = vor.u32 %v753_v18, %v752_v17  ;;  %v1764_v40 = vld [vmem:[%s2317_s2 + $0x1b0] sm:$0xff]  ;;  %v971_v43 = vrot.slane %v2007_v35, 3  ;;  %v1762_v46 = vld [vmem:[%s2317_s2 + $0x1a0] sm:$0xff] }
  0x1d   : > { %428 = vmatpush.bf16.msra.mxu0 %v1713_v21  ;;  %v511_v55 = vsel %vm499_vm0, %v506_v51, %v510_v52  ;;  %v523_v56 = vsel %vm499_vm0, %v518_v53, %v522_v54  ;;  %v675_v21 = vunpack.c.h.b16 %v278_v9  ;;  %v1771_v45 = vld [vmem:[%s2317_s2 + $0x1e8] sm:$0xff]  ;;  %v1768_v51 = vld [vmem:[%s2317_s2 + $0x1d0] sm:$0xff]  ;;  %v1758_v54 = vld [vmem:[%s2317_s2 + $0x180] sm:$0xff] }
  0x1e   : > { %446 = vmatpush.bf16.msra.mxu1 %v1721_v22  ;;  %v2188_v22 = vld [vmem:[%s2317_s2 + $0x100] sm:$0xff]  ;;  %v1767_v53 = vld [vmem:[%s2317_s2 + $0x1c8] sm:$0xff] }
  0x1f   : > { %634 = vmatpush.bf16.msra.mxu2 %v1975_v23 }
  0x20   : > { %652 = vmatpush.bf16.msra.mxu3 %v1980_v24 }
  0x21   : > { %429 = vmatpush.bf16.msra.mxu0 %v1712_v29  ;;  %v757_v29 = vor.u32 %v756_v19, %v755_v16 }
  0x22   : > { %447 = vmatpush.bf16.msra.mxu1 %v1720_v30  ;;  %v2200_v30 = vld [vmem:[%s2317_s2 + $0x1b8] sm:$0xff] }
  0x23   : > { %635 = vmatpush.bf16.msra.mxu2 %v1997_v31  ;;  %v758_v39 = vsel %vm744_vm1, %v754_v28, %v757_v29 }
  0x24   : > { %653 = vmatpush.bf16.msra.mxu3 %v2002_v32 }
  0x25   : > { %430 = vmatpush.bf16.msra.mxu0 %v1711_v37  ;;  %v968_v37 = vrot.slane %v2004_v33, 3 }
  0x26   : > { %448 = vmatpush.bf16.msra.mxu1 %v1719_v38 }
  0x27   : > { %636 = vmatpush.bf16.msra.mxu2 %v2023_v41 }
  0x28   : > { %654 = vmatpush.bf16.msra.mxu3 %v2028_v42 }
  0x29   : > { %431 = vmatpush.bf16.msra.mxu0 %v1710_v47  ;;  %v1770_v47 = vld [vmem:[%s2317_s2 + $0x1e0] sm:$0xff] }
  0x2a   : > { %449 = vmatpush.bf16.msra.mxu1 %v1718_v48  ;;  %v1761_v48 = vld [vmem:[%s2317_s2 + $0x198] sm:$0xff] }
  0x2b   : > { %637 = vmatpush.bf16.msra.mxu2 %v2047_v49 }
  0x2c   : > { %655 = vmatpush.bf16.msra.mxu3 %v2052_v50  ;;  %432 = vmatmul.bf16.vlgmr.msra.gmra.mxu0 %v1982_v25  ;;  %v1772_v25 = vld [vmem:[%s2317_s2 + $0x1f0] sm:$0xff] }
  0x2d   : > { %680 = vmatpush.bf16.msrb.mxu0 %v1895_v2  ;;  %450 = vmatmul.bf16.vlgmr.msra.gmra.mxu1 %v1984_v26  ;;  %v2118_v2 = vld [vmem:[%s2317_s2 + $0x160] sm:$0xff] }
  0x2e   : > { %693 = vmatpush.bf16.msrb.mxu1 %v1900_v3  ;;  %638 = vmatmul.bf16.vlgmr.msra.gmra.mxu2 %v511_v55  ;;  %v526_v3 = vor.u32 %v524_v63, %v510_v52  ;;  %v1759_v52 = vld [vmem:[%s2317_s2 + $0x188] sm:$0xff]  ;;  %v1766_v55 = vld [vmem:[%s2317_s2 + $0x1c0] sm:$0xff] }
  0x2f   : > { %656 = vmatmul.bf16.vlgmr.msra.gmra.mxu3 %v523_v56  ;;  %859 = vmatpush.bf16.msrb.mxu2 %v2067_v57 }
  0x30   : > { %877 = vmatpush.bf16.msrb.mxu3 %v2072_v58 }
  0x31   : > { %681 = vmatpush.bf16.msrb.mxu0 %v1915_v6  ;;  %v2132_v6 = vld [vmem:[%s2317_s2 + $0x158] sm:$0xff] }
  0x32   : > { %694 = vmatpush.bf16.msrb.mxu1 %v1920_v7  ;;  %v2145_v7 = vld [vmem:[%s2317_s2 + $0x110] sm:$0xff] }
  0x33   : > { %860 = vmatpush.bf16.msrb.mxu2 %v2083_v59 }
  0x34   : > { %878 = vmatpush.bf16.msrb.mxu3 %v2088_v60 }
  0x35   : > { %682 = vmatpush.bf16.msrb.mxu0 %v1934_v10  ;;  %v748_v10 = vrot.slane %v524_v63, 2 }
  0x36   : > { %695 = vmatpush.bf16.msrb.mxu1 %v1939_v11  ;;  %v2162_v11 = vld [vmem:[%s2317_s2 + $0x108] sm:$0xff] }
  0x37   : > { %861 = vmatpush.bf16.msrb.mxu2 %v2097_v61 }
  0x38   : > { %879 = vmatpush.bf16.msrb.mxu3 %v2102_v62 }
  0x39   : > { %683 = vmatpush.bf16.msrb.mxu0 %v1955_v14  ;;  %v746_v14 = vrot.slane %v503_v34, 3  ;;  %v2211_v34 = vpack.c.b16 %v675_v21, %v675_v21 }
  0x3a   : > { %696 = vmatpush.bf16.msrb.mxu1 %v1962_v15  ;;  %v749_v15 = vrot.slane %v508_v44, 3 }
  0x3b   : > { %862 = vmatpush.bf16.msrb.mxu2 %v2113_v1 }
  0x3c   : > { %880 = vmatpush.bf16.msrb.mxu3 %v2118_v2  ;;  %437 = vmatmul.bf16.gmra.mxu0 %v2004_v33  ;;  %v750_v27 = vor.u32 %v749_v15, %v748_v10 }
  0x3d   : > { %684 = vmatpush.bf16.msrb.mxu0 %v1975_v23  ;;  %455 = vmatmul.bf16.gmra.mxu1 %v2007_v35  ;;  %v2193_v23 = vld [vmem:[%s2317_s2 + $0x140] sm:$0xff] }
  0x3e   : > { %697 = vmatpush.bf16.msrb.mxu1 %v1980_v24  ;;  %643 = vmatmul.bf16.gmra.mxu2 %v526_v3  ;;  %v747_v24 = vor.u32 %v746_v14, %v745_v13 }
  0x3f   : > { %661 = vmatmul.bf16.gmra.mxu3 %v529_v4  ;;  %863 = vmatpush.bf16.msrb.mxu2 %v2127_v5 }
  0x40   : > { %881 = vmatpush.bf16.msrb.mxu3 %v2132_v6  ;;  %v751_v38 = vsel %vm744_vm1, %v747_v24, %v750_v27 }
  0x41   : > { %685 = vmatpush.bf16.msrb.mxu0 %v1997_v31  ;;  %v2205_v31 = vld [vmem:[%s2317_s2 + $0x1f8] sm:$0xff] }
  0x42   : > { %698 = vmatpush.bf16.msrb.mxu1 %v2002_v32  ;;  %v2209_v32 = vpack.c.b16 %v674_v20, %v674_v20 }
  0x43   : > { %864 = vmatpush.bf16.msrb.mxu2 %v2145_v7 }
  0x44   : > { %882 = vmatpush.bf16.msrb.mxu3 %v2150_v8 }
  0x45   : > { %686 = vmatpush.bf16.msrb.mxu0 %v2023_v41  ;;  %v969_v41 = vsel %vm966_vm2, %v967_v36, %v968_v37 }
  0x46   : > { %699 = vmatpush.bf16.msrb.mxu1 %v2028_v42  ;;  %v970_v42 = vrot.slane %v1984_v26, 3  ;;  %v1763_v26 = vld [vmem:[%s2317_s2 + $0x1a8] sm:$0xff] }
  0x47   : > { %865 = vmatpush.bf16.msrb.mxu2 %v2162_v11 }
  0x48   : > { %883 = vmatpush.bf16.msrb.mxu3 %v2167_v12  ;;  %v972_v44 = vsel %vm966_vm2, %v970_v42, %v971_v43 }
  0x49   : > { %687 = vmatpush.bf16.msrb.mxu0 %v2047_v49  ;;  %v1769_v49 = vld [vmem:[%s2317_s2 + $0x1d8] sm:$0xff] }
  0x4a   : > { %700 = vmatpush.bf16.msrb.mxu1 %v2052_v50  ;;  %v1760_v50 = vld [vmem:[%s2317_s2 + $0x190] sm:$0xff] }
  0x4b   : > { %866 = vmatpush.bf16.msrb.mxu2 %v2188_v22 }
  0x4c   : > { %884 = vmatpush.bf16.msrb.mxu3 %v2193_v23  ;;  %688 = vmatmul.bf16.vlgmr.msrb.gmra.mxu0 %v2209_v32 }
  0x4d   : > { %902 = vmatpush.bf16.msra.mxu0 %v2067_v57  ;;  %701 = vmatmul.bf16.vlgmr.msrb.gmra.mxu1 %v2211_v34 }
  0x4e   : > { %915 = vmatpush.bf16.msra.mxu1 %v2072_v58  ;;  %867 = vmatmul.bf16.vlgmr.msrb.gmra.mxu2 %v751_v38 }
  0x4f   : > { %1073 = vmatpush.bf16.msra.mxu2 %v2200_v30  ;;  %885 = vmatmul.bf16.vlgmr.msrb.gmra.mxu3 %v758_v39 }
  0x50   : > { %1091 = vmatpush.bf16.msra.mxu3 %v2205_v31 }
  0x51   : > { %903 = vmatpush.bf16.msra.mxu0 %v2083_v59 }
  0x52   : > { %916 = vmatpush.bf16.msra.mxu1 %v2088_v60 }
  0x53   : > { %1074 = vmatpush.bf16.msra.mxu2 %v1764_v40 }
  0x54   : > { %1092 = vmatpush.bf16.msra.mxu3 %v1772_v25 }
  0x55   : > { %904 = vmatpush.bf16.msra.mxu0 %v2097_v61 }
  0x56   : > { %917 = vmatpush.bf16.msra.mxu1 %v2102_v62 }
  0x57   : > { %1075 = vmatpush.bf16.msra.mxu2 %v1763_v26 }
  0x58   : > { %1093 = vmatpush.bf16.msra.mxu3 %v1771_v45 }
  0x59   : > { %905 = vmatpush.bf16.msra.mxu0 %v2113_v1 }
  0x5a   : > { %918 = vmatpush.bf16.msra.mxu1 %v2118_v2 }
  0x5b   : > { %1076 = vmatpush.bf16.msra.mxu2 %v1762_v46 }
  0x5c   : > { %1094 = vmatpush.bf16.msra.mxu3 %v1770_v47 }
  0x5d   : > { %906 = vmatpush.bf16.msra.mxu0 %v2127_v5 }
  0x5e   : > { %919 = vmatpush.bf16.msra.mxu1 %v2132_v6  ;;  %872 = vmatmul.bf16.gmra.mxu2 %v750_v27 }
  0x5f   : > { %1077 = vmatpush.bf16.msra.mxu2 %v1761_v48  ;;  %890 = vmatmul.bf16.gmra.mxu3 %v757_v29 }
  0x60   : > { %1095 = vmatpush.bf16.msra.mxu3 %v1769_v49 }
  0x61   : > { %907 = vmatpush.bf16.msra.mxu0 %v2145_v7 }
  0x62   : > { %920 = vmatpush.bf16.msra.mxu1 %v2150_v8 }
  0x63   : > { %1078 = vmatpush.bf16.msra.mxu2 %v1760_v50 }
  0x64   : > { %1096 = vmatpush.bf16.msra.mxu3 %v1768_v51 }
  0x65   : > { %908 = vmatpush.bf16.msra.mxu0 %v2162_v11 }
  0x66   : > { %921 = vmatpush.bf16.msra.mxu1 %v2167_v12 }
  0x67   : > { %1079 = vmatpush.bf16.msra.mxu2 %v1759_v52 }
  0x68   : > { %1097 = vmatpush.bf16.msra.mxu3 %v1767_v53 }
  0x69   : > { %909 = vmatpush.bf16.msra.mxu0 %v2188_v22 }
  0x6a   : > { %922 = vmatpush.bf16.msra.mxu1 %v2193_v23 }
  0x6b   : > { %1080 = vmatpush.bf16.msra.mxu2 %v1758_v54 }
  0x6c   : > { %910 = vmatmul.bf16.vlgmr.msra.gmra.mxu0 %v2209_v32  ;;  %1098 = vmatpush.bf16.msra.mxu3 %v1766_v55 }
  0x6d   : > { %1116 = vmatpush.bf16.msrb.mxu0 %v2200_v30  ;;  %923 = vmatmul.bf16.vlgmr.msra.gmra.mxu1 %v2211_v34 }
  0x6e   : > { %1129 = vmatpush.bf16.msrb.mxu1 %v2205_v31  ;;  %1081 = vmatmul.bf16.vlgmr.msra.gmra.mxu2 %v969_v41 }
  0x6f   : > { %1099 = vmatmul.bf16.vlgmr.msra.gmra.mxu3 %v972_v44 }
  0x71   : > { %1117 = vmatpush.bf16.msrb.mxu0 %v1764_v40 }
  0x72   : > { %1130 = vmatpush.bf16.msrb.mxu1 %v1772_v25 }
  0x75   : > { %1118 = vmatpush.bf16.msrb.mxu0 %v1763_v26 }
  0x76   : > { %1131 = vmatpush.bf16.msrb.mxu1 %v1771_v45 }
  0x79   : > { %1119 = vmatpush.bf16.msrb.mxu0 %v1762_v46  ;;  %v1806_v46 = vld [vmem:[%s2318_s3] ss:$0 sm:$0xff] }
  0x7a   : > { %1132 = vmatpush.bf16.msrb.mxu1 %v1770_v47 }
  0x7d   : > { %1120 = vmatpush.bf16.msrb.mxu0 %v1761_v48 }
  0x7e   : > { %1133 = vmatpush.bf16.msrb.mxu1 %v1769_v49  ;;  %1086 = vmatmul.bf16.gmra.mxu2 %v968_v37 }
  0x7f   : > { %1104 = vmatmul.bf16.gmra.mxu3 %v971_v43 }
  0x81   : > { %1121 = vmatpush.bf16.msrb.mxu0 %v1760_v50 }
  0x82   : > { %1134 = vmatpush.bf16.msrb.mxu1 %v1768_v51 }
  0x85   : > { %1122 = vmatpush.bf16.msrb.mxu0 %v1759_v52 }
  0x86   : > { %1135 = vmatpush.bf16.msrb.mxu1 %v1767_v53 }
  0x89   : > { %1123 = vmatpush.bf16.msrb.mxu0 %v1758_v54 }
  0x8a   : > { %1136 = vmatpush.bf16.msrb.mxu1 %v1766_v55 }
  0x8c   : > { %1124 = vmatmul.bf16.vlgmr.msrb.gmra.mxu0 %v2209_v32 }
  0x8d   : > { %1137 = vmatmul.bf16.vlgmr.msrb.gmra.mxu1 %v2211_v34 }
  0xa9   : > { %v433_v56 = vpop.f32.mrf.mxu0 }
  0xaa   : > { %v451_v57 = vpop.f32.mrf.mxu1 }
  0xab   : > { %v452_v58 = vadd.f32 %v451_v57, %v433_v56 }
  0xb1   : > { %v639_v59 = vpop.f32.mrf.mxu2  ;;  %v435_v61 = vpop.f32.mrf.mxu0 }
  0xb2   : > { %v657_v60 = vpop.f32.mrf.mxu3  ;;  %v453_v62 = vpop.f32.mrf.mxu1 }
  0xb3   : > { %v454_v63 = vadd.f32 %v453_v62, %v435_v61  ;;  %v658_v39 = vadd.f32 %v657_v60, %v639_v59 }
  0xb5   : > { %v666_v42 = vadd.f32 %v658_v39, %v452_v58 }
  0xb9   : > { %v641_v0 = vpop.f32.mrf.mxu2  ;;  %v438_v1 = vpop.f32.mrf.mxu0 }
  0xba   : > { %v659_v33 = vpop.f32.mrf.mxu3  ;;  %v456_v2 = vpop.f32.mrf.mxu1 }
  0xbb   : > { %v457_v35 = vadd.f32 %v456_v2, %v438_v1  ;;  %v660_v47 = vadd.f32 %v659_v33, %v641_v0 }
  0xbd   : > { %462 = vst [vmem:[#allocation2 + $0x10] sm:$0xff] %v457_v35  ;;  %v667_v51 = vadd.f32 %v660_v47, %v454_v63 }
  0xc1   : > { %v644_v3 = vpop.f32.mrf.mxu2  ;;  %v440_v6 = vpop.f32.mrf.mxu0 }
  0xc2   : > { %v662_v4 = vpop.f32.mrf.mxu3  ;;  %v458_v7 = vpop.f32.mrf.mxu1 }
  0xc3   : > { %v663_v5 = vadd.f32 %v662_v4, %v644_v3 }
  0xc4   : > { %v498_v8 = vld [vmem:[#allocation2 + $0x10] sm:$0x7f]  ;;  %v672_v13 = vld [vmem:[#allocation2 + $0x17] sm:$0x1] }
  0xc5   : > { %v668_v9 = vadd.f32 %v663_v5, %v498_v8 }
  0xc7   : > { %671 = vst [vmem:[#allocation2 + $0x10] sm:$0x7f] %v668_v9 }
  0xc9   : > { %v646_v10 = vpop.f32.mrf.mxu2  ;;  %v689_v12 = vpop.f32.mrf.mxu0 }
  0xca   : > { %v664_v11 = vpop.f32.mrf.mxu3  ;;  %v702_v14 = vpop.f32.mrf.mxu1 }
  0xcb   : > { %v703_v15 = vadd.f32 %v702_v14, %v689_v12 }
  0xcd   : > { %v706_v16 = vadd.f32 %v703_v15, %v672_v13 }
  0xce   : > { %v743_v28 = vld [vmem:[#allocation2 + $0x10] sm:$0x7] }
  0xcf   : > { %707 = vst [vmem:[#allocation2 + $0x17] sm:$0x1] %v706_v16 }
  0xd1   : > { %v868_v17 = vpop.f32.mrf.mxu2  ;;  %v691_v19 = vpop.f32.mrf.mxu0 }
  0xd2   : > { %v886_v18 = vpop.f32.mrf.mxu3  ;;  %v704_v20 = vpop.f32.mrf.mxu1 }
  0xd3   : > { %v887_v41 = vadd.f32 %v886_v18, %v868_v17 }
  0xd5   : > { %v895_v26 = vadd.f32 %v887_v41, %v666_v42 }
  0xd6   : > { %v901_v34 = vld [vmem:[#allocation2 + $0x13] sm:$0x1f] }
  0xd9   : > { %v870_v21 = vpop.f32.mrf.mxu2 }
  0xda   : > { %v888_v22 = vpop.f32.mrf.mxu3 }
  0xdb   : > { %v889_v49 = vadd.f32 %v888_v22, %v870_v21 }
  0xdd   : > { %v896_v55 = vadd.f32 %v889_v49, %v667_v51 }
  0xe1   : > { %v873_v23 = vpop.f32.mrf.mxu2 }
  0xe2   : > { %v891_v24 = vpop.f32.mrf.mxu3 }
  0xe3   : > { %v892_v27 = vadd.f32 %v891_v24, %v873_v23 }
  0xe5   : > { %v897_v29 = vadd.f32 %v892_v27, %v743_v28 }
  0xe7   : > { %900 = vst [vmem:[#allocation2 + $0x10] sm:$0x7] %v897_v29 }
  0xe9   : > { %v911_v30 = vpop.f32.mrf.mxu0  ;;  %v875_v37 = vpop.f32.mrf.mxu2 }
  0xea   : > { %v924_v31 = vpop.f32.mrf.mxu1  ;;  %v893_v38 = vpop.f32.mrf.mxu3 }
  0xeb   : > { %v925_v32 = vadd.f32 %v924_v31, %v911_v30 }
  0xed   : > { %v928_v36 = vadd.f32 %v925_v32, %v901_v34 }
  0xee   : > { %v965_v63 = vld [vmem:[#allocation2 + $0x10] sm:$0x3] }
  0xef   : > { %929 = vst [vmem:[#allocation2 + $0x13] sm:$0x1f] %v928_v36 }
  0xf1   : > { %v913_v40 = vpop.f32.mrf.mxu0  ;;  %v1082_v43 = vpop.f32.mrf.mxu2 }
  0xf2   : > { %v926_v25 = vpop.f32.mrf.mxu1  ;;  %v1100_v44 = vpop.f32.mrf.mxu3 }
  0xf3   : > { %v1101_v45 = vadd.f32 %v1100_v44, %v1082_v43 }
  0xf5   : > { %v1109_v48 = vadd.f32 %v1101_v45, %v895_v26 }
  0xf6   : > { %v1115_v4 = vld [vmem:[#allocation2 + $0x12] sm:$0x3f] }
  0xf7   : > { %v2298_v50 = vadd.f32 %v1806_v46, %v1109_v48 }
  0xf9   : > { %v1701_v52 = vmul.f32 -1.442695, %v2298_v50  ;;  %v1084_v53 = vpop.f32.mrf.mxu2 }
  0xfa   : > { %v1102_v54 = vpop.f32.mrf.mxu3 }
  0xfb   : > { %1807 = vpow2.f32 %v1701_v52  ;;  %v1103_v56 = vadd.f32 %v1102_v54, %v1084_v53 }
  0xfd   : > { %v1110_v57 = vadd.f32 %v1103_v56, %v896_v55 }
  0xff   : > { %v1152_v58 = vadd.f32 %v1806_v46, %v1110_v57 }
 0x101   : > { %v1808_v59 = vpop.eup %1807  ;;  %v1702_v60 = vmul.f32 -1.442695, %v1152_v58  ;;  %v1087_v62 = vpop.f32.mrf.mxu2 }
 0x102   : > { %v1163_v61 = vadd.f32 1.0, %v1808_v59  ;;  %v1105_v1 = vpop.f32.mrf.mxu3 }
 0x103   : > { %1809 = vpow2.f32 %v1702_v60  ;;  %v1106_v0 = vadd.f32 %v1105_v1, %v1087_v62 }
 0x104   : > { %1811 = vrcp.f32 %v1163_v61  ;;  %v1177_v22 = vand.u32 2147483648, %v1163_v61  ;;  %vm1171_vm4 = vweird.f32 %v1163_v61  ;;  %v1175_v23 = vand.u32 2147483647, %v1163_v61 }
 0x105   : > { %v1111_v35 = vadd.f32 %v1106_v0, %v965_v63 }
 0x106   : > { %v1178_v31 = vor.u32 1.1754944e-38, %v1177_v22  ;;  %vm1176_vm7 = vcmp.eq.f32.partialorder %v1175_v23, 8.507059e+37 }
 0x107   : > { %1114 = vst [vmem:[#allocation2 + $0x10] sm:$0x3] %v1111_v35 }
 0x109   : > { %v1125_v33 = vpop.f32.mrf.mxu0  ;;  %v1810_v6 = vpop.eup %1809 }
 0x10a   : > { %v1138_v2 = vpop.f32.mrf.mxu1  ;;  %v1812_v7 = vpop.eup %1811  ;;  %v1164_v8 = vadd.f32 1.0, %v1810_v6 }
 0x10b   : > { %v1139_v3 = vadd.f32 %v1138_v2, %v1125_v33  ;;  %v1089_v9 = vpop.f32.mrf.mxu2  ;;  %v1107_v10 = vpop.f32.mrf.mxu3  ;;  %v1167_v11 = vmul.f32 %v1812_v7, %v1163_v61  ;;  %vm1172_vm3 = vweird.f32 %v1812_v7 }
 0x10c   : > { %1813 = vrcp.f32 %v1164_v8  ;;  %vm1173_vm5 = vmor %vm1171_vm4, %vm1172_vm3  ;;  %v1192_v27 = vand.u32 2147483648, %v1164_v8  ;;  %v1190_v30 = vand.u32 2147483647, %v1164_v8  ;;  %vm1186_vm8 = vweird.f32 %v1164_v8 }
 0x10d   : > { %v1142_v5 = vadd.f32 %v1139_v3, %v1115_v4  ;;  %v1168_v14 = vsub.f32 1.0, %v1167_v11 }
 0x10e   : > { %v1193_v36 = vor.u32 1.1754944e-38, %v1192_v27  ;;  %vm1191_vm10 = vcmp.eq.f32.partialorder %v1190_v30, 8.507059e+37 }
 0x10f   : > { %1143 = vst [vmem:[#allocation2 + $0x12] sm:$0x3f] %v1142_v5  ;;  %v1169_v15 = vmul.f32 %v1812_v7, %v1168_v14 }
 0x111   : > { %v1127_v12 = vpop.f32.mrf.mxu0  ;;  %v1170_v19 = vadd.f32 %v1812_v7, %v1169_v15 }
 0x112   : > { %v1140_v13 = vpop.f32.mrf.mxu1  ;;  %v1814_v18 = vpop.eup %1813 }
 0x113   : > { %v1182_v20 = vmul.f32 %v1814_v18, %v1164_v8  ;;  %v1174_v28 = vsel %vm1173_vm5, %v1812_v7, %v1170_v19  ;;  %vm1187_vm6 = vweird.f32 %v1814_v18 }
 0x114   : > { %v1179_v34 = vsel %vm1176_vm7, %v1178_v31, %v1174_v28  ;;  %vm1188_vm9 = vmor %vm1186_vm8, %vm1187_vm6 }
 0x115   : > { %v1183_v24 = vsub.f32 1.0, %v1182_v20  ;;  %v1211_v25 = vmul.f32 %v1179_v34, %v2298_v50 }
 0x116   : > { %v1146_v16 = vld [vmem:[#allocation2 + $0x10] sm:$0xff] }
 0x117   : > { %v1153_v17 = vadd.f32 %v1806_v46, %v1146_v16  ;;  %v1184_v29 = vmul.f32 %v1814_v18, %v1183_v24 }
 0x119   : > { %v1703_v21 = vmul.f32 -1.442695, %v1153_v17  ;;  %v1185_v32 = vadd.f32 %v1814_v18, %v1184_v29 }
 0x11b   : > { %1815 = vpow2.f32 %v1703_v21  ;;  %v1189_v38 = vsel %vm1188_vm9, %v1814_v18, %v1185_v32 }
 0x11c   : > { %v1194_v39 = vsel %vm1191_vm10, %v1193_v36, %v1189_v38 }
 0x11d   : > { %v1212_v41 = vmul.f32 %v1194_v39, %v1152_v58 }
 0x11f   : > { %v1777_v42 = vpack.c.bf16 %v1212_v41, %v1211_v25 }
 0x121   : > { %v1816_v37 = vpop.eup %1815  ;;  %1778 = vst [vmem:[%s274_s30] sm:$0xff] %v1777_v42  }
 0x122   : > { %v1165_v40 = vadd.f32 1.0, %v1816_v37 }
 0x124   : > { %1817 = vrcp.f32 %v1165_v40  ;;  %v1207_v45 = vand.u32 2147483648, %v1165_v40  ;;  %v1205_v47 = vand.u32 2147483647, %v1165_v40  ;;  %vm1201_vm12 = vweird.f32 %v1165_v40 }
 0x126   : > { %v1208_v49 = vor.u32 1.1754944e-38, %v1207_v45  ;;  %vm1206_vm14 = vcmp.eq.f32.partialorder %v1205_v47, 8.507059e+37 }
 0x12a   : > { %v1818_v43 = vpop.eup %1817 }
 0x12b   : > { %v1197_v44 = vmul.f32 %v1818_v43, %v1165_v40  ;;  %vm1202_vm11 = vweird.f32 %v1818_v43 }
 0x12c   : > { %vm1203_vm13 = vmor %vm1201_vm12, %vm1202_vm11 }
 0x12d   : > { %v1198_v26 = vsub.f32 1.0, %v1197_v44 }
 0x12f   : > { %v1199_v46 = vmul.f32 %v1818_v43, %v1198_v26 }
 0x131   : > { %v1200_v48 = vadd.f32 %v1818_v43, %v1199_v46 }
 0x133   : > { %v1204_v50 = vsel %vm1203_vm13, %v1818_v43, %v1200_v48 }
 0x134   : > { %v1209_v51 = vsel %vm1206_vm14, %v1208_v49, %v1204_v50 }
 0x135   : > { %v1213_v52 = vmul.f32 %v1209_v51, %v1153_v17 }
 0x137   : > { %v1216_v53 = vpack.c.bf16 %v1213_v52, %v1213_v52 }
 0x139   : > { %1219 = vst [vmem:[%s274_s30 + $0x8] sm:$0xf] %v1216_v53 }
 0x13a PF: > { %s14_s17 = sadd.s32 1, %s1841_s17   ;;  %s2320_s15 = smov %s1837_s16 }
 0x13b   : > { %p11_p5 = scmp.ge.s32.totalorder %s14_s17, 4   ;;  %s2321_s16 = smov %s2323_s18 }
 0x13d   :  { %13 = sbr.rel (!%p11_p5) target bundleno = 2 (0x2), region = 72 }

// kernel: yolox_forward.13
= control target key start
LH: loop header
LB: loop body
LE: loop exit
PB: predicated region body
PF: predicated region fallthrough
CT: control target
= control target key end

     0   :  { %s580_s12 = smov 0   ;;  %s663_s0 = inlined_call_operand.vmem [shape: bf16[2,4,256], index: 0, kind: input, shape index: {}]   ;;  %s664_s1 = inlined_call_operand.vmem [shape: bf16[256,6], index: 1, kind: input, shape index: {}]   ;;  %s665_s2 = inlined_call_operand.vmem [shape: f32[1,6], index: 2, kind: input, shape index: {}]   ;;  %s666_s3 = inlined_call_operand.vmem [shape: f32[2,4,6], index: 3, kind: output, shape index: {}]  }
   0x1 LB: > { %s441_s13 = sadd.s32 4294967295, %s557_s12   ;;  %p445_p0 = scmp.ge.s32.totalorder %s557_s12, 1  ;;  %s557_s12 = sphi %s580_s12, %s13_s12  }
   0x2   : > { %p137_p1 = scmp.lt.s32.totalorder %s557_s12, 3 }
   0x4   : > { %p138_p2 = pnand %p445_p0, %p137_p1 }
   0x5   : > { %p160_p3 = scmp.lt.s32.totalorder (!%p138_p2), %s441_s13, 1 }
   0x6   : > { %141 = sbr.rel (%p138_p2) target bundleno = 204 (0xcc), region = 32 }
   0xb   : > { %v524_v0 = vld [vmem:[%s664_s1 + $0x38] sm:$0xff]  ;;  %v523_v2 = vld [vmem:[%s664_s1 + $0x30] sm:$0xff]  ;;  %s670_s13 = smov (!%p160_p3, %s441_s13), 1  ;;  %v522_v4 = vld [vmem:[%s664_s1 + $0x28] sm:$0xff]  ;;  %v559_v19 = vmov 2.0   ;;  %v334_v22 = vlaneseq  ;;  %vm386_vm11 = vcmask 44032  }
   0xc   : > { %v532_v1 = vld [vmem:[%s664_s1 + $0x78] sm:$0xff]  ;;  %308 = vmatpush.bf16.msra.mxu0 %v524_v0  ;;  %v531_v3 = vld [vmem:[%s664_s1 + $0x70] sm:$0xff]  ;;  %s516_s22 = sshll.u32 %s670_s13, 2  ;;  %v530_v5 = vld [vmem:[%s664_s1 + $0x68] sm:$0xff]  ;;  %543 = vrcp.f32 %v559_v19 }
   0xd   : > { %321 = vmatpush.bf16.msra.mxu1 %v532_v1  ;;  %s164_s25 = scalar_lea.vmem %s663_s0, %s516_s22  ;;  %v521_v7 = vld [vmem:[%s664_s1 + $0x20] sm:$0xff]  ;;  %v520_v9 = vld [vmem:[%s664_s1 + $0x18] sm:$0xff]  ;;  %v519_v11 = vld [vmem:[%s664_s1 + $0x10] sm:$0xff]  ;;  %v335_v25 = vshrl.u32 %v334_v22, 7  ;;  %v337_v33 = vand.u32 127, %v334_v22  ;;  %s168_s30 = scalar_lea.vmem %s666_s3, %s516_s22 }
   0xe   : > { %v169_v6 = vld [vmem:[%s164_s25] sm:$0xf]  ;;  %v528_v10 = vld [vmem:[%s664_s1 + $0x58] sm:$0xff]  ;;  %v527_v12 = vld [vmem:[%s664_s1 + $0x50] sm:$0xff] }
   0xf   : > { %207 = vst [vmem:[#allocation1] ss:$4 sm:$0xff] %v169_v6  ;;  %v529_v8 = vld [vmem:[%s664_s1 + $0x60] sm:$0xff]  ;;  %v518_v13 = vld [vmem:[%s664_s1 + $0x8] sm:$0xff]  ;;  %v338_v30 = vcvt.s32.f32 %v335_v25  ;;  %vm355_vm1 = vcmp.ge.s32.totalorder %v337_v33, 2  ;;  %vm356_vm2 = vcmp.lt.s32.totalorder %v337_v33, 4 }
  0x10   : > { %309 = vmatpush.bf16.msra.mxu0 %v523_v2  ;;  %v526_v14 = vld [vmem:[%s664_s1 + $0x48] sm:$0xff]  ;;  %v517_v15 = vld [vmem:[%s664_s1] sm:$0xff]  ;;  %vm647_vm3 = vmand %vm355_vm1, %vm356_vm2  ;;  %vm352_vm4 = vcmp.eq.s32.totalorder %v337_v33, 1  ;;  %vm351_vm5 = vcmp.eq.s32.totalorder %v337_v33, 0  ;;  %vm383_vm10 = vcmp.lt.s32.totalorder %v337_v33, 2 }
  0x11   : > { %322 = vmatpush.bf16.msra.mxu1 %v531_v3  ;;  %v525_v16 = vld [vmem:[%s664_s1 + $0x40] sm:$0xff]  ;;  %v339_v34 = vadd.f32 0.5, %v338_v30 }
  0x12   : > { %v544_v20 = vpop.eup %543  ;;  %v542_v24 = vld [vmem:[%s665_s2] ss:$0 sm:$0xff] }
  0x13   : > { %v341_v21 = vmul.f32 2.0, %v544_v20  ;;  %vm345_vm0 = vweird.f32 %v544_v20 }
  0x14   : > { %310 = vmatpush.bf16.msra.mxu0 %v522_v4 }
  0x15   : > { %323 = vmatpush.bf16.msra.mxu1 %v530_v5  ;;  %v342_v23 = vsub.f32 1.0, %v341_v21 }
  0x16   : > { %v208_v17 = vld.sshfl [vmem:[#allocation1] sm:$0xff pattern:$0x73625140]  ;;  %v209_v18 = vld.sshfl [vmem:[#allocation1 + $0x8] sm:$0xff pattern:$0x73625140] }
  0x17   : > { %v343_v26 = vmul.f32 %v544_v20, %v342_v23 }
  0x18   : > { %311 = vmatpush.bf16.msra.mxu0 %v521_v7 }
  0x19   : > { %324 = vmatpush.bf16.msra.mxu1 %v529_v8  ;;  %v344_v31 = vadd.f32 %v544_v20, %v343_v26 }
  0x1b   : > { %v346_v36 = vsel %vm345_vm0, %v544_v20, %v344_v31 }
  0x1c   : > { %312 = vmatpush.bf16.msra.mxu0 %v520_v9  ;;  %v347_v39 = vmul.f32 %v346_v36, %v339_v34 }
  0x1d   : > { %325 = vmatpush.bf16.msra.mxu1 %v528_v10 }
  0x1e   : > { %v348_v42 = vfloor.f32 %v347_v39 }
  0x20   : > { %313 = vmatpush.bf16.msra.mxu0 %v519_v11  ;;  %v349_v45 = vmul.f32 2.0, %v348_v42  ;;  %v353_v49 = vsel %vm352_vm4, %v348_v42, 0.0 }
  0x21   : > { %326 = vmatpush.bf16.msra.mxu1 %v527_v12 }
  0x22   : > { %v350_v47 = vsub.f32 %v338_v30, %v349_v45 }
  0x24   : > { %314 = vmatpush.bf16.msra.mxu0 %v518_v13  ;;  %v354_v51 = vsel %vm351_vm5, %v350_v47, %v353_v49 }
  0x25   : > { %327 = vmatpush.bf16.msra.mxu1 %v526_v14 }
  0x28   : > { %315 = vmatpush.bf16.msra.mxu0 %v517_v15 }
  0x29   : > { %328 = vmatpush.bf16.msra.mxu1 %v525_v16 }
  0x2b   : > { %316 = vmatmul.bf16.vlgmr.msra.gmra.mxu0 %v208_v17 }
  0x2c   : > { %329 = vmatmul.bf16.vlgmr.msra.gmra.mxu1 %v209_v18 }
  0xa8   : > { %v317_v27 = vpop.f32.mrf.mxu0 }
  0xa9   : > { %v330_v28 = vpop.f32.mrf.mxu1  ;;  %v318_v29 = vadd.f32 %v542_v24, %v317_v27 }
  0xab   : > { %v331_v32 = vadd.f32 %v330_v28, %v318_v29 }
  0xad   : > { %v513_v35 = vmul.f32 -1.442695, %v331_v32  ;;  %v360_v44 = vsel %vm647_vm3, %v331_v32, 0.0  ;;  %v358_v57 = vadd.f32 %v354_v51, %v331_v32 }
  0xae   : > { %v361_v46 = vmul.f32 1.442695, %v360_v44 }
  0xaf   : > { %545 = vpow2.f32 %v513_v35  ;;  %v359_v62 = vmul.f32 16.0, %v358_v57 }
  0xb0   : > { %v319_v37 = vpop.f32.mrf.mxu0 }
  0xb1   : > { %v332_v38 = vpop.f32.mrf.mxu1 }
  0xb5   : > { %v546_v41 = vpop.eup %545 }
  0xb6   : > { %v367_v43 = vadd.f32 1.0, %v546_v41 }
  0xb8   : > { %547 = vrcp.f32 %v367_v43  ;;  %v379_v53 = vand.u32 2147483648, %v367_v43  ;;  %v377_v55 = vand.u32 2147483647, %v367_v43  ;;  %vm373_vm7 = vweird.f32 %v367_v43 }
  0xb9   : > { %549 = vpow2.f32 %v361_v46 }
  0xba   : > { %v380_v59 = vor.u32 1.1754944e-38, %v379_v53  ;;  %vm378_vm9 = vcmp.eq.f32.partialorder %v377_v55, 8.507059e+37 }
  0xbe   : > { %v548_v48 = vpop.eup %547 }
  0xbf   : > { %v369_v50 = vmul.f32 %v548_v48, %v367_v43  ;;  %vm374_vm6 = vweird.f32 %v548_v48  ;;  %v550_v56 = vpop.eup %549 }
  0xc0   : > { %vm375_vm8 = vmor %vm373_vm7, %vm374_vm6  ;;  %v363_v60 = vmul.f32 16.0, %v550_v56 }
  0xc1   : > { %v370_v52 = vsub.f32 1.0, %v369_v50 }
  0xc3   : > { %v371_v54 = vmul.f32 %v548_v48, %v370_v52 }
  0xc5   : > { %v372_v58 = vadd.f32 %v548_v48, %v371_v54 }
  0xc7   : > { %v376_v61 = vsel %vm375_vm8, %v548_v48, %v372_v58 }
  0xc8   : > { %v381_v63 = vsel %vm378_vm9, %v380_v59, %v376_v61 }
  0xc9   : > { %v384_v0 = vsel %vm647_vm3, %v363_v60, %v381_v63 }
  0xca   : > { %v385_v1 = vsel %vm383_vm10, %v359_v62, %v384_v0 }
  0xcb   : > { %387 = vst.msk [vmem:[%s168_s30] sm:$0xf] %vm386_vm11, %v385_v1 }
  0xcc PF: > { %s13_s12 = sadd.s32 1, %s557_s12  }
  0xcd   : > { %p10_p4 = scmp.ge.s32.totalorder %s13_s12, 4  }
  0xcf   :  { %12 = sbr.rel (!%p10_p4) target bundleno = 1 (0x1), region = 62 }

// kernel: yolox_forward.12
= control target key start
LH: loop header
LB: loop body
LE: loop exit
PB: predicated region body
PF: predicated region fallthrough
CT: control target
= control target key end

     0   :  { %s520_s12 = smov 0   ;;  %s606_s0 = inlined_call_operand.vmem [shape: bf16[2,16,128], index: 0, kind: input, shape index: {}]   ;;  %s607_s1 = inlined_call_operand.vmem [shape: bf16[128,6], index: 1, kind: input, shape index: {}]   ;;  %s608_s2 = inlined_call_operand.vmem [shape: f32[1,6], index: 2, kind: input, shape index: {}]   ;;  %s609_s3 = inlined_call_operand.vmem [shape: f32[2,16,6], index: 3, kind: output, shape index: {}]  }
   0x1 LB: > { %s407_s13 = sadd.s32 4294967295, %s497_s12   ;;  %p411_p0 = scmp.ge.s32.totalorder %s497_s12, 1  ;;  %s497_s12 = sphi %s520_s12, %s13_s12  }
   0x2   : > { %p137_p1 = scmp.lt.s32.totalorder %s497_s12, 3 }
   0x4   : > { %p138_p2 = pnand %p411_p0, %p137_p1 }
   0x5   : > { %p161_p3 = scmp.lt.s32.totalorder (!%p138_p2), %s407_s13, 1 }
   0x6   : > { %141 = sbr.rel (%p138_p2) target bundleno = 210 (0xd2), region = 32 }
   0xb   : > { %v466_v0 = vld [vmem:[%s607_s1 + $0x38] sm:$0xff]  ;;  %v465_v1 = vld [vmem:[%s607_s1 + $0x30] sm:$0xff]  ;;  %v464_v2 = vld [vmem:[%s607_s1 + $0x28] sm:$0xff]  ;;  %s613_s13 = smov (!%p161_p3, %s407_s13), 1  ;;  %v499_v9 = vmov 4.0   ;;  %v261_v12 = vlaneseq  ;;  %vm349_vm11 = vcmask 48128  }
   0xc   : > { %247 = vmatpush.bf16.msra.mxu0 %v466_v0  ;;  %v463_v3 = vld [vmem:[%s607_s1 + $0x20] sm:$0xff]  ;;  %v462_v4 = vld [vmem:[%s607_s1 + $0x18] sm:$0xff]  ;;  %v461_v5 = vld [vmem:[%s607_s1 + $0x10] sm:$0xff]  ;;  %s456_s28 = sshll.u32 %s613_s13, 3  ;;  %477 = vrcp.f32 %v499_v9  ;;  %s457_s9 = sshll.u32 %s613_s13, 4 }
   0xd   : > { %v460_v6 = vld [vmem:[%s607_s1 + $0x8] sm:$0xff]  ;;  %v459_v7 = vld [vmem:[%s607_s1] sm:$0xff]  ;;  %s165_s6 = scalar_lea.vmem %s606_s0, %s456_s28  ;;  %v262_v14 = vshrl.u32 %v261_v12, 7  ;;  %v561_v21 = vand.u32 127, %v261_v12  ;;  %s170_s13 = scalar_lea.vmem %s609_s3, %s457_s9 }
   0xe   : > { %v458_v8 = vld [vmem:[%s165_s6] sm:$0xff] }
   0xf   : > { %v476_v16 = vld [vmem:[%s608_s2] ss:$0 sm:$0xff]  ;;  %v266_v17 = vcvt.s32.f32 %v262_v14  ;;  %v263_v24 = vadd.s32 8, %v262_v14  ;;  %vm291_vm1 = vcmp.ge.s32.totalorder %v561_v21, 2  ;;  %vm292_vm2 = vcmp.lt.s32.totalorder %v561_v21, 4 }
  0x10   : > { %248 = vmatpush.bf16.msra.mxu0 %v465_v1  ;;  %vm567_vm3 = vmand %vm291_vm1, %vm292_vm2  ;;  %vm286_vm4 = vcmp.eq.s32.totalorder %v561_v21, 1  ;;  %vm285_vm5 = vcmp.eq.s32.totalorder %v561_v21, 0  ;;  %vm344_vm9 = vcmp.lt.s32.totalorder %v561_v21, 2 }
  0x11   : > { %v268_v22 = vadd.f32 0.5, %v266_v17  ;;  %v267_v27 = vcvt.s32.f32 %v263_v24 }
  0x12   : > { %v478_v10 = vpop.eup %477 }
  0x13   : > { %v271_v11 = vmul.f32 4.0, %v478_v10  ;;  %vm275_vm0 = vweird.f32 %v478_v10  ;;  %v269_v33 = vadd.f32 0.5, %v267_v27 }
  0x14   : > { %249 = vmatpush.bf16.msra.mxu0 %v464_v2 }
  0x15   : > { %v272_v13 = vsub.f32 1.0, %v271_v11 }
  0x17   : > { %v273_v15 = vmul.f32 %v478_v10, %v272_v13 }
  0x18   : > { %250 = vmatpush.bf16.msra.mxu0 %v463_v3 }
  0x19   : > { %v274_v19 = vadd.f32 %v478_v10, %v273_v15 }
  0x1b   : > { %v276_v25 = vsel %vm275_vm0, %v478_v10, %v274_v19 }
  0x1c   : > { %251 = vmatpush.bf16.msra.mxu0 %v462_v4  ;;  %v277_v26 = vmul.f32 %v276_v25, %v268_v22  ;;  %v278_v38 = vmul.f32 %v276_v25, %v269_v33 }
  0x1e   : > { %v279_v32 = vfloor.f32 %v277_v26  ;;  %v280_v42 = vfloor.f32 %v278_v38 }
  0x20   : > { %252 = vmatpush.bf16.msra.mxu0 %v461_v5  ;;  %v281_v37 = vmul.f32 4.0, %v279_v32  ;;  %v287_v44 = vsel %vm286_vm4, %v279_v32, 0.0  ;;  %v282_v50 = vmul.f32 4.0, %v280_v42  ;;  %v288_v61 = vsel %vm286_vm4, %v280_v42, 0.0 }
  0x22   : > { %v283_v41 = vsub.f32 %v266_v17, %v281_v37  ;;  %v284_v58 = vsub.f32 %v267_v27, %v282_v50 }
  0x24   : > { %253 = vmatpush.bf16.msra.mxu0 %v460_v6  ;;  %v289_v48 = vsel %vm285_vm5, %v283_v41, %v287_v44  ;;  %v290_v4 = vsel %vm285_vm5, %v284_v58, %v288_v61 }
  0x28   : > { %254 = vmatpush.bf16.msra.mxu0 %v459_v7 }
  0x2b   : > { %255 = vmatmul.bf16.vlgmr.msra.gmra.mxu0 %v458_v8 }
  0xa8   : > { %v256_v18 = vpop.f32.mrf.mxu0 }
  0xa9   : > { %v257_v20 = vadd.f32 %v476_v16, %v256_v18 }
  0xab   : > { %v452_v23 = vmul.f32 -1.442695, %v257_v20  ;;  %v298_v36 = vsel %vm567_vm3, %v257_v20, 0.0  ;;  %v294_v56 = vadd.f32 %v289_v48, %v257_v20 }
  0xac   : > { %v300_v39 = vmul.f32 1.442695, %v298_v36 }
  0xad   : > { %479 = vpow2.f32 %v452_v23  ;;  %v296_v1 = vmul.f32 8.0, %v294_v56 }
  0xb0   : > { %v258_v28 = vpop.f32.mrf.mxu0 }
  0xb1   : > { %v565_v29 = vadd.f32 %v476_v16, %v258_v28 }
  0xb3   : > { %v480_v31 = vpop.eup %479  ;;  %v453_v34 = vmul.f32 -1.442695, %v565_v29  ;;  %v299_v47 = vsel %vm567_vm3, %v565_v29, 0.0  ;;  %v295_v11 = vadd.f32 %v290_v4, %v565_v29 }
  0xb4   : > { %v312_v35 = vadd.f32 1.0, %v480_v31  ;;  %v302_v52 = vmul.f32 1.442695, %v299_v47 }
  0xb5   : > { %481 = vpow2.f32 %v453_v34  ;;  %v297_v16 = vmul.f32 8.0, %v295_v11 }
  0xb6   : > { %483 = vrcp.f32 %v312_v35  ;;  %v325_v51 = vand.u32 2147483648, %v312_v35  ;;  %v323_v54 = vand.u32 2147483647, %v312_v35  ;;  %vm319_vm7 = vweird.f32 %v312_v35 }
  0xb7   : > { %485 = vpow2.f32 %v300_v39 }
  0xb8   : > { %v326_v60 = vor.u32 1.1754944e-38, %v325_v51  ;;  %vm324_vm10 = vcmp.eq.f32.partialorder %v323_v54, 8.507059e+37 }
  0xbb   : > { %v482_v40 = vpop.eup %481 }
  0xbc   : > { %v484_v43 = vpop.eup %483  ;;  %v313_v45 = vadd.f32 1.0, %v482_v40 }
  0xbd   : > { %v315_v46 = vmul.f32 %v484_v43, %v312_v35  ;;  %vm320_vm6 = vweird.f32 %v484_v43  ;;  %v486_v55 = vpop.eup %485 }
  0xbe   : > { %487 = vrcp.f32 %v313_v45  ;;  %vm321_vm8 = vmor %vm319_vm7, %vm320_vm6  ;;  %v304_v62 = vmul.f32 8.0, %v486_v55  ;;  %v340_v7 = vand.u32 2147483648, %v313_v45  ;;  %v338_v9 = vand.u32 2147483647, %v313_v45 }
  0xbf   : > { %v316_v49 = vsub.f32 1.0, %v315_v46  ;;  %489 = vpow2.f32 %v302_v52  ;;  %vm334_vm13 = vweird.f32 %v313_v45 }
  0xc0   : > { %v341_v13 = vor.u32 1.1754944e-38, %v340_v7  ;;  %vm339_vm15 = vcmp.eq.f32.partialorder %v338_v9, 8.507059e+37 }
  0xc1   : > { %v317_v53 = vmul.f32 %v484_v43, %v316_v49 }
  0xc3   : > { %v318_v57 = vadd.f32 %v484_v43, %v317_v53 }
  0xc4   : > { %v488_v59 = vpop.eup %487 }
  0xc5   : > { %v322_v63 = vsel %vm321_vm8, %v484_v43, %v318_v57  ;;  %v330_v0 = vmul.f32 %v488_v59, %v313_v45  ;;  %vm335_vm12 = vweird.f32 %v488_v59  ;;  %v490_v10 = vpop.eup %489 }
  0xc6   : > { %v327_v2 = vsel %vm324_vm10, %v326_v60, %v322_v63  ;;  %vm336_vm14 = vmor %vm334_vm13, %vm335_vm12  ;;  %v305_v14 = vmul.f32 8.0, %v490_v10 }
  0xc7   : > { %v345_v3 = vsel %vm567_vm3, %v304_v62, %v327_v2  ;;  %v331_v5 = vsub.f32 1.0, %v330_v0 }
  0xc8   : > { %v347_v6 = vsel %vm344_vm9, %v296_v1, %v345_v3 }
  0xc9   : > { %350 = vst.msk [vmem:[%s170_s13] sm:$0xff] %vm349_vm11, %v347_v6  ;;  %v332_v8 = vmul.f32 %v488_v59, %v331_v5 }
  0xcb   : > { %v333_v12 = vadd.f32 %v488_v59, %v332_v8 }
  0xcd   : > { %v337_v15 = vsel %vm336_vm14, %v488_v59, %v333_v12 }
  0xce   : > { %v342_v17 = vsel %vm339_vm15, %v341_v13, %v337_v15 }
  0xcf   : > { %v346_v18 = vsel %vm567_vm3, %v305_v14, %v342_v17 }
  0xd0   : > { %v348_v19 = vsel %vm344_vm9, %v297_v16, %v346_v18 }
  0xd1   : > { %351 = vst.msk [vmem:[%s170_s13 + $0x8] sm:$0xff] %vm349_vm11, %v348_v19 }
  0xd2 PF: > { %s13_s12 = sadd.s32 1, %s497_s12  }
  0xd3   : > { %p10_p4 = scmp.ge.s32.totalorder %s13_s12, 4  }
  0xd5   :  { %12 = sbr.rel (!%p10_p4) target bundleno = 1 (0x1), region = 62 }

// kernel: yolox_forward.11
= control target key start
LH: loop header
LB: loop body
LE: loop exit
PB: predicated region body
PF: predicated region fallthrough
CT: control target
= control target key end

     0   :  { %s812_s12 = smov 0   ;;  %s1121_s0 = inlined_call_operand.vmem [shape: bf16[2,64,64], index: 0, kind: input, shape index: {}]   ;;  %s1122_s1 = inlined_call_operand.vmem [shape: bf16[64,6], index: 1, kind: input, shape index: {}]   ;;  %s1123_s2 = inlined_call_operand.vmem [shape: f32[1,6], index: 2, kind: input, shape index: {}]   ;;  %s1124_s3 = inlined_call_operand.vmem [shape: f32[2,64,6], index: 3, kind: output, shape index: {}]  }
   0x1 LB: > { %s646_s13 = sadd.s32 4294967295, %s789_s12   ;;  %p650_p0 = scmp.ge.s32.totalorder %s789_s12, 1  ;;  %s789_s12 = sphi %s812_s12, %s13_s12  }
   0x2   : > { %p137_p1 = scmp.lt.s32.totalorder %s789_s12, 3 }
   0x4   : > { %p138_p2 = pnand %p650_p0, %p137_p1 }
   0x5   : > { %p161_p3 = scmp.lt.s32.totalorder (!%p138_p2), %s646_s13, 1 }
   0x6   : > { %141 = sbr.rel (%p138_p2) target bundleno = 221 (0xdd), region = 32 }
   0xb   : > { %v710_v0 = vld [vmem:[%s1122_s1 + $0x18] sm:$0xff]  ;;  %v709_v1 = vld [vmem:[%s1122_s1 + $0x10] sm:$0xff]  ;;  %s1134_s13 = smov (!%p161_p3, %s646_s13), 1  ;;  %v708_v2 = vld [vmem:[%s1122_s1 + $0x8] sm:$0xff]  ;;  %vm236_vm0 = vcmask 523264   ;;  %v791_v8 = vmov 8.0   ;;  %v278_v10 = vlaneseq }
   0xc   : > { %253 = vmatpush.bf16.msra.mxu0 %v710_v0  ;;  %711 = vmatpush.bf16.msra.mxu1 %v710_v0  ;;  %s701_s20 = sshll.u32 %s1134_s13, 5  ;;  %v707_v3 = vld [vmem:[%s1122_s1] sm:$0xff]  ;;  %733 = vrcp.f32 %v791_v8  ;;  %vm582_vm9 = vcmask 48128   ;;  %s702_s28 = sshll.u32 %s1134_s13, 6 }
   0xd   : > { %712 = vmatpush.bf16.msra.mxu2 %v710_v0  ;;  %713 = vmatpush.bf16.msra.mxu3 %v710_v0  ;;  %s165_s25 = scalar_lea.vmem %s1121_s0, %s701_s20  ;;  %v838_v12 = vshrl.u32 %v278_v10, 7  ;;  %v857_v35 = vand.u32 127, %v278_v10  ;;  %v865_v40 = vld [vmem:[%s1123_s2] ss:$0 sm:$0xff]  ;;  %s997_s4 = scalar_lea.vmem %s1124_s3, %s702_s28 }
   0xe   : > { %v703_v4 = vld [vmem:[%s165_s25] sm:$0xff]  ;;  %v704_v5 = vld [vmem:[%s165_s25 + $0x8] sm:$0xff]  ;;  %v705_v6 = vld [vmem:[%s165_s25 + $0x10] sm:$0xff] }
   0xf   : > { %v706_v7 = vld [vmem:[%s165_s25 + $0x18] sm:$0xff]  ;;  %v281_v15 = vadd.s32 16, %v838_v12  ;;  %v283_v16 = vadd.s32 32, %v838_v12  ;;  %v285_v17 = vadd.s32 48, %v838_v12  ;;  %v289_v18 = vcvt.s32.f32 %v838_v12 }
  0x10   : > { %254 = vmatpush.bf16.msra.mxu0 %v709_v1  ;;  %714 = vmatpush.bf16.msra.mxu1 %v709_v1  ;;  %v845_v23 = vadd.s32 8, %v838_v12  ;;  %v848_v24 = vadd.s32 24, %v838_v12  ;;  %vm362_vm2 = vcmp.ge.s32.totalorder %v857_v35, 2  ;;  %vm363_vm3 = vcmp.lt.s32.totalorder %v857_v35, 4 }
  0x11   : > { %715 = vmatpush.bf16.msra.mxu2 %v709_v1  ;;  %716 = vmatpush.bf16.msra.mxu3 %v709_v1  ;;  %v291_v20 = vcvt.s32.f32 %v281_v15  ;;  %v293_v21 = vcvt.s32.f32 %v283_v16  ;;  %v295_v22 = vcvt.s32.f32 %v285_v17  ;;  %v297_v25 = vadd.f32 0.5, %v289_v18  ;;  %vm873_vm5 = vmand %vm362_vm2, %vm363_vm3 }
  0x12   : > { %v734_v9 = vpop.eup %733  ;;  %v290_v30 = vcvt.s32.f32 %v845_v23  ;;  %v292_v31 = vcvt.s32.f32 %v848_v24  ;;  %vm345_vm4 = vcmp.eq.s32.totalorder %v857_v35, 1  ;;  %vm344_vm6 = vcmp.eq.s32.totalorder %v857_v35, 0 }
  0x13   : > { %v306_v11 = vmul.f32 8.0, %v734_v9  ;;  %vm310_vm1 = vweird.f32 %v734_v9  ;;  %v299_v27 = vadd.f32 0.5, %v291_v20  ;;  %v301_v28 = vadd.f32 0.5, %v293_v21 }
  0x14   : > { %255 = vmatpush.bf16.msra.mxu0 %v708_v2  ;;  %717 = vmatpush.bf16.msra.mxu1 %v708_v2  ;;  %v303_v29 = vadd.f32 0.5, %v295_v22  ;;  %v298_v37 = vadd.f32 0.5, %v290_v30  ;;  %v300_v38 = vadd.f32 0.5, %v292_v31  ;;  %v880_v58 = vadd.s32 40, %v838_v12 }
  0x15   : > { %718 = vmatpush.bf16.msra.mxu2 %v708_v2  ;;  %719 = vmatpush.bf16.msra.mxu3 %v708_v2  ;;  %v307_v13 = vsub.f32 1.0, %v306_v11  ;;  %vm565_vm7 = vcmp.lt.s32.totalorder %v857_v35, 2 }
  0x16   : > { %v294_v11 = vcvt.s32.f32 %v880_v58 }
  0x17   : > { %v308_v14 = vmul.f32 %v734_v9, %v307_v13 }
  0x18   : > { %256 = vmatpush.bf16.msra.mxu0 %v707_v3  ;;  %720 = vmatpush.bf16.msra.mxu1 %v707_v3 }
  0x19   : > { %721 = vmatpush.bf16.msra.mxu2 %v707_v3  ;;  %722 = vmatpush.bf16.msra.mxu3 %v707_v3  ;;  %v309_v19 = vadd.f32 %v734_v9, %v308_v14 }
  0x1b   : > { %687 = vmatmul.msk.bf16.vlgmr.msra.gmra.mxu0 %vm236_vm0, %v703_v4  ;;  %688 = vmatmul.msk.bf16.vlgmr.msra.gmra.mxu1 %vm236_vm0, %v704_v5  ;;  %v850_v26 = vsel %vm310_vm1, %v734_v9, %v309_v19 }
  0x1c   : > { %689 = vmatmul.msk.bf16.vlgmr.msra.gmra.mxu2 %vm236_vm0, %v705_v6  ;;  %690 = vmatmul.msk.bf16.vlgmr.msra.gmra.mxu3 %vm236_vm0, %v706_v7  ;;  %v312_v32 = vmul.f32 %v850_v26, %v297_v25  ;;  %v314_v33 = vmul.f32 %v850_v26, %v299_v27  ;;  %v316_v34 = vmul.f32 %v850_v26, %v301_v28 }
  0x1d   : > { %v318_v36 = vmul.f32 %v850_v26, %v303_v29  ;;  %v313_v44 = vmul.f32 %v850_v26, %v298_v37  ;;  %v315_v45 = vmul.f32 %v850_v26, %v300_v38 }
  0x1e   : > { %v320_v39 = vfloor.f32 %v312_v32  ;;  %v322_v41 = vfloor.f32 %v314_v33  ;;  %v324_v42 = vfloor.f32 %v316_v34 }
  0x1f   : > { %v326_v43 = vfloor.f32 %v318_v36  ;;  %v321_v55 = vfloor.f32 %v313_v44  ;;  %v323_v57 = vfloor.f32 %v315_v45 }
  0x20   : > { %v328_v47 = vmul.f32 8.0, %v320_v39  ;;  %v330_v52 = vmul.f32 8.0, %v322_v41  ;;  %v332_v53 = vmul.f32 8.0, %v324_v42  ;;  %v346_v60 = vsel %vm345_vm4, %v320_v39, 0.0 }
  0x21   : > { %v334_v54 = vmul.f32 8.0, %v326_v43  ;;  %v348_v0 = vsel %vm345_vm4, %v322_v41, 0.0  ;;  %v350_v3 = vsel %vm345_vm4, %v324_v42, 0.0  ;;  %v329_v5 = vmul.f32 8.0, %v321_v55 }
  0x22   : > { %v336_v59 = vsub.f32 %v289_v18, %v328_v47  ;;  %v338_v63 = vsub.f32 %v291_v20, %v330_v52  ;;  %v340_v1 = vsub.f32 %v293_v21, %v332_v53  ;;  %v352_v9 = vsel %vm345_vm4, %v326_v43, 0.0 }
  0x23   : > { %v342_v4 = vsub.f32 %v295_v22, %v334_v54  ;;  %v331_v10 = vmul.f32 8.0, %v323_v57  ;;  %v902_v18 = vadd.s32 56, %v838_v12  ;;  %v337_v22 = vsub.f32 %v290_v30, %v329_v5 }
  0x24   : > { %v354_v15 = vsel %vm344_vm6, %v336_v59, %v346_v60  ;;  %v356_v16 = vsel %vm344_vm6, %v338_v63, %v348_v0  ;;  %v358_v19 = vsel %vm344_vm6, %v340_v1, %v350_v3  ;;  %v347_v27 = vsel %vm345_vm4, %v321_v55, 0.0 }
  0x25   : > { %v360_v21 = vsel %vm344_vm6, %v342_v4, %v352_v9  ;;  %v339_v28 = vsub.f32 %v292_v31, %v331_v10  ;;  %v302_v12 = vadd.f32 0.5, %v294_v11  ;;  %v349_v36 = vsel %vm345_vm4, %v323_v57, 0.0 }
  0x26   : > { %v296_v37 = vcvt.s32.f32 %v902_v18  ;;  %v355_v44 = vsel %vm344_vm6, %v337_v22, %v347_v27 }
  0x27   : > { %v935_v47 = vmul.f32 %v850_v26, %v302_v12 }
  0x28   : > { %v944_v52 = vadd.f32 0.5, %v296_v37 }
  0x98   : > { %v258_v46 = vpop.f32.mrf.mxu0  ;;  %v263_v48 = vpop.f32.mrf.mxu1 }
  0x99   : > { %v259_v49 = vadd.f32 %v865_v40, %v258_v46  ;;  %v264_v51 = vadd.f32 %v865_v40, %v263_v48  ;;  %v932_v46 = vsel %vm344_vm6, %v339_v28, %v349_v36 }
  0x9b   : > { %v691_v56 = vmul.f32 -1.442695, %v259_v49  ;;  %v381_v61 = vsel %vm873_vm5, %v259_v49, 0.0  ;;  %v693_v62 = vmul.f32 -1.442695, %v264_v51  ;;  %v383_v2 = vsel %vm873_vm5, %v264_v51, 0.0 }
  0x9c   : > { %v389_v6 = vmul.f32 1.442695, %v381_v61  ;;  %v393_v17 = vmul.f32 1.442695, %v383_v2  ;;  %v365_v30 = vadd.f32 %v354_v15, %v259_v49  ;;  %v367_v31 = vadd.f32 %v356_v16, %v264_v51 }
  0x9d   : > { %735 = vpow2.f32 %v691_v56 }
  0x9e   : > { %737 = vpow2.f32 %v693_v62  ;;  %v937_v49 = vmul.f32 4.0, %v365_v30  ;;  %v946_v54 = vmul.f32 4.0, %v367_v31 }
  0x9f   : > { %v268_v7 = vpop.f32.mrf.mxu2  ;;  %v273_v8 = vpop.f32.mrf.mxu3  ;;  %739 = vpow2.f32 %v389_v6 }
  0xa0   : > { %v269_v13 = vadd.f32 %v865_v40, %v268_v7  ;;  %v274_v14 = vadd.f32 %v865_v40, %v273_v8  ;;  %v260_v25 = vpop.f32.mrf.mxu0  ;;  %v265_v34 = vpop.f32.mrf.mxu1 }
  0xa1   : > { %v261_v39 = vadd.f32 %v865_v40, %v260_v25  ;;  %v928_v45 = vadd.f32 %v865_v40, %v265_v34 }
  0xa2   : > { %v695_v20 = vmul.f32 -1.442695, %v269_v13  ;;  %v385_v32 = vsel %vm873_vm5, %v269_v13, 0.0  ;;  %v697_v33 = vmul.f32 -1.442695, %v274_v14  ;;  %v369_v38 = vadd.f32 %v358_v19, %v269_v13 }
  0xa3   : > { %v736_v23 = vpop.eup %735  ;;  %v397_v42 = vmul.f32 1.442695, %v385_v32  ;;  %v371_v43 = vadd.f32 %v360_v21, %v274_v14  ;;  %v387_v51 = vsel %vm873_vm5, %v274_v14, 0.0  ;;  %v950_v56 = vadd.f32 %v355_v44, %v261_v39 }
  0xa4   : > { %v914_v29 = vadd.f32 1.0, %v736_v23  ;;  %741 = vpow2.f32 %v695_v20  ;;  %v738_v24 = vpop.eup %737  ;;  %v948_v55 = vmul.f32 4.0, %v369_v38  ;;  %v692_v57 = vmul.f32 -1.442695, %v261_v39 }
  0xa5   : > { %743 = vpow2.f32 %v393_v17  ;;  %v923_v41 = vadd.f32 1.0, %v738_v24  ;;  %v740_v48 = vpop.eup %739  ;;  %v954_v61 = vmul.f32 4.0, %v371_v43  ;;  %v382_v62 = vsel %vm873_vm5, %v261_v39, 0.0 }
  0xa6   : > { %745 = vrcp.f32 %v914_v29  ;;  %v454_v0 = vand.u32 2147483647, %v914_v29  ;;  %v401_v1 = vmul.f32 1.442695, %v387_v51  ;;  %v694_v2 = vmul.f32 -1.442695, %v928_v45 }
  0xa7   : > { %747 = vpow2.f32 %v697_v33  ;;  %v405_v3 = vmul.f32 4.0, %v740_v48  ;;  %v456_v5 = vand.u32 2147483648, %v914_v29  ;;  %vm450_vm8 = vweird.f32 %v914_v29 }
  0xa8   : > { %749 = vrcp.f32 %v923_v41  ;;  %v484_v8 = vand.u32 2147483647, %v923_v41  ;;  %v391_v9 = vmul.f32 1.442695, %v382_v62  ;;  %v486_v14 = vand.u32 2147483648, %v923_v41 }
  0xa9   : > { %751 = vpow2.f32 %v397_v42  ;;  %vm971_vm10 = vcmp.eq.f32.partialorder %v454_v0, 8.507059e+37  ;;  %v384_v19 = vsel %vm873_vm5, %v928_v45, 0.0  ;;  %v457_v22 = vor.u32 1.1754944e-38, %v456_v5 }
  0xaa   : > { %v742_v53 = vpop.eup %741  ;;  %753 = vpow2.f32 %v692_v57  ;;  %vm480_vm12 = vweird.f32 %v923_v41  ;;  %vm981_vm13 = vcmp.eq.f32.partialorder %v484_v8, 8.507059e+37  ;;  %v487_v32 = vor.u32 1.1754944e-38, %v486_v14 }
  0xab   : > { %v744_v59 = vpop.eup %743  ;;  %v952_v60 = vadd.f32 1.0, %v742_v53  ;;  %v395_v30 = vmul.f32 1.442695, %v384_v19  ;;  %v275_v19 = vpop.f32.mrf.mxu3 }
  0xac   : > { %v746_v63 = vpop.eup %745  ;;  %v965_v7 = vmul.f32 4.0, %v744_v59  ;;  %v270_v59 = vpop.f32.mrf.mxu2 }
  0xad   : > { %v446_v4 = vmul.f32 %v746_v63, %v914_v29  ;;  %755 = vrcp.f32 %v952_v60  ;;  %v748_v6 = vpop.eup %747  ;;  %vm451_vm11 = vweird.f32 %v746_v63  ;;  %vm510_vm0 = vweird.f32 %v952_v60 }
  0xae   : > { %v750_v10 = vpop.eup %749  ;;  %v969_v15 = vadd.f32 1.0, %v748_v6  ;;  %757 = vpow2.f32 %v694_v2  ;;  %vm452_vm14 = vmor %vm450_vm8, %vm451_vm11  ;;  %v514_v39 = vand.u32 2147483647, %v952_v60  ;;  %v516_v48 = vand.u32 2147483648, %v952_v60 }
  0xaf   : > { %v447_v13 = vsub.f32 1.0, %v446_v4  ;;  %v476_v17 = vmul.f32 %v750_v10, %v923_v41  ;;  %759 = vpow2.f32 %v401_v1  ;;  %v752_v20 = vpop.eup %751  ;;  %vm481_vm15 = vweird.f32 %v750_v10 }
  0xb0   : > { %761 = vrcp.f32 %v969_v15  ;;  %v754_v23 = vpop.eup %753  ;;  %v409_v36 = vmul.f32 4.0, %v752_v20  ;;  %vm482_vm1 = vmor %vm480_vm12, %vm481_vm15  ;;  %v544_v4 = vand.u32 2147483647, %v969_v15  ;;  %v1023_v8 = vadd.f32 %v865_v40, %v270_v59 }
  0xb1   : > { %v448_v21 = vmul.f32 %v746_v63, %v447_v13  ;;  %v477_v25 = vsub.f32 1.0, %v476_v17  ;;  %763 = vpow2.f32 %v391_v9  ;;  %v986_v33 = vadd.f32 1.0, %v754_v23 }
  0xb2   : > { %vm515_vm8 = vcmp.eq.f32.partialorder %v514_v39, 8.507059e+37  ;;  %v517_v13 = vor.u32 1.1754944e-38, %v516_v48  ;;  %v546_v14 = vand.u32 2147483648, %v969_v15  ;;  %vm540_vm11 = vweird.f32 %v969_v15 }
  0xb3   : > { %v756_v28 = vpop.eup %755  ;;  %v449_v12 = vadd.f32 %v746_v63, %v448_v21  ;;  %v478_v34 = vmul.f32 %v750_v10, %v477_v25  ;;  %765 = vrcp.f32 %v986_v33  ;;  %vm1036_vm12 = vcmp.eq.f32.partialorder %v544_v4, 8.507059e+37 }
  0xb4   : > { %v506_v24 = vmul.f32 %v756_v28, %v952_v60  ;;  %v758_v31 = vpop.eup %757  ;;  %vm511_vm2 = vweird.f32 %v756_v28  ;;  %767 = vpow2.f32 %v395_v30  ;;  %v469_v60 = vand.u32 2147483647, %v986_v33 }
  0xb5   : > { %v453_v38 = vsel %vm452_vm14, %v746_v63, %v449_v12  ;;  %v760_v42 = vpop.eup %759  ;;  %v479_v43 = vadd.f32 %v750_v10, %v478_v34  ;;  %v1007_v57 = vadd.f32 1.0, %v758_v31  ;;  %vm512_vm3 = vmor %vm510_vm0, %vm511_vm2  ;;  %v696_v27 = vmul.f32 -1.442695, %v1023_v8 }
  0xb6   : > { %v458_v29 = vsel %vm971_vm10, %v457_v22, %v453_v38  ;;  %v507_v44 = vsub.f32 1.0, %v506_v24  ;;  %v762_v51 = vpop.eup %761  ;;  %v1049_v30 = vadd.f32 %v865_v40, %v275_v19  ;;  %vm465_vm15 = vweird.f32 %v986_v33 }
  0xb7   : > { %v566_v53 = vsel %vm873_vm5, %v405_v3, %v458_v29  ;;  %v764_v62 = vpop.eup %763  ;;  %v483_v0 = vsel %vm482_vm1, %v750_v10, %v479_v43  ;;  %v536_v2 = vmul.f32 %v762_v51, %v969_v15  ;;  %v411_v3 = vmul.f32 4.0, %v760_v42 }
  0xb8   : > { %v574_v63 = vsel %vm565_vm7, %v937_v49, %v566_v53  ;;  %v508_v1 = vmul.f32 %v756_v28, %v507_v44  ;;  %v488_v41 = vsel %vm981_vm13, %v487_v32, %v483_v0  ;;  %769 = vrcp.f32 %v1007_v57 }
  0xb9   : > { %583 = vst.msk [vmem:[%s997_s4] sm:$0xff] %vm582_vm9, %v574_v63  ;;  %v568_v5 = vsel %vm873_vm5, %v965_v7, %v488_v41  ;;  %v537_v6 = vsub.f32 1.0, %v536_v2  ;;  %v766_v9 = vpop.eup %765  ;;  %vm541_vm10 = vweird.f32 %v762_v51  ;;  %v547_v15 = vor.u32 1.1754944e-38, %v546_v14 }
  0xba   : > { %v509_v49 = vadd.f32 %v756_v28, %v508_v1  ;;  %v576_v10 = vsel %vm565_vm7, %v946_v54, %v568_v5  ;;  %v461_v17 = vmul.f32 %v766_v9, %v986_v33  ;;  %v768_v20 = vpop.eup %767  ;;  %vm542_vm13 = vmor %vm540_vm11, %vm541_vm10  ;;  %v471_v32 = vand.u32 2147483648, %v986_v33 }
  0xbb   : > { %585 = vst.msk [vmem:[%s997_s4 + $0x10] sm:$0xff] %vm582_vm9, %v576_v10  ;;  %v538_v16 = vmul.f32 %v762_v51, %v537_v6  ;;  %vm466_vm14 = vweird.f32 %v766_v9  ;;  %v406_v38 = vmul.f32 4.0, %v764_v62  ;;  %771 = vpow2.f32 %v696_v27 }
  0xbc   : > { %v513_v7 = vsel %vm512_vm3, %v756_v28, %v509_v49  ;;  %v462_v25 = vsub.f32 1.0, %v461_v17  ;;  %vm470_vm0 = vcmp.eq.f32.partialorder %v469_v60, 8.507059e+37  ;;  %vm467_vm1 = vmor %vm465_vm15, %vm466_vm14  ;;  %v472_v29 = vor.u32 1.1754944e-38, %v471_v32 }
  0xbd   : > { %v518_v21 = vsel %vm515_vm8, %v517_v13, %v513_v7  ;;  %v539_v23 = vadd.f32 %v762_v51, %v538_v16  ;;  %v501_v43 = vand.u32 2147483648, %v1007_v57  ;;  %v698_v44 = vmul.f32 -1.442695, %v1049_v30 }
  0xbe   : > { %v570_v22 = vsel %vm873_vm5, %v409_v36, %v518_v21  ;;  %v770_v28 = vpop.eup %769  ;;  %v463_v36 = vmul.f32 %v766_v9, %v462_v25  ;;  %v374_v53 = vmul.f32 4.0, %v950_v56  ;;  %vm495_vm3 = vweird.f32 %v1007_v57 }
  0xbf   : > { %v578_v12 = vsel %vm565_vm7, %v948_v55, %v570_v22  ;;  %v543_v34 = vsel %vm542_vm13, %v762_v51, %v539_v23  ;;  %v491_v24 = vmul.f32 %v770_v28, %v1007_v57  ;;  %vm496_vm2 = vweird.f32 %v770_v28 }
  0xc0   : > { %587 = vst.msk [vmem:[%s997_s4 + $0x20] sm:$0xff] %vm582_vm9, %v578_v12  ;;  %v548_v31 = vsel %vm1036_vm12, %v547_v15, %v543_v34  ;;  %v464_v40 = vadd.f32 %v766_v9, %v463_v36  ;;  %v499_v51 = vand.u32 2147483647, %v1007_v57  ;;  %773 = vpow2.f32 %v698_v44  ;;  %vm497_vm8 = vmor %vm495_vm3, %vm496_vm2 }
  0xc1   : > { %v572_v55 = vsel %vm873_vm5, %v411_v3, %v548_v31  ;;  %v492_v39 = vsub.f32 1.0, %v491_v24  ;;  %v325_v0 = vfloor.f32 %v935_v47  ;;  %v772_v1 = vpop.eup %771  ;;  %v502_v41 = vor.u32 1.1754944e-38, %v501_v43 }
  0xc2   : > { %v580_v42 = vsel %vm565_vm7, %v954_v61, %v572_v55  ;;  %v468_v33 = vsel %vm467_vm1, %v766_v9, %v464_v40  ;;  %v368_v61 = vadd.f32 %v932_v46, %v928_v45  ;;  %v386_v56 = vsel %vm873_vm5, %v1023_v8, 0.0 }
  0xc3   : > { %589 = vst.msk [vmem:[%s997_s4 + $0x30] sm:$0xff] %vm582_vm9, %v580_v42  ;;  %v493_v48 = vmul.f32 %v770_v28, %v492_v39  ;;  %v473_v59 = vsel %vm470_vm0, %v472_v29, %v468_v33  ;;  %v319_v45 = vmul.f32 %v850_v26, %v944_v52  ;;  %v408_v46 = vmul.f32 4.0, %v768_v20 }
  0xc4   : > { %v567_v62 = vsel %vm873_vm5, %v406_v38, %v473_v59  ;;  %vm500_vm10 = vcmp.eq.f32.partialorder %v499_v51, 8.507059e+37  ;;  %v442_v47 = vadd.f32 1.0, %v772_v1  ;;  %v376_v3 = vmul.f32 4.0, %v368_v61 }
  0xc5   : > { %v494_v63 = vadd.f32 %v770_v28, %v493_v48  ;;  %v575_v2 = vsel %vm565_vm7, %v374_v53, %v567_v62  ;;  %v333_v9 = vmul.f32 8.0, %v325_v0  ;;  %v399_v10 = vmul.f32 1.442695, %v386_v56 }
  0xc6   : > { %584 = vst.msk [vmem:[%s997_s4 + $0x8] sm:$0xff] %vm582_vm9, %v575_v2  ;;  %775 = vrcp.f32 %v442_v47  ;;  %v774_v49 = vpop.eup %773  ;;  %v327_v13 = vfloor.f32 %v319_v45  ;;  %v388_v52 = vsel %vm873_vm5, %v1049_v30, 0.0  ;;  %v351_v17 = vsel %vm345_vm4, %v325_v0, 0.0 }
  0xc7   : > { %v498_v57 = vsel %vm497_vm8, %v770_v28, %v494_v63  ;;  %v444_v26 = vadd.f32 1.0, %v774_v49  ;;  %v341_v14 = vsub.f32 %v294_v11, %v333_v9  ;;  %v403_v19 = vmul.f32 1.442695, %v388_v52 }
  0xc8   : > { %v503_v4 = vsel %vm500_vm10, %v502_v41, %v498_v57  ;;  %v335_v7 = vmul.f32 8.0, %v327_v13  ;;  %v529_v23 = vand.u32 2147483647, %v442_v47  ;;  %v531_v25 = vand.u32 2147483648, %v442_v47 }
  0xc9   : > { %v569_v5 = vsel %vm873_vm5, %v408_v46, %v503_v4  ;;  %777 = vrcp.f32 %v444_v26  ;;  %v359_v21 = vsel %vm344_vm6, %v341_v14, %v351_v17  ;;  %v353_v58 = vsel %vm345_vm4, %v327_v13, 0.0 }
  0xca   : > { %v577_v6 = vsel %vm565_vm7, %v376_v3, %v569_v5  ;;  %779 = vpow2.f32 %v399_v10  ;;  %v343_v60 = vsub.f32 %v296_v37, %v335_v7  ;;  %v370_v12 = vadd.f32 %v359_v21, %v1023_v8 }
  0xcb   : > { %586 = vst.msk [vmem:[%s997_s4 + $0x18] sm:$0xff] %vm582_vm9, %v577_v6  ;;  %781 = vpow2.f32 %v403_v19  ;;  %vm525_vm12 = vweird.f32 %v442_v47  ;;  %vm530_vm14 = vcmp.eq.f32.partialorder %v529_v23, 8.507059e+37  ;;  %v532_v34 = vor.u32 1.1754944e-38, %v531_v25 }
  0xcc   : > { %v776_v16 = vpop.eup %775  ;;  %v361_v32 = vsel %vm344_vm6, %v343_v60, %v353_v58  ;;  %v561_v36 = vand.u32 2147483648, %v444_v26  ;;  %v559_v38 = vand.u32 2147483647, %v444_v26  ;;  %v378_v40 = vmul.f32 4.0, %v370_v12 }
  0xcd   : > { %v521_v20 = vmul.f32 %v776_v16, %v442_v47  ;;  %vm526_vm11 = vweird.f32 %v776_v16  ;;  %v372_v8 = vadd.f32 %v361_v32, %v1049_v30  ;;  %vm555_vm6 = vweird.f32 %v444_v26 }
  0xce   : > { %vm527_vm13 = vmor %vm525_vm12, %vm526_vm11  ;;  %v562_v44 = vor.u32 1.1754944e-38, %v561_v36  ;;  %vm560_vm0 = vcmp.eq.f32.partialorder %v559_v38, 8.507059e+37 }
  0xcf   : > { %v522_v54 = vsub.f32 1.0, %v521_v20  ;;  %v778_v22 = vpop.eup %777  ;;  %v380_v51 = vmul.f32 4.0, %v372_v8 }
  0xd0   : > { %v780_v11 = vpop.eup %779  ;;  %v551_v28 = vmul.f32 %v778_v22, %v444_v26  ;;  %vm556_vm4 = vweird.f32 %v778_v22 }
  0xd1   : > { %v523_v27 = vmul.f32 %v776_v16, %v522_v54  ;;  %v410_v37 = vmul.f32 4.0, %v780_v11  ;;  %v782_v55 = vpop.eup %781  ;;  %vm557_vm15 = vmor %vm555_vm6, %vm556_vm4 }
  0xd2   : > { %v552_v18 = vsub.f32 1.0, %v551_v28  ;;  %v412_v33 = vmul.f32 4.0, %v782_v55 }
  0xd3   : > { %v524_v15 = vadd.f32 %v776_v16, %v523_v27 }
  0xd4   : > { %v553_v31 = vmul.f32 %v778_v22, %v552_v18 }
  0xd5   : > { %v528_v24 = vsel %vm527_vm13, %v776_v16, %v524_v15 }
  0xd6   : > { %v533_v39 = vsel %vm530_vm14, %v532_v34, %v528_v24  ;;  %v554_v29 = vadd.f32 %v778_v22, %v553_v31 }
  0xd7   : > { %v571_v42 = vsel %vm873_vm5, %v410_v37, %v533_v39 }
  0xd8   : > { %v579_v43 = vsel %vm565_vm7, %v378_v40, %v571_v42  ;;  %v558_v48 = vsel %vm557_vm15, %v778_v22, %v554_v29 }
  0xd9   : > { %588 = vst.msk [vmem:[%s997_s4 + $0x28] sm:$0xff] %vm582_vm9, %v579_v43  ;;  %v563_v53 = vsel %vm560_vm0, %v562_v44, %v558_v48 }
  0xda   : > { %v573_v30 = vsel %vm873_vm5, %v412_v33, %v563_v53 }
  0xdb   : > { %v581_v59 = vsel %vm565_vm7, %v380_v51, %v573_v30 }
  0xdc   : > { %590 = vst.msk [vmem:[%s997_s4 + $0x38] sm:$0xff] %vm582_vm9, %v581_v59 }
  0xdd PF: > { %s13_s12 = sadd.s32 1, %s789_s12  }
  0xde   : > { %p10_p4 = scmp.ge.s32.totalorder %s13_s12, 4  }
  0xe0   :  { %12 = sbr.rel (!%p10_p4) target bundleno = 1 (0x1), region = 62 }

// kernel: yolox_forward.10
= control target key start
LH: loop header
LB: loop body
LE: loop exit
PB: predicated region body
PF: predicated region fallthrough
CT: control target
= control target key end

     0   :  { %s4427_s15 = smov 0   ;;  %s4429_s16 = smov 0   ;;  %s6941_s0 = inlined_call_operand.vmem [shape: bf16[2,2,8,512], index: 0, kind: input, shape index: {}, may-alias: {0,1}]   ;;  %s6942_s1 = inlined_call_operand.vmem [shape: bf16[2,2,8,512], index: 1, kind: input, shape index: {}, may-alias: {0,1}]   ;;  %s6943_s2 = inlined_call_operand.vmem [shape: bf16[4,512,256], index: 2, kind: input, shape index: {}]   ;;  %s6944_s3 = inlined_call_operand.vmem [shape: f32[1,256], index: 3, kind: input, shape index: {}]   ;;  %s6945_s4 = inlined_call_operand.vmem [shape: bf16[2,1,8,256], index: 4, kind: output, shape index: {}]  }
   0x1   :  { %s4431_s17 = smov 0  }
   0x2 LB: > { %s26_s18 = sadd.s32 1, %s4396_s16  ;;  %p2858_p0 = scmp.ge.s32.totalorder %s4400_s17, 1  ;;  %s4400_s17 = sphi %s4431_s17, %s14_s17   ;;  %s4396_s16 = sphi %s4429_s16, %s7129_s16   ;;  %s4392_s15 = sphi %s4427_s15, %s7128_s15  }
   0x3   : > { %p28_p1 = scmp.ge.s32.totalorder %s26_s18, 2  ;;  %p202_p2 = scmp.lt.s32.totalorder %s4400_s17, 3 }
   0x5   : > { %s7131_s18 = smov (%p28_p1, %s26_s18), 0  ;;  %p203_p3 = pnand %p2858_p0, %p202_p2 }
   0x7   : > { %206 = sbr.rel (%p203_p3) target bundleno = 647 (0x287), region = 36 }
   0xc   : > { %v2923_v0 = vld [vmem:[%s6943_s2 + $0x70] sm:$0xf]  ;;  %v4104_v1 = vld [vmem:[%s6943_s2 + $0x74] sm:$0xf0]  ;;  %v2915_v11 = vld [vmem:[%s6943_s2 + $0x60] sm:$0xf] }
   0xd   : > { %v2987_v2 = vld [vmem:[%s6943_s2 + $0xf0] sm:$0xf]  ;;  %v2924_v3 = vor.u32 %v4104_v1, %v2923_v0  ;;  %v4120_v4 = vld [vmem:[%s6943_s2 + $0xf4] sm:$0xf0]  ;;  %v4102_v13 = vld [vmem:[%s6943_s2 + $0x64] sm:$0xf0] }
   0xe   : > { %v3051_v5 = vld [vmem:[%s6943_s2 + $0x170] sm:$0xf]  ;;  %v4136_v6 = vld [vmem:[%s6943_s2 + $0x174] sm:$0xf0]  ;;  %v2988_v7 = vor.u32 %v4120_v4, %v2987_v2  ;;  %v2979_v14 = vld [vmem:[%s6943_s2 + $0xe0] sm:$0xf]  ;;  %v2916_v16 = vor.u32 %v4102_v13, %v2915_v11 }
   0xf   : > { %v3052_v8 = vor.u32 %v4136_v6, %v3051_v5  ;;  %v3115_v9 = vld [vmem:[%s6943_s2 + $0x1f0] sm:$0xf]  ;;  %v4152_v10 = vld [vmem:[%s6943_s2 + $0x1f4] sm:$0xf0]  ;;  %677 = vmatpush.bf16.msra.mxu0 %v2924_v3  ;;  %v4118_v15 = vld [vmem:[%s6943_s2 + $0xe4] sm:$0xf0] }
  0x10   : > { %v3116_v12 = vor.u32 %v4152_v10, %v3115_v9  ;;  %690 = vmatpush.bf16.msra.mxu1 %v2988_v7  ;;  %v2980_v17 = vor.u32 %v4118_v15, %v2979_v14  ;;  %v3043_v18 = vld [vmem:[%s6943_s2 + $0x160] sm:$0xf]  ;;  %v4134_v19 = vld [vmem:[%s6943_s2 + $0x164] sm:$0xf0]  ;;  %v2907_v23 = vld [vmem:[%s6943_s2 + $0x50] sm:$0xf] }
  0x11   : > { %703 = vmatpush.bf16.msra.mxu2 %v3052_v8  ;;  %v3107_v20 = vld [vmem:[%s6943_s2 + $0x1e0] sm:$0xf]  ;;  %v3044_v21 = vor.u32 %v4134_v19, %v3043_v18  ;;  %v4150_v22 = vld [vmem:[%s6943_s2 + $0x1e4] sm:$0xf0]  ;;  %v4100_v24 = vld [vmem:[%s6943_s2 + $0x54] sm:$0xf0] }
  0x12   : > { %716 = vmatpush.bf16.msra.mxu3 %v3116_v12  ;;  %v3108_v25 = vor.u32 %v4150_v22, %v3107_v20  ;;  %v2971_v26 = vld [vmem:[%s6943_s2 + $0xd0] sm:$0xf]  ;;  %v4116_v27 = vld [vmem:[%s6943_s2 + $0xd4] sm:$0xf0]  ;;  %v2908_v29 = vor.u32 %v4100_v24, %v2907_v23  ;;  %v2899_v35 = vld [vmem:[%s6943_s2 + $0x40] sm:$0xf] }
  0x13   : > { %v3035_v28 = vld [vmem:[%s6943_s2 + $0x150] sm:$0xf]  ;;  %678 = vmatpush.bf16.msra.mxu0 %v2916_v16  ;;  %v4132_v30 = vld [vmem:[%s6943_s2 + $0x154] sm:$0xf0]  ;;  %v2972_v33 = vor.u32 %v4116_v27, %v2971_v26  ;;  %v4098_v36 = vld [vmem:[%s6943_s2 + $0x44] sm:$0xf0] }
  0x14   : > { %v3099_v31 = vld [vmem:[%s6943_s2 + $0x1d0] sm:$0xf]  ;;  %v4148_v32 = vld [vmem:[%s6943_s2 + $0x1d4] sm:$0xf0]  ;;  %691 = vmatpush.bf16.msra.mxu1 %v2980_v17  ;;  %v3036_v34 = vor.u32 %v4132_v30, %v3035_v28  ;;  %v2963_v37 = vld [vmem:[%s6943_s2 + $0xc0] sm:$0xf]  ;;  %v2900_v44 = vor.u32 %v4098_v36, %v2899_v35 }
  0x15   : > { %704 = vmatpush.bf16.msra.mxu2 %v3044_v21  ;;  %v3100_v38 = vor.u32 %v4148_v32, %v3099_v31  ;;  %v4114_v39 = vld [vmem:[%s6943_s2 + $0xc4] sm:$0xf0]  ;;  %v3027_v40 = vld [vmem:[%s6943_s2 + $0x140] sm:$0xf]  ;;  %v2891_v47 = vld [vmem:[%s6943_s2 + $0x30] sm:$0xf] }
  0x16   : > { %717 = vmatpush.bf16.msra.mxu3 %v3108_v25  ;;  %v4130_v41 = vld [vmem:[%s6943_s2 + $0x144] sm:$0xf0]  ;;  %v3091_v42 = vld [vmem:[%s6943_s2 + $0x1c0] sm:$0xf]  ;;  %v2964_v45 = vor.u32 %v4114_v39, %v2963_v37  ;;  %v4096_v48 = vld [vmem:[%s6943_s2 + $0x34] sm:$0xf0] }
  0x17   : > { %v4146_v43 = vld [vmem:[%s6943_s2 + $0x1c4] sm:$0xf0]  ;;  %679 = vmatpush.bf16.msra.mxu0 %v2908_v29  ;;  %v3028_v46 = vor.u32 %v4130_v41, %v3027_v40  ;;  %v2955_v49 = vld [vmem:[%s6943_s2 + $0xb0] sm:$0xf]  ;;  %v4112_v51 = vld [vmem:[%s6943_s2 + $0xb4] sm:$0xf0]  ;;  %v2892_v56 = vor.u32 %v4096_v48, %v2891_v47 }
  0x18   : > { %692 = vmatpush.bf16.msra.mxu1 %v2972_v33  ;;  %v3092_v50 = vor.u32 %v4146_v43, %v3091_v42  ;;  %v3019_v52 = vld [vmem:[%s6943_s2 + $0x130] sm:$0xf]  ;;  %v4128_v53 = vld [vmem:[%s6943_s2 + $0x134] sm:$0xf0]  ;;  %v2956_v57 = vor.u32 %v4112_v51, %v2955_v49  ;;  %v2883_v59 = vld [vmem:[%s6943_s2 + $0x20] sm:$0xf] }
  0x19   : > { %705 = vmatpush.bf16.msra.mxu2 %v3036_v34  ;;  %v3083_v54 = vld [vmem:[%s6943_s2 + $0x1b0] sm:$0xf]  ;;  %v4144_v55 = vld [vmem:[%s6943_s2 + $0x1b4] sm:$0xf0]  ;;  %v3020_v58 = vor.u32 %v4128_v53, %v3019_v52  ;;  %v4094_v60 = vld [vmem:[%s6943_s2 + $0x24] sm:$0xf0] }
  0x1a   : > { %718 = vmatpush.bf16.msra.mxu3 %v3100_v38  ;;  %v2947_v61 = vld [vmem:[%s6943_s2 + $0xa0] sm:$0xf]  ;;  %v3084_v62 = vor.u32 %v4144_v55, %v3083_v54  ;;  %v4110_v63 = vld [vmem:[%s6943_s2 + $0xa4] sm:$0xf0]  ;;  %v2884_v4 = vor.u32 %v4094_v60, %v2883_v59  ;;  %v2875_v7 = vld [vmem:[%s6943_s2 + $0x10] sm:$0xf] }
  0x1b   : > { %680 = vmatpush.bf16.msra.mxu0 %v2900_v44  ;;  %v3011_v0 = vld [vmem:[%s6943_s2 + $0x120] sm:$0xf]  ;;  %v4126_v1 = vld [vmem:[%s6943_s2 + $0x124] sm:$0xf0]  ;;  %v2948_v5 = vor.u32 %v4110_v63, %v2947_v61  ;;  %v4092_v8 = vld [vmem:[%s6943_s2 + $0x14] sm:$0xf0] }
  0x1c   : > { %693 = vmatpush.bf16.msra.mxu1 %v2964_v45  ;;  %v3075_v2 = vld [vmem:[%s6943_s2 + $0x1a0] sm:$0xf]  ;;  %v4142_v3 = vld [vmem:[%s6943_s2 + $0x1a4] sm:$0xf0]  ;;  %v3012_v6 = vor.u32 %v4126_v1, %v3011_v0  ;;  %v2939_v9 = vld [vmem:[%s6943_s2 + $0x90] sm:$0xf]  ;;  %v2876_v16 = vor.u32 %v4092_v8, %v2875_v7 }
  0x1d   : > { %706 = vmatpush.bf16.msra.mxu2 %v3028_v46  ;;  %v3076_v10 = vor.u32 %v4142_v3, %v3075_v2  ;;  %v4108_v11 = vld [vmem:[%s6943_s2 + $0x94] sm:$0xf0]  ;;  %v3003_v12 = vld [vmem:[%s6943_s2 + $0x110] sm:$0xf]  ;;  %v2867_v17 = vld [vmem:[%s6943_s2] sm:$0xf] }
  0x1e   : > { %719 = vmatpush.bf16.msra.mxu3 %v3092_v50  ;;  %v4124_v13 = vld [vmem:[%s6943_s2 + $0x114] sm:$0xf0]  ;;  %v3067_v14 = vld [vmem:[%s6943_s2 + $0x190] sm:$0xf]  ;;  %v4090_v18 = vld [vmem:[%s6943_s2 + $0x4] sm:$0xf0]  ;;  %v2940_v19 = vor.u32 %v4108_v11, %v2939_v9 }
  0x1f   : > { %681 = vmatpush.bf16.msra.mxu0 %v2892_v56  ;;  %v4140_v15 = vld [vmem:[%s6943_s2 + $0x194] sm:$0xf0]  ;;  %v3004_v20 = vor.u32 %v4124_v13, %v3003_v12  ;;  %v2931_v21 = vld [vmem:[%s6943_s2 + $0x80] sm:$0xf]  ;;  %v4106_v22 = vld [vmem:[%s6943_s2 + $0x84] sm:$0xf0]  ;;  %v2868_v31 = vor.u32 %v4090_v18, %v2867_v17 }
  0x20   : > { %694 = vmatpush.bf16.msra.mxu1 %v2956_v57  ;;  %v2995_v23 = vld [vmem:[%s6943_s2 + $0x100] sm:$0xf]  ;;  %v3068_v24 = vor.u32 %v4140_v15, %v3067_v14  ;;  %v4122_v25 = vld [vmem:[%s6943_s2 + $0x104] sm:$0xf0]  ;;  %v4103_v28 = vld [vmem:[%s6943_s2 + $0x74] sm:$0xf]  ;;  %v2932_v35 = vor.u32 %v4106_v22, %v2931_v21 }
  0x21   : > { %707 = vmatpush.bf16.msra.mxu2 %v3020_v58  ;;  %v3059_v26 = vld [vmem:[%s6943_s2 + $0x180] sm:$0xf]  ;;  %v4138_v27 = vld [vmem:[%s6943_s2 + $0x184] sm:$0xf0]  ;;  %v2925_v29 = vld [vmem:[%s6943_s2 + $0x78] sm:$0xf0]  ;;  %v2996_v36 = vor.u32 %v4122_v25, %v2995_v23 }
  0x22   : > { %720 = vmatpush.bf16.msra.mxu3 %v3084_v62  ;;  %v4119_v30 = vld [vmem:[%s6943_s2 + $0xf4] sm:$0xf]  ;;  %v2989_v32 = vld [vmem:[%s6943_s2 + $0xf8] sm:$0xf0]  ;;  %v3060_v39 = vor.u32 %v4138_v27, %v3059_v26  ;;  %v2928_v40 = vor.u32 %v4103_v28, %v2925_v29  ;;  %v4101_v43 = vld [vmem:[%s6943_s2 + $0x64] sm:$0xf] }
  0x23   : > { %682 = vmatpush.bf16.msra.mxu0 %v2884_v4  ;;  %v4135_v33 = vld [vmem:[%s6943_s2 + $0x174] sm:$0xf]  ;;  %v3053_v34 = vld [vmem:[%s6943_s2 + $0x178] sm:$0xf0]  ;;  %v2992_v41 = vor.u32 %v4119_v30, %v2989_v32  ;;  %v2917_v44 = vld [vmem:[%s6943_s2 + $0x68] sm:$0xf0] }
  0x24   : > { %695 = vmatpush.bf16.msra.mxu1 %v2948_v5  ;;  %v4151_v37 = vld [vmem:[%s6943_s2 + $0x1f4] sm:$0xf]  ;;  %v3117_v38 = vld [vmem:[%s6943_s2 + $0x1f8] sm:$0xf0]  ;;  %v3056_v42 = vor.u32 %v4135_v33, %v3053_v34  ;;  %v4117_v45 = vld [vmem:[%s6943_s2 + $0xe4] sm:$0xf]  ;;  %v2920_v52 = vor.u32 %v4101_v43, %v2917_v44 }
  0x25   : > { %708 = vmatpush.bf16.msra.mxu2 %v3012_v6  ;;  %v3120_v46 = vor.u32 %v4151_v37, %v3117_v38  ;;  %v2981_v47 = vld [vmem:[%s6943_s2 + $0xe8] sm:$0xf0]  ;;  %v4133_v48 = vld [vmem:[%s6943_s2 + $0x164] sm:$0xf]  ;;  %p246_p4 = scmp.lt.s32.totalorder %s4392_s15, 1  ;;  %vm1433_vm0 = vcmask 1040384  }
  0x26   : > { %721 = vmatpush.bf16.msra.mxu3 %v3076_v10  ;;  %v3045_v49 = vld [vmem:[%s6943_s2 + $0x168] sm:$0xf0]  ;;  %v4149_v50 = vld [vmem:[%s6943_s2 + $0x1e4] sm:$0xf]  ;;  %v4099_v53 = vld [vmem:[%s6943_s2 + $0x54] sm:$0xf]  ;;  %v2984_v56 = vor.u32 %v4117_v45, %v2981_v47 }
  0x27   : > { %683 = vmatpush.bf16.msra.mxu0 %v2876_v16  ;;  %v3109_v51 = vld [vmem:[%s6943_s2 + $0x1e8] sm:$0xf0]  ;;  %v2909_v54 = vld [vmem:[%s6943_s2 + $0x58] sm:$0xf0]  ;;  %v4115_v55 = vld [vmem:[%s6943_s2 + $0xd4] sm:$0xf]  ;;  %v3048_v57 = vor.u32 %v4133_v48, %v3045_v49 }
  0x28   : > { %696 = vmatpush.bf16.msra.mxu1 %v2940_v19  ;;  %v2973_v58 = vld [vmem:[%s6943_s2 + $0xd8] sm:$0xf0]  ;;  %v4131_v59 = vld [vmem:[%s6943_s2 + $0x154] sm:$0xf]  ;;  %s7133_s15 = smov (!%p246_p4, %s4392_s15), 1  ;;  %v3112_v60 = vor.u32 %v4149_v50, %v3109_v51  ;;  %v2912_v0 = vor.u32 %v4099_v53, %v2909_v54 }
  0x29   : > { %709 = vmatpush.bf16.msra.mxu2 %v3004_v20  ;;  %v3037_v61 = vld [vmem:[%s6943_s2 + $0x158] sm:$0xf0]  ;;  %v4147_v62 = vld [vmem:[%s6943_s2 + $0x1d4] sm:$0xf]  ;;  %s4085_s19 = sshll.u32 %s7133_s15, 5  ;;  %v2976_v3 = vor.u32 %v4115_v55, %v2973_v58  ;;  %s4088_s8 = sshll.u32 %s7133_s15, 3 }
  0x2a   : > { %722 = vmatpush.bf16.msra.mxu3 %v3068_v24  ;;  %v3101_v63 = vld [vmem:[%s6943_s2 + $0x1d8] sm:$0xf0]  ;;  %v4097_v1 = vld [vmem:[%s6943_s2 + $0x44] sm:$0xf]  ;;  %v2901_v2 = vld [vmem:[%s6943_s2 + $0x48] sm:$0xf0]  ;;  %s254_s26 = scalar_lea.vmem %s6941_s0, %s4085_s19  ;;  %v3040_v4 = vor.u32 %v4131_v59, %v3037_v61  ;;  %s274_s11 = scalar_lea.vmem %s6945_s4, %s4088_s8 }
  0x2b   : > { %684 = vmatpush.bf16.msra.mxu0 %v2868_v31  ;;  %v3104_v5 = vor.u32 %v4147_v62, %v3101_v63  ;;  %v4113_v6 = vld [vmem:[%s6943_s2 + $0xc4] sm:$0xf]  ;;  %v276_v7 = vld [vmem:[%s254_s26 + $0x8] sm:$0xff]  ;;  %v2904_v16 = vor.u32 %v4097_v1, %v2901_v2  ;;  %v4095_v25 = vld [vmem:[%s6943_s2 + $0x34] sm:$0xf]  ;;  %s4087_s23 = sadd.s32 16, %s4085_s19 }
  0x2c   : > { %697 = vmatpush.bf16.msra.mxu1 %v2932_v35  ;;  %v275_v8 = vld [vmem:[%s254_s26] sm:$0xff]  ;;  %v2965_v9 = vld [vmem:[%s6943_s2 + $0xc8] sm:$0xf0]  ;;  %v347_v12 = vunpack.c.l.b16 %v276_v7  ;;  %v348_v13 = vunpack.c.h.b16 %v276_v7  ;;  %v2893_v26 = vld [vmem:[%s6943_s2 + $0x38] sm:$0xf0]  ;;  %s264_s26 = scalar_lea.vmem %s6942_s1, %s4087_s23 }
  0x2d   : > { %710 = vmatpush.bf16.msra.mxu2 %v2996_v36  ;;  %v4129_v10 = vld [vmem:[%s6943_s2 + $0x144] sm:$0xf]  ;;  %v3029_v11 = vld [vmem:[%s6943_s2 + $0x148] sm:$0xf0]  ;;  %v345_v14 = vunpack.c.l.b16 %v275_v8  ;;  %v346_v15 = vunpack.c.h.b16 %v275_v8  ;;  %v2968_v23 = vor.u32 %v4113_v6, %v2965_v9  ;;  %v4111_v27 = vld [vmem:[%s6943_s2 + $0xb4] sm:$0xf]  ;;  %v2896_v34 = vor.u32 %v4095_v25, %v2893_v26 }
  0x2e   : > { %723 = vmatpush.bf16.msra.mxu3 %v3060_v39  ;;  %v4145_v17 = vld [vmem:[%s6943_s2 + $0x1c4] sm:$0xf]  ;;  %v3093_v18 = vld [vmem:[%s6943_s2 + $0x1c8] sm:$0xf0]  ;;  %v4745_v19 = vpack.c.b16 %v347_v12, %v347_v12  ;;  %v4747_v20 = vpack.c.b16 %v348_v13, %v348_v13  ;;  %v3032_v24 = vor.u32 %v4129_v10, %v3029_v11  ;;  %v2957_v29 = vld [vmem:[%s6943_s2 + $0xb8] sm:$0xf0] }
  0x2f   : > { %729 = vmatpush.bf16.msrb.mxu0 %v2928_v40  ;;  %v4749_v21 = vpack.c.b16 %v345_v14, %v345_v14  ;;  %v4751_v22 = vpack.c.b16 %v346_v15, %v346_v15  ;;  %v3096_v28 = vor.u32 %v4145_v17, %v3093_v18  ;;  %v4127_v30 = vld [vmem:[%s6943_s2 + $0x134] sm:$0xf]  ;;  %v3021_v31 = vld [vmem:[%s6943_s2 + $0x138] sm:$0xf0]  ;;  %v2960_v35 = vor.u32 %v4111_v27, %v2957_v29  ;;  %v4093_v37 = vld [vmem:[%s6943_s2 + $0x24] sm:$0xf] }
  0x30   : > { %742 = vmatpush.bf16.msrb.mxu1 %v2992_v41  ;;  %7015 = vst [vmem:[#allocation3_spill] sm:$0xff] %v4745_v19  ;;  %711 = vmatmul.bf16.vlgmr.msra.gmra.mxu2 %v4745_v19  ;;  %v4143_v32 = vld [vmem:[%s6943_s2 + $0x1b4] sm:$0xf]  ;;  %v3085_v33 = vld [vmem:[%s6943_s2 + $0x1b8] sm:$0xf0]  ;;  %v3024_v36 = vor.u32 %v4127_v30, %v3021_v31 }
  0x31   : > { %755 = vmatpush.bf16.msrb.mxu2 %v3056_v42  ;;  %7016 = vst [vmem:[#allocation4_spill] sm:$0xff] %v4747_v20  ;;  %724 = vmatmul.bf16.vlgmr.msra.gmra.mxu3 %v4747_v20  ;;  %v2885_v38 = vld [vmem:[%s6943_s2 + $0x28] sm:$0xf0]  ;;  %v4109_v39 = vld [vmem:[%s6943_s2 + $0xa4] sm:$0xf]  ;;  %v3088_v40 = vor.u32 %v4143_v32, %v3085_v33 }
  0x32   : > { %768 = vmatpush.bf16.msrb.mxu3 %v3120_v46  ;;  %7017 = vst [vmem:[#allocation5_spill] sm:$0xff] %v4749_v21  ;;  %685 = vmatmul.bf16.vlgmr.msra.gmra.mxu0 %v4749_v21  ;;  %v2949_v41 = vld [vmem:[%s6943_s2 + $0xa8] sm:$0xf0]  ;;  %v4125_v42 = vld [vmem:[%s6943_s2 + $0x124] sm:$0xf]  ;;  %v2888_v46 = vor.u32 %v4093_v37, %v2885_v38 }
  0x33   : > { %730 = vmatpush.bf16.msrb.mxu0 %v2920_v52  ;;  %7018 = vst [vmem:[#allocation6_spill] sm:$0xff] %v4751_v22  ;;  %698 = vmatmul.bf16.vlgmr.msra.gmra.mxu1 %v4751_v22  ;;  %v3013_v43 = vld [vmem:[%s6943_s2 + $0x128] sm:$0xf0]  ;;  %v4141_v44 = vld [vmem:[%s6943_s2 + $0x1a4] sm:$0xf]  ;;  %v2952_v47 = vor.u32 %v4109_v39, %v2949_v41 }
  0x34   : > { %743 = vmatpush.bf16.msrb.mxu1 %v2984_v56  ;;  %v3077_v45 = vld [vmem:[%s6943_s2 + $0x1a8] sm:$0xf0]  ;;  %v3016_v48 = vor.u32 %v4125_v42, %v3013_v43  ;;  %v4091_v49 = vld [vmem:[%s6943_s2 + $0x14] sm:$0xf]  ;;  %v2877_v50 = vld [vmem:[%s6943_s2 + $0x18] sm:$0xf0] }
  0x35   : > { %756 = vmatpush.bf16.msrb.mxu2 %v3048_v57  ;;  %v4107_v51 = vld [vmem:[%s6943_s2 + $0x94] sm:$0xf]  ;;  %v3080_v52 = vor.u32 %v4141_v44, %v3077_v45  ;;  %v2941_v53 = vld [vmem:[%s6943_s2 + $0x98] sm:$0xf0]  ;;  %v2880_v58 = vor.u32 %v4091_v49, %v2877_v50  ;;  %v4089_v59 = vld [vmem:[%s6943_s2 + $0x4] sm:$0xf] }
  0x36   : > { %769 = vmatpush.bf16.msrb.mxu3 %v3112_v60  ;;  %v4123_v54 = vld [vmem:[%s6943_s2 + $0x114] sm:$0xf]  ;;  %v3005_v55 = vld [vmem:[%s6943_s2 + $0x118] sm:$0xf0]  ;;  %v2869_v60 = vld [vmem:[%s6943_s2 + $0x8] sm:$0xf0]  ;;  %v2944_v61 = vor.u32 %v4107_v51, %v2941_v53 }
  0x37   : > { %731 = vmatpush.bf16.msrb.mxu0 %v2912_v0  ;;  %v4139_v56 = vld [vmem:[%s6943_s2 + $0x194] sm:$0xf]  ;;  %v3069_v57 = vld [vmem:[%s6943_s2 + $0x198] sm:$0xf0]  ;;  %v3008_v62 = vor.u32 %v4123_v54, %v3005_v55  ;;  %v4105_v63 = vld [vmem:[%s6943_s2 + $0x84] sm:$0xf]  ;;  %v2872_v9 = vor.u32 %v4089_v59, %v2869_v60 }
  0x38   : > { %744 = vmatpush.bf16.msrb.mxu1 %v2976_v3  ;;  %v2933_v0 = vld [vmem:[%s6943_s2 + $0x88] sm:$0xf0]  ;;  %v4121_v1 = vld [vmem:[%s6943_s2 + $0x104] sm:$0xf]  ;;  %v3072_v2 = vor.u32 %v4139_v56, %v3069_v57  ;;  %v3243_v6 = vld [vmem:[%s6943_s2 + $0x270] sm:$0xf] }
  0x39   : > { %757 = vmatpush.bf16.msrb.mxu2 %v3040_v4  ;;  %v2997_v3 = vld [vmem:[%s6943_s2 + $0x108] sm:$0xf0]  ;;  %v4137_v4 = vld [vmem:[%s6943_s2 + $0x184] sm:$0xf]  ;;  %v4168_v7 = vld [vmem:[%s6943_s2 + $0x274] sm:$0xf0]  ;;  %v2936_v13 = vor.u32 %v4105_v63, %v2933_v0 }
  0x3a   : > { %770 = vmatpush.bf16.msrb.mxu3 %v3104_v5  ;;  %v3061_v5 = vld [vmem:[%s6943_s2 + $0x188] sm:$0xf0]  ;;  %v3307_v8 = vld [vmem:[%s6943_s2 + $0x2f0] sm:$0xf]  ;;  %v4184_v10 = vld [vmem:[%s6943_s2 + $0x2f4] sm:$0xf0]  ;;  %v3000_v14 = vor.u32 %v4121_v1, %v2997_v3  ;;  %v4877_v18 = vor.u32 %v4168_v7, %v3243_v6 }
  0x3b   : > { %732 = vmatpush.bf16.msrb.mxu0 %v2904_v16  ;;  %v3371_v11 = vld [vmem:[%s6943_s2 + $0x370] sm:$0xf]  ;;  %v4200_v12 = vld [vmem:[%s6943_s2 + $0x374] sm:$0xf0]  ;;  %v3064_v17 = vor.u32 %v4137_v4, %v3061_v5  ;;  %v3235_v25 = vld [vmem:[%s6943_s2 + $0x260] sm:$0xf] }
  0x3c   : > { %745 = vmatpush.bf16.msrb.mxu1 %v2968_v23  ;;  %v3435_v15 = vld [vmem:[%s6943_s2 + $0x3f0] sm:$0xf]  ;;  %v4216_v16 = vld [vmem:[%s6943_s2 + $0x3f4] sm:$0xf0]  ;;  %v4879_v23 = vor.u32 %v4184_v10, %v3307_v8  ;;  %v4166_v26 = vld [vmem:[%s6943_s2 + $0x264] sm:$0xf0] }
  0x3d   : > { %758 = vmatpush.bf16.msrb.mxu2 %v3032_v24  ;;  %v4881_v24 = vor.u32 %v4200_v12, %v3371_v11  ;;  %v3299_v27 = vld [vmem:[%s6943_s2 + $0x2e0] sm:$0xf]  ;;  %v4182_v29 = vld [vmem:[%s6943_s2 + $0x2e4] sm:$0xf0]  ;;  %v3227_v37 = vld [vmem:[%s6943_s2 + $0x250] sm:$0xf] }
  0x3e   : > { %771 = vmatpush.bf16.msrb.mxu3 %v3096_v28  ;;  %v4892_v28 = vor.u32 %v4216_v16, %v3435_v15  ;;  %v3363_v30 = vld [vmem:[%s6943_s2 + $0x360] sm:$0xf]  ;;  %v4198_v31 = vld [vmem:[%s6943_s2 + $0x364] sm:$0xf0]  ;;  %v4164_v38 = vld [vmem:[%s6943_s2 + $0x254] sm:$0xf0] }
  0x3f   : > { %733 = vmatpush.bf16.msrb.mxu0 %v2896_v34  ;;  %v3427_v32 = vld [vmem:[%s6943_s2 + $0x3e0] sm:$0xf]  ;;  %v4214_v33 = vld [vmem:[%s6943_s2 + $0x3e4] sm:$0xf0]  ;;  %v4910_v34 = vor.u32 %v4166_v26, %v3235_v25  ;;  %v3291_v39 = vld [vmem:[%s6943_s2 + $0x2d0] sm:$0xf] }
  0x40   : > { %746 = vmatpush.bf16.msrb.mxu1 %v2960_v35  ;;  %v4914_v35 = vor.u32 %v4182_v29, %v3299_v27  ;;  %v4180_v41 = vld [vmem:[%s6943_s2 + $0x2d4] sm:$0xf0]  ;;  %v3355_v42 = vld [vmem:[%s6943_s2 + $0x350] sm:$0xf]  ;;  %v3219_v49 = vld [vmem:[%s6943_s2 + $0x240] sm:$0xf] }
  0x41   : > { %759 = vmatpush.bf16.msrb.mxu2 %v3024_v36  ;;  %v4916_v36 = vor.u32 %v4198_v31, %v3363_v30  ;;  %v4196_v43 = vld [vmem:[%s6943_s2 + $0x354] sm:$0xf0]  ;;  %v3419_v44 = vld [vmem:[%s6943_s2 + $0x3d0] sm:$0xf]  ;;  %v4162_v50 = vld [vmem:[%s6943_s2 + $0x244] sm:$0xf0] }
  0x42   : > { %772 = vmatpush.bf16.msrb.mxu3 %v3088_v40  ;;  %v4929_v40 = vor.u32 %v4214_v33, %v3427_v32  ;;  %v4212_v45 = vld [vmem:[%s6943_s2 + $0x3d4] sm:$0xf0]  ;;  %v3283_v51 = vld [vmem:[%s6943_s2 + $0x2c0] sm:$0xf]  ;;  %v4178_v53 = vld [vmem:[%s6943_s2 + $0x2c4] sm:$0xf0] }
  0x43   : > { %734 = vmatpush.bf16.msrb.mxu0 %v2888_v46  ;;  %v4950_v46 = vor.u32 %v4164_v38, %v3227_v37  ;;  %v3347_v54 = vld [vmem:[%s6943_s2 + $0x340] sm:$0xf]  ;;  %v4194_v55 = vld [vmem:[%s6943_s2 + $0x344] sm:$0xf0]  ;;  %v4990_v59 = vor.u32 %v4178_v53, %v3283_v51  ;;  %v3275_v63 = vld [vmem:[%s6943_s2 + $0x2b0] sm:$0xf] }
  0x44   : > { %747 = vmatpush.bf16.msrb.mxu1 %v2952_v47  ;;  %v4954_v47 = vor.u32 %v4180_v41, %v3291_v39  ;;  %v3411_v56 = vld [vmem:[%s6943_s2 + $0x3c0] sm:$0xf]  ;;  %v4210_v57 = vld [vmem:[%s6943_s2 + $0x3c4] sm:$0xf0]  ;;  %v4992_v60 = vor.u32 %v4194_v55, %v3347_v54  ;;  %v4176_v1 = vld [vmem:[%s6943_s2 + $0x2b4] sm:$0xf0] }
  0x45   : > { %760 = vmatpush.bf16.msrb.mxu2 %v3016_v48  ;;  %v4956_v48 = vor.u32 %v4196_v43, %v3355_v42  ;;  %v5004_v0 = vor.u32 %v4210_v57, %v3411_v56  ;;  %v4192_v3 = vld [vmem:[%s6943_s2 + $0x334] sm:$0xf0]  ;;  %v3403_v4 = vld [vmem:[%s6943_s2 + $0x3b0] sm:$0xf]  ;;  %v5026_v7 = vor.u32 %v4176_v1, %v3275_v63  ;;  %v4158_v10 = vld [vmem:[%s6943_s2 + $0x224] sm:$0xf0] }
  0x46   : > { %773 = vmatpush.bf16.msrb.mxu3 %v3080_v52  ;;  %v4968_v52 = vor.u32 %v4212_v45, %v3419_v44  ;;  %v4208_v5 = vld [vmem:[%s6943_s2 + $0x3b4] sm:$0xf0]  ;;  %v3267_v11 = vld [vmem:[%s6943_s2 + $0x2a0] sm:$0xf]  ;;  %v4190_v15 = vld [vmem:[%s6943_s2 + $0x324] sm:$0xf0] }
  0x47   : > { %735 = vmatpush.bf16.msrb.mxu0 %v2880_v58  ;;  %v4986_v58 = vor.u32 %v4162_v50, %v3219_v49  ;;  %v5040_v12 = vor.u32 %v4208_v5, %v3403_v4  ;;  %v3395_v16 = vld [vmem:[%s6943_s2 + $0x3a0] sm:$0xf]  ;;  %v3195_v26 = vld [vmem:[%s6943_s2 + $0x210] sm:$0xf]  ;;  %v4156_v27 = vld [vmem:[%s6943_s2 + $0x214] sm:$0xf0] }
  0x48   : > { %748 = vmatpush.bf16.msrb.mxu1 %v2944_v61  ;;  %v3211_v61 = vld [vmem:[%s6943_s2 + $0x230] sm:$0xf]  ;;  %v4172_v32 = vld [vmem:[%s6943_s2 + $0x294] sm:$0xf0]  ;;  %v3187_v42 = vld [vmem:[%s6943_s2 + $0x200] sm:$0xf]  ;;  %v5106_v49 = vor.u32 %v4156_v27, %v3195_v26 }
  0x49   : > { %761 = vmatpush.bf16.msrb.mxu2 %v3008_v62  ;;  %v4160_v62 = vld [vmem:[%s6943_s2 + $0x234] sm:$0xf0]  ;;  %v3259_v29 = vld [vmem:[%s6943_s2 + $0x290] sm:$0xf]  ;;  %v4154_v43 = vld [vmem:[%s6943_s2 + $0x204] sm:$0xf0] }
  0x4a   : > { %774 = vmatpush.bf16.msrb.mxu3 %v3072_v2  ;;  %v3339_v2 = vld [vmem:[%s6943_s2 + $0x330] sm:$0xf]  ;;  %v5022_v6 = vor.u32 %v4160_v62, %v3211_v61  ;;  %v4188_v37 = vld [vmem:[%s6943_s2 + $0x314] sm:$0xf0]  ;;  %v3251_v44 = vld [vmem:[%s6943_s2 + $0x280] sm:$0xf]  ;;  %v5117_v54 = vor.u32 %v4172_v32, %v3259_v29  ;;  %v5139_v4 = vor.u32 %v4154_v43, %v3187_v42 }
  0x4b   : > { %736 = vmatpush.bf16.msrb.mxu0 %v2872_v9  ;;  %v5028_v8 = vor.u32 %v4192_v3, %v3339_v2  ;;  %v3203_v9 = vld [vmem:[%s6943_s2 + $0x220] sm:$0xf]  ;;  %v3323_v33 = vld [vmem:[%s6943_s2 + $0x310] sm:$0xf]  ;;  %v4204_v41 = vld [vmem:[%s6943_s2 + $0x394] sm:$0xf0] }
  0x4c   : > { %749 = vmatpush.bf16.msrb.mxu1 %v2936_v13  ;;  %v4174_v13 = vld [vmem:[%s6943_s2 + $0x2a4] sm:$0xf0]  ;;  %v5058_v25 = vor.u32 %v4158_v10, %v3203_v9  ;;  %v3387_v39 = vld [vmem:[%s6943_s2 + $0x390] sm:$0xf]  ;;  %v3315_v50 = vld [vmem:[%s6943_s2 + $0x300] sm:$0xf]  ;;  %v5119_v55 = vor.u32 %v4188_v37, %v3323_v33 }
  0x4d   : > { %762 = vmatpush.bf16.msrb.mxu2 %v3000_v14  ;;  %v3331_v14 = vld [vmem:[%s6943_s2 + $0x320] sm:$0xf]  ;;  %v5071_v30 = vor.u32 %v4174_v13, %v3267_v11  ;;  %v4170_v45 = vld [vmem:[%s6943_s2 + $0x284] sm:$0xf0]  ;;  %v6952_v53 = vshll.u32 %v4745_v19, 16  ;;  %v6950_v61 = vshll.u32 %v4747_v20, 16  ;;  %v5130_v63 = vor.u32 %v4204_v41, %v3387_v39 }
  0x4e   : > { %775 = vmatpush.bf16.msrb.mxu3 %v3064_v17  ;;  %737 = vmatmul.bf16.vlgmr.msrb.gmra.mxu0 %v4749_v21  ;;  %v4206_v17 = vld [vmem:[%s6943_s2 + $0x3a4] sm:$0xf0]  ;;  %v5073_v31 = vor.u32 %v4190_v15, %v3331_v14  ;;  %v3379_v56 = vld [vmem:[%s6943_s2 + $0x380] sm:$0xf]  ;;  %v6948_v62 = vshll.u32 %v4749_v21, 16  ;;  %v6946_v3 = vshll.u32 %v4751_v22, 16  ;;  %v5151_v11 = vor.u32 %v4170_v45, %v3251_v44 }
  0x4f   : > { %1202 = vmatpush.bf16.msra.mxu0 %v4877_v18  ;;  %750 = vmatmul.bf16.vlgmr.msrb.gmra.mxu1 %v4751_v22  ;;  %v5085_v38 = vor.u32 %v4206_v17, %v3395_v16  ;;  %v4186_v51 = vld [vmem:[%s6943_s2 + $0x304] sm:$0xf0]  ;;  %v4167_v1 = vld [vmem:[%s6943_s2 + $0x274] sm:$0xf]  ;;  %v3245_v2 = vld [vmem:[%s6943_s2 + $0x278] sm:$0xf0] }
  0x50   : > { %1215 = vmatpush.bf16.msra.mxu1 %v4879_v23  ;;  %763 = vmatmul.bf16.vlgmr.msrb.gmra.mxu2 %v4745_v19  ;;  %v4202_v57 = vld [vmem:[%s6943_s2 + $0x384] sm:$0xf0]  ;;  %v4183_v5 = vld [vmem:[%s6943_s2 + $0x2f4] sm:$0xf]  ;;  %v3309_v9 = vld [vmem:[%s6943_s2 + $0x2f8] sm:$0xf0]  ;;  %v5153_v13 = vor.u32 %v4186_v51, %v3315_v50  ;;  %v5178_v39 = vor.u32 %v4167_v1, %v3245_v2 }
  0x51   : > { %1228 = vmatpush.bf16.msra.mxu2 %v4881_v24  ;;  %776 = vmatmul.bf16.vlgmr.msrb.gmra.mxu3 %v4747_v20  ;;  %v4199_v10 = vld [vmem:[%s6943_s2 + $0x374] sm:$0xf]  ;;  %v3373_v14 = vld [vmem:[%s6943_s2 + $0x378] sm:$0xf0]  ;;  %v6953_v16 = vshrl.u32 %v4745_v19, 16  ;;  %v869_v17 = vrot.slane %v6952_v53, 1  ;;  %v5176_v37 = vor.u32 %v4202_v57, %v3379_v56  ;;  %v5183_v43 = vor.u32 %v4183_v5, %v3309_v9 }
  0x52   : > { %1241 = vmatpush.bf16.msra.mxu3 %v4892_v28  ;;  %v4215_v15 = vld [vmem:[%s6943_s2 + $0x3f4] sm:$0xf]  ;;  %v3437_v26 = vld [vmem:[%s6943_s2 + $0x3f8] sm:$0xf0]  ;;  %v6951_v27 = vshrl.u32 %v4747_v20, 16  ;;  %v876_v29 = vrot.slane %v6950_v61, 1  ;;  %v5185_v44 = vor.u32 %v4199_v10, %v3373_v14 }
  0x53   : > { %1203 = vmatpush.bf16.msra.mxu0 %v4910_v34  ;;  %v6949_v32 = vshrl.u32 %v4749_v21, 16  ;;  %v855_v33 = vrot.slane %v6948_v62, 1  ;;  %v6947_v41 = vshrl.u32 %v4751_v22, 16  ;;  %v862_v42 = vrot.slane %v6946_v3, 1  ;;  %v4165_v45 = vld [vmem:[%s6943_s2 + $0x264] sm:$0xf] }
  0x54   : > { %1216 = vmatpush.bf16.msra.mxu1 %v4914_v35  ;;  %v3237_v50 = vld [vmem:[%s6943_s2 + $0x268] sm:$0xf0]  ;;  %v4181_v51 = vld [vmem:[%s6943_s2 + $0x2e4] sm:$0xf]  ;;  %v5197_v56 = vor.u32 %v4215_v15, %v3437_v26  ;;  %v5201_v57 = vor.u32 %v869_v17, %v6953_v16  ;;  %v5216_v9 = vor.u32 %v876_v29, %v6951_v27  ;;  %v4159_v16 = vld [vmem:[%s6943_s2 + $0x234] sm:$0xf] }
  0x55   : > { %1229 = vmatpush.bf16.msra.mxu2 %v4916_v36  ;;  %v3301_v1 = vld [vmem:[%s6943_s2 + $0x2e8] sm:$0xf0]  ;;  %v4197_v2 = vld [vmem:[%s6943_s2 + $0x364] sm:$0xf]  ;;  %v5226_v15 = vor.u32 %v855_v33, %v6949_v32  ;;  %v5230_v17 = vor.u32 %v4165_v45, %v3237_v50  ;;  %v5234_v26 = vor.u32 %v862_v42, %v6947_v41  ;;  %v4163_v33 = vld [vmem:[%s6943_s2 + $0x254] sm:$0xf] }
  0x56   : > { %1242 = vmatpush.bf16.msra.mxu3 %v4929_v40  ;;  %v3365_v5 = vld [vmem:[%s6943_s2 + $0x368] sm:$0xf0]  ;;  %v4213_v10 = vld [vmem:[%s6943_s2 + $0x3e4] sm:$0xf]  ;;  %v5238_v29 = vor.u32 %v4181_v51, %v3301_v1  ;;  %v3229_v45 = vld [vmem:[%s6943_s2 + $0x258] sm:$0xf0] }
  0x57   : > { %1204 = vmatpush.bf16.msra.mxu0 %v4950_v46  ;;  %v3429_v14 = vld [vmem:[%s6943_s2 + $0x3e8] sm:$0xf0]  ;;  %v5240_v3 = vor.u32 %v4197_v2, %v3365_v5  ;;  %v4179_v42 = vld [vmem:[%s6943_s2 + $0x2d4] sm:$0xf]  ;;  %v3293_v51 = vld [vmem:[%s6943_s2 + $0x2d8] sm:$0xf0] }
  0x58   : > { %1217 = vmatpush.bf16.msra.mxu1 %v4954_v47  ;;  %v5253_v50 = vor.u32 %v4213_v10, %v3429_v14  ;;  %v4195_v1 = vld [vmem:[%s6943_s2 + $0x354] sm:$0xf]  ;;  %v3357_v2 = vld [vmem:[%s6943_s2 + $0x358] sm:$0xf0]  ;;  %v5274_v14 = vor.u32 %v4163_v33, %v3229_v45  ;;  %v5278_v41 = vor.u32 %v4179_v42, %v3293_v51  ;;  %v4161_v32 = vld [vmem:[%s6943_s2 + $0x244] sm:$0xf] }
  0x59   : > { %1230 = vmatpush.bf16.msra.mxu2 %v4956_v48  ;;  %v4211_v5 = vld [vmem:[%s6943_s2 + $0x3d4] sm:$0xf]  ;;  %v3421_v10 = vld [vmem:[%s6943_s2 + $0x3d8] sm:$0xf0]  ;;  %v5280_v62 = vor.u32 %v4195_v1, %v3357_v2  ;;  %v3221_v61 = vld [vmem:[%s6943_s2 + $0x248] sm:$0xf0] }
  0x5a   : > { %1243 = vmatpush.bf16.msra.mxu3 %v4968_v52  ;;  %v4177_v33 = vld [vmem:[%s6943_s2 + $0x2c4] sm:$0xf]  ;;  %v5292_v45 = vor.u32 %v4211_v5, %v3421_v10  ;;  %v3285_v42 = vld [vmem:[%s6943_s2 + $0x2c8] sm:$0xf0]  ;;  %v5310_v10 = vor.u32 %v4161_v32, %v3221_v61  ;;  %v3213_v22 = vld [vmem:[%s6943_s2 + $0x238] sm:$0xf0] }
  0x5b   : > { %1205 = vmatpush.bf16.msra.mxu0 %v4986_v58  ;;  %v4193_v51 = vld [vmem:[%s6943_s2 + $0x344] sm:$0xf]  ;;  %v3349_v1 = vld [vmem:[%s6943_s2 + $0x348] sm:$0xf0]  ;;  %v5314_v27 = vor.u32 %v4177_v33, %v3285_v42  ;;  %v4175_v61 = vld [vmem:[%s6943_s2 + $0x2b4] sm:$0xf] }
  0x5c   : > { %1218 = vmatpush.bf16.msra.mxu1 %v4990_v59  ;;  %7019 = vst [vmem:[#allocation7_spill] sm:$0xff] %v5292_v45  ;;  %v4209_v2 = vld [vmem:[%s6943_s2 + $0x3c4] sm:$0xf]  ;;  %v3413_v5 = vld [vmem:[%s6943_s2 + $0x3c8] sm:$0xf0]  ;;  %v5316_v53 = vor.u32 %v4193_v51, %v3349_v1 }
  0x5d   : > { %1231 = vmatpush.bf16.msra.mxu2 %v4992_v60  ;;  %7020 = vst [vmem:[#allocation8_spill] sm:$0xff] %v5310_v10  ;;  %v5328_v32 = vor.u32 %v4209_v2, %v3413_v5  ;;  %v3277_v33 = vld [vmem:[%s6943_s2 + $0x2b8] sm:$0xf0]  ;;  %v4191_v42 = vld [vmem:[%s6943_s2 + $0x334] sm:$0xf]  ;;  %v5346_v5 = vor.u32 %v4159_v16, %v3213_v22 }
  0x5e   : > { %1244 = vmatpush.bf16.msra.mxu3 %v5004_v0  ;;  %7021 = vst [vmem:[#allocation9_spill] sm:$0xff] %v5314_v27  ;;  %v3341_v51 = vld [vmem:[%s6943_s2 + $0x338] sm:$0xf0]  ;;  %v4207_v1 = vld [vmem:[%s6943_s2 + $0x3b4] sm:$0xf]  ;;  %v5350_v21 = vor.u32 %v4175_v61, %v3277_v33 }
  0x5f   : > { %1206 = vmatpush.bf16.msra.mxu0 %v5022_v6  ;;  %7022 = vst [vmem:[#allocation10_spill] sm:$0xff] %v5316_v53  ;;  %v3405_v2 = vld [vmem:[%s6943_s2 + $0x3b8] sm:$0xf0]  ;;  %v5352_v20 = vor.u32 %v4191_v42, %v3341_v51  ;;  %v4157_v19 = vld [vmem:[%s6943_s2 + $0x224] sm:$0xf] }
  0x60   : > { %1219 = vmatpush.bf16.msra.mxu1 %v5026_v7  ;;  %7023 = vst [vmem:[#allocation11_spill] sm:$0xff] %v5328_v32  ;;  %v4173_v22 = vld [vmem:[%s6943_s2 + $0x2a4] sm:$0xf]  ;;  %v5364_v16 = vor.u32 %v4207_v1, %v3405_v2  ;;  %v3269_v61 = vld [vmem:[%s6943_s2 + $0x2a8] sm:$0xf0] }
  0x61   : > { %1232 = vmatpush.bf16.msra.mxu2 %v5028_v8  ;;  %7024 = vst [vmem:[#allocation12_spill] sm:$0xff] %v5346_v5  ;;  %v4189_v33 = vld [vmem:[%s6943_s2 + $0x324] sm:$0xf]  ;;  %v3333_v42 = vld [vmem:[%s6943_s2 + $0x328] sm:$0xf0] }
  0x62   : > { %1245 = vmatpush.bf16.msra.mxu3 %v5040_v12  ;;  %7025 = vst [vmem:[#allocation13_spill] sm:$0xff] %v5350_v21  ;;  %v4205_v51 = vld [vmem:[%s6943_s2 + $0x3a4] sm:$0xf]  ;;  %v3397_v1 = vld [vmem:[%s6943_s2 + $0x3a8] sm:$0xf0] }
  0x63   : > { %1207 = vmatpush.bf16.msra.mxu0 %v5058_v25  ;;  %7026 = vst [vmem:[#allocation14_spill] sm:$0xff] %v5352_v20 }
  0x64   : > { %1220 = vmatpush.bf16.msra.mxu1 %v5071_v30  ;;  %7027 = vst [vmem:[#allocation15_spill] sm:$0xff] %v5364_v16 }
  0x65   : > { %1233 = vmatpush.bf16.msra.mxu2 %v5073_v31 }
  0x66   : > { %1246 = vmatpush.bf16.msra.mxu3 %v5085_v38 }
  0x67   : > { %1208 = vmatpush.bf16.msra.mxu0 %v5106_v49 }
  0x68   : > { %1221 = vmatpush.bf16.msra.mxu1 %v5117_v54 }
  0x69   : > { %1234 = vmatpush.bf16.msra.mxu2 %v5119_v55 }
  0x6a   : > { %1247 = vmatpush.bf16.msra.mxu3 %v5130_v63 }
  0x6b   : > { %1209 = vmatpush.bf16.msra.mxu0 %v5139_v4 }
  0x6c   : > { %1222 = vmatpush.bf16.msra.mxu1 %v5151_v11 }
  0x6d   : > { %1235 = vmatpush.bf16.msra.mxu2 %v5153_v13 }
  0x6e   : > { %1248 = vmatpush.bf16.msra.mxu3 %v5176_v37  ;;  %1210 = vmatmul.bf16.vlgmr.msra.gmra.mxu0 %v5226_v15 }
  0x6f   : > { %1254 = vmatpush.bf16.msrb.mxu0 %v5178_v39  ;;  %1223 = vmatmul.bf16.vlgmr.msra.gmra.mxu1 %v5234_v26 }
  0x70   : > { %1267 = vmatpush.bf16.msrb.mxu1 %v5183_v43  ;;  %1236 = vmatmul.bf16.vlgmr.msra.gmra.mxu2 %v5201_v57 }
  0x71   : > { %1280 = vmatpush.bf16.msrb.mxu2 %v5185_v44  ;;  %1249 = vmatmul.bf16.vlgmr.msra.gmra.mxu3 %v5216_v9 }
  0x72   : > { %1293 = vmatpush.bf16.msrb.mxu3 %v5197_v56 }
  0x73   : > { %1255 = vmatpush.bf16.msrb.mxu0 %v5230_v17 }
  0x74   : > { %1268 = vmatpush.bf16.msrb.mxu1 %v5238_v29 }
  0x75   : > { %1281 = vmatpush.bf16.msrb.mxu2 %v5240_v3 }
  0x76   : > { %1294 = vmatpush.bf16.msrb.mxu3 %v5253_v50 }
  0x77   : > { %1256 = vmatpush.bf16.msrb.mxu0 %v5274_v14 }
  0x78   : > { %1269 = vmatpush.bf16.msrb.mxu1 %v5278_v41 }
  0x79   : > { %1282 = vmatpush.bf16.msrb.mxu2 %v5280_v62 }
  0x7a   : > { %1295 = vmatpush.bf16.msrb.mxu3 %v5292_v45  ;;  %v3205_v45 = vld [vmem:[%s6943_s2 + $0x228] sm:$0xf0] }
  0x7b   : > { %1257 = vmatpush.bf16.msrb.mxu0 %v5310_v10  ;;  %v5382_v2 = vor.u32 %v4157_v19, %v3205_v45  ;;  %v3197_v10 = vld [vmem:[%s6943_s2 + $0x218] sm:$0xf0]  ;;  %v4171_v19 = vld [vmem:[%s6943_s2 + $0x294] sm:$0xf]  ;;  %v5400_v45 = vor.u32 %v4205_v51, %v3397_v1 }
  0x7c   : > { %1270 = vmatpush.bf16.msrb.mxu1 %v5314_v27  ;;  %v4155_v27 = vld [vmem:[%s6943_s2 + $0x214] sm:$0xf]  ;;  %v3389_v51 = vld [vmem:[%s6943_s2 + $0x398] sm:$0xf0] }
  0x7d   : > { %1283 = vmatpush.bf16.msrb.mxu2 %v5316_v53  ;;  %v5388_v53 = vor.u32 %v4189_v33, %v3333_v42  ;;  %7030 = vst [vmem:[#allocation18_spill] sm:$0xff] %v5400_v45  ;;  %v3325_v33 = vld [vmem:[%s6943_s2 + $0x318] sm:$0xf0]  ;;  %v4203_v42 = vld [vmem:[%s6943_s2 + $0x394] sm:$0xf]  ;;  %v5418_v1 = vor.u32 %v4155_v27, %v3197_v10 }
  0x7e   : > { %1296 = vmatpush.bf16.msrb.mxu3 %v5328_v32  ;;  %v5386_v32 = vor.u32 %v4173_v22, %v3269_v61  ;;  %v3261_v22 = vld [vmem:[%s6943_s2 + $0x298] sm:$0xf0]  ;;  %v4187_v61 = vld [vmem:[%s6943_s2 + $0x314] sm:$0xf]  ;;  %v4169_v27 = vld [vmem:[%s6943_s2 + $0x284] sm:$0xf]  ;;  %v5436_v10 = vor.u32 %v4203_v42, %v3389_v51 }
  0x7f   : > { %1258 = vmatpush.bf16.msrb.mxu0 %v5346_v5  ;;  %7029 = vst [vmem:[#allocation17_spill] sm:$0xff] %v5388_v53  ;;  %v3189_v5 = vld [vmem:[%s6943_s2 + $0x208] sm:$0xf0] }
  0x80   : > { %1271 = vmatpush.bf16.msrb.mxu1 %v5350_v21  ;;  %7028 = vst [vmem:[#allocation16_spill] sm:$0xff] %v5386_v32  ;;  %v4153_v21 = vld [vmem:[%s6943_s2 + $0x204] sm:$0xf]  ;;  %v3381_v42 = vld [vmem:[%s6943_s2 + $0x388] sm:$0xf0] }
  0x81   : > { %1284 = vmatpush.bf16.msrb.mxu2 %v5352_v20  ;;  %v5424_v20 = vor.u32 %v4187_v61, %v3325_v33  ;;  %v3317_v61 = vld [vmem:[%s6943_s2 + $0x308] sm:$0xf0]  ;;  %v4201_v33 = vld [vmem:[%s6943_s2 + $0x384] sm:$0xf]  ;;  %v5454_v51 = vor.u32 %v4153_v21, %v3189_v5  ;;  %v3747_v5 = vld [vmem:[%s6943_s2 + $0x5e0] sm:$0xf] }
  0x82   : > { %1297 = vmatpush.bf16.msrb.mxu3 %v5364_v16  ;;  %v5422_v16 = vor.u32 %v4171_v19, %v3261_v22  ;;  %v3253_v19 = vld [vmem:[%s6943_s2 + $0x288] sm:$0xf0]  ;;  %v4185_v22 = vld [vmem:[%s6943_s2 + $0x304] sm:$0xf] }
  0x83   : > { %1259 = vmatpush.bf16.msrb.mxu0 %v5382_v2  ;;  %v278_v21 = vld [vmem:[%s264_s26 + $0x8] sm:$0xff] }
  0x84   : > { %1272 = vmatpush.bf16.msrb.mxu1 %v5386_v32  ;;  %v5463_v32 = vor.u32 %v4201_v33, %v3381_v42  ;;  %v3675_v33 = vld [vmem:[%s6943_s2 + $0x550] sm:$0xf]  ;;  %v4260_v42 = vld [vmem:[%s6943_s2 + $0x554] sm:$0xf0] }
  0x85   : > { %1285 = vmatpush.bf16.msrb.mxu2 %v5388_v53  ;;  %v5460_v53 = vor.u32 %v4185_v22, %v3317_v61  ;;  %v4244_v61 = vld [vmem:[%s6943_s2 + $0x4d4] sm:$0xf0] }
  0x86   : > { %1298 = vmatpush.bf16.msrb.mxu3 %v5400_v45  ;;  %v5458_v45 = vor.u32 %v4169_v27, %v3253_v19  ;;  %v3611_v19 = vld [vmem:[%s6943_s2 + $0x4d0] sm:$0xf] }
  0x87   : > { %1260 = vmatpush.bf16.msrb.mxu0 %v5418_v1 }
  0x88   : > { %1273 = vmatpush.bf16.msrb.mxu1 %v5422_v16 }
  0x89   : > { %1286 = vmatpush.bf16.msrb.mxu2 %v5424_v20 }
  0x8a   : > { %1299 = vmatpush.bf16.msrb.mxu3 %v5436_v10 }
  0x8b   : > { %1261 = vmatpush.bf16.msrb.mxu0 %v5454_v51 }
  0x8c   : > { %1274 = vmatpush.bf16.msrb.mxu1 %v5458_v45 }
  0x8d   : > { %1287 = vmatpush.bf16.msrb.mxu2 %v5460_v53 }
  0x8e   : > { %1300 = vmatpush.bf16.msrb.mxu3 %v5463_v32  ;;  %1262 = vmatmul.bf16.vlgmr.msrb.gmra.mxu0 %v5226_v15  ;;  %v4230_v15 = vld [vmem:[%s6943_s2 + $0x464] sm:$0xf0] }
  0x8f   : > { %1326 = vmatpush.bf16.msra.mxu0 %v4877_v18  ;;  %1275 = vmatmul.bf16.vlgmr.msrb.gmra.mxu1 %v5234_v26  ;;  %v277_v18 = vld [vmem:[%s264_s26] sm:$0xff] }
  0x90   : > { %1339 = vmatpush.bf16.msra.mxu1 %v4879_v23  ;;  %1288 = vmatmul.bf16.vlgmr.msrb.gmra.mxu2 %v5201_v57  ;;  %v1316_v23 = vunpack.c.l.b16 %v278_v21 }
  0x91   : > { %1352 = vmatpush.bf16.msra.mxu2 %v4881_v24  ;;  %1301 = vmatmul.bf16.vlgmr.msrb.gmra.mxu3 %v5216_v9  ;;  %v1317_v24 = vunpack.c.h.b16 %v278_v21  ;;  %v4276_v21 = vld [vmem:[%s6943_s2 + $0x5d4] sm:$0xf0] }
  0x92   : > { %1365 = vmatpush.bf16.msra.mxu3 %v4892_v28  ;;  %v1314_v28 = vunpack.c.l.b16 %v277_v18 }
  0x93   : > { %1327 = vmatpush.bf16.msra.mxu0 %v4910_v34  ;;  %v1315_v34 = vunpack.c.h.b16 %v277_v18 }
  0x94   : > { %1340 = vmatpush.bf16.msra.mxu1 %v4914_v35  ;;  %v5507_v35 = vpack.c.b16 %v1316_v23, %v1316_v23  ;;  %v5655_v23 = vor.u32 %v4244_v61, %v3611_v19 }
  0x95   : > { %1353 = vmatpush.bf16.msra.mxu2 %v4916_v36  ;;  %v5511_v36 = vpack.c.b16 %v1317_v24, %v1317_v24  ;;  %v5657_v24 = vor.u32 %v4260_v42, %v3675_v33  ;;  %v4220_v33 = vld [vmem:[%s6943_s2 + $0x414] sm:$0xf0]  ;;  %v3579_v42 = vld [vmem:[%s6943_s2 + $0x490] sm:$0xf] }
  0x96   : > { %1366 = vmatpush.bf16.msra.mxu3 %v4929_v40  ;;  %v5513_v40 = vpack.c.b16 %v1314_v28, %v1314_v28  ;;  %v3539_v28 = vld [vmem:[%s6943_s2 + $0x440] sm:$0xf] }
  0x97   : > { %1328 = vmatpush.bf16.msra.mxu0 %v4950_v46  ;;  %v5517_v46 = vpack.c.b16 %v1315_v34, %v1315_v34  ;;  %v4226_v34 = vld [vmem:[%s6943_s2 + $0x444] sm:$0xf0] }
  0x98   : > { %1341 = vmatpush.bf16.msra.mxu1 %v4954_v47  ;;  %v7032_v47 = vld [vmem:[#allocation7_spill] sm:$0xff] }
  0x99   : > { %1354 = vmatpush.bf16.msra.mxu2 %v4956_v48  ;;  %7031 = vst [vmem:[#allocation19_spill] sm:$0xff] %v5517_v46  ;;  %v7033_v48 = vld [vmem:[#allocation8_spill] sm:$0xff] }
  0x9a   : > { %1367 = vmatpush.bf16.msra.mxu3 %v4968_v52  ;;  %v7034_v52 = vld [vmem:[#allocation9_spill] sm:$0xff] }
  0x9b   : > { %1329 = vmatpush.bf16.msra.mxu0 %v4986_v58  ;;  %v7035_v58 = vld [vmem:[#allocation10_spill] sm:$0xff] }
  0x9c   : > { %1342 = vmatpush.bf16.msra.mxu1 %v4990_v59  ;;  %v7036_v59 = vld [vmem:[#allocation11_spill] sm:$0xff] }
  0x9d   : > { %1355 = vmatpush.bf16.msra.mxu2 %v4992_v60  ;;  %v7037_v60 = vld [vmem:[#allocation12_spill] sm:$0xff] }
  0x9e   : > { %1368 = vmatpush.bf16.msra.mxu3 %v5004_v0 }
  0x9f   : > { %1330 = vmatpush.bf16.msra.mxu0 %v5022_v6  ;;  %v7038_v6 = vld [vmem:[#allocation13_spill] sm:$0xff] }
  0xa0   : > { %1343 = vmatpush.bf16.msra.mxu1 %v5026_v7  ;;  %v7039_v7 = vld [vmem:[#allocation14_spill] sm:$0xff] }
  0xa1   : > { %1356 = vmatpush.bf16.msra.mxu2 %v5028_v8 }
  0xa2   : > { %1369 = vmatpush.bf16.msra.mxu3 %v5040_v12  ;;  %v7040_v12 = vld [vmem:[#allocation15_spill] sm:$0xff] }
  0xa3   : > { %1331 = vmatpush.bf16.msra.mxu0 %v5058_v25 }
  0xa4   : > { %1344 = vmatpush.bf16.msra.mxu1 %v5071_v30  ;;  %v7041_v30 = vld [vmem:[#allocation16_spill] sm:$0xff] }
  0xa5   : > { %1357 = vmatpush.bf16.msra.mxu2 %v5073_v31  ;;  %v7042_v31 = vld [vmem:[#allocation17_spill] sm:$0xff] }
  0xa6   : > { %1370 = vmatpush.bf16.msra.mxu3 %v5085_v38 }
  0xa7   : > { %1332 = vmatpush.bf16.msra.mxu0 %v5106_v49  ;;  %v7043_v49 = vld [vmem:[#allocation18_spill] sm:$0xff] }
  0xa8   : > { %1345 = vmatpush.bf16.msra.mxu1 %v5117_v54 }
  0xa9   : > { %1358 = vmatpush.bf16.msra.mxu2 %v5119_v55 }
  0xaa   : > { %1371 = vmatpush.bf16.msra.mxu3 %v5130_v63  ;;  %v4232_v63 = vld [vmem:[%s6943_s2 + $0x474] sm:$0xf0] }
  0xab   : > { %1333 = vmatpush.bf16.msra.mxu0 %v5139_v4  ;;  %v4248_v4 = vld [vmem:[%s6943_s2 + $0x4f4] sm:$0xf0] }
  0xac   : > { %1346 = vmatpush.bf16.msra.mxu1 %v5151_v11  ;;  %v3691_v11 = vld [vmem:[%s6943_s2 + $0x570] sm:$0xf] }
  0xad   : > { %1359 = vmatpush.bf16.msra.mxu2 %v5153_v13  ;;  %v4264_v13 = vld [vmem:[%s6943_s2 + $0x574] sm:$0xf0] }
  0xae   : > { %1372 = vmatpush.bf16.msra.mxu3 %v5176_v37  ;;  %1334 = vmatmul.bf16.vlgmr.msra.gmra.mxu0 %v5513_v40  ;;  %v5578_v9 = vor.u32 %v4264_v13, %v3691_v11 }
  0xaf   : > { %1378 = vmatpush.bf16.msrb.mxu0 %v5178_v39  ;;  %1347 = vmatmul.bf16.vlgmr.msra.gmra.mxu1 %v5517_v46  ;;  %v686_v0 = vpop.f32.mrf.mxu0 }
  0xb0   : > { %1391 = vmatpush.bf16.msrb.mxu1 %v5183_v43  ;;  %1360 = vmatmul.bf16.vlgmr.msra.gmra.mxu2 %v5507_v35  ;;  %v699_v8 = vpop.f32.mrf.mxu1  ;;  %v4280_v43 = vld [vmem:[%s6943_s2 + $0x5f4] sm:$0xf0] }
  0xb1   : > { %1404 = vmatpush.bf16.msrb.mxu2 %v5185_v44  ;;  %1373 = vmatmul.bf16.vlgmr.msra.gmra.mxu3 %v5511_v36  ;;  %v700_v25 = vadd.f32 %v699_v8, %v686_v0  ;;  %v4274_v0 = vld [vmem:[%s6943_s2 + $0x5c4] sm:$0xf0] }
  0xb2   : > { %1417 = vmatpush.bf16.msrb.mxu3 %v5197_v56 }
  0xb3   : > { %1379 = vmatpush.bf16.msrb.mxu0 %v5230_v17  ;;  %v712_v38 = vpop.f32.mrf.mxu2  ;;  %v3619_v17 = vld [vmem:[%s6943_s2 + $0x4e0] sm:$0xf] }
  0xb4   : > { %1392 = vmatpush.bf16.msrb.mxu1 %v5238_v29  ;;  %v713_v54 = vadd.f32 %v712_v38, %v700_v25  ;;  %v725_v55 = vpop.f32.mrf.mxu3  ;;  %v4246_v29 = vld [vmem:[%s6943_s2 + $0x4e4] sm:$0xf0]  ;;  %v3595_v38 = vld [vmem:[%s6943_s2 + $0x4b0] sm:$0xf] }
  0xb5   : > { %1405 = vmatpush.bf16.msrb.mxu2 %v5240_v3  ;;  %v3627_v3 = vld [vmem:[%s6943_s2 + $0x4f0] sm:$0xf] }
  0xb6   : > { %1418 = vmatpush.bf16.msrb.mxu3 %v5253_v50  ;;  %v726_v37 = vadd.f32 %v725_v55, %v713_v54  ;;  %v5576_v57 = vor.u32 %v4248_v4, %v3627_v3  ;;  %v3683_v50 = vld [vmem:[%s6943_s2 + $0x560] sm:$0xf]  ;;  %v4240_v55 = vld [vmem:[%s6943_s2 + $0x4b4] sm:$0xf0]  ;;  %v3723_v3 = vld [vmem:[%s6943_s2 + $0x5b0] sm:$0xf] }
  0xb7   : > { %1380 = vmatpush.bf16.msrb.mxu0 %v5274_v14  ;;  %v688_v39 = vpop.f32.mrf.mxu0  ;;  %v4262_v14 = vld [vmem:[%s6943_s2 + $0x564] sm:$0xf0]  ;;  %v4272_v4 = vld [vmem:[%s6943_s2 + $0x5b4] sm:$0xf0]  ;;  %v5727_v13 = vor.u32 %v4240_v55, %v3595_v38  ;;  %v3635_v38 = vld [vmem:[%s6943_s2 + $0x500] sm:$0xf] }
  0xb8   : > { %1393 = vmatpush.bf16.msrb.mxu1 %v5278_v41  ;;  %v3755_v41 = vld [vmem:[%s6943_s2 + $0x5f0] sm:$0xf]  ;;  %v701_v44 = vpop.f32.mrf.mxu1  ;;  %781 = vst [vmem:[#allocation2] sm:$0xff] %v726_v37  ;;  %v3699_v55 = vld [vmem:[%s6943_s2 + $0x580] sm:$0xf] }
  0xb9   : > { %1406 = vmatpush.bf16.msrb.mxu2 %v5280_v62  ;;  %v3563_v62 = vld [vmem:[%s6943_s2 + $0x470] sm:$0xf]  ;;  %v5590_v26 = vor.u32 %v4280_v43, %v3755_v41  ;;  %v3523_v41 = vld [vmem:[%s6943_s2 + $0x420] sm:$0xf]  ;;  %v4222_v43 = vld [vmem:[%s6943_s2 + $0x424] sm:$0xf0] }
  0xba   : > { %1419 = vmatpush.bf16.msrb.mxu3 %v7032_v47  ;;  %v5574_v56 = vor.u32 %v4232_v63, %v3563_v62  ;;  %v3603_v47 = vld [vmem:[%s6943_s2 + $0x4c0] sm:$0xf]  ;;  %v3659_v62 = vld [vmem:[%s6943_s2 + $0x530] sm:$0xf]  ;;  %v4256_v63 = vld [vmem:[%s6943_s2 + $0x534] sm:$0xf0] }
  0xbb   : > { %1381 = vmatpush.bf16.msrb.mxu0 %v7033_v48  ;;  %v5729_v37 = vor.u32 %v4256_v63, %v3659_v62  ;;  %v3587_v44 = vld [vmem:[%s6943_s2 + $0x4a0] sm:$0xf] }
  0xbc   : > { %1394 = vmatpush.bf16.msrb.mxu1 %v7034_v52  ;;  %v727_v27 = vpop.f32.mrf.mxu3  ;;  %v4242_v52 = vld [vmem:[%s6943_s2 + $0x4c4] sm:$0xf0] }
  0xbd   : > { %1407 = vmatpush.bf16.msrb.mxu2 %v7035_v58  ;;  %v3667_v58 = vld [vmem:[%s6943_s2 + $0x540] sm:$0xf]  ;;  %v5691_v8 = vor.u32 %v4242_v52, %v3603_v47  ;;  %v5759_v27 = vor.u32 %v4222_v43, %v3523_v41  ;;  %v4252_v47 = vld [vmem:[%s6943_s2 + $0x514] sm:$0xf0]  ;;  %v3707_v52 = vld [vmem:[%s6943_s2 + $0x590] sm:$0xf] }
  0xbe   : > { %1420 = vmatpush.bf16.msrb.mxu3 %v7036_v59  ;;  %v4258_v59 = vld [vmem:[%s6943_s2 + $0x544] sm:$0xf0] }
  0xbf   : > { %1382 = vmatpush.bf16.msrb.mxu0 %v7037_v60  ;;  %v3731_v60 = vld [vmem:[%s6943_s2 + $0x5c0] sm:$0xf] }
  0xc0   : > { %1395 = vmatpush.bf16.msrb.mxu1 %v7038_v6  ;;  %v5687_v6 = vor.u32 %v4226_v34, %v3539_v28  ;;  %v3643_v34 = vld [vmem:[%s6943_s2 + $0x510] sm:$0xf] }
  0xc1   : > { %1408 = vmatpush.bf16.msrb.mxu2 %v7039_v7 }
  0xc2   : > { %1421 = vmatpush.bf16.msrb.mxu3 %v7040_v12  ;;  %v5693_v12 = vor.u32 %v4258_v59, %v3667_v58  ;;  %v4268_v58 = vld [vmem:[%s6943_s2 + $0x594] sm:$0xf0]  ;;  %v3507_v59 = vld [vmem:[%s6943_s2 + $0x400] sm:$0xf] }
  0xc3   : > { %1383 = vmatpush.bf16.msrb.mxu0 %v5382_v2  ;;  %v714_v2 = vpop.f32.mrf.mxu2  ;;  %v5825_v63 = vor.u32 %v4268_v58, %v3707_v52  ;;  %v7050_v58 = vld [vmem:[#allocation5_spill] sm:$0xff] }
  0xc4   : > { %1396 = vmatpush.bf16.msrb.mxu1 %v7041_v30  ;;  %v3531_v30 = vld [vmem:[%s6943_s2 + $0x430] sm:$0xf] }
  0xc5   : > { %1409 = vmatpush.bf16.msrb.mxu2 %v7042_v31  ;;  %v4224_v31 = vld [vmem:[%s6943_s2 + $0x434] sm:$0xf0] }
  0xc6   : > { %1422 = vmatpush.bf16.msrb.mxu3 %v7043_v49  ;;  %v5705_v49 = vor.u32 %v4274_v0, %v3731_v60  ;;  %v5723_v11 = vor.u32 %v4224_v31, %v3531_v30  ;;  %v4218_v0 = vld [vmem:[%s6943_s2 + $0x404] sm:$0xf0]  ;;  %v5813_v31 = vor.u32 %v4252_v47, %v3643_v34 }
  0xc7   : > { %1384 = vmatpush.bf16.msrb.mxu0 %v5418_v1  ;;  %v5836_v43 = vor.u32 %v4218_v0, %v3507_v59  ;;  %v7051_v59 = vshrl.u32 %v7050_v58, 16 }
  0xc8   : > { %1397 = vmatpush.bf16.msrb.mxu1 %v5422_v16  ;;  %v4278_v16 = vld [vmem:[%s6943_s2 + $0x5e4] sm:$0xf0] }
  0xc9   : > { %1410 = vmatpush.bf16.msrb.mxu2 %v5424_v20  ;;  %v3555_v20 = vld [vmem:[%s6943_s2 + $0x460] sm:$0xf]  ;;  %v5630_v22 = vor.u32 %v4278_v16, %v3747_v5  ;;  %v4270_v16 = vld [vmem:[%s6943_s2 + $0x5a4] sm:$0xf0]  ;;  %v1510_v0 = vrot.slane %v7051_v59, 1 }
  0xca   : > { %1423 = vmatpush.bf16.msrb.mxu3 %v5436_v10  ;;  %v5611_v1 = vor.u32 %v4230_v15, %v3555_v20  ;;  %v3547_v10 = vld [vmem:[%s6943_s2 + $0x450] sm:$0xf]  ;;  %v5741_v20 = vor.u32 %v4272_v4, %v3723_v3  ;;  %v3715_v5 = vld [vmem:[%s6943_s2 + $0x5a0] sm:$0xf]  ;;  %v4266_v3 = vld [vmem:[%s6943_s2 + $0x584] sm:$0xf0] }
  0xcb   : > { %1385 = vmatpush.bf16.msrb.mxu0 %v5454_v51  ;;  %v3739_v51 = vld [vmem:[%s6943_s2 + $0x5d0] sm:$0xf]  ;;  %v738_v7 = vpop.f32.mrf.mxu0  ;;  %v5780_v28 = vor.u32 %v4270_v16, %v3715_v5  ;;  %v4231_v4 = vld [vmem:[%s6943_s2 + $0x474] sm:$0xf]  ;;  %v4229_v59 = vld [vmem:[%s6943_s2 + $0x464] sm:$0xf] }
  0xcc   : > { %1398 = vmatpush.bf16.msrb.mxu1 %v5458_v45  ;;  %v5617_v45 = vor.u32 %v4262_v14, %v3683_v50  ;;  %v5669_v48 = vor.u32 %v4276_v21, %v3739_v51  ;;  %v751_v25 = vpop.f32.mrf.mxu1  ;;  %v3651_v50 = vld [vmem:[%s6943_s2 + $0x520] sm:$0xf]  ;;  %v4254_v14 = vld [vmem:[%s6943_s2 + $0x524] sm:$0xf0]  ;;  %v4236_v51 = vld [vmem:[%s6943_s2 + $0x494] sm:$0xf0] }
  0xcd   : > { %1411 = vmatpush.bf16.msrb.mxu2 %v5460_v53  ;;  %v5615_v53 = vor.u32 %v4246_v29, %v3619_v17  ;;  %v752_v54 = vadd.f32 %v751_v25, %v738_v7  ;;  %v4238_v29 = vld [vmem:[%s6943_s2 + $0x4a4] sm:$0xf0]  ;;  %v5768_v61 = vor.u32 %v4254_v14, %v3651_v50  ;;  %v3571_v7 = vld [vmem:[%s6943_s2 + $0x480] sm:$0xf]  ;;  %v5811_v30 = vor.u32 %v4236_v51, %v3579_v42  ;;  %v3693_v14 = vld [vmem:[%s6943_s2 + $0x578] sm:$0xf0] }
  0xce   : > { %1424 = vmatpush.bf16.msrb.mxu3 %v5463_v32  ;;  %v4228_v32 = vld [vmem:[%s6943_s2 + $0x454] sm:$0xf0]  ;;  %1386 = vmatmul.bf16.vlgmr.msrb.gmra.mxu0 %v5513_v40  ;;  %v5766_v19 = vor.u32 %v4238_v29, %v3587_v44  ;;  %v4234_v25 = vld [vmem:[%s6943_s2 + $0x484] sm:$0xf0]  ;;  %v4247_v44 = vld [vmem:[%s6943_s2 + $0x4f4] sm:$0xf] }
  0xcf   : > { %1846 = vmatpush.bf16.msra.mxu0 %v5574_v56  ;;  %1399 = vmatmul.bf16.vlgmr.msrb.gmra.mxu1 %v5517_v46  ;;  %v5651_v18 = vor.u32 %v4228_v32, %v3547_v10  ;;  %v3515_v10 = vld [vmem:[%s6943_s2 + $0x410] sm:$0xf]  ;;  %v5848_v29 = vor.u32 %v4234_v25, %v3571_v7  ;;  %v4279_v5 = vld [vmem:[%s6943_s2 + $0x5f4] sm:$0xf]  ;;  %v3757_v42 = vld [vmem:[%s6943_s2 + $0x5f8] sm:$0xf0] }
  0xd0   : > { %1859 = vmatpush.bf16.msra.mxu1 %v5576_v57  ;;  %1412 = vmatmul.bf16.vlgmr.msrb.gmra.mxu2 %v5507_v35  ;;  %v5798_v60 = vor.u32 %v4220_v33, %v3515_v10  ;;  %v7044_v16 = vld [vmem:[#allocation3_spill] sm:$0xff]  ;;  %v7047_v51 = vld [vmem:[#allocation4_spill] sm:$0xff]  ;;  %v7052_v7 = vshll.u32 %v7050_v58, 16 }
  0xd1   : > { %1872 = vmatpush.bf16.msra.mxu2 %v5578_v9  ;;  %1425 = vmatmul.bf16.vlgmr.msrb.gmra.mxu3 %v5511_v36  ;;  %v7049_v47 = vshll.u32 %v7047_v51, 16 }
  0xd2   : > { %1885 = vmatpush.bf16.msra.mxu3 %v5590_v26  ;;  %v1511_v25 = vrot.slane %v7052_v7, 2 }
  0xd3   : > { %1847 = vmatpush.bf16.msra.mxu0 %v5611_v1  ;;  %v764_v39 = vpop.f32.mrf.mxu2  ;;  %v740_v32 = vpop.f32.mrf.mxu0  ;;  %v1520_v52 = vrot.slane %v7049_v47, 2 }
  0xd4   : > { %1860 = vmatpush.bf16.msra.mxu1 %v5615_v53  ;;  %v765_v15 = vadd.f32 %v764_v39, %v752_v54  ;;  %v777_v17 = vpop.f32.mrf.mxu3  ;;  %v753_v21 = vpop.f32.mrf.mxu1  ;;  %v4250_v54 = vld [vmem:[%s6943_s2 + $0x504] sm:$0xf0]  ;;  %v3565_v39 = vld [vmem:[%s6943_s2 + $0x478] sm:$0xf0]  ;;  %v7046_v32 = vshll.u32 %v7044_v16, 16 }
  0xd5   : > { %1873 = vmatpush.bf16.msra.mxu2 %v5617_v45  ;;  %v5850_v50 = vor.u32 %v4250_v54, %v3635_v38  ;;  %v7048_v21 = vshrl.u32 %v7047_v51, 16  ;;  %v5876_v38 = vor.u32 %v4266_v3, %v3699_v55  ;;  %v5878_v54 = vor.u32 %v4231_v4, %v3565_v39  ;;  %v3557_v55 = vld [vmem:[%s6943_s2 + $0x468] sm:$0xf0]  ;;  %v4245_v3 = vld [vmem:[%s6943_s2 + $0x4e4] sm:$0xf] }
  0xd6   : > { %1886 = vmatpush.bf16.msra.mxu3 %v5630_v22  ;;  %v778_v2 = vadd.f32 %v777_v17, %v765_v15  ;;  %v3629_v15 = vld [vmem:[%s6943_s2 + $0x4f8] sm:$0xf0]  ;;  %v4263_v17 = vld [vmem:[%s6943_s2 + $0x574] sm:$0xf]  ;;  %v1517_v33 = vrot.slane %v7046_v32, 2  ;;  %v5898_v4 = vor.u32 %v4279_v5, %v3757_v42  ;;  %v5925_v42 = vor.u32 %v4229_v59, %v3557_v55 }
  0xd7   : > { %1848 = vmatpush.bf16.msra.mxu0 %v5651_v18  ;;  %v1519_v34 = vrot.slane %v7048_v21, 1  ;;  %v5884_v51 = vor.u32 %v4247_v44, %v3629_v15  ;;  %v5886_v47 = vor.u32 %v4263_v17, %v3693_v14  ;;  %v3621_v44 = vld [vmem:[%s6943_s2 + $0x4e8] sm:$0xf0]  ;;  %v4261_v15 = vld [vmem:[%s6943_s2 + $0x564] sm:$0xf] }
  0xd8   : > { %1861 = vmatpush.bf16.msra.mxu1 %v5655_v23  ;;  %782 = vst [vmem:[#allocation2 + $0x8] sm:$0xff] %v778_v2  ;;  %v7045_v2 = vshrl.u32 %v7044_v16, 16  ;;  %v3685_v17 = vld [vmem:[%s6943_s2 + $0x568] sm:$0xf0]  ;;  %v4277_v5 = vld [vmem:[%s6943_s2 + $0x5e4] sm:$0xf] }
  0xd9   : > { %1874 = vmatpush.bf16.msra.mxu2 %v5657_v24  ;;  %v5913_v14 = vor.u32 %v1520_v52, %v1519_v34  ;;  %7056 = vst [vmem:[#allocation7_spill] sm:$0xff] %v5925_v42  ;;  %v5931_v34 = vor.u32 %v4245_v3, %v3621_v44  ;;  %v5933_v52 = vor.u32 %v4261_v15, %v3685_v17  ;;  %v3677_v59 = vld [vmem:[%s6943_s2 + $0x558] sm:$0xf0]  ;;  %v4275_v55 = vld [vmem:[%s6943_s2 + $0x5d4] sm:$0xf] }
  0xda   : > { %1887 = vmatpush.bf16.msra.mxu3 %v5669_v48  ;;  %v1516_v10 = vrot.slane %v7045_v2, 1  ;;  %v3741_v3 = vld [vmem:[%s6943_s2 + $0x5d8] sm:$0xf0] }
  0xdb   : > { %1849 = vmatpush.bf16.msra.mxu0 %v5687_v6  ;;  %v766_v62 = vpop.f32.mrf.mxu2  ;;  %7057 = vst [vmem:[#allocation8_spill] sm:$0xff] %v5931_v34 }
  0xdc   : > { %1862 = vmatpush.bf16.msra.mxu1 %v5691_v8  ;;  %v779_v41 = vpop.f32.mrf.mxu3  ;;  %v7053_v62 = vld [vmem:[#allocation6_spill] sm:$0xff]  ;;  %v5900_v39 = vor.u32 %v1517_v33, %v1516_v10  ;;  %v5921_v33 = vor.u32 %v1511_v25, %v1510_v0  ;;  %7058 = vst [vmem:[#allocation9_spill] sm:$0xff] %v5933_v52  ;;  %v4227_v0 = vld [vmem:[%s6943_s2 + $0x454] sm:$0xf]  ;;  %v3549_v25 = vld [vmem:[%s6943_s2 + $0x458] sm:$0xf0] }
  0xdd   : > { %1875 = vmatpush.bf16.msra.mxu2 %v5693_v12  ;;  %v7054_v41 = vshrl.u32 %v7053_v62, 16  ;;  %v7055_v32 = vshll.u32 %v7053_v62, 16  ;;  %v3749_v10 = vld [vmem:[%s6943_s2 + $0x5e8] sm:$0xf0]  ;;  %v5967_v44 = vor.u32 %v4227_v0, %v3549_v25  ;;  %v4241_v0 = vld [vmem:[%s6943_s2 + $0x4c4] sm:$0xf]  ;;  %v5985_v25 = vor.u32 %v4275_v55, %v3741_v3 }
  0xde   : > { %1888 = vmatpush.bf16.msra.mxu3 %v5705_v49  ;;  %v3733_v55 = vld [vmem:[%s6943_s2 + $0x5c8] sm:$0xf0] }
  0xdf   : > { %1850 = vmatpush.bf16.msra.mxu0 %v5723_v11  ;;  %v1513_v2 = vrot.slane %v7054_v41, 1  ;;  %v1514_v21 = vrot.slane %v7055_v32, 2  ;;  %v4243_v41 = vld [vmem:[%s6943_s2 + $0x4d4] sm:$0xf]  ;;  %v3613_v32 = vld [vmem:[%s6943_s2 + $0x4d8] sm:$0xf0] }
  0xe0   : > { %1863 = vmatpush.bf16.msra.mxu1 %v5727_v13  ;;  %7060 = vst [vmem:[#allocation11_spill] sm:$0xff] %v5967_v44  ;;  %v5971_v15 = vor.u32 %v4243_v41, %v3613_v32  ;;  %v3605_v41 = vld [vmem:[%s6943_s2 + $0x4c8] sm:$0xf0]  ;;  %v4257_v32 = vld [vmem:[%s6943_s2 + $0x544] sm:$0xf] }
  0xe1   : > { %1876 = vmatpush.bf16.msra.mxu2 %v5729_v37  ;;  %v5927_v7 = vor.u32 %v1514_v21, %v1513_v2  ;;  %v5946_v2 = vor.u32 %v4277_v5, %v3749_v10  ;;  %v4259_v21 = vld [vmem:[%s6943_s2 + $0x554] sm:$0xf]  ;;  %v4225_v5 = vld [vmem:[%s6943_s2 + $0x444] sm:$0xf]  ;;  %v3541_v10 = vld [vmem:[%s6943_s2 + $0x448] sm:$0xf0]  ;;  %v6007_v58 = vor.u32 %v4241_v0, %v3605_v41 }
  0xe2   : > { %1889 = vmatpush.bf16.msra.mxu3 %v5741_v20  ;;  %7061 = vst [vmem:[#allocation12_spill] sm:$0xff] %v5971_v15  ;;  %v5973_v17 = vor.u32 %v4259_v21, %v3677_v59  ;;  %v3669_v21 = vld [vmem:[%s6943_s2 + $0x548] sm:$0xf0]  ;;  %v4273_v59 = vld [vmem:[%s6943_s2 + $0x5c4] sm:$0xf]  ;;  %v6003_v3 = vor.u32 %v4225_v5, %v3541_v10 }
  0xe3   : > { %1851 = vmatpush.bf16.msra.mxu0 %v5759_v27  ;;  %7059 = vst [vmem:[#allocation10_spill] sm:$0xff] %v5946_v2  ;;  %v6009_v16 = vor.u32 %v4257_v32, %v3669_v21  ;;  %v4239_v5 = vld [vmem:[%s6943_s2 + $0x4b4] sm:$0xf]  ;;  %v6021_v10 = vor.u32 %v4273_v59, %v3733_v55  ;;  %v3597_v41 = vld [vmem:[%s6943_s2 + $0x4b8] sm:$0xf0] }
  0xe4   : > { %1864 = vmatpush.bf16.msra.mxu1 %v5766_v19  ;;  %7062 = vst [vmem:[#allocation13_spill] sm:$0xff] %v5973_v17  ;;  %v4255_v32 = vld [vmem:[%s6943_s2 + $0x534] sm:$0xf]  ;;  %v3661_v21 = vld [vmem:[%s6943_s2 + $0x538] sm:$0xf0]  ;;  %v6043_v59 = vor.u32 %v4239_v5, %v3597_v41 }
  0xe5   : > { %1877 = vmatpush.bf16.msra.mxu2 %v5768_v61  ;;  %7063 = vst [vmem:[#allocation14_spill] sm:$0xff] %v5985_v25  ;;  %v6045_v55 = vor.u32 %v4255_v32, %v3661_v21  ;;  %v3589_v32 = vld [vmem:[%s6943_s2 + $0x4a8] sm:$0xf0]  ;;  %v4253_v21 = vld [vmem:[%s6943_s2 + $0x524] sm:$0xf] }
  0xe6   : > { %1890 = vmatpush.bf16.msra.mxu3 %v5780_v28  ;;  %7064 = vst [vmem:[#allocation15_spill] sm:$0xff] %v6003_v3 }
  0xe7   : > { %1852 = vmatpush.bf16.msra.mxu0 %v5798_v60  ;;  %7065 = vst [vmem:[#allocation16_spill] sm:$0xff] %v6007_v58 }
  0xe8   : > { %1865 = vmatpush.bf16.msra.mxu1 %v5811_v30  ;;  %7066 = vst [vmem:[#allocation17_spill] sm:$0xff] %v6009_v16 }
  0xe9   : > { %1878 = vmatpush.bf16.msra.mxu2 %v5813_v31  ;;  %7067 = vst [vmem:[#allocation18_spill] sm:$0xff] %v6021_v10 }
  0xea   : > { %1891 = vmatpush.bf16.msra.mxu3 %v5825_v63 }
  0xeb   : > { %1853 = vmatpush.bf16.msra.mxu0 %v5836_v43  ;;  %v1211_v62 = vpop.f32.mrf.mxu0 }
  0xec   : > { %1866 = vmatpush.bf16.msra.mxu1 %v5848_v29 }
  0xed   : > { %1879 = vmatpush.bf16.msra.mxu2 %v5850_v50 }
  0xee   : > { %1892 = vmatpush.bf16.msra.mxu3 %v5876_v38  ;;  %1854 = vmatmul.bf16.vlgmr.msra.gmra.mxu0 %v5921_v33 }
  0xef   : > { %1898 = vmatpush.bf16.msrb.mxu0 %v5878_v54  ;;  %1867 = vmatmul.bf16.vlgmr.msra.gmra.mxu1 %v5927_v7 }
  0xf0   : > { %1911 = vmatpush.bf16.msrb.mxu1 %v5884_v51  ;;  %1880 = vmatmul.bf16.vlgmr.msra.gmra.mxu2 %v5900_v39 }
  0xf1   : > { %1924 = vmatpush.bf16.msrb.mxu2 %v5886_v47  ;;  %1893 = vmatmul.bf16.vlgmr.msra.gmra.mxu3 %v5913_v14 }
  0xf2   : > { %1937 = vmatpush.bf16.msrb.mxu3 %v5898_v4 }
  0xf3   : > { %1899 = vmatpush.bf16.msrb.mxu0 %v5925_v42  ;;  %v4219_v42 = vld [vmem:[%s6943_s2 + $0x414] sm:$0xf] }
  0xf4   : > { %1912 = vmatpush.bf16.msrb.mxu1 %v5931_v34  ;;  %v3525_v34 = vld [vmem:[%s6943_s2 + $0x428] sm:$0xf0]  ;;  %v1250_v41 = vpop.f32.mrf.mxu3 }
  0xf5   : > { %1925 = vmatpush.bf16.msrb.mxu2 %v5933_v52  ;;  %v4223_v52 = vld [vmem:[%s6943_s2 + $0x434] sm:$0xf] }
  0xf6   : > { %1938 = vmatpush.bf16.msrb.mxu3 %v5946_v2  ;;  %v1224_v2 = vpop.f32.mrf.mxu1 }
  0xf7   : > { %1900 = vmatpush.bf16.msrb.mxu0 %v5967_v44  ;;  %v3533_v44 = vld [vmem:[%s6943_s2 + $0x438] sm:$0xf0]  ;;  %v1225_v0 = vadd.f32 %v1224_v2, %v1211_v62 }
  0xf8   : > { %1913 = vmatpush.bf16.msrb.mxu1 %v5971_v15  ;;  %v3725_v62 = vld [vmem:[%s6943_s2 + $0x5b8] sm:$0xf0]  ;;  %v6039_v2 = vor.u32 %v4223_v52, %v3533_v44  ;;  %v4221_v15 = vld [vmem:[%s6943_s2 + $0x424] sm:$0xf] }
  0xf9   : > { %1926 = vmatpush.bf16.msrb.mxu2 %v5973_v17  ;;  %v4271_v17 = vld [vmem:[%s6943_s2 + $0x5b4] sm:$0xf]  ;;  %v4237_v52 = vld [vmem:[%s6943_s2 + $0x4a4] sm:$0xf] }
  0xfa   : > { %1939 = vmatpush.bf16.msrb.mxu3 %v5985_v25  ;;  %7068 = vst [vmem:[#allocation20_spill] sm:$0xff] %v6039_v2  ;;  %v1237_v25 = vpop.f32.mrf.mxu2  ;;  %v6057_v44 = vor.u32 %v4271_v17, %v3725_v62  ;;  %v3717_v17 = vld [vmem:[%s6943_s2 + $0x5a8] sm:$0xf0]  ;;  %v6075_v62 = vor.u32 %v4221_v15, %v3525_v34 }
  0xfb   : > { %1901 = vmatpush.bf16.msrb.mxu0 %v6003_v3  ;;  %v1238_v5 = vadd.f32 %v1237_v25, %v1225_v0  ;;  %v848_v25 = vld [vmem:[#allocation2] sm:$0x7f]  ;;  %v6079_v3 = vor.u32 %v4237_v52, %v3589_v32  ;;  %v4267_v32 = vld [vmem:[%s6943_s2 + $0x594] sm:$0xf] }
  0xfc   : > { %1914 = vmatpush.bf16.msrb.mxu1 %v6007_v58  ;;  %v1213_v58 = vpop.f32.mrf.mxu0 }
  0xfd   : > { %1927 = vmatpush.bf16.msrb.mxu2 %v6009_v16  ;;  %v3653_v16 = vld [vmem:[%s6943_s2 + $0x528] sm:$0xf0]  ;;  %v1251_v0 = vadd.f32 %v1250_v41, %v1238_v5  ;;  %v4235_v58 = vld [vmem:[%s6943_s2 + $0x494] sm:$0xf]  ;;  %v3645_v41 = vld [vmem:[%s6943_s2 + $0x518] sm:$0xf0] }
  0xfe   : > { %1940 = vmatpush.bf16.msrb.mxu3 %v6021_v10  ;;  %v4269_v10 = vld [vmem:[%s6943_s2 + $0x5a4] sm:$0xf]  ;;  %v6081_v46 = vor.u32 %v4253_v21, %v3653_v16  ;;  %v1226_v34 = vpop.f32.mrf.mxu1  ;;  %v3581_v16 = vld [vmem:[%s6943_s2 + $0x498] sm:$0xf0]  ;;  %v4251_v5 = vld [vmem:[%s6943_s2 + $0x514] sm:$0xf] }
  0xff   : > { %1902 = vmatpush.bf16.msrb.mxu0 %v6039_v2  ;;  %v3517_v2 = vld [vmem:[%s6943_s2 + $0x418] sm:$0xf0]  ;;  %v1306_v15 = vadd.f32 %v1251_v0, %v848_v25  ;;  %v6093_v52 = vor.u32 %v4269_v10, %v3717_v17  ;;  %v6115_v17 = vor.u32 %v4235_v58, %v3581_v16  ;;  %v6117_v25 = vor.u32 %v4251_v5, %v3645_v41  ;;  %v4217_v0 = vld [vmem:[%s6943_s2 + $0x404] sm:$0xf]  ;;  %v3509_v34 = vld [vmem:[%s6943_s2 + $0x408] sm:$0xf0]  ;;  %v1252_v41 = vpop.f32.mrf.mxu3 }
 0x100   : > { %1915 = vmatpush.bf16.msrb.mxu1 %v6043_v59  ;;  %7069 = vst [vmem:[#allocation21_spill] sm:$0xff] %v6081_v46  ;;  %v3709_v10 = vld [vmem:[%s6943_s2 + $0x598] sm:$0xf0]  ;;  %v6111_v21 = vor.u32 %v4219_v42, %v3517_v2  ;;  %v4233_v42 = vld [vmem:[%s6943_s2 + $0x484] sm:$0xf] }
 0x101   : > { %1928 = vmatpush.bf16.msrb.mxu2 %v6045_v55  ;;  %7070 = vst [vmem:[#allocation22_spill] sm:$0xff] %v6093_v52  ;;  %v3573_v58 = vld [vmem:[%s6943_s2 + $0x488] sm:$0xf0]  ;;  %v4249_v16 = vld [vmem:[%s6943_s2 + $0x504] sm:$0xf] }
 0x102   : > { %1941 = vmatpush.bf16.msrb.mxu3 %v6057_v44  ;;  %1308 = vst [vmem:[#allocation2] sm:$0x7f] %v1306_v15  ;;  %v1239_v2 = vpop.f32.mrf.mxu2  ;;  %v6129_v15 = vor.u32 %v4267_v32, %v3709_v10  ;;  %v3637_v5 = vld [vmem:[%s6943_s2 + $0x508] sm:$0xf0]  ;;  %v6147_v10 = vor.u32 %v4217_v0, %v3509_v34 }
 0x103   : > { %1903 = vmatpush.bf16.msrb.mxu0 %v6075_v62  ;;  %v4265_v2 = vld [vmem:[%s6943_s2 + $0x584] sm:$0xf]  ;;  %v3701_v32 = vld [vmem:[%s6943_s2 + $0x588] sm:$0xf0] }
 0x104   : > { %1916 = vmatpush.bf16.msrb.mxu1 %v6079_v3  ;;  %v6156_v41 = vor.u32 %v4265_v2, %v3701_v32  ;;  %v4067_v2 = vld [vmem:[%s6943_s2 + $0x7e0] sm:$0xf]  ;;  %v4342_v32 = vld [vmem:[%s6943_s2 + $0x7e4] sm:$0xf0] }
 0x105   : > { %1929 = vmatpush.bf16.msrb.mxu2 %v6081_v46  ;;  %v6153_v46 = vor.u32 %v4249_v16, %v3637_v5  ;;  %v4003_v16 = vld [vmem:[%s6943_s2 + $0x760] sm:$0xf]  ;;  %v4326_v5 = vld [vmem:[%s6943_s2 + $0x764] sm:$0xf0] }
 0x106   : > { %1942 = vmatpush.bf16.msrb.mxu3 %v6093_v52  ;;  %v6151_v52 = vor.u32 %v4233_v42, %v3573_v58  ;;  %v3939_v42 = vld [vmem:[%s6943_s2 + $0x6e0] sm:$0xf]  ;;  %v4310_v58 = vld [vmem:[%s6943_s2 + $0x6e4] sm:$0xf0] }
 0x107   : > { %1904 = vmatpush.bf16.msrb.mxu0 %v6111_v21 }
 0x108   : > { %1917 = vmatpush.bf16.msrb.mxu1 %v6115_v17 }
 0x109   : > { %1930 = vmatpush.bf16.msrb.mxu2 %v6117_v25 }
 0x10a   : > { %1943 = vmatpush.bf16.msrb.mxu3 %v6129_v15 }
 0x10b   : > { %1905 = vmatpush.bf16.msrb.mxu0 %v6147_v10 }
 0x10c   : > { %1918 = vmatpush.bf16.msrb.mxu1 %v6151_v52 }
 0x10d   : > { %1931 = vmatpush.bf16.msrb.mxu2 %v6153_v46 }
 0x10e   : > { %1944 = vmatpush.bf16.msrb.mxu3 %v6156_v41  ;;  %1906 = vmatmul.bf16.vlgmr.msrb.gmra.mxu0 %v5921_v33  ;;  %v4296_v33 = vld [vmem:[%s6943_s2 + $0x674] sm:$0xf0] }
 0x10f   : > { %1956 = vmatpush.bf16.msra.mxu0 %v5574_v56  ;;  %1919 = vmatmul.bf16.vlgmr.msrb.gmra.mxu1 %v5927_v7  ;;  %v1263_v56 = vpop.f32.mrf.mxu0  ;;  %v3947_v7 = vld [vmem:[%s6943_s2 + $0x6f0] sm:$0xf] }
 0x110   : > { %1969 = vmatpush.bf16.msra.mxu1 %v5576_v57  ;;  %1932 = vmatmul.bf16.vlgmr.msrb.gmra.mxu2 %v5900_v39  ;;  %v1276_v57 = vpop.f32.mrf.mxu1 }
 0x111   : > { %1982 = vmatpush.bf16.msra.mxu2 %v5578_v9  ;;  %1945 = vmatmul.bf16.vlgmr.msrb.gmra.mxu3 %v5913_v14  ;;  %v1277_v9 = vadd.f32 %v1276_v57, %v1263_v56  ;;  %v3883_v14 = vld [vmem:[%s6943_s2 + $0x670] sm:$0xf] }
 0x112   : > { %1995 = vmatpush.bf16.msra.mxu3 %v5590_v26  ;;  %v3867_v56 = vld [vmem:[%s6943_s2 + $0x650] sm:$0xf] }
 0x113   : > { %1957 = vmatpush.bf16.msra.mxu0 %v5611_v1  ;;  %v1289_v26 = vpop.f32.mrf.mxu2  ;;  %v3931_v57 = vld [vmem:[%s6943_s2 + $0x6d0] sm:$0xf] }
 0x114   : > { %1970 = vmatpush.bf16.msra.mxu1 %v5615_v53  ;;  %v1290_v1 = vadd.f32 %v1289_v26, %v1277_v9  ;;  %v1302_v53 = vpop.f32.mrf.mxu3  ;;  %v6318_v9 = vor.u32 %v4342_v32, %v4067_v2  ;;  %v4308_v26 = vld [vmem:[%s6943_s2 + $0x6d4] sm:$0xf0]  ;;  %v4302_v2 = vld [vmem:[%s6943_s2 + $0x6a4] sm:$0xf0]  ;;  %v3971_v32 = vld [vmem:[%s6943_s2 + $0x720] sm:$0xf] }
 0x115   : > { %1983 = vmatpush.bf16.msra.mxu2 %v5617_v45 }
 0x116   : > { %1996 = vmatpush.bf16.msra.mxu3 %v5630_v22  ;;  %v1303_v45 = vadd.f32 %v1302_v53, %v1290_v1  ;;  %v3995_v1 = vld [vmem:[%s6943_s2 + $0x750] sm:$0xf]  ;;  %v4324_v53 = vld [vmem:[%s6943_s2 + $0x754] sm:$0xf0] }
 0x117   : > { %1958 = vmatpush.bf16.msra.mxu0 %v5651_v18  ;;  %v1265_v22 = vpop.f32.mrf.mxu0  ;;  %v849_v18 = vld [vmem:[#allocation2 + $0x8] sm:$0x7f] }
 0x118   : > { %1971 = vmatpush.bf16.msra.mxu1 %v5655_v23  ;;  %v1278_v23 = vpop.f32.mrf.mxu1  ;;  %v4340_v22 = vld [vmem:[%s6943_s2 + $0x7d4] sm:$0xf0] }
 0x119   : > { %1984 = vmatpush.bf16.msra.mxu2 %v5657_v24  ;;  %v1307_v24 = vadd.f32 %v1303_v45, %v849_v18  ;;  %v4059_v45 = vld [vmem:[%s6943_s2 + $0x7d0] sm:$0xf]  ;;  %v6343_v23 = vor.u32 %v4308_v26, %v3931_v57 }
 0x11a   : > { %1997 = vmatpush.bf16.msra.mxu3 %v5669_v48 }
 0x11b   : > { %1959 = vmatpush.bf16.msra.mxu0 %v5687_v6  ;;  %1309 = vst [vmem:[#allocation2 + $0x8] sm:$0x7f] %v1307_v24  ;;  %v1291_v48 = vpop.f32.mrf.mxu2  ;;  %v6345_v24 = vor.u32 %v4324_v53, %v3995_v1  ;;  %v3835_v1 = vld [vmem:[%s6943_s2 + $0x610] sm:$0xf] }
 0x11c   : > { %1972 = vmatpush.bf16.msra.mxu1 %v5691_v8  ;;  %v1304_v6 = vpop.f32.mrf.mxu3  ;;  %v7071_v8 = vld [vmem:[#allocation7_spill] sm:$0xff]  ;;  %v3859_v48 = vld [vmem:[%s6943_s2 + $0x640] sm:$0xf] }
 0x11d   : > { %1985 = vmatpush.bf16.msra.mxu2 %v5693_v12  ;;  %v7072_v12 = vld [vmem:[#allocation19_spill] sm:$0xff]  ;;  %v4290_v6 = vld [vmem:[%s6943_s2 + $0x644] sm:$0xf0] }
 0x11e   : > { %1998 = vmatpush.bf16.msra.mxu3 %v5705_v49  ;;  %v7073_v49 = vld [vmem:[#allocation8_spill] sm:$0xff] }
 0x11f   : > { %1960 = vmatpush.bf16.msra.mxu0 %v5723_v11  ;;  %v7074_v11 = vld [vmem:[#allocation9_spill] sm:$0xff] }
 0x120   : > { %1973 = vmatpush.bf16.msra.mxu1 %v5727_v13  ;;  %v7075_v13 = vld [vmem:[#allocation10_spill] sm:$0xff] }
 0x121   : > { %1986 = vmatpush.bf16.msra.mxu2 %v5729_v37  ;;  %v7076_v37 = vld [vmem:[#allocation11_spill] sm:$0xff] }
 0x122   : > { %1999 = vmatpush.bf16.msra.mxu3 %v5741_v20 }
 0x123   : > { %1961 = vmatpush.bf16.msra.mxu0 %v5759_v27  ;;  %v7077_v27 = vld [vmem:[#allocation12_spill] sm:$0xff] }
 0x124   : > { %1974 = vmatpush.bf16.msra.mxu1 %v5766_v19  ;;  %v7078_v19 = vld [vmem:[#allocation13_spill] sm:$0xff] }
 0x125   : > { %1987 = vmatpush.bf16.msra.mxu2 %v5768_v61 }
 0x126   : > { %2000 = vmatpush.bf16.msra.mxu3 %v5780_v28  ;;  %v7079_v28 = vld [vmem:[#allocation14_spill] sm:$0xff] }
 0x127   : > { %1962 = vmatpush.bf16.msra.mxu0 %v5798_v60  ;;  %v7080_v60 = vld [vmem:[#allocation15_spill] sm:$0xff] }
 0x128   : > { %1975 = vmatpush.bf16.msra.mxu1 %v5811_v30  ;;  %v7081_v30 = vld [vmem:[#allocation16_spill] sm:$0xff] }
 0x129   : > { %1988 = vmatpush.bf16.msra.mxu2 %v5813_v31  ;;  %v7082_v31 = vld [vmem:[#allocation17_spill] sm:$0xff] }
 0x12a   : > { %2001 = vmatpush.bf16.msra.mxu3 %v5825_v63 }
 0x12b   : > { %1963 = vmatpush.bf16.msra.mxu0 %v5836_v43  ;;  %v6211_v20 = vpop.f32.mrf.mxu0  ;;  %v7083_v43 = vld [vmem:[#allocation18_spill] sm:$0xff] }
 0x12c   : > { %1976 = vmatpush.bf16.msra.mxu1 %v5848_v29  ;;  %v6215_v61 = vpop.f32.mrf.mxu1 }
 0x12d   : > { %1989 = vmatpush.bf16.msra.mxu2 %v5850_v50  ;;  %v7084_v50 = vld [vmem:[#allocation20_spill] sm:$0xff] }
 0x12e   : > { %2002 = vmatpush.bf16.msra.mxu3 %v5876_v38  ;;  %1964 = vmatmul.bf16.vlgmr.msra.gmra.mxu0 %v5513_v40 }
 0x12f   : > { %2008 = vmatpush.bf16.msrb.mxu0 %v5878_v54  ;;  %1977 = vmatmul.bf16.vlgmr.msra.gmra.mxu1 %v7072_v12  ;;  %v7085_v54 = vld [vmem:[#allocation21_spill] sm:$0xff] }
 0x130   : > { %2021 = vmatpush.bf16.msrb.mxu1 %v5884_v51  ;;  %1990 = vmatmul.bf16.vlgmr.msra.gmra.mxu2 %v5507_v35 }
 0x131   : > { %2034 = vmatpush.bf16.msrb.mxu2 %v5886_v47  ;;  %2003 = vmatmul.bf16.vlgmr.msra.gmra.mxu3 %v5511_v36 }
 0x132   : > { %2047 = vmatpush.bf16.msrb.mxu3 %v5898_v4  ;;  %v7086_v4 = vld [vmem:[#allocation22_spill] sm:$0xff] }
 0x133   : > { %2009 = vmatpush.bf16.msrb.mxu0 %v7071_v8  ;;  %v6221_v63 = vpop.f32.mrf.mxu2  ;;  %v1337_v51 = vpop.f32.mrf.mxu0  ;;  %v3923_v8 = vld [vmem:[%s6943_s2 + $0x6c0] sm:$0xf] }
 0x134   : > { %2022 = vmatpush.bf16.msrb.mxu1 %v7073_v49  ;;  %v6224_v29 = vpop.f32.mrf.mxu3  ;;  %v1350_v38 = vpop.f32.mrf.mxu1  ;;  %v6357_v49 = vor.u32 %v4340_v22, %v4059_v45  ;;  %v4288_v51 = vld [vmem:[%s6943_s2 + $0x634] sm:$0xf0] }
 0x135   : > { %2035 = vmatpush.bf16.msrb.mxu2 %v7074_v11  ;;  %v4306_v11 = vld [vmem:[%s6943_s2 + $0x6c4] sm:$0xf0]  ;;  %v3915_v38 = vld [vmem:[%s6943_s2 + $0x6b0] sm:$0xf] }
 0x136   : > { %2048 = vmatpush.bf16.msrb.mxu3 %v7075_v13  ;;  %v3987_v13 = vld [vmem:[%s6943_s2 + $0x740] sm:$0xf] }
 0x137   : > { %2010 = vmatpush.bf16.msrb.mxu0 %v7076_v37  ;;  %v4322_v37 = vld [vmem:[%s6943_s2 + $0x744] sm:$0xf0] }
 0x138   : > { %2023 = vmatpush.bf16.msrb.mxu1 %v7077_v27  ;;  %v4051_v27 = vld [vmem:[%s6943_s2 + $0x7c0] sm:$0xf] }
 0x139   : > { %2036 = vmatpush.bf16.msrb.mxu2 %v7078_v19  ;;  %v4338_v19 = vld [vmem:[%s6943_s2 + $0x7c4] sm:$0xf0] }
 0x13a   : > { %2049 = vmatpush.bf16.msrb.mxu3 %v7079_v28  ;;  %v6375_v28 = vor.u32 %v4290_v6, %v3859_v48  ;;  %v4284_v48 = vld [vmem:[%s6943_s2 + $0x614] sm:$0xf0]  ;;  %v3899_v6 = vld [vmem:[%s6943_s2 + $0x690] sm:$0xf] }
 0x13b   : > { %2011 = vmatpush.bf16.msrb.mxu0 %v7080_v60  ;;  %v1363_v47 = vpop.f32.mrf.mxu2 }
 0x13c   : > { %2024 = vmatpush.bf16.msrb.mxu1 %v7081_v30  ;;  %v1376_v39 = vpop.f32.mrf.mxu3  ;;  %v6379_v30 = vor.u32 %v4306_v11, %v3923_v8  ;;  %v6395_v47 = vor.u32 %v4338_v19, %v4051_v27  ;;  %v4300_v8 = vld [vmem:[%s6943_s2 + $0x694] sm:$0xf0] }
 0x13d   : > { %2037 = vmatpush.bf16.msrb.mxu2 %v7082_v31  ;;  %v6381_v31 = vor.u32 %v4322_v37, %v3987_v13  ;;  %v4304_v39 = vld [vmem:[%s6943_s2 + $0x6b4] sm:$0xf0]  ;;  %v1311_v37 = vld [vmem:[#allocation2 + $0x7] ss:$8 sm:$0x3] }
 0x13e   : > { %2050 = vmatpush.bf16.msrb.mxu3 %v7083_v43 }
 0x13f   : > { %2012 = vmatpush.bf16.msrb.mxu0 %v7084_v50  ;;  %v3851_v50 = vld [vmem:[%s6943_s2 + $0x630] sm:$0xf] }
 0x140   : > { %2025 = vmatpush.bf16.msrb.mxu1 %v6043_v59  ;;  %v4011_v59 = vld [vmem:[%s6943_s2 + $0x770] sm:$0xf] }
 0x141   : > { %2038 = vmatpush.bf16.msrb.mxu2 %v6045_v55  ;;  %v4328_v55 = vld [vmem:[%s6943_s2 + $0x774] sm:$0xf0] }
 0x142   : > { %2051 = vmatpush.bf16.msrb.mxu3 %v6057_v44  ;;  %v4075_v44 = vld [vmem:[%s6943_s2 + $0x7f0] sm:$0xf]  ;;  %v6266_v34 = vor.u32 %v4328_v55, %v4011_v59 }
 0x143   : > { %2013 = vmatpush.bf16.msrb.mxu0 %v6075_v62  ;;  %v4344_v62 = vld [vmem:[%s6943_s2 + $0x7f4] sm:$0xf0] }
 0x144   : > { %2026 = vmatpush.bf16.msrb.mxu1 %v6079_v3  ;;  %v4312_v3 = vld [vmem:[%s6943_s2 + $0x6f4] sm:$0xf0] }
 0x145   : > { %2039 = vmatpush.bf16.msrb.mxu2 %v7085_v54  ;;  %v6264_v0 = vor.u32 %v4312_v3, %v3947_v7  ;;  %v1349_v54 = vadd.f32 %v6215_v61, %v6211_v20  ;;  %v4043_v20 = vld [vmem:[%s6943_s2 + $0x7b0] sm:$0xf]  ;;  %v4336_v61 = vld [vmem:[%s6943_s2 + $0x7b4] sm:$0xf0]  ;;  %v6413_v7 = vor.u32 %v4288_v51, %v3851_v50  ;;  %v6417_v3 = vor.u32 %v4304_v39, %v3915_v38  ;;  %v3827_v38 = vld [vmem:[%s6943_s2 + $0x600] sm:$0xf] }
 0x146   : > { %2052 = vmatpush.bf16.msrb.mxu3 %v7086_v4  ;;  %v4316_v50 = vld [vmem:[%s6943_s2 + $0x714] sm:$0xf0]  ;;  %v4282_v39 = vld [vmem:[%s6943_s2 + $0x604] sm:$0xf0] }
 0x147   : > { %2014 = vmatpush.bf16.msrb.mxu0 %v6111_v21  ;;  %v6262_v21 = vor.u32 %v4296_v33, %v3883_v14  ;;  %v3979_v14 = vld [vmem:[%s6943_s2 + $0x730] sm:$0xf]  ;;  %v4320_v33 = vld [vmem:[%s6943_s2 + $0x734] sm:$0xf0] }
 0x148   : > { %2027 = vmatpush.bf16.msrb.mxu1 %v6115_v17  ;;  %v3875_v17 = vld [vmem:[%s6943_s2 + $0x660] sm:$0xf]  ;;  %v6419_v59 = vor.u32 %v4320_v33, %v3979_v14  ;;  %v4332_v51 = vld [vmem:[%s6943_s2 + $0x794] sm:$0xf0]  ;;  %v4298_v33 = vld [vmem:[%s6943_s2 + $0x684] sm:$0xf0] }
 0x149   : > { %2040 = vmatpush.bf16.msrb.mxu2 %v6117_v25  ;;  %v4294_v25 = vld [vmem:[%s6943_s2 + $0x664] sm:$0xf0]  ;;  %v3891_v14 = vld [vmem:[%s6943_s2 + $0x680] sm:$0xf] }
 0x14a   : > { %2053 = vmatpush.bf16.msrb.mxu3 %v6129_v15  ;;  %v6278_v15 = vor.u32 %v4344_v62, %v4075_v44  ;;  %v3843_v44 = vld [vmem:[%s6943_s2 + $0x620] sm:$0xf]  ;;  %v4286_v62 = vld [vmem:[%s6943_s2 + $0x624] sm:$0xf0] }
 0x14b   : > { %2015 = vmatpush.bf16.msrb.mxu0 %v6147_v10  ;;  %v6299_v10 = vor.u32 %v4294_v25, %v3875_v17  ;;  %v1387_v60 = vpop.f32.mrf.mxu0  ;;  %v3907_v17 = vld [vmem:[%s6943_s2 + $0x6a0] sm:$0xf]  ;;  %v1362_v25 = vadd.f32 %v6221_v63, %v1349_v54  ;;  %v6450_v26 = vor.u32 %v4286_v62, %v3843_v44  ;;  %v4314_v62 = vld [vmem:[%s6943_s2 + $0x704] sm:$0xf0] }
 0x14c   : > { %2028 = vmatpush.bf16.msrb.mxu1 %v6151_v52  ;;  %v6303_v52 = vor.u32 %v4310_v58, %v3939_v42  ;;  %v1400_v43 = vpop.f32.mrf.mxu1  ;;  %v6432_v42 = vor.u32 %v4336_v61, %v4043_v20  ;;  %v4035_v63 = vld [vmem:[%s6943_s2 + $0x7a0] sm:$0xf]  ;;  %v6457_v45 = vor.u32 %v4302_v2, %v3907_v17  ;;  %v6508_v61 = vor.u32 %v4300_v8, %v3899_v6  ;;  %v3885_v2 = vld [vmem:[%s6943_s2 + $0x678] sm:$0xf0]  ;;  %v4343_v6 = vld [vmem:[%s6943_s2 + $0x7f4] sm:$0xf] }
 0x14d   : > { %2041 = vmatpush.bf16.msrb.mxu2 %v6153_v46  ;;  %v6305_v46 = vor.u32 %v4326_v5, %v4003_v16  ;;  %v1401_v4 = vadd.f32 %v1400_v43, %v1387_v60  ;;  %v1437_v5 = vlaneseq  ;;  %v1375_v13 = vadd.f32 %v6224_v29, %v1362_v25  ;;  %v3963_v43 = vld [vmem:[%s6943_s2 + $0x710] sm:$0xf]  ;;  %v3955_v44 = vld [vmem:[%s6943_s2 + $0x700] sm:$0xf]  ;;  %v4077_v8 = vld [vmem:[%s6943_s2 + $0x7f8] sm:$0xf0] }
 0x14e   : > { %2054 = vmatpush.bf16.msrb.mxu3 %v6156_v41  ;;  %v4292_v41 = vld [vmem:[%s6943_s2 + $0x654] sm:$0xf0]  ;;  %2016 = vmatmul.bf16.vlgmr.msrb.gmra.mxu0 %v5513_v40  ;;  %v4027_v29 = vld [vmem:[%s6943_s2 + $0x790] sm:$0xf]  ;;  %v4019_v17 = vld [vmem:[%s6943_s2 + $0x780] sm:$0xf] }
 0x14f   : > { %2465 = vmatpush.bf16.msra.mxu0 %v6262_v21  ;;  %2029 = vmatmul.bf16.vlgmr.msrb.gmra.mxu1 %v7072_v12  ;;  %v6339_v18 = vor.u32 %v4292_v41, %v3867_v56  ;;  %v4318_v56 = vld [vmem:[%s6943_s2 + $0x724] sm:$0xf0]  ;;  %vm6472_vm1 = vcmp.lt.s32.totalorder %v1437_v5, 256  ;;  %v4295_v5 = vld [vmem:[%s6943_s2 + $0x674] sm:$0xf] }
 0x150   : > { %2478 = vmatpush.bf16.msra.mxu1 %v6264_v0  ;;  %2042 = vmatmul.bf16.vlgmr.msrb.gmra.mxu2 %v5507_v35  ;;  %v4334_v41 = vld [vmem:[%s6943_s2 + $0x7a4] sm:$0xf0]  ;;  %v6459_v22 = vor.u32 %v4318_v56, %v3971_v32  ;;  %v4311_v56 = vld [vmem:[%s6943_s2 + $0x6f4] sm:$0xf] }
 0x151   : > { %2491 = vmatpush.bf16.msra.mxu2 %v6266_v34  ;;  %2055 = vmatmul.bf16.vlgmr.msrb.gmra.mxu3 %v5511_v36  ;;  %v6476_v60 = vor.u32 %v4334_v41, %v4035_v63  ;;  %v6539_v63 = vor.u32 %v4282_v39, %v3827_v38  ;;  %v3949_v41 = vld [vmem:[%s6943_s2 + $0x6f8] sm:$0xf0]  ;;  %v6582_v38 = vor.u32 %v4343_v6, %v4077_v8  ;;  %v4325_v39 = vld [vmem:[%s6943_s2 + $0x764] sm:$0xf] }
 0x152   : > { %2504 = vmatpush.bf16.msra.mxu3 %v6278_v15  ;;  %v6568_v19 = vor.u32 %v4311_v56, %v3949_v41  ;;  %v4291_v41 = vld [vmem:[%s6943_s2 + $0x654] sm:$0xf]  ;;  %v3933_v8 = vld [vmem:[%s6943_s2 + $0x6d8] sm:$0xf0] }
 0x153   : > { %2466 = vmatpush.bf16.msra.mxu0 %v6299_v10  ;;  %v1413_v55 = vpop.f32.mrf.mxu2  ;;  %v1389_v53 = vpop.f32.mrf.mxu0 }
 0x154   : > { %2479 = vmatpush.bf16.msra.mxu1 %v6303_v52  ;;  %v1414_v58 = vadd.f32 %v1413_v55, %v1401_v4  ;;  %v1426_v16 = vpop.f32.mrf.mxu3  ;;  %v1402_v11 = vpop.f32.mrf.mxu1  ;;  %v6495_v4 = vor.u32 %v4284_v48, %v3835_v1  ;;  %v6510_v55 = vor.u32 %v4316_v50, %v3963_v43  ;;  %v4013_v1 = vld [vmem:[%s6943_s2 + $0x778] sm:$0xf0]  ;;  %v6552_v53 = vor.u32 %v4298_v33, %v3891_v14  ;;  %v4293_v50 = vld [vmem:[%s6943_s2 + $0x664] sm:$0xf]  ;;  %v4005_v14 = vld [vmem:[%s6943_s2 + $0x768] sm:$0xf0] }
 0x155   : > { %2492 = vmatpush.bf16.msra.mxu2 %v6305_v46  ;;  %v6554_v48 = vor.u32 %v4314_v62, %v3955_v44  ;;  %v7090_v33 = vld [vmem:[#allocation4_spill] sm:$0xff]  ;;  %v4341_v44 = vld [vmem:[%s6943_s2 + $0x7e4] sm:$0xf]  ;;  %v4069_v62 = vld [vmem:[%s6943_s2 + $0x7e8] sm:$0xf0]  ;;  %v6612_v56 = vor.u32 %v4325_v39, %v4005_v14 }
 0x156   : > { %2505 = vmatpush.bf16.msra.mxu3 %v6318_v9  ;;  %v1427_v57 = vadd.f32 %v1426_v16, %v1414_v58  ;;  %v6522_v58 = vor.u32 %v4332_v51, %v4027_v29  ;;  %v4330_v16 = vld [vmem:[%s6943_s2 + $0x784] sm:$0xf0]  ;;  %v3877_v29 = vld [vmem:[%s6943_s2 + $0x668] sm:$0xf0]  ;;  %v4309_v51 = vld [vmem:[%s6943_s2 + $0x6e4] sm:$0xf]  ;;  %v6626_v6 = vor.u32 %v4341_v44, %v4069_v62 }
 0x157   : > { %2467 = vmatpush.bf16.msra.mxu0 %v6339_v18  ;;  %v6563_v11 = vor.u32 %v4330_v16, %v4019_v17  ;;  %v7091_v17 = vld [vmem:[#allocation5_spill] sm:$0xff]  ;;  %v6605_v16 = vor.u32 %v4293_v50, %v3877_v29  ;;  %7095 = vst [vmem:[#allocation9_spill] sm:$0xff] %v6612_v56  ;;  %v4323_v50 = vld [vmem:[%s6943_s2 + $0x754] sm:$0xf]  ;;  %v3997_v29 = vld [vmem:[%s6943_s2 + $0x758] sm:$0xf0] }
 0x158   : > { %2480 = vmatpush.bf16.msra.mxu1 %v6343_v23  ;;  %v1432_v27 = vrot.slane %v1427_v57, 7  ;;  %v4327_v57 = vld [vmem:[%s6943_s2 + $0x774] sm:$0xf]  ;;  %7096 = vst [vmem:[#allocation10_spill] sm:$0xff] %v6626_v6  ;;  %v6656_v44 = vor.u32 %v4323_v50, %v3997_v29  ;;  %v4289_v62 = vld [vmem:[%s6943_s2 + $0x644] sm:$0xf] }
 0x159   : > { %2493 = vmatpush.bf16.msra.mxu2 %v6345_v24  ;;  %v6570_v43 = vor.u32 %v4327_v57, %v4013_v1  ;;  %7092 = vst [vmem:[#allocation7_spill] sm:$0xff] %v6605_v16  ;;  %v3869_v57 = vld [vmem:[%s6943_s2 + $0x658] sm:$0xf0]  ;;  %v4307_v1 = vld [vmem:[%s6943_s2 + $0x6d4] sm:$0xf] }
 0x15a   : > { %2506 = vmatpush.bf16.msra.mxu3 %v6357_v49  ;;  %v1434_v54 = vsel %vm1433_vm0, %v1375_v13, %v1432_v27  ;;  %v6565_v13 = vor.u32 %v4295_v5, %v3885_v2  ;;  %v7093_v5 = vld [vmem:[#allocation6_spill] sm:$0xff]  ;;  %v6650_v39 = vor.u32 %v4291_v41, %v3869_v57  ;;  %v6654_v14 = vor.u32 %v4307_v1, %v3933_v8  ;;  %v4305_v41 = vld [vmem:[%s6943_s2 + $0x6c4] sm:$0xf] }
 0x15b   : > { %2468 = vmatpush.bf16.msra.mxu0 %v6375_v28  ;;  %v1436_v20 = vadd.f32 %v1434_v54, %v1311_v37  ;;  %v1415_v25 = vpop.f32.mrf.mxu2  ;;  %v7089_v37 = vld [vmem:[#allocation3_spill] sm:$0xff]  ;;  %v3941_v54 = vld [vmem:[%s6943_s2 + $0x6e8] sm:$0xf0]  ;;  %v6996_v2 = vrot.slane %v7093_v5, 2  ;;  %7099 = vst [vmem:[#allocation13_spill] sm:$0xff] %v6656_v44 }
 0x15c   : > { %2481 = vmatpush.bf16.msra.mxu1 %v6379_v30  ;;  %v1428_v32 = vpop.f32.mrf.mxu3  ;;  %v6998_v27 = vrot.slane %v7089_v37, 2  ;;  %v6995_v25 = vrot.slane %v7091_v17, 2  ;;  %7097 = vst [vmem:[#allocation11_spill] sm:$0xff] %v6650_v39  ;;  %v3925_v1 = vld [vmem:[%s6943_s2 + $0x6c8] sm:$0xf0] }
 0x15d   : > { %2494 = vmatpush.bf16.msra.mxu2 %v6381_v31  ;;  %1441 = vst.msk [vmem:[#allocation2 + $0x7] ss:$8 sm:$0x3] %vm6472_vm1, %v1436_v20  ;;  %v6997_v20 = vrot.slane %v7090_v33, 2  ;;  %v6610_v32 = vor.u32 %v4309_v51, %v3941_v54  ;;  %v4339_v51 = vld [vmem:[%s6943_s2 + $0x7d4] sm:$0xf] }
 0x15e   : > { %2507 = vmatpush.bf16.msra.mxu3 %v6395_v47  ;;  %v4061_v54 = vld [vmem:[%s6943_s2 + $0x7d8] sm:$0xf0]  ;;  %7098 = vst [vmem:[#allocation12_spill] sm:$0xff] %v6654_v14  ;;  %v4321_v8 = vld [vmem:[%s6943_s2 + $0x744] sm:$0xf] }
 0x15f   : > { %2469 = vmatpush.bf16.msra.mxu0 %v6413_v7  ;;  %7094 = vst [vmem:[#allocation8_spill] sm:$0xff] %v6610_v32  ;;  %v6668_v57 = vor.u32 %v4339_v51, %v4061_v54  ;;  %v3989_v50 = vld [vmem:[%s6943_s2 + $0x748] sm:$0xf0]  ;;  %v4337_v29 = vld [vmem:[%s6943_s2 + $0x7c4] sm:$0xf] }
 0x160   : > { %2482 = vmatpush.bf16.msra.mxu1 %v6417_v3  ;;  %v4053_v51 = vld [vmem:[%s6943_s2 + $0x7c8] sm:$0xf0] }
 0x161   : > { %2495 = vmatpush.bf16.msra.mxu2 %v6419_v59  ;;  %7100 = vst [vmem:[#allocation14_spill] sm:$0xff] %v6668_v57 }
 0x162   : > { %2508 = vmatpush.bf16.msra.mxu3 %v6432_v42 }
 0x163   : > { %2470 = vmatpush.bf16.msra.mxu0 %v6450_v26 }
 0x164   : > { %2483 = vmatpush.bf16.msra.mxu1 %v6457_v45 }
 0x165   : > { %2496 = vmatpush.bf16.msra.mxu2 %v6459_v22 }
 0x166   : > { %2509 = vmatpush.bf16.msra.mxu3 %v6476_v60 }
 0x167   : > { %2471 = vmatpush.bf16.msra.mxu0 %v6495_v4 }
 0x168   : > { %2484 = vmatpush.bf16.msra.mxu1 %v6508_v61 }
 0x169   : > { %2497 = vmatpush.bf16.msra.mxu2 %v6510_v55 }
 0x16a   : > { %2510 = vmatpush.bf16.msra.mxu3 %v6522_v58 }
 0x16b   : > { %2472 = vmatpush.bf16.msra.mxu0 %v6539_v63 }
 0x16c   : > { %2485 = vmatpush.bf16.msra.mxu1 %v6552_v53 }
 0x16d   : > { %2498 = vmatpush.bf16.msra.mxu2 %v6554_v48 }
 0x16e   : > { %2511 = vmatpush.bf16.msra.mxu3 %v6563_v11  ;;  %2473 = vmatmul.bf16.vlgmr.msra.gmra.mxu0 %v6995_v25  ;;  %v3861_v25 = vld [vmem:[%s6943_s2 + $0x648] sm:$0xf0] }
 0x16f   : > { %2517 = vmatpush.bf16.msrb.mxu0 %v6565_v13  ;;  %2486 = vmatmul.bf16.vlgmr.msra.gmra.mxu1 %v6996_v2  ;;  %v6686_v54 = vor.u32 %v4289_v62, %v3861_v25  ;;  %v1855_v2 = vpop.f32.mrf.mxu0  ;;  %v4303_v25 = vld [vmem:[%s6943_s2 + $0x6b4] sm:$0xf]  ;;  %v6704_v62 = vor.u32 %v4337_v29, %v4053_v51 }
 0x170   : > { %2530 = vmatpush.bf16.msrb.mxu1 %v6568_v19  ;;  %2499 = vmatmul.bf16.vlgmr.msra.gmra.mxu2 %v6998_v27  ;;  %v6692_v27 = vor.u32 %v4321_v8, %v3989_v50  ;;  %v4319_v8 = vld [vmem:[%s6943_s2 + $0x734] sm:$0xf]  ;;  %v3981_v50 = vld [vmem:[%s6943_s2 + $0x738] sm:$0xf0] }
 0x171   : > { %2543 = vmatpush.bf16.msrb.mxu2 %v6570_v43  ;;  %2512 = vmatmul.bf16.vlgmr.msra.gmra.mxu3 %v6997_v20  ;;  %7101 = vst [vmem:[#allocation15_spill] sm:$0xff] %v6686_v54  ;;  %v6690_v20 = vor.u32 %v4305_v41, %v3925_v1  ;;  %v3917_v1 = vld [vmem:[%s6943_s2 + $0x6b8] sm:$0xf0]  ;;  %v6728_v51 = vor.u32 %v4319_v8, %v3981_v50  ;;  %v3909_v8 = vld [vmem:[%s6943_s2 + $0x6a8] sm:$0xf0] }
 0x172   : > { %2556 = vmatpush.bf16.msrb.mxu3 %v6582_v38  ;;  %7103 = vst [vmem:[#allocation17_spill] sm:$0xff] %v6692_v27  ;;  %v6726_v29 = vor.u32 %v4303_v25, %v3917_v1  ;;  %v4317_v50 = vld [vmem:[%s6943_s2 + $0x724] sm:$0xf] }
 0x173   : > { %2518 = vmatpush.bf16.msrb.mxu0 %v6605_v16  ;;  %7102 = vst [vmem:[#allocation16_spill] sm:$0xff] %v6690_v20  ;;  %v4283_v16 = vld [vmem:[%s6943_s2 + $0x614] sm:$0xf] }
 0x174   : > { %2531 = vmatpush.bf16.msrb.mxu1 %v6610_v32  ;;  %7104 = vst [vmem:[#allocation18_spill] sm:$0xff] %v6704_v62  ;;  %v3845_v32 = vld [vmem:[%s6943_s2 + $0x628] sm:$0xf0]  ;;  %v1894_v1 = vpop.f32.mrf.mxu3 }
 0x175   : > { %2544 = vmatpush.bf16.msrb.mxu2 %v6612_v56  ;;  %v4287_v56 = vld [vmem:[%s6943_s2 + $0x634] sm:$0xf] }
 0x176   : > { %2557 = vmatpush.bf16.msrb.mxu3 %v6626_v6  ;;  %v1868_v6 = vpop.f32.mrf.mxu1 }
 0x177   : > { %2519 = vmatpush.bf16.msrb.mxu0 %v6650_v39  ;;  %v3853_v39 = vld [vmem:[%s6943_s2 + $0x638] sm:$0xf0]  ;;  %v1869_v41 = vadd.f32 %v1868_v6, %v1855_v2 }
 0x178   : > { %2532 = vmatpush.bf16.msrb.mxu1 %v6654_v14  ;;  %v4045_v2 = vld [vmem:[%s6943_s2 + $0x7b8] sm:$0xf0]  ;;  %v6722_v6 = vor.u32 %v4287_v56, %v3853_v39  ;;  %v4285_v14 = vld [vmem:[%s6943_s2 + $0x624] sm:$0xf] }
 0x179   : > { %2545 = vmatpush.bf16.msrb.mxu2 %v6656_v44  ;;  %v4335_v44 = vld [vmem:[%s6943_s2 + $0x7b4] sm:$0xf]  ;;  %v4301_v56 = vld [vmem:[%s6943_s2 + $0x6a4] sm:$0xf] }
 0x17a   : > { %2558 = vmatpush.bf16.msrb.mxu3 %v6668_v57  ;;  %7105 = vst [vmem:[#allocation20_spill] sm:$0xff] %v6722_v6  ;;  %v1881_v57 = vpop.f32.mrf.mxu2  ;;  %v6740_v39 = vor.u32 %v4335_v44, %v4045_v2  ;;  %v4037_v44 = vld [vmem:[%s6943_s2 + $0x7a8] sm:$0xf0]  ;;  %v6758_v2 = vor.u32 %v4285_v14, %v3845_v32 }
 0x17b   : > { %2520 = vmatpush.bf16.msrb.mxu0 %v6686_v54  ;;  %v1882_v25 = vadd.f32 %v1881_v57, %v1869_v41  ;;  %v1508_v57 = vld [vmem:[#allocation2] sm:$0x1f]  ;;  %v6762_v54 = vor.u32 %v4301_v56, %v3909_v8  ;;  %v4331_v8 = vld [vmem:[%s6943_s2 + $0x794] sm:$0xf] }
 0x17c   : > { %2533 = vmatpush.bf16.msrb.mxu1 %v6690_v20  ;;  %v1857_v20 = vpop.f32.mrf.mxu0 }
 0x17d   : > { %2546 = vmatpush.bf16.msrb.mxu2 %v6692_v27  ;;  %v3973_v27 = vld [vmem:[%s6943_s2 + $0x728] sm:$0xf0]  ;;  %v1895_v41 = vadd.f32 %v1894_v1, %v1882_v25  ;;  %v4299_v20 = vld [vmem:[%s6943_s2 + $0x694] sm:$0xf]  ;;  %v3965_v1 = vld [vmem:[%s6943_s2 + $0x718] sm:$0xf0] }
 0x17e   : > { %2559 = vmatpush.bf16.msrb.mxu3 %v6704_v62  ;;  %v4333_v62 = vld [vmem:[%s6943_s2 + $0x7a4] sm:$0xf]  ;;  %v6764_v12 = vor.u32 %v4317_v50, %v3973_v27  ;;  %v1870_v32 = vpop.f32.mrf.mxu1  ;;  %v3901_v27 = vld [vmem:[%s6943_s2 + $0x698] sm:$0xf0]  ;;  %v4315_v25 = vld [vmem:[%s6943_s2 + $0x714] sm:$0xf] }
 0x17f   : > { %2521 = vmatpush.bf16.msrb.mxu0 %v6722_v6  ;;  %v3837_v6 = vld [vmem:[%s6943_s2 + $0x618] sm:$0xf0]  ;;  %v1950_v14 = vadd.f32 %v1895_v41, %v1508_v57  ;;  %v6776_v56 = vor.u32 %v4333_v62, %v4037_v44  ;;  %v6798_v44 = vor.u32 %v4299_v20, %v3901_v27  ;;  %v6800_v57 = vor.u32 %v4315_v25, %v3965_v1  ;;  %v4281_v41 = vld [vmem:[%s6943_s2 + $0x604] sm:$0xf]  ;;  %v3829_v32 = vld [vmem:[%s6943_s2 + $0x608] sm:$0xf0]  ;;  %v1896_v1 = vpop.f32.mrf.mxu3 }
 0x180   : > { %2534 = vmatpush.bf16.msrb.mxu1 %v6726_v29  ;;  %7106 = vst [vmem:[#allocation21_spill] sm:$0xff] %v6764_v12  ;;  %v4029_v62 = vld [vmem:[%s6943_s2 + $0x798] sm:$0xf0]  ;;  %v6794_v50 = vor.u32 %v4283_v16, %v3837_v6  ;;  %v4297_v16 = vld [vmem:[%s6943_s2 + $0x684] sm:$0xf] }
 0x181   : > { %2547 = vmatpush.bf16.msrb.mxu2 %v6728_v51  ;;  %7107 = vst [vmem:[#allocation22_spill] sm:$0xff] %v6776_v56  ;;  %v3893_v20 = vld [vmem:[%s6943_s2 + $0x688] sm:$0xf0]  ;;  %v4313_v27 = vld [vmem:[%s6943_s2 + $0x704] sm:$0xf] }
 0x182   : > { %2560 = vmatpush.bf16.msrb.mxu3 %v6740_v39  ;;  %1952 = vst [vmem:[#allocation2] sm:$0x1f] %v1950_v14  ;;  %v1883_v6 = vpop.f32.mrf.mxu2  ;;  %v6812_v14 = vor.u32 %v4331_v8, %v4029_v62  ;;  %v3957_v25 = vld [vmem:[%s6943_s2 + $0x708] sm:$0xf0]  ;;  %v6830_v62 = vor.u32 %v4281_v41, %v3829_v32  ;;  %v7108_v41 = vrot.slane %v7089_v37, 2  ;;  %v7109_v32 = vrot.slane %v7090_v33, 2 }
 0x183   : > { %2522 = vmatpush.bf16.msrb.mxu0 %v6758_v2  ;;  %v4329_v6 = vld [vmem:[%s6943_s2 + $0x784] sm:$0xf]  ;;  %v4021_v8 = vld [vmem:[%s6943_s2 + $0x788] sm:$0xf0] }
 0x184   : > { %2535 = vmatpush.bf16.msrb.mxu1 %v6762_v54  ;;  %v6839_v1 = vor.u32 %v4329_v6, %v4021_v8  ;;  %v1954_v33 = vld [vmem:[#allocation2] sm:$0xe0] }
 0x185   : > { %2548 = vmatpush.bf16.msrb.mxu2 %v6764_v12  ;;  %v6836_v12 = vor.u32 %v4313_v27, %v3957_v25 }
 0x186   : > { %2561 = vmatpush.bf16.msrb.mxu3 %v6776_v56  ;;  %v6834_v56 = vor.u32 %v4297_v16, %v3893_v20  ;;  %v7110_v16 = vrot.slane %v7091_v17, 2  ;;  %v7111_v20 = vrot.slane %v7093_v5, 2 }
 0x187   : > { %2523 = vmatpush.bf16.msrb.mxu0 %v6794_v50  ;;  %v7126_v5 = vld [vmem:[#allocation21_spill] sm:$0xff] }
 0x188   : > { %2536 = vmatpush.bf16.msrb.mxu1 %v6798_v44  ;;  %v7127_v25 = vld [vmem:[#allocation22_spill] sm:$0xff] }
 0x189   : > { %2549 = vmatpush.bf16.msrb.mxu2 %v6800_v57 }
 0x18a   : > { %2562 = vmatpush.bf16.msrb.mxu3 %v6812_v14 }
 0x18b   : > { %2524 = vmatpush.bf16.msrb.mxu0 %v6830_v62 }
 0x18c   : > { %2537 = vmatpush.bf16.msrb.mxu1 %v6834_v56 }
 0x18d   : > { %2550 = vmatpush.bf16.msrb.mxu2 %v6836_v12 }
 0x18e   : > { %2563 = vmatpush.bf16.msrb.mxu3 %v6839_v1  ;;  %2525 = vmatmul.bf16.vlgmr.msrb.gmra.mxu0 %v7110_v16 }
 0x18f   : > { %2575 = vmatpush.bf16.msra.mxu0 %v6262_v21  ;;  %2538 = vmatmul.bf16.vlgmr.msrb.gmra.mxu1 %v7111_v20  ;;  %v1907_v21 = vpop.f32.mrf.mxu0 }
 0x190   : > { %2588 = vmatpush.bf16.msra.mxu1 %v6264_v0  ;;  %2551 = vmatmul.bf16.vlgmr.msrb.gmra.mxu2 %v7108_v41  ;;  %v1920_v0 = vpop.f32.mrf.mxu1 }
 0x191   : > { %2601 = vmatpush.bf16.msra.mxu2 %v6266_v34  ;;  %2564 = vmatmul.bf16.vlgmr.msrb.gmra.mxu3 %v7109_v32  ;;  %v1921_v34 = vadd.f32 %v1920_v0, %v1907_v21  ;;  %v2135_v0 = vld [vmem:[#allocation2] sm:$0xf] }
 0x192   : > { %2614 = vmatpush.bf16.msra.mxu3 %v6278_v15 }
 0x193   : > { %2576 = vmatpush.bf16.msra.mxu0 %v6299_v10  ;;  %v1933_v15 = vpop.f32.mrf.mxu2 }
 0x194   : > { %2589 = vmatpush.bf16.msra.mxu1 %v6303_v52  ;;  %v1934_v10 = vadd.f32 %v1933_v15, %v1921_v34  ;;  %v1946_v52 = vpop.f32.mrf.mxu3 }
 0x195   : > { %2602 = vmatpush.bf16.msra.mxu2 %v6305_v46 }
 0x196   : > { %2615 = vmatpush.bf16.msra.mxu3 %v6318_v9  ;;  %v1947_v46 = vadd.f32 %v1946_v52, %v1934_v10 }
 0x197   : > { %2577 = vmatpush.bf16.msra.mxu0 %v6339_v18  ;;  %v1909_v9 = vpop.f32.mrf.mxu0  ;;  %v1509_v18 = vld [vmem:[#allocation2 + $0x8] sm:$0x1f] }
 0x198   : > { %2590 = vmatpush.bf16.msra.mxu1 %v6343_v23  ;;  %v1922_v23 = vpop.f32.mrf.mxu1 }
 0x199   : > { %2603 = vmatpush.bf16.msra.mxu2 %v6345_v24  ;;  %v1951_v24 = vadd.f32 %v1947_v46, %v1509_v18 }
 0x19a   : > { %2616 = vmatpush.bf16.msra.mxu3 %v6357_v49 }
 0x19b   : > { %2578 = vmatpush.bf16.msra.mxu0 %v6375_v28  ;;  %1953 = vst [vmem:[#allocation2 + $0x8] sm:$0x1f] %v1951_v24  ;;  %v1935_v49 = vpop.f32.mrf.mxu2 }
 0x19c   : > { %2591 = vmatpush.bf16.msra.mxu1 %v6379_v30  ;;  %v1948_v28 = vpop.f32.mrf.mxu3  ;;  %v7112_v30 = vld [vmem:[#allocation7_spill] sm:$0xff] }
 0x19d   : > { %2604 = vmatpush.bf16.msra.mxu2 %v6381_v31  ;;  %v7113_v31 = vld [vmem:[#allocation19_spill] sm:$0xff] }
 0x19e   : > { %2617 = vmatpush.bf16.msra.mxu3 %v6395_v47  ;;  %v7114_v47 = vld [vmem:[#allocation8_spill] sm:$0xff] }
 0x19f   : > { %2579 = vmatpush.bf16.msra.mxu0 %v6413_v7  ;;  %v7115_v7 = vld [vmem:[#allocation9_spill] sm:$0xff] }
 0x1a0   : > { %2592 = vmatpush.bf16.msra.mxu1 %v6417_v3  ;;  %v7116_v3 = vld [vmem:[#allocation10_spill] sm:$0xff] }
 0x1a1   : > { %2605 = vmatpush.bf16.msra.mxu2 %v6419_v59  ;;  %v7117_v59 = vld [vmem:[#allocation11_spill] sm:$0xff] }
 0x1a2   : > { %2618 = vmatpush.bf16.msra.mxu3 %v6432_v42 }
 0x1a3   : > { %2580 = vmatpush.bf16.msra.mxu0 %v6450_v26  ;;  %v7118_v26 = vld [vmem:[#allocation12_spill] sm:$0xff] }
 0x1a4   : > { %2593 = vmatpush.bf16.msra.mxu1 %v6457_v45  ;;  %v7119_v45 = vld [vmem:[#allocation13_spill] sm:$0xff] }
 0x1a5   : > { %2606 = vmatpush.bf16.msra.mxu2 %v6459_v22 }
 0x1a6   : > { %2619 = vmatpush.bf16.msra.mxu3 %v6476_v60  ;;  %v7120_v60 = vld [vmem:[#allocation14_spill] sm:$0xff] }
 0x1a7   : > { %2581 = vmatpush.bf16.msra.mxu0 %v6495_v4 }
 0x1a8   : > { %2594 = vmatpush.bf16.msra.mxu1 %v6508_v61  ;;  %v7121_v61 = vld [vmem:[#allocation15_spill] sm:$0xff] }
 0x1a9   : > { %2607 = vmatpush.bf16.msra.mxu2 %v6510_v55  ;;  %v7122_v55 = vld [vmem:[#allocation16_spill] sm:$0xff] }
 0x1aa   : > { %2620 = vmatpush.bf16.msra.mxu3 %v6522_v58  ;;  %v7123_v58 = vld [vmem:[#allocation17_spill] sm:$0xff] }
 0x1ab   : > { %2582 = vmatpush.bf16.msra.mxu0 %v6539_v63  ;;  %v1965_v42 = vpop.f32.mrf.mxu0 }
 0x1ac   : > { %2595 = vmatpush.bf16.msra.mxu1 %v6552_v53  ;;  %v1978_v22 = vpop.f32.mrf.mxu1  ;;  %v7124_v53 = vld [vmem:[#allocation18_spill] sm:$0xff] }
 0x1ad   : > { %2608 = vmatpush.bf16.msra.mxu2 %v6554_v48  ;;  %v1979_v4 = vadd.f32 %v1978_v22, %v1965_v42 }
 0x1ae   : > { %2621 = vmatpush.bf16.msra.mxu3 %v6563_v11  ;;  %2583 = vmatmul.bf16.vlgmr.msra.gmra.mxu0 %v5513_v40 }
 0x1af   : > { %2627 = vmatpush.bf16.msrb.mxu0 %v6565_v13  ;;  %2596 = vmatmul.bf16.vlgmr.msra.gmra.mxu1 %v7113_v31  ;;  %v7125_v13 = vld [vmem:[#allocation20_spill] sm:$0xff] }
 0x1b0   : > { %2640 = vmatpush.bf16.msrb.mxu1 %v6568_v19  ;;  %2609 = vmatmul.bf16.vlgmr.msra.gmra.mxu2 %v5507_v35 }
 0x1b1   : > { %2653 = vmatpush.bf16.msrb.mxu2 %v6570_v43  ;;  %2622 = vmatmul.bf16.vlgmr.msra.gmra.mxu3 %v5511_v36 }
 0x1b2   : > { %2666 = vmatpush.bf16.msrb.mxu3 %v6582_v38 }
 0x1b3   : > { %2628 = vmatpush.bf16.msrb.mxu0 %v7112_v30  ;;  %v1991_v63 = vpop.f32.mrf.mxu2  ;;  %v1967_v19 = vpop.f32.mrf.mxu0 }
 0x1b4   : > { %2641 = vmatpush.bf16.msrb.mxu1 %v7114_v47  ;;  %v1992_v48 = vadd.f32 %v1991_v63, %v1979_v4  ;;  %v2004_v11 = vpop.f32.mrf.mxu3  ;;  %v1980_v43 = vpop.f32.mrf.mxu1 }
 0x1b5   : > { %2654 = vmatpush.bf16.msrb.mxu2 %v7115_v7 }
 0x1b6   : > { %2667 = vmatpush.bf16.msrb.mxu3 %v7116_v3  ;;  %v2005_v37 = vadd.f32 %v2004_v11, %v1992_v48 }
 0x1b7   : > { %2629 = vmatpush.bf16.msrb.mxu0 %v7117_v59 }
 0x1b8   : > { %2642 = vmatpush.bf16.msrb.mxu1 %v7118_v26  ;;  %v2062_v38 = vrot.slane %v2005_v37, 3  ;;  %v2691_v37 = vld [vmem:[%s6944_s3] sm:$0x3] }
 0x1b9   : > { %2655 = vmatpush.bf16.msrb.mxu2 %v7119_v45  ;;  %v2693_v19 = vperm.slane %v2691_v37, 0 }
 0x1ba   : > { %2668 = vmatpush.bf16.msrb.mxu3 %v7120_v60  ;;  %v2066_v17 = vadd.f32 %v2062_v38, %v1954_v33 }
 0x1bb   : > { %2630 = vmatpush.bf16.msrb.mxu0 %v7121_v61  ;;  %v1993_v27 = vpop.f32.mrf.mxu2 }
 0x1bc   : > { %2643 = vmatpush.bf16.msrb.mxu1 %v7122_v55  ;;  %2068 = vst [vmem:[#allocation2] sm:$0xe0] %v2066_v17  ;;  %v2006_v6 = vpop.f32.mrf.mxu3 }
 0x1bd   : > { %2656 = vmatpush.bf16.msrb.mxu2 %v7123_v58 }
 0x1be   : > { %2669 = vmatpush.bf16.msrb.mxu3 %v7124_v53 }
 0x1bf   : > { %2631 = vmatpush.bf16.msrb.mxu0 %v7125_v13 }
 0x1c0   : > { %2644 = vmatpush.bf16.msrb.mxu1 %v6726_v29 }
 0x1c1   : > { %2657 = vmatpush.bf16.msrb.mxu2 %v6728_v51 }
 0x1c2   : > { %2670 = vmatpush.bf16.msrb.mxu3 %v6740_v39 }
 0x1c3   : > { %2632 = vmatpush.bf16.msrb.mxu0 %v6758_v2  ;;  %v2573_v53 = vld [vmem:[#allocation2] sm:$0xf0] }
 0x1c4   : > { %2645 = vmatpush.bf16.msrb.mxu1 %v6762_v54 }
 0x1c5   : > { %2658 = vmatpush.bf16.msrb.mxu2 %v7126_v5 }
 0x1c6   : > { %2671 = vmatpush.bf16.msrb.mxu3 %v7127_v25 }
 0x1c7   : > { %2633 = vmatpush.bf16.msrb.mxu0 %v6794_v50 }
 0x1c8   : > { %2646 = vmatpush.bf16.msrb.mxu1 %v6798_v44 }
 0x1c9   : > { %2659 = vmatpush.bf16.msrb.mxu2 %v6800_v57 }
 0x1ca   : > { %2672 = vmatpush.bf16.msrb.mxu3 %v6812_v14  ;;  %v1955_v14 = vld [vmem:[#allocation2 + $0x8] sm:$0xe0] }
 0x1cb   : > { %2634 = vmatpush.bf16.msrb.mxu0 %v6830_v62  ;;  %v2017_v54 = vpop.f32.mrf.mxu0 }
 0x1cc   : > { %2647 = vmatpush.bf16.msrb.mxu1 %v6834_v56  ;;  %v2030_v29 = vpop.f32.mrf.mxu1 }
 0x1cd   : > { %2660 = vmatpush.bf16.msrb.mxu2 %v6836_v12  ;;  %v2031_v51 = vadd.f32 %v2030_v29, %v2017_v54 }
 0x1ce   : > { %2673 = vmatpush.bf16.msrb.mxu3 %v6839_v1  ;;  %2635 = vmatmul.bf16.vlgmr.msrb.gmra.mxu0 %v5513_v40 }
 0x1cf   : > { %2648 = vmatmul.bf16.vlgmr.msrb.gmra.mxu1 %v7113_v31  ;;  %v2136_v31 = vld [vmem:[#allocation2 + $0x8] sm:$0xf] }
 0x1d0   : > { %2661 = vmatmul.bf16.vlgmr.msrb.gmra.mxu2 %v5507_v35 }
 0x1d1   : > { %2674 = vmatmul.bf16.vlgmr.msrb.gmra.mxu3 %v5511_v36 }
 0x1d3   : > { %v2043_v39 = vpop.f32.mrf.mxu2  ;;  %v2019_v56 = vpop.f32.mrf.mxu0 }
 0x1d4   : > { %v2044_v2 = vadd.f32 %v2043_v39, %v2031_v51  ;;  %v2056_v50 = vpop.f32.mrf.mxu3  ;;  %v2032_v57 = vpop.f32.mrf.mxu1 }
 0x1d6   : > { %v2057_v44 = vadd.f32 %v2056_v50, %v2044_v2 }
 0x1d8   : > { %v2063_v12 = vrot.slane %v2057_v44, 3 }
 0x1da   : > { %v2067_v8 = vadd.f32 %v2063_v12, %v1955_v14 }
 0x1db   : > { %v2045_v62 = vpop.f32.mrf.mxu2 }
 0x1dc   : > { %2069 = vst [vmem:[#allocation2 + $0x8] sm:$0xe0] %v2067_v8  ;;  %v2058_v40 = vpop.f32.mrf.mxu3  ;;  %v2694_v8 = vperm.slane %v2691_v37, 1 }
 0x1e3   : > { %v2574_v50 = vld [vmem:[#allocation2 + $0x8] sm:$0xf0] }
 0x1eb   : > { %v2474_v1 = vpop.f32.mrf.mxu0 }
 0x1ec   : > { %v2487_v41 = vpop.f32.mrf.mxu1 }
 0x1ed   : > { %v2488_v35 = vadd.f32 %v2487_v41, %v2474_v1 }
 0x1f3   : > { %v2500_v32 = vpop.f32.mrf.mxu2  ;;  %v2476_v21 = vpop.f32.mrf.mxu0 }
 0x1f4   : > { %v2501_v36 = vadd.f32 %v2500_v32, %v2488_v35  ;;  %v2513_v16 = vpop.f32.mrf.mxu3  ;;  %v2489_v34 = vpop.f32.mrf.mxu1 }
 0x1f6   : > { %v2514_v20 = vadd.f32 %v2513_v16, %v2501_v36 }
 0x1f8   : > { %v2569_v15 = vadd.f32 %v2514_v20, %v2135_v0 }
 0x1fa   : > { %2571 = vst [vmem:[#allocation2] sm:$0xf] %v2569_v15 }
 0x1fb   : > { %v2502_v10 = vpop.f32.mrf.mxu2 }
 0x1fc   : > { %v2515_v52 = vpop.f32.mrf.mxu3 }
 0x20b   : > { %v2526_v46 = vpop.f32.mrf.mxu0 }
 0x20c   : > { %v2539_v9 = vpop.f32.mrf.mxu1 }
 0x20d   : > { %v2540_v18 = vadd.f32 %v2539_v9, %v2526_v46 }
 0x213   : > { %v2552_v23 = vpop.f32.mrf.mxu2  ;;  %v2528_v30 = vpop.f32.mrf.mxu0 }
 0x214   : > { %v2553_v24 = vadd.f32 %v2552_v23, %v2540_v18  ;;  %v2565_v49 = vpop.f32.mrf.mxu3  ;;  %v2541_v47 = vpop.f32.mrf.mxu1 }
 0x216   : > { %v2566_v28 = vadd.f32 %v2565_v49, %v2553_v24 }
 0x218   : > { %v2570_v7 = vadd.f32 %v2566_v28, %v2136_v31 }
 0x21a   : > { %2572 = vst [vmem:[#allocation2 + $0x8] sm:$0xf] %v2570_v7 }
 0x21b   : > { %v2554_v3 = vpop.f32.mrf.mxu2 }
 0x21c   : > { %v2567_v59 = vpop.f32.mrf.mxu3 }
 0x22b   : > { %v2584_v42 = vpop.f32.mrf.mxu0 }
 0x22c   : > { %v2597_v26 = vpop.f32.mrf.mxu1 }
 0x22d   : > { %v2598_v45 = vadd.f32 %v2597_v26, %v2584_v42 }
 0x233   : > { %v2610_v22 = vpop.f32.mrf.mxu2  ;;  %v2586_v55 = vpop.f32.mrf.mxu0 }
 0x234   : > { %v2611_v60 = vadd.f32 %v2610_v22, %v2598_v45  ;;  %v2623_v4 = vpop.f32.mrf.mxu3  ;;  %v2599_v58 = vpop.f32.mrf.mxu1 }
 0x236   : > { %v2624_v61 = vadd.f32 %v2623_v4, %v2611_v60 }
 0x238   : > { %v2681_v63 = vrot.slane %v2624_v61, 4 }
 0x23a   : > { %v2685_v48 = vadd.f32 %v2681_v63, %v2573_v53 }
 0x23b   : > { %v2612_v11 = vpop.f32.mrf.mxu2 }
 0x23c   : > { %2687 = vst [vmem:[#allocation2] sm:$0xf0] %v2685_v48  ;;  %v2625_v13 = vpop.f32.mrf.mxu3 }
 0x243   : > { %v2689_v43 = vld [vmem:[#allocation2] sm:$0xff] }
 0x244   : > { %v2697_v17 = vadd.f32 %v2693_v19, %v2689_v43 }
 0x246   : > { %v4081_v27 = vmul.f32 -1.442695, %v2697_v17 }
 0x248   : > { %4370 = vpow2.f32 %v4081_v27 }
 0x24b   : > { %v2636_v38 = vpop.f32.mrf.mxu0 }
 0x24c   : > { %v2649_v33 = vpop.f32.mrf.mxu1 }
 0x24d   : > { %v2650_v5 = vadd.f32 %v2649_v33, %v2636_v38 }
 0x24e   : > { %v4371_v57 = vpop.eup %4370 }
 0x24f   : > { %v2705_v14 = vadd.f32 1.0, %v4371_v57 }
 0x251   : > { %4372 = vrcp.f32 %v2705_v14  ;;  %v2718_v15 = vand.u32 2147483648, %v2705_v14  ;;  %vm2712_vm3 = vweird.f32 %v2705_v14  ;;  %v2716_v10 = vand.u32 2147483647, %v2705_v14 }
 0x253   : > { %v2662_v25 = vpop.f32.mrf.mxu2  ;;  %v2638_v29 = vpop.f32.mrf.mxu0  ;;  %v2719_v24 = vor.u32 1.1754944e-38, %v2718_v15  ;;  %vm2717_vm6 = vcmp.eq.f32.partialorder %v2716_v10, 8.507059e+37 }
 0x254   : > { %v2663_v6 = vadd.f32 %v2662_v25, %v2650_v5  ;;  %v2675_v54 = vpop.f32.mrf.mxu3  ;;  %v2651_v51 = vpop.f32.mrf.mxu1 }
 0x256   : > { %v2676_v39 = vadd.f32 %v2675_v54, %v2663_v6 }
 0x257   : > { %v4373_v41 = vpop.eup %4372 }
 0x258   : > { %v2682_v2 = vrot.slane %v2676_v39, 4  ;;  %v2708_v35 = vmul.f32 %v4373_v41, %v2705_v14  ;;  %vm2713_vm2 = vweird.f32 %v4373_v41 }
 0x259   : > { %vm2714_vm4 = vmor %vm2712_vm3, %vm2713_vm2 }
 0x25a   : > { %v2686_v44 = vadd.f32 %v2682_v2, %v2574_v50  ;;  %v2709_v16 = vsub.f32 1.0, %v2708_v35 }
 0x25b   : > { %v2664_v56 = vpop.f32.mrf.mxu2 }
 0x25c   : > { %2688 = vst [vmem:[#allocation2 + $0x8] sm:$0xf0] %v2686_v44  ;;  %v2677_v12 = vpop.f32.mrf.mxu3  ;;  %v2710_v20 = vmul.f32 %v4373_v41, %v2709_v16 }
 0x25e   : > { %v2711_v0 = vadd.f32 %v4373_v41, %v2710_v20 }
 0x260   : > { %v2715_v9 = vsel %vm2714_vm4, %v4373_v41, %v2711_v0 }
 0x261   : > { %v2720_v28 = vsel %vm2717_vm6, %v2719_v24, %v2715_v9 }
 0x262   : > { %v2737_v7 = vmul.f32 %v2720_v28, %v2697_v17 }
 0x263   : > { %v2690_v62 = vld [vmem:[#allocation2 + $0x8] sm:$0xff] }
 0x264   : > { %v2698_v40 = vadd.f32 %v2694_v8, %v2690_v62 }
 0x266   : > { %v4082_v1 = vmul.f32 -1.442695, %v2698_v40 }
 0x268   : > { %4374 = vpow2.f32 %v4082_v1 }
 0x26e   : > { %v4375_v32 = vpop.eup %4374 }
 0x26f   : > { %v2706_v36 = vadd.f32 1.0, %v4375_v32 }
 0x271   : > { %4376 = vrcp.f32 %v2706_v36  ;;  %v2733_v46 = vand.u32 2147483648, %v2706_v36  ;;  %v2731_v23 = vand.u32 2147483647, %v2706_v36  ;;  %vm2727_vm7 = vweird.f32 %v2706_v36 }
 0x273   : > { %v2734_v30 = vor.u32 1.1754944e-38, %v2733_v46  ;;  %vm2732_vm9 = vcmp.eq.f32.partialorder %v2731_v23, 8.507059e+37 }
 0x277   : > { %v4377_v21 = vpop.eup %4376 }
 0x278   : > { %v2723_v34 = vmul.f32 %v4377_v21, %v2706_v36  ;;  %vm2728_vm5 = vweird.f32 %v4377_v21 }
 0x279   : > { %vm2729_vm8 = vmor %vm2727_vm7, %vm2728_vm5 }
 0x27a   : > { %v2724_v52 = vsub.f32 1.0, %v2723_v34 }
 0x27c   : > { %v2725_v18 = vmul.f32 %v4377_v21, %v2724_v52 }
 0x27e   : > { %v2726_v49 = vadd.f32 %v4377_v21, %v2725_v18 }
 0x280   : > { %v2730_v31 = vsel %vm2729_vm8, %v4377_v21, %v2726_v49 }
 0x281   : > { %v2735_v47 = vsel %vm2732_vm9, %v2734_v30, %v2730_v31 }
 0x282   : > { %v2738_v3 = vmul.f32 %v2735_v47, %v2698_v40 }
 0x284   : > { %v2739_v59 = vpack.c.bf16 %v2738_v3, %v2737_v7 }
 0x286   : > { %2740 = vst [vmem:[%s274_s11] sm:$0xff] %v2739_v59 }
 0x287 PF: > { %s14_s17 = sadd.s32 1, %s4400_s17   ;;  %s7128_s15 = smov %s4396_s16 }
 0x288   : > { %p11_p5 = scmp.ge.s32.totalorder %s14_s17, 4   ;;  %s7129_s16 = smov %s7131_s18 }
 0x28a   :  { %13 = sbr.rel (!%p11_p5) target bundleno = 2 (0x2), region = 73 }

</bundles_post_ra>
